<compile_context>
chip_gen: v5e
topology: v5e:2x2
jax: 0.10.0
libtpu: 0.0.40
codegen_flags: <defaults>
</compile_context>

<pallas_src>
import functools

import jax
import jax.numpy as jnp
import numpy as np
from jax.experimental import pallas as pl
from jax.experimental.pallas import tpu as pltpu

EPS = 1e-5


def basic_block_kernel(xrows_ref, xres_ref, t1_ref, t2a_ref, t2b_ref, t2c_ref,
                       u_ref, d_ref, fold_ref, g1_ref, b1_ref, g2_ref, b2_ref,
                       out_ref, *, inv_cnt):
    """Whole (small) batch in one invocation, lane-dense layout.

    xrows_ref : (M, 3*W*C) bf16  row-im2col of x over the kh taps (M = N*H)
    xres_ref  : (M, W*C)   f32   lane-dense residual (unpadded x)
    t1_ref    : (3*W*C, W*P) bf16  conv1 block-Toeplitz weights (kw folded in)
    t2*_ref   : (W*P, W*P) bf16  conv2 block-Toeplitz weights, one per kh tap
    u_ref/d_ref : (M, M)   f32   row-shift selection matrices (kh = 0 / 2),
                                 per-image H-boundary zeroing folded in
    fold_ref  : (W*P, W*P) f32   channel fold + broadcast matrix (c == c')
    g*/b*     : (1, W*P)   f32   BN gamma / beta, pre-tiled over W
    out_ref   : (M, W*P)   f32
    """
    fold = fold_ref[...]

    def bn_affine(acc, g_wp, b_wp):
        # Fused one-pass batch statistics: per-channel sum and sum-of-squares,
        # folded over the W groups in the lane dim and broadcast back to all
        # lanes of that channel via the 0/1 matrix `fold` (MXU, exact in f32).
        sums = jnp.dot(acc, fold, preferred_element_type=jnp.float32)
        sqs = jnp.dot(acc * acc, fold, preferred_element_type=jnp.float32)
        s = jnp.sum(sums, axis=0, keepdims=True)        # (1, WP)
        q = jnp.sum(sqs, axis=0, keepdims=True)         # (1, WP)
        mean = s * inv_cnt
        var = q * inv_cnt - mean * mean                 # biased variance
        scale = g_wp * jax.lax.rsqrt(var + EPS)         # (1, WP)
        shift = b_wp - mean * scale                     # (1, WP)
        return acc * scale + shift

    # ---- conv1: one lane-dense bf16 MXU matmul, K = 3*W*C -------------------
    acc1 = jnp.dot(xrows_ref[...], t1_ref[...],
                   preferred_element_type=jnp.float32)          # (M, WP) f32

    # ---- BN1 + ReLU ----------------------------------------------------------
    h1 = jnp.maximum(bn_affine(acc1, g1_ref[...], b1_ref[...]), 0.0)
    h1b = h1.astype(jnp.bfloat16)

    # ---- conv2: three lane-dense matmuls (one per kh tap); the kh row shifts
    #      (with per-image H-boundary zeros) are tiny selection matmuls. -------
    c_up = jnp.dot(h1b, t2a_ref[...], preferred_element_type=jnp.float32)
    c_md = jnp.dot(h1b, t2b_ref[...], preferred_element_type=jnp.float32)
    c_dn = jnp.dot(h1b, t2c_ref[...], preferred_element_type=jnp.float32)
    acc2 = (c_md
            + jnp.dot(u_ref[...], c_up, preferred_element_type=jnp.float32)
            + jnp.dot(d_ref[...], c_dn, preferred_element_type=jnp.float32))

    # ---- BN2 + residual + ReLU (unmasked full-width lane-dense store) --------
    out_ref[...] = jnp.maximum(
        bn_affine(acc2, g2_ref[...], b2_ref[...]) + xres_ref[...], 0.0)


def _toeplitz_w(w_hwio, W):
    """Fold the kw taps of a 3x3 HWIO weight into per-kh block-Toeplitz mats.

    Returns T of shape (3, W*Cin, W*Cout) with
      T[kh, wp*Cin + ci, w*Cout + co] = w[kh, kw, ci, co]  where wp = w+kw-1,
    and zero for out-of-range wp (this reproduces zero padding along W).
    """
    Cin, Cout = w_hwio.shape[2], w_hwio.shape[3]
    sel = np.zeros((3, W, W), np.float32)        # sel[kw, wp, w]
    for kw in range(3):
        for w in range(W):
            wp = w + kw - 1
            if 0 <= wp < W:
                sel[kw, wp, w] = 1.0
    t = jnp.einsum('kpw,hkio->hpiwo', jnp.asarray(sel), w_hwio)
    return t.reshape(3, W * Cin, W * Cout)


@jax.jit
def basic_block(x_nchw, w1, g1, b1, w2, g2, b2):
    N, C, H, W = x_nchw.shape
    P = w1.shape[-1]
    assert C == P, "residual add requires inplanes == planes (downsample=None)"
    WC, WP, M = W * C, W * P, N * H

    # ---- layout plumbing (XLA side): NHWC, lane-dense 2-D views --------------
    x = jnp.transpose(x_nchw, (0, 2, 3, 1)).astype(jnp.float32)   # (N, H, W, C)
    x2d = x.reshape(N, H, WC)                                     # (N, H, W*C)
    xres = x2d.reshape(M, WC)                                     # residual, f32

    # Row-im2col over kh only (zero rows at the H border). kw is folded into
    # the block-Toeplitz weight matrices, so conv1 is a single matmul.
    zrow = jnp.zeros((N, 1, WC), jnp.float32)
    up = jnp.concatenate([zrow, x2d[:, :H - 1, :]], axis=1)       # row h-1
    dn = jnp.concatenate([x2d[:, 1:, :], zrow], axis=1)           # row h+1
    xrows = jnp.concatenate([up, x2d, dn], axis=-1)               # (N, H, 3*WC)
    xrows = xrows.reshape(M, 3 * WC).astype(jnp.bfloat16)

    t1 = _toeplitz_w(w1, W).reshape(3 * WC, WP).astype(jnp.bfloat16)  # (3WC,WP)
    t2 = _toeplitz_w(w2, W).astype(jnp.bfloat16)                      # (3,WP,WP)
    t2a, t2b, t2c = t2[0], t2[1], t2[2]

    # kh row-shift selection matrices with per-image H-boundary zeroing.
    # (U @ y)[i] = y[i-1] (or 0 at the top of each image), (D @ y)[i] = y[i+1].
    idx = np.arange(M)
    hof = idx % H
    u_np = np.zeros((M, M), np.float32)
    u_np[idx[hof > 0], idx[hof > 0] - 1] = 1.0
    d_np = np.zeros((M, M), np.float32)
    d_np[idx[hof < H - 1], idx[hof < H - 1] + 1] = 1.0
    u_mat = jnp.asarray(u_np)
    d_mat = jnp.asarray(d_np)

    # Channel fold + broadcast matrix: G[w*C + c, w'*C + c'] = (c == c').
    ch = np.arange(WP) % P
    fold = jnp.asarray((ch[:, None] == ch[None, :]).astype(np.float32))

    # Pre-tile gamma/beta over W (lane index = w*P + c) in XLA land.
    g1_wp = jnp.tile(g1.reshape(1, P), (1, W)).astype(jnp.float32)
    b1_wp = jnp.tile(b1.reshape(1, P), (1, W)).astype(jnp.float32)
    g2_wp = jnp.tile(g2.reshape(1, P), (1, W)).astype(jnp.float32)
    b2_wp = jnp.tile(b2.reshape(1, P), (1, W)).astype(jnp.float32)

    out2d = pl.pallas_call(
        functools.partial(basic_block_kernel, inv_cnt=1.0 / (M * W)),
        out_shape=jax.ShapeDtypeStruct((M, WP), jnp.float32),
        grid=(1,),
        in_specs=[
            pl.BlockSpec((M, 3 * WC), lambda i: (0, 0)),     # xrows (bf16)
            pl.BlockSpec((M, WC), lambda i: (0, 0)),         # residual (f32)
            pl.BlockSpec((3 * WC, WP), lambda i: (0, 0)),    # conv1 Toeplitz
            pl.BlockSpec((WP, WP), lambda i: (0, 0)),        # conv2 Toeplitz kh=0
            pl.BlockSpec((WP, WP), lambda i: (0, 0)),        # conv2 Toeplitz kh=1
            pl.BlockSpec((WP, WP), lambda i: (0, 0)),        # conv2 Toeplitz kh=2
            pl.BlockSpec((M, M), lambda i: (0, 0)),          # U row-shift
            pl.BlockSpec((M, M), lambda i: (0, 0)),          # D row-shift
            pl.BlockSpec((WP, WP), lambda i: (0, 0)),        # channel fold
            pl.BlockSpec((1, WP), lambda i: (0, 0)),         # bn1 gamma
            pl.BlockSpec((1, WP), lambda i: (0, 0)),         # bn1 beta
            pl.BlockSpec((1, WP), lambda i: (0, 0)),         # bn2 gamma
            pl.BlockSpec((1, WP), lambda i: (0, 0)),         # bn2 beta
        ],
        out_specs=pl.BlockSpec((M, WP), lambda i: (0, 0)),
        compiler_params=pltpu.CompilerParams(
            dimension_semantics=("arbitrary",)),
    )(xrows, xres, t1, t2a, t2b, t2c, u_mat, d_mat, fold,
      g1_wp, b1_wp, g2_wp, b2_wp)

    return jnp.transpose(out2d.reshape(N, H, W, P), (0, 3, 1, 2))  # NCHW


def reference_basic_block(x, w1, g1, b1, w2, g2, b2):
    """Pure-JAX reference (NCHW, HWIO weights), training-mode BN, f32 HIGHEST."""
    def conv(y, w):
        return jax.lax.conv_general_dilated(
            y, w, window_strides=(1, 1), padding=((1, 1), (1, 1)),
            dimension_numbers=("NCHW", "HWIO", "NCHW"),
            precision=jax.lax.Precision.HIGHEST)

    def bn(y, g, b):
        mean = jnp.mean(y, axis=(0, 2, 3), keepdims=True)
        var = jnp.mean((y - mean) ** 2, axis=(0, 2, 3), keepdims=True)
        return ((y - mean) * jax.lax.rsqrt(var + EPS)
                * g.reshape(1, -1, 1, 1) + b.reshape(1, -1, 1, 1))

    out = jnp.maximum(bn(conv(x, w1), g1, b1), 0.0)
    out = bn(conv(out, w2), g2, b2)
    return jnp.maximum(out + x, 0.0)


if __name__ == "__main__":
    N, C, H, W = 2, 8, 16, 16       # inplanes = planes = 8, stride = 1
    P = C                           # W*C = 128 -> exactly one lane-width

    key = jax.random.PRNGKey(0)
    kx, kw1, kw2, kg1, kb1, kg2, kb2 = jax.random.split(key, 7)

    x = jax.random.normal(kx, (N, C, H, W), jnp.float32)
    # Deterministic synthetic parameters (shapes from the module __init__), HWIO.
    w1 = 0.1 * jax.random.normal(kw1, (3, 3, C, P), jnp.float32)   # conv1
    w2 = 0.1 * jax.random.normal(kw2, (3, 3, P, P), jnp.float32)   # conv2
    g1 = jax.random.uniform(kg1, (P,), jnp.float32, 0.5, 1.5)      # bn1.weight
    b1 = 0.1 * jax.random.normal(kb1, (P,), jnp.float32)           # bn1.bias
    g2 = jax.random.uniform(kg2, (P,), jnp.float32, 0.5, 1.5)      # bn2.weight
    b2 = 0.1 * jax.random.normal(kb2, (P,), jnp.float32)           # bn2.bias

    out = jax.block_until_ready(basic_block(x, w1, g1, b1, w2, g2, b2))
    ref = jax.block_until_ready(reference_basic_block(x, w1, g1, b1, w2, g2, b2))

    # bf16 MXU operands (single-pass) vs an f32 HIGHEST reference -> ~1e-2 diffs.
    np.testing.assert_allclose(np.asarray(out), np.asarray(ref),
                               rtol=4e-2, atol=4e-2)

    print("KERNEL_OK")
</pallas_src>

<mosaic_0001>
module attributes {stable_mosaic.version = 11 : i64} {
  func.func @basic_block_kernel(%arg0: i32, %arg1: memref<32x384xbf16, #tpu.memory_space<vmem>>, %arg2: memref<32x128xf32, #tpu.memory_space<vmem>>, %arg3: memref<384x128xbf16, #tpu.memory_space<vmem>>, %arg4: memref<128x128xbf16, #tpu.memory_space<vmem>>, %arg5: memref<128x128xbf16, #tpu.memory_space<vmem>>, %arg6: memref<128x128xbf16, #tpu.memory_space<vmem>>, %arg7: memref<32x32xf32, #tpu.memory_space<vmem>>, %arg8: memref<32x32xf32, #tpu.memory_space<vmem>>, %arg9: memref<128x128xf32, #tpu.memory_space<vmem>>, %arg10: memref<1x128xf32, #tpu.memory_space<vmem>>, %arg11: memref<1x128xf32, #tpu.memory_space<vmem>>, %arg12: memref<1x128xf32, #tpu.memory_space<vmem>>, %arg13: memref<1x128xf32, #tpu.memory_space<vmem>>, %arg14: memref<32x128xf32, #tpu.memory_space<vmem>>) attributes {dimension_semantics = [#tpu.dimension_semantics<arbitrary>], iteration_bounds = array<i64: 1>, scalar_prefetch = 0 : i64, scratch_operands = 0 : i64, tpu.core_type = #tpu.core_type<tc>, window_params = [{pipeline_mode = #tpu.pipeline_mode<synchronous>, transform_indices = @transform_0, window_bounds = array<i64: 32, 384>}, {pipeline_mode = #tpu.pipeline_mode<synchronous>, transform_indices = @transform_1, window_bounds = array<i64: 32, 128>}, {pipeline_mode = #tpu.pipeline_mode<synchronous>, transform_indices = @transform_2, window_bounds = array<i64: 384, 128>}, {pipeline_mode = #tpu.pipeline_mode<synchronous>, transform_indices = @transform_3, window_bounds = array<i64: 128, 128>}, {pipeline_mode = #tpu.pipeline_mode<synchronous>, transform_indices = @transform_4, window_bounds = array<i64: 128, 128>}, {pipeline_mode = #tpu.pipeline_mode<synchronous>, transform_indices = @transform_5, window_bounds = array<i64: 128, 128>}, {pipeline_mode = #tpu.pipeline_mode<synchronous>, transform_indices = @transform_6, window_bounds = array<i64: 32, 32>}, {pipeline_mode = #tpu.pipeline_mode<synchronous>, transform_indices = @transform_7, window_bounds = array<i64: 32, 32>}, {pipeline_mode = #tpu.pipeline_mode<synchronous>, transform_indices = @transform_8, window_bounds = array<i64: 128, 128>}, {pipeline_mode = #tpu.pipeline_mode<synchronous>, transform_indices = @transform_9, window_bounds = array<i64: 1, 128>}, {pipeline_mode = #tpu.pipeline_mode<synchronous>, transform_indices = @transform_10, window_bounds = array<i64: 1, 128>}, {pipeline_mode = #tpu.pipeline_mode<synchronous>, transform_indices = @transform_11, window_bounds = array<i64: 1, 128>}, {pipeline_mode = #tpu.pipeline_mode<synchronous>, transform_indices = @transform_12, window_bounds = array<i64: 1, 128>}, {pipeline_mode = #tpu.pipeline_mode<synchronous>, transform_indices = @transform_13, window_bounds = array<i64: 32, 128>}]} {
    %c0 = arith.constant 0 : index
    %c0_0 = arith.constant 0 : index
    %0 = vector.load %arg9[%c0, %c0_0] : memref<128x128xf32, #tpu.memory_space<vmem>>, vector<128x128xf32>
    %c0_1 = arith.constant 0 : index
    %c0_2 = arith.constant 0 : index
    %1 = vector.load %arg1[%c0_1, %c0_2] : memref<32x384xbf16, #tpu.memory_space<vmem>>, vector<32x384xbf16>
    %c0_3 = arith.constant 0 : index
    %c0_4 = arith.constant 0 : index
    %2 = vector.load %arg3[%c0_3, %c0_4] : memref<384x128xbf16, #tpu.memory_space<vmem>>, vector<384x128xbf16>
    %cst = arith.constant dense<0.000000e+00> : vector<32x128xf32>
    %3 = tpu.matmul %1, %2, %cst {dimension_numbers = #tpu.dot_dimension_numbers<[1], [0], [0], [1], [0, 0, 1, 1], [], []>} : vector<32x384xbf16>, vector<384x128xbf16>, vector<32x128xf32> -> vector<32x128xf32>
    %c0_5 = arith.constant 0 : index
    %c0_6 = arith.constant 0 : index
    %4 = vector.load %arg10[%c0_5, %c0_6] : memref<1x128xf32, #tpu.memory_space<vmem>>, vector<1x128xf32>
    %c0_7 = arith.constant 0 : index
    %c0_8 = arith.constant 0 : index
    %5 = vector.load %arg11[%c0_7, %c0_8] : memref<1x128xf32, #tpu.memory_space<vmem>>, vector<1x128xf32>
    %cst_9 = arith.constant dense<0.000000e+00> : vector<32x128xf32>
    %6 = tpu.matmul %3, %0, %cst_9 {dimension_numbers = #tpu.dot_dimension_numbers<[1], [0], [0], [1], [0, 0, 1, 1], [], []>} : vector<32x128xf32>, vector<128x128xf32>, vector<32x128xf32> -> vector<32x128xf32>
    %7 = arith.mulf %3, %3 : vector<32x128xf32>
    %cst_10 = arith.constant dense<0.000000e+00> : vector<32x128xf32>
    %8 = tpu.matmul %7, %0, %cst_10 {dimension_numbers = #tpu.dot_dimension_numbers<[1], [0], [0], [1], [0, 0, 1, 1], [], []>} : vector<32x128xf32>, vector<128x128xf32>, vector<32x128xf32> -> vector<32x128xf32>
    %cst_11 = arith.constant dense<0.000000e+00> : vector<128xf32>
    %9 = vector.multi_reduction <add>, %6, %cst_11 [0] : vector<32x128xf32> to vector<128xf32>
    %10 = vector.shape_cast %9 : vector<128xf32> to vector<1x128xf32>
    %cst_12 = arith.constant dense<0.000000e+00> : vector<128xf32>
    %11 = vector.multi_reduction <add>, %8, %cst_12 [0] : vector<32x128xf32> to vector<128xf32>
    %12 = vector.shape_cast %11 : vector<128xf32> to vector<1x128xf32>
    %cst_13 = arith.constant 0.001953125 : f32
    %13 = vector.broadcast %cst_13 : f32 to vector<1x128xf32>
    %14 = arith.mulf %10, %13 : vector<1x128xf32>
    %cst_14 = arith.constant 0.001953125 : f32
    %15 = vector.broadcast %cst_14 : f32 to vector<1x128xf32>
    %16 = arith.mulf %12, %15 : vector<1x128xf32>
    %17 = arith.mulf %14, %14 : vector<1x128xf32>
    %18 = arith.subf %16, %17 : vector<1x128xf32>
    %cst_15 = arith.constant 9.99999974E-6 : f32
    %19 = vector.broadcast %cst_15 : f32 to vector<1x128xf32>
    %20 = arith.addf %18, %19 : vector<1x128xf32>
    %21 = math.rsqrt %20 : vector<1x128xf32>
    %22 = arith.mulf %4, %21 : vector<1x128xf32>
    %23 = arith.mulf %14, %22 : vector<1x128xf32>
    %24 = arith.subf %5, %23 : vector<1x128xf32>
    %25 = vector.broadcast %22 : vector<1x128xf32> to vector<32x128xf32>
    %26 = arith.mulf %3, %25 : vector<32x128xf32>
    %27 = vector.broadcast %24 : vector<1x128xf32> to vector<32x128xf32>
    %28 = arith.addf %26, %27 : vector<32x128xf32>
    %cst_16 = arith.constant 0.000000e+00 : f32
    %29 = vector.broadcast %cst_16 : f32 to vector<32x128xf32>
    %30 = arith.maximumf %28, %29 : vector<32x128xf32>
    %31 = arith.truncf %30 : vector<32x128xf32> to vector<32x128xbf16>
    %c0_17 = arith.constant 0 : index
    %c0_18 = arith.constant 0 : index
    %32 = vector.load %arg4[%c0_17, %c0_18] : memref<128x128xbf16, #tpu.memory_space<vmem>>, vector<128x128xbf16>
    %cst_19 = arith.constant dense<0.000000e+00> : vector<32x128xf32>
    %33 = tpu.matmul %31, %32, %cst_19 {dimension_numbers = #tpu.dot_dimension_numbers<[1], [0], [0], [1], [0, 0, 1, 1], [], []>} : vector<32x128xbf16>, vector<128x128xbf16>, vector<32x128xf32> -> vector<32x128xf32>
    %c0_20 = arith.constant 0 : index
    %c0_21 = arith.constant 0 : index
    %34 = vector.load %arg5[%c0_20, %c0_21] : memref<128x128xbf16, #tpu.memory_space<vmem>>, vector<128x128xbf16>
    %cst_22 = arith.constant dense<0.000000e+00> : vector<32x128xf32>
    %35 = tpu.matmul %31, %34, %cst_22 {dimension_numbers = #tpu.dot_dimension_numbers<[1], [0], [0], [1], [0, 0, 1, 1], [], []>} : vector<32x128xbf16>, vector<128x128xbf16>, vector<32x128xf32> -> vector<32x128xf32>
    %c0_23 = arith.constant 0 : index
    %c0_24 = arith.constant 0 : index
    %36 = vector.load %arg6[%c0_23, %c0_24] : memref<128x128xbf16, #tpu.memory_space<vmem>>, vector<128x128xbf16>
    %cst_25 = arith.constant dense<0.000000e+00> : vector<32x128xf32>
    %37 = tpu.matmul %31, %36, %cst_25 {dimension_numbers = #tpu.dot_dimension_numbers<[1], [0], [0], [1], [0, 0, 1, 1], [], []>} : vector<32x128xbf16>, vector<128x128xbf16>, vector<32x128xf32> -> vector<32x128xf32>
    %c0_26 = arith.constant 0 : index
    %c0_27 = arith.constant 0 : index
    %38 = vector.load %arg7[%c0_26, %c0_27] : memref<32x32xf32, #tpu.memory_space<vmem>>, vector<32x32xf32>
    %cst_28 = arith.constant dense<0.000000e+00> : vector<32x128xf32>
    %39 = tpu.matmul %38, %33, %cst_28 {dimension_numbers = #tpu.dot_dimension_numbers<[1], [0], [0], [1], [0, 0, 1, 1], [], []>} : vector<32x32xf32>, vector<32x128xf32>, vector<32x128xf32> -> vector<32x128xf32>
    %40 = arith.addf %35, %39 : vector<32x128xf32>
    %c0_29 = arith.constant 0 : index
    %c0_30 = arith.constant 0 : index
    %41 = vector.load %arg8[%c0_29, %c0_30] : memref<32x32xf32, #tpu.memory_space<vmem>>, vector<32x32xf32>
    %cst_31 = arith.constant dense<0.000000e+00> : vector<32x128xf32>
    %42 = tpu.matmul %41, %37, %cst_31 {dimension_numbers = #tpu.dot_dimension_numbers<[1], [0], [0], [1], [0, 0, 1, 1], [], []>} : vector<32x32xf32>, vector<32x128xf32>, vector<32x128xf32> -> vector<32x128xf32>
    %43 = arith.addf %40, %42 : vector<32x128xf32>
    %c0_32 = arith.constant 0 : index
    %c0_33 = arith.constant 0 : index
    %44 = vector.load %arg12[%c0_32, %c0_33] : memref<1x128xf32, #tpu.memory_space<vmem>>, vector<1x128xf32>
    %c0_34 = arith.constant 0 : index
    %c0_35 = arith.constant 0 : index
    %45 = vector.load %arg13[%c0_34, %c0_35] : memref<1x128xf32, #tpu.memory_space<vmem>>, vector<1x128xf32>
    %cst_36 = arith.constant dense<0.000000e+00> : vector<32x128xf32>
    %46 = tpu.matmul %43, %0, %cst_36 {dimension_numbers = #tpu.dot_dimension_numbers<[1], [0], [0], [1], [0, 0, 1, 1], [], []>} : vector<32x128xf32>, vector<128x128xf32>, vector<32x128xf32> -> vector<32x128xf32>
    %47 = arith.mulf %43, %43 : vector<32x128xf32>
    %cst_37 = arith.constant dense<0.000000e+00> : vector<32x128xf32>
    %48 = tpu.matmul %47, %0, %cst_37 {dimension_numbers = #tpu.dot_dimension_numbers<[1], [0], [0], [1], [0, 0, 1, 1], [], []>} : vector<32x128xf32>, vector<128x128xf32>, vector<32x128xf32> -> vector<32x128xf32>
    %cst_38 = arith.constant dense<0.000000e+00> : vector<128xf32>
    %49 = vector.multi_reduction <add>, %46, %cst_38 [0] : vector<32x128xf32> to vector<128xf32>
    %50 = vector.shape_cast %49 : vector<128xf32> to vector<1x128xf32>
    %cst_39 = arith.constant dense<0.000000e+00> : vector<128xf32>
    %51 = vector.multi_reduction <add>, %48, %cst_39 [0] : vector<32x128xf32> to vector<128xf32>
    %52 = vector.shape_cast %51 : vector<128xf32> to vector<1x128xf32>
    %cst_40 = arith.constant 0.001953125 : f32
    %53 = vector.broadcast %cst_40 : f32 to vector<1x128xf32>
    %54 = arith.mulf %50, %53 : vector<1x128xf32>
    %cst_41 = arith.constant 0.001953125 : f32
    %55 = vector.broadcast %cst_41 : f32 to vector<1x128xf32>
    %56 = arith.mulf %52, %55 : vector<1x128xf32>
    %57 = arith.mulf %54, %54 : vector<1x128xf32>
    %58 = arith.subf %56, %57 : vector<1x128xf32>
    %cst_42 = arith.constant 9.99999974E-6 : f32
    %59 = vector.broadcast %cst_42 : f32 to vector<1x128xf32>
    %60 = arith.addf %58, %59 : vector<1x128xf32>
    %61 = math.rsqrt %60 : vector<1x128xf32>
    %62 = arith.mulf %44, %61 : vector<1x128xf32>
    %63 = arith.mulf %54, %62 : vector<1x128xf32>
    %64 = arith.subf %45, %63 : vector<1x128xf32>
    %65 = vector.broadcast %62 : vector<1x128xf32> to vector<32x128xf32>
    %66 = arith.mulf %43, %65 : vector<32x128xf32>
    %67 = vector.broadcast %64 : vector<1x128xf32> to vector<32x128xf32>
    %68 = arith.addf %66, %67 : vector<32x128xf32>
    %c0_43 = arith.constant 0 : index
    %c0_44 = arith.constant 0 : index
    %69 = vector.load %arg2[%c0_43, %c0_44] : memref<32x128xf32, #tpu.memory_space<vmem>>, vector<32x128xf32>
    %70 = arith.addf %68, %69 : vector<32x128xf32>
    %cst_45 = arith.constant 0.000000e+00 : f32
    %71 = vector.broadcast %cst_45 : f32 to vector<32x128xf32>
    %72 = arith.maximumf %70, %71 : vector<32x128xf32>
    %c0_46 = arith.constant 0 : index
    %c0_47 = arith.constant 0 : index
    %73 = vector.load %arg14[%c0_46, %c0_47] : memref<32x128xf32, #tpu.memory_space<vmem>>, vector<32x128xf32>
    tpu.vector_store %arg14[%c0_46, %c0_47], %72 {strides = array<i32>} : memref<32x128xf32, #tpu.memory_space<vmem>>, vector<32x128xf32>,
    return
  }
  func.func @transform_0(%arg0: i32) -> (i32, i32) {
    %c0_i32 = arith.constant 0 : i32
    %c0_i32_0 = arith.constant 0 : i32
    %c0_i32_1 = arith.constant 0 : i32
    return %c0_i32, %c0_i32_0 : i32, i32
  }
  func.func @transform_1(%arg0: i32) -> (i32, i32) {
    %c0_i32 = arith.constant 0 : i32
    %c0_i32_0 = arith.constant 0 : i32
    %c0_i32_1 = arith.constant 0 : i32
    return %c0_i32, %c0_i32_0 : i32, i32
  }
  func.func @transform_2(%arg0: i32) -> (i32, i32) {
    %c0_i32 = arith.constant 0 : i32
    %c0_i32_0 = arith.constant 0 : i32
    %c0_i32_1 = arith.constant 0 : i32
    return %c0_i32, %c0_i32_0 : i32, i32
  }
  func.func @transform_3(%arg0: i32) -> (i32, i32) {
    %c0_i32 = arith.constant 0 : i32
    %c0_i32_0 = arith.constant 0 : i32
    %c0_i32_1 = arith.constant 0 : i32
    return %c0_i32, %c0_i32_0 : i32, i32
  }
  func.func @transform_4(%arg0: i32) -> (i32, i32) {
    %c0_i32 = arith.constant 0 : i32
    %c0_i32_0 = arith.constant 0 : i32
    %c0_i32_1 = arith.constant 0 : i32
    return %c0_i32, %c0_i32_0 : i32, i32
  }
  func.func @transform_5(%arg0: i32) -> (i32, i32) {
    %c0_i32 = arith.constant 0 : i32
    %c0_i32_0 = arith.constant 0 : i32
    %c0_i32_1 = arith.constant 0 : i32
    return %c0_i32, %c0_i32_0 : i32, i32
  }
  func.func @transform_6(%arg0: i32) -> (i32, i32) {
    %c0_i32 = arith.constant 0 : i32
    %c0_i32_0 = arith.constant 0 : i32
    %c0_i32_1 = arith.constant 0 : i32
    return %c0_i32, %c0_i32_0 : i32, i32
  }
  func.func @transform_7(%arg0: i32) -> (i32, i32) {
    %c0_i32 = arith.constant 0 : i32
    %c0_i32_0 = arith.constant 0 : i32
    %c0_i32_1 = arith.constant 0 : i32
    return %c0_i32, %c0_i32_0 : i32, i32
  }
  func.func @transform_8(%arg0: i32) -> (i32, i32) {
    %c0_i32 = arith.constant 0 : i32
    %c0_i32_0 = arith.constant 0 : i32
    %c0_i32_1 = arith.constant 0 : i32
    return %c0_i32, %c0_i32_0 : i32, i32
  }
  func.func @transform_9(%arg0: i32) -> (i32, i32) {
    %c0_i32 = arith.constant 0 : i32
    %c0_i32_0 = arith.constant 0 : i32
    %c0_i32_1 = arith.constant 0 : i32
    return %c0_i32, %c0_i32_0 : i32, i32
  }
  func.func @transform_10(%arg0: i32) -> (i32, i32) {
    %c0_i32 = arith.constant 0 : i32
    %c0_i32_0 = arith.constant 0 : i32
    %c0_i32_1 = arith.constant 0 : i32
    return %c0_i32, %c0_i32_0 : i32, i32
  }
  func.func @transform_11(%arg0: i32) -> (i32, i32) {
    %c0_i32 = arith.constant 0 : i32
    %c0_i32_0 = arith.constant 0 : i32
    %c0_i32_1 = arith.constant 0 : i32
    return %c0_i32, %c0_i32_0 : i32, i32
  }
  func.func @transform_12(%arg0: i32) -> (i32, i32) {
    %c0_i32 = arith.constant 0 : i32
    %c0_i32_0 = arith.constant 0 : i32
    %c0_i32_1 = arith.constant 0 : i32
    return %c0_i32, %c0_i32_0 : i32, i32
  }
  func.func @transform_13(%arg0: i32) -> (i32, i32) {
    %c0_i32 = arith.constant 0 : i32
    %c0_i32_0 = arith.constant 0 : i32
    %c0_i32_1 = arith.constant 0 : i32
    return %c0_i32, %c0_i32_0 : i32, i32
  }
}

</mosaic_0001>

<bundles_post_ra>
// kernel: squeeze.3
= control target key start
LH: loop header
LB: loop body
LE: loop exit
PB: predicated region body
PF: predicated region fallthrough
CT: control target
= control target key end

     0   :  { %s15157_s0 = inlined_call_operand.vmem [shape: bf16[1,16,8,16,8], index: 0, kind: input, shape index: {}]   ;;  %s15158_s1 = inlined_call_operand.vmem [shape: bf16[128,128], index: 1, kind: output, shape index: {}]  }
   0x1   :  { %15170 = sst [smem:[#allocation131_spill]] %s15157_s0 }
   0x2   :  { %15171 = sst [smem:[#allocation132_spill]] %s15158_s1 }
   0x3   :  { %v10700_v0 = vld [vmem:[%s15157_s0 + $0x138] sm:$0xff]   ;;  %v11472_v1 = vld [vmem:[%s15157_s0 + $0x130] sm:$0xff]   ;;  %v11477_v2 = vld [vmem:[%s15157_s0 + $0x128] sm:$0xff]   ;;  %s4196_s9 = smov 3  ;;  %s4199_s10 = smov 12  ;;  %vm3846_vm0 = vcmask 1043458  }
   0x4   :  { %v10415_v3 = vunpack.c.h.bf16 %v10700_v0  ;;  %v10419_v4 = vunpack.c.h.bf16 %v11472_v1  ;;  %v11483_v5 = vld [vmem:[%s15157_s0 + $0x120] sm:$0xff]   ;;  %v11488_v6 = vld [vmem:[%s15157_s0 + $0x118] sm:$0xff]   ;;  %v11493_v7 = vld [vmem:[%s15157_s0 + $0x110] sm:$0xff]   ;;  %v10423_v8 = vunpack.c.h.bf16 %v11477_v2  ;;  %v10414_v32 = vunpack.c.l.bf16 %v10700_v0  ;;  %s4204_s11 = smov 48  ;;  %s4209_s12 = smov 192 }
   0x5   :  { %v10427_v9 = vunpack.c.h.bf16 %v11483_v5  ;;  %v11500_v10 = vld [vmem:[%s15157_s0 + $0x108] sm:$0xff]   ;;  %v10431_v11 = vunpack.c.h.bf16 %v11488_v6  ;;  %v11506_v12 = vld [vmem:[%s15157_s0 + $0x100] sm:$0xff]   ;;  %v10435_v13 = vunpack.c.h.bf16 %v11493_v7  ;;  %v11512_v14 = vld [vmem:[%s15157_s0 + $0x38] sm:$0xff]   ;;  %v10418_v33 = vunpack.c.l.bf16 %v11472_v1  ;;  %s4174_s13 = smov 3  ;;  %s4177_s14 = smov 12 }
   0x6   :  { %2658 = vst [vmem:[#allocation1 + $0x278] sm:$0xff] %v10415_v3  ;;  %v10439_v15 = vunpack.c.h.bf16 %v11500_v10  ;;  %v11518_v16 = vld [vmem:[%s15157_s0 + $0x30] sm:$0xff]   ;;  %v10443_v17 = vunpack.c.h.bf16 %v11506_v12  ;;  %v11524_v18 = vld [vmem:[%s15157_s0 + $0x28] sm:$0xff]   ;;  %v10543_v19 = vunpack.c.h.bf16 %v11512_v14  ;;  %v11530_v20 = vld [vmem:[%s15157_s0 + $0x20] sm:$0xff]   ;;  %v10422_v34 = vunpack.c.l.bf16 %v11477_v2  ;;  %s4182_s15 = smov 48  ;;  %s4187_s16 = smov 192 }
   0x7   :  { %2688 = vst [vmem:[#allocation1 + $0x268] sm:$0xff] %v10419_v4  ;;  %v10547_v21 = vunpack.c.h.bf16 %v11518_v16  ;;  %v11536_v22 = vld [vmem:[%s15157_s0 + $0x18] sm:$0xff]   ;;  %v10551_v23 = vunpack.c.h.bf16 %v11524_v18  ;;  %v11542_v24 = vld [vmem:[%s15157_s0 + $0x10] sm:$0xff]   ;;  %v10555_v25 = vunpack.c.h.bf16 %v11530_v20  ;;  %v11548_v26 = vld [vmem:[%s15157_s0 + $0x8] sm:$0xff]   ;;  %v10426_v37 = vunpack.c.l.bf16 %v11483_v5  ;;  %s15159_s21 = smov 120   ;;  %s11676_s22 = smov 3 }
   0x8   :  { %2718 = vst [vmem:[#allocation1 + $0x258] sm:$0xff] %v10423_v8  ;;  %v10559_v27 = vunpack.c.h.bf16 %v11536_v22  ;;  %v11554_v28 = vld [vmem:[%s15157_s0] sm:$0xff]   ;;  %v10563_v29 = vunpack.c.h.bf16 %v11542_v24  ;;  %v10567_v30 = vunpack.c.h.bf16 %v11548_v26  ;;  %v10430_v38 = vunpack.c.l.bf16 %v11488_v6  ;;  %v11581_v61 = vld [vmem:[%s15157_s0 + $0x178] sm:$0xff]   ;;  %v11587_v63 = vld [vmem:[%s15157_s0 + $0x170] sm:$0xff]   ;;  %s11678_s23 = smov 12  ;;  %s4288_s24 = smov 3 }
   0x9   :  { %2748 = vst [vmem:[#allocation1 + $0x248] sm:$0xff] %v10427_v9  ;;  %v10571_v31 = vunpack.c.h.bf16 %v11554_v28  ;;  %v10434_v39 = vunpack.c.l.bf16 %v11493_v7  ;;  %vm3850_vm1 = vcmask 1045508   ;;  %v10438_v42 = vunpack.c.l.bf16 %v11500_v10  ;;  %v11594_v1 = vld [vmem:[%s15157_s0 + $0x168] sm:$0xff]   ;;  %v11600_v3 = vld [vmem:[%s15157_s0 + $0x160] sm:$0xff]   ;;  %v11606_v5 = vld [vmem:[%s15157_s0 + $0x158] sm:$0xff]   ;;  %s4291_s25 = smov 12 }
   0xa   :  { %2778 = vst [vmem:[#allocation1 + $0x238] sm:$0xff] %v10431_v11  ;;  %v10442_v43 = vunpack.c.l.bf16 %v11506_v12  ;;  %vm3854_vm2 = vcmask 1047558   ;;  %v10542_v46 = vunpack.c.l.bf16 %v11512_v14  ;;  %v10546_v47 = vunpack.c.l.bf16 %v11518_v16  ;;  %v11612_v7 = vld [vmem:[%s15157_s0 + $0x150] sm:$0xff]   ;;  %v11618_v9 = vld [vmem:[%s15157_s0 + $0x148] sm:$0xff]   ;;  %v11624_v11 = vld [vmem:[%s15157_s0 + $0x140] sm:$0xff]   ;;  %s11681_s26 = smov 48 }
   0xb   :  { %2808 = vst [vmem:[#allocation1 + $0x228] sm:$0xff] %v10435_v13  ;;  %v10550_v51 = vunpack.c.l.bf16 %v11524_v18  ;;  %v10554_v55 = vunpack.c.l.bf16 %v11530_v20  ;;  %v10558_v57 = vunpack.c.l.bf16 %v11536_v22  ;;  %v10562_v59 = vunpack.c.l.bf16 %v11542_v24  ;;  %v11630_v13 = vld [vmem:[%s15157_s0 + $0x78] sm:$0xff]   ;;  %s11683_s27 = smov 192  ;;  %s4296_s28 = smov 48 }
   0xc   :  { %2838 = vst [vmem:[#allocation1 + $0x218] sm:$0xff] %v10439_v15  ;;  %v10566_v62 = vunpack.c.l.bf16 %v11548_v26  ;;  %v10570_v0 = vunpack.c.l.bf16 %v11554_v28  ;;  %v10383_v2 = vunpack.c.h.bf16 %v11581_v61  ;;  %v10387_v4 = vunpack.c.h.bf16 %v11587_v63  ;;  %v11636_v15 = vld [vmem:[%s15157_s0 + $0x70] sm:$0xff]   ;;  %s4301_s29 = smov 192  ;;  %s11688_s30 = smov 3 }
   0xd   :  { %2868 = vst [vmem:[#allocation1 + $0x208] sm:$0xff] %v10443_v17  ;;  %v10391_v6 = vunpack.c.h.bf16 %v11594_v1  ;;  %v10395_v8 = vunpack.c.h.bf16 %v11600_v3  ;;  %v10399_v10 = vunpack.c.h.bf16 %v11606_v5  ;;  %v10403_v12 = vunpack.c.h.bf16 %v11612_v7  ;;  %v11642_v17 = vld [vmem:[%s15157_s0 + $0x68] sm:$0xff]   ;;  %s11691_s2 = smov 12  ;;  %s11693_s3 = smov 48 }
   0xe   :  { %3618 = vst [vmem:[#allocation1 + $0x78] sm:$0xff] %v10543_v19  ;;  %v10407_v14 = vunpack.c.h.bf16 %v11618_v9  ;;  %v10411_v16 = vunpack.c.h.bf16 %v11624_v11  ;;  %v10511_v18 = vunpack.c.h.bf16 %v11630_v13  ;;  %v11648_v19 = vld [vmem:[%s15157_s0 + $0x60] sm:$0xff]   ;;  %v10515_v20 = vunpack.c.h.bf16 %v11636_v15  ;;  %s11696_s4 = smov 192  ;;  %s11698_s5 = smov 3 }
   0xf   :  { %3648 = vst [vmem:[#allocation1 + $0x68] sm:$0xff] %v10547_v21  ;;  %v11654_v21 = vld [vmem:[%s15157_s0 + $0x58] sm:$0xff]   ;;  %v10519_v22 = vunpack.c.h.bf16 %v11642_v17  ;;  %v10523_v24 = vunpack.c.h.bf16 %v11648_v19  ;;  %s11702_s6 = smov 12  ;;  %s11704_s7 = smov 48  ;;  %vm3856_vm3 = vcmask 64512   ;;  %vm4193_vm4 = vcmask 1048512  }
  0x10   :  { %3678 = vst [vmem:[#allocation1 + $0x58] sm:$0xff] %v10551_v23  ;;  %v11660_v23 = vld [vmem:[%s15157_s0 + $0x50] sm:$0xff]   ;;  %v10527_v26 = vunpack.c.h.bf16 %v11654_v21  ;;  %s11706_s8 = smov 192  ;;  %s11736_s17 = smov 3  ;;  %vm4560_vm5 = vcmask 982912   ;;  %vm4927_vm6 = vcmask 917312  }
  0x11   :  { %3708 = vst [vmem:[#allocation1 + $0x48] sm:$0xff] %v10555_v25  ;;  %v11666_v25 = vld [vmem:[%s15157_s0 + $0x48] sm:$0xff]   ;;  %v10531_v28 = vunpack.c.h.bf16 %v11660_v23  ;;  %s11740_s18 = smov 12  ;;  %s11742_s19 = smov 48  ;;  %vm5294_vm7 = vcmask 851712   ;;  %vm5661_vm8 = vcmask 786112  }
  0x12   :  { %3738 = vst [vmem:[#allocation1 + $0x38] sm:$0xff] %v10559_v27  ;;  %v11672_v27 = vld [vmem:[%s15157_s0 + $0x40] sm:$0xff]   ;;  %s11746_s20 = smov 192  ;;  %s11785_s1 = smov 12  ;;  %vm6028_vm9 = vcmask 720512   ;;  %vm6395_vm10 = vcmask 654912  }
  0x13   :  { %3768 = vst [vmem:[#allocation1 + $0x28] sm:$0xff] %v10563_v29  ;;  %v10535_v29 = vunpack.c.h.bf16 %v11666_v25  ;;  %15177 = sst [smem:[#allocation7_spill]] %s11785_s1  ;;  %s11834_s1 = smov 192  ;;  %vm6762_vm11 = vcmask 589312   ;;  %vm7129_vm12 = vcmask 523712   ;;  %vm7496_vm13 = vcmask 458112  }
  0x14   :  { %3798 = vst [vmem:[#allocation1 + $0x18] sm:$0xff] %v10567_v30  ;;  %v4197_v35 = vld [vmem:[#allocation1 + $0x20f] ss:$16 sm:%s4196_s9]   ;;  %v10539_v30 = vunpack.c.h.bf16 %v11672_v27  ;;  %s11708_s9 = smov 3  ;;  %15188 = sst [smem:[#allocation18_spill]] %s11834_s1  ;;  %vm7863_vm14 = vcmask 392512  }
  0x15   :  { %v4200_v36 = vld [vmem:[#allocation1 + $0x20f] ss:$16 sm:%s4199_s10]   ;;  %3828 = vst [vmem:[#allocation1 + $0x8] sm:$0xff] %v10571_v31  ;;  %v10382_v31 = vunpack.c.l.bf16 %v11581_v61  ;;  %s11711_s10 = smov 12  ;;  %v10534_v61 = vunpack.c.l.bf16 %v11666_v25  ;;  %s11848_s1 = smov 192  ;;  %vm8230_vm15 = vcmask 326912  }
  0x16   :  { %2673 = vst [vmem:[#allocation1 + $0x270] sm:$0xff] %v10414_v32  ;;  %v4202_v40 = vsel %vm3846_vm0, %v4200_v36, %v4197_v35  ;;  %v4205_v41 = vld [vmem:[#allocation1 + $0x20f] ss:$16 sm:%s4204_s11]   ;;  %v10386_v32 = vunpack.c.l.bf16 %v11587_v63  ;;  %v10394_v36 = vunpack.c.l.bf16 %v11600_v3  ;;  %s11713_s11 = smov 48  ;;  %v10538_v63 = vunpack.c.l.bf16 %v11672_v27  ;;  %15191 = sst [smem:[#allocation21_spill]] %s11848_s1 }
  0x17   :  { %2703 = vst [vmem:[#allocation1 + $0x260] sm:$0xff] %v10418_v33  ;;  %v4207_v44 = vsel %vm3850_vm1, %v4205_v41, %v4202_v40  ;;  %v4210_v45 = vld [vmem:[#allocation1 + $0x20f] ss:$16 sm:%s4209_s12]   ;;  %v10390_v33 = vunpack.c.l.bf16 %v11594_v1  ;;  %v10406_v41 = vunpack.c.l.bf16 %v11618_v9  ;;  %s11717_s12 = smov 192  ;;  %s11855_s1 = smov 12 }
  0x18   :  { %2733 = vst [vmem:[#allocation1 + $0x250] sm:$0xff] %v10422_v34  ;;  %v4212_v54 = vsel %vm3854_vm2, %v4210_v45, %v4207_v44  ;;  %v10510_v45 = vunpack.c.l.bf16 %v11630_v13  ;;  %15193 = sst [smem:[#allocation23_spill]] %s11855_s1  ;;  %s11862_s1 = smov 192 }
  0x19   :  { %2763 = vst [vmem:[#allocation1 + $0x240] sm:$0xff] %v10426_v37  ;;  %v10398_v37 = vunpack.c.l.bf16 %v11606_v5  ;;  %15195 = sst [smem:[#allocation25_spill]] %s11862_s1  ;;  %s11869_s1 = smov 12 }
  0x1a   :  { %2793 = vst [vmem:[#allocation1 + $0x230] sm:$0xff] %v10430_v38  ;;  %v10402_v38 = vunpack.c.l.bf16 %v11612_v7  ;;  %15197 = sst [smem:[#allocation27_spill]] %s11869_s1  ;;  %s11876_s1 = smov 192 }
  0x1b   :  { %2823 = vst [vmem:[#allocation1 + $0x220] sm:$0xff] %v10434_v39  ;;  %15199 = sst [smem:[#allocation29_spill]] %s11876_s1  ;;  %s11883_s1 = smov 12 }
  0x1c   :  { %v4175_v48 = vld [vmem:[#allocation1 + $0xf] ss:$16 sm:%s4174_s13]   ;;  %2853 = vst [vmem:[#allocation1 + $0x210] sm:$0xff] %v10438_v42  ;;  %v10410_v42 = vunpack.c.l.bf16 %v11624_v11  ;;  %s11719_s13 = smov 3  ;;  %15201 = sst [smem:[#allocation31_spill]] %s11883_s1 }
  0x1d   :  { %v4178_v49 = vld [vmem:[#allocation1 + $0xf] ss:$16 sm:%s4177_s14]   ;;  %2883 = vst [vmem:[#allocation1 + $0x200] sm:$0xff] %v10442_v43  ;;  %s11722_s14 = smov 12  ;;  %s11890_s1 = smov 192 }
  0x1e   :  { %v4183_v50 = vld [vmem:[#allocation1 + $0xf] ss:$16 sm:%s4182_s15]   ;;  %v4180_v52 = vsel %vm3846_vm0, %v4178_v49, %v4175_v48  ;;  %3633 = vst [vmem:[#allocation1 + $0x70] sm:$0xff] %v10542_v46  ;;  %s11724_s15 = smov 48  ;;  %v10514_v46 = vunpack.c.l.bf16 %v11636_v15  ;;  %15203 = sst [smem:[#allocation33_spill]] %s11890_s1 }
  0x1f   :  { %v4188_v53 = vld [vmem:[#allocation1 + $0xf] ss:$16 sm:%s4187_s16]   ;;  %v4185_v56 = vsel %vm3850_vm1, %v4183_v50, %v4180_v52  ;;  %3663 = vst [vmem:[#allocation1 + $0x60] sm:$0xff] %v10546_v47  ;;  %v10518_v50 = vunpack.c.l.bf16 %v11642_v17  ;;  %s11734_s16 = smov 192  ;;  %s11897_s1 = smov 12 }
  0x20   :  { %v4190_v58 = vsel %vm3854_vm2, %v4188_v53, %v4185_v56  ;;  %3693 = vst [vmem:[#allocation1 + $0x50] sm:$0xff] %v10550_v51  ;;  %v10526_v56 = vunpack.c.l.bf16 %v11654_v21 }
  0x21   :  { %v10761_v60 = vpack.i.bf16 %v4212_v54, %v4190_v58  ;;  %3723 = vst [vmem:[#allocation1 + $0x40] sm:$0xff] %v10554_v55  ;;  %v10522_v54 = vunpack.c.l.bf16 %v11648_v19  ;;  %v10530_v58 = vunpack.c.l.bf16 %v11660_v23 }
  0x22   :  { %3753 = vst [vmem:[#allocation1 + $0x30] sm:$0xff] %v10558_v57 }
  0x23   :  { %10762 = vrot.lane.b32.xlu0 %v10761_v60, %s15159_s21  ;;  %3783 = vst [vmem:[#allocation1 + $0x20] sm:$0xff] %v10562_v59  ;;  %v10636_v60 = vld [vmem:[%s15157_s0 + $0x338] sm:$0xff]  }
  0x24   :  { %3813 = vst [vmem:[#allocation1 + $0x10] sm:$0xff] %v10566_v62  ;;  %v10637_v62 = vld [vmem:[%s15157_s0 + $0x330] sm:$0xff]   ;;  %v10159_v1 = vunpack.c.h.bf16 %v10636_v60 }
  0x25   :  { %3841 = vst [vmem:[#allocation1] sm:$0xff] %v10570_v0  ;;  %v10638_v0 = vld [vmem:[%s15157_s0 + $0x328] sm:$0xff]   ;;  %v10163_v3 = vunpack.c.h.bf16 %v10637_v62 }
  0x26   :  { %2418 = vst [vmem:[#allocation1 + $0x2f8] sm:$0xff] %v10383_v2  ;;  %v10639_v2 = vld [vmem:[%s15157_s0 + $0x320] sm:$0xff]   ;;  %v10167_v5 = vunpack.c.h.bf16 %v10638_v0 }
  0x27   :  { %2448 = vst [vmem:[#allocation1 + $0x2e8] sm:$0xff] %v10387_v4  ;;  %v10640_v4 = vld [vmem:[%s15157_s0 + $0x318] sm:$0xff]   ;;  %v10171_v7 = vunpack.c.h.bf16 %v10639_v2  ;;  %v10665_v2 = vld [vmem:[%s15157_s0 + $0x250] sm:$0xff]  }
  0x28   :  { %2478 = vst [vmem:[#allocation1 + $0x2d8] sm:$0xff] %v10391_v6  ;;  %v10641_v6 = vld [vmem:[%s15157_s0 + $0x310] sm:$0xff]   ;;  %v10175_v9 = vunpack.c.h.bf16 %v10640_v4 }
  0x29   :  { %2508 = vst [vmem:[#allocation1 + $0x2c8] sm:$0xff] %v10395_v8  ;;  %v10642_v8 = vld [vmem:[%s15157_s0 + $0x308] sm:$0xff]   ;;  %v10179_v11 = vunpack.c.h.bf16 %v10641_v6 }
  0x2a   :  { %2538 = vst [vmem:[#allocation1 + $0x2b8] sm:$0xff] %v10399_v10  ;;  %v10643_v10 = vld [vmem:[%s15157_s0 + $0x300] sm:$0xff]   ;;  %v10183_v13 = vunpack.c.h.bf16 %v10642_v8 }
  0x2b   :  { %2568 = vst [vmem:[#allocation1 + $0x2a8] sm:$0xff] %v10403_v12  ;;  %v10668_v12 = vld [vmem:[%s15157_s0 + $0x238] sm:$0xff]   ;;  %v10187_v15 = vunpack.c.h.bf16 %v10643_v10  ;;  %v10667_v8 = vld [vmem:[%s15157_s0 + $0x240] sm:$0xff]   ;;  %v10275_v10 = vunpack.c.h.bf16 %v10665_v2 }
  0x2c   :  { %2598 = vst [vmem:[#allocation1 + $0x298] sm:$0xff] %v10407_v14  ;;  %v10669_v14 = vld [vmem:[%s15157_s0 + $0x230] sm:$0xff]   ;;  %v10287_v17 = vunpack.c.h.bf16 %v10668_v12  ;;  %v10616_v2 = vld [vmem:[%s15157_s0 + $0x3d8] sm:$0xff]  }
  0x2d   :  { %2628 = vst [vmem:[#allocation1 + $0x288] sm:$0xff] %v10411_v16  ;;  %v10670_v16 = vld [vmem:[%s15157_s0 + $0x228] sm:$0xff]   ;;  %v10291_v19 = vunpack.c.h.bf16 %v10669_v14  ;;  %v10283_v14 = vunpack.c.h.bf16 %v10667_v8  ;;  %v10079_v8 = vunpack.c.h.bf16 %v10616_v2 }
  0x2e   :  { %3378 = vst [vmem:[#allocation1 + $0xf8] sm:$0xff] %v10511_v18  ;;  %v10671_v18 = vld [vmem:[%s15157_s0 + $0x220] sm:$0xff]   ;;  %v10295_v21 = vunpack.c.h.bf16 %v10670_v16 }
  0x2f   :  { %3408 = vst [vmem:[#allocation1 + $0xe8] sm:$0xff] %v10515_v20  ;;  %v10672_v20 = vld [vmem:[%s15157_s0 + $0x218] sm:$0xff]   ;;  %v10299_v23 = vunpack.c.h.bf16 %v10671_v18 }
  0x30   :  { %3438 = vst [vmem:[#allocation1 + $0xd8] sm:$0xff] %v10519_v22  ;;  %v10673_v22 = vld [vmem:[%s15157_s0 + $0x210] sm:$0xff]   ;;  %v10303_v25 = vunpack.c.h.bf16 %v10672_v20 }
  0x31   :  { %3468 = vst [vmem:[#allocation1 + $0xc8] sm:$0xff] %v10523_v24  ;;  %v10674_v24 = vld [vmem:[%s15157_s0 + $0x208] sm:$0xff]   ;;  %v10307_v27 = vunpack.c.h.bf16 %v10673_v22  ;;  %v10681_v20 = vld [vmem:[%s15157_s0 + $0x1d0] sm:$0xff]  }
  0x32   :  { %3498 = vst [vmem:[#allocation1 + $0xb8] sm:$0xff] %v10527_v26  ;;  %v10675_v26 = vld [vmem:[%s15157_s0 + $0x200] sm:$0xff]  }
  0x33   :  { %3528 = vst [vmem:[#allocation1 + $0xa8] sm:$0xff] %v10531_v28  ;;  %v10628_v28 = vld [vmem:[%s15157_s0 + $0x378] sm:$0xff]  }
  0x34   :  { %3558 = vst [vmem:[#allocation1 + $0x98] sm:$0xff] %v10535_v29  ;;  %v4289_v34 = vld [vmem:[#allocation1 + $0x28f] ss:$16 sm:%s4288_s24]   ;;  %s11773_s24 = smov 48  ;;  %v10311_v29 = vunpack.c.h.bf16 %v10674_v24 }
  0x35   :  { %v4292_v35 = vld [vmem:[#allocation1 + $0x28f] ss:$16 sm:%s4291_s25]   ;;  %3588 = vst [vmem:[#allocation1 + $0x88] sm:$0xff] %v10539_v30  ;;  %s11754_s25 = smov 12  ;;  %15174 = sst [smem:[#allocation4_spill]] %s11773_s24  ;;  %v10629_v30 = vld [vmem:[%s15157_s0 + $0x370] sm:$0xff]  }
  0x36   :  { %2433 = vst [vmem:[#allocation1 + $0x2f0] sm:$0xff] %v10382_v31  ;;  %v4294_v39 = vsel %vm3846_vm0, %v4292_v35, %v4289_v34  ;;  %v4297_v40 = vld [vmem:[#allocation1 + $0x28f] ss:$16 sm:%s4296_s28]   ;;  %s11771_s28 = smov 12  ;;  %s11794_s24 = smov 3  ;;  %v10315_v31 = vunpack.c.h.bf16 %v10675_v26  ;;  %v10631_v34 = vld [vmem:[%s15157_s0 + $0x360] sm:$0xff]   ;;  %v10131_v35 = vunpack.c.h.bf16 %v10629_v30 }
  0x37   :  { %2463 = vst [vmem:[#allocation1 + $0x2e0] sm:$0xff] %v10386_v32  ;;  %v4299_v43 = vsel %vm3850_vm1, %v4297_v40, %v4294_v39  ;;  %v4302_v44 = vld [vmem:[#allocation1 + $0x28f] ss:$16 sm:%s4301_s29]   ;;  %s11762_s29 = smov 192  ;;  %15173 = sst [smem:[#allocation3_spill]] %s11771_s28  ;;  %v10633_v40 = vld [vmem:[%s15157_s0 + $0x350] sm:$0xff]  }
  0x38   :  { %2493 = vst [vmem:[#allocation1 + $0x2d0] sm:$0xff] %v10390_v33  ;;  %v4304_v53 = vsel %vm3854_vm2, %v4302_v44, %v4299_v43  ;;  %s11792_s28 = smov 192  ;;  %15180 = sst [smem:[#allocation10_spill]] %s11794_s24  ;;  %v10630_v32 = vld [vmem:[%s15157_s0 + $0x368] sm:$0xff]   ;;  %v10127_v33 = vunpack.c.h.bf16 %v10628_v28  ;;  %v10683_v30 = vld [vmem:[%s15157_s0 + $0x1c0] sm:$0xff]  }
  0x39   :  { %2523 = vst [vmem:[#allocation1 + $0x2c0] sm:$0xff] %v10394_v36  ;;  %15179 = sst [smem:[#allocation9_spill]] %s11792_s28  ;;  %s11801_s24 = smov 3  ;;  %v10632_v36 = vld [vmem:[%s15157_s0 + $0x358] sm:$0xff]   ;;  %v10135_v39 = vunpack.c.h.bf16 %v10630_v32  ;;  %v10634_v43 = vld [vmem:[%s15157_s0 + $0x348] sm:$0xff]  }
  0x3a   :  { %2553 = vst [vmem:[#allocation1 + $0x2b0] sm:$0xff] %v10398_v37  ;;  %15182 = sst [smem:[#allocation12_spill]] %s11801_s24  ;;  %s11808_s24 = smov 12  ;;  %v10682_v26 = vld [vmem:[%s15157_s0 + $0x1c8] sm:$0xff]  }
  0x3b   :  { %2583 = vst [vmem:[#allocation1 + $0x2a0] sm:$0xff] %v10402_v38  ;;  %15184 = sst [smem:[#allocation14_spill]] %s11808_s24  ;;  %s11815_s24 = smov 48  ;;  %v10343_v32 = vunpack.c.h.bf16 %v10682_v26 }
  0x3c   :  { %v4266_v47 = vld [vmem:[#allocation1 + $0x8f] ss:$16 sm:%s11676_s22]   ;;  %2613 = vst [vmem:[#allocation1 + $0x290] sm:$0xff] %v10406_v41  ;;  %s11748_s22 = smov 3  ;;  %15186 = sst [smem:[#allocation16_spill]] %s11815_s24  ;;  %v10139_v41 = vunpack.c.h.bf16 %v10631_v34 }
  0x3d   :  { %v4269_v48 = vld [vmem:[#allocation1 + $0x8f] ss:$16 sm:%s11678_s23]   ;;  %2643 = vst [vmem:[#allocation1 + $0x280] sm:$0xff] %v10410_v42  ;;  %s11764_s23 = smov 3  ;;  %s11822_s24 = smov 3  ;;  %v10143_v42 = vunpack.c.h.bf16 %v10632_v36  ;;  %v10347_v36 = vunpack.c.h.bf16 %v10683_v30 }
  0x3e   :  { %v4274_v49 = vld [vmem:[#allocation1 + $0x8f] ss:$16 sm:%s11681_s26]   ;;  %v4271_v51 = vsel %vm3846_vm0, %v4269_v48, %v4266_v47  ;;  %3393 = vst [vmem:[#allocation1 + $0xf0] sm:$0xff] %v10510_v45  ;;  %s11756_s26 = smov 48  ;;  %15172 = sst [smem:[#allocation2_spill]] %s11764_s23  ;;  %v10635_v47 = vld [vmem:[%s15157_s0 + $0x340] sm:$0xff]  }
  0x3f   :  { %v4279_v52 = vld [vmem:[#allocation1 + $0x8f] ss:$16 sm:%s11683_s27]   ;;  %v4276_v55 = vsel %vm3850_vm1, %v4274_v49, %v4271_v51  ;;  %3423 = vst [vmem:[#allocation1 + $0xe0] sm:$0xff] %v10514_v46  ;;  %s11780_s27 = smov 3  ;;  %s11799_s23 = smov 12  ;;  %v10147_v46 = vunpack.c.h.bf16 %v10633_v40  ;;  %v10151_v49 = vunpack.c.h.bf16 %v10634_v43 }
  0x40   :  { %v4281_v57 = vsel %vm3854_vm2, %v4279_v52, %v4276_v55  ;;  %3453 = vst [vmem:[#allocation1 + $0xd0] sm:$0xff] %v10518_v50  ;;  %15176 = sst [smem:[#allocation6_spill]] %s11780_s27  ;;  %s11827_s28 = smov 12  ;;  %v10660_v48 = vld [vmem:[%s15157_s0 + $0x278] sm:$0xff]   ;;  %v10661_v50 = vld [vmem:[%s15157_s0 + $0x270] sm:$0xff]  }
  0x41   :  { %v10771_v59 = vpack.i.bf16 %v4304_v53, %v4281_v57  ;;  %3483 = vst [vmem:[#allocation1 + $0xc0] sm:$0xff] %v10522_v54  ;;  %15181 = sst [smem:[#allocation11_spill]] %s11799_s23  ;;  %s11806_s23 = smov 48  ;;  %v10155_v53 = vunpack.c.h.bf16 %v10635_v47  ;;  %v10662_v54 = vld [vmem:[%s15157_s0 + $0x268] sm:$0xff]   ;;  %v10255_v55 = vunpack.c.h.bf16 %v10660_v48  ;;  %v10664_v57 = vld [vmem:[%s15157_s0 + $0x258] sm:$0xff]  }
  0x42   :  { %3513 = vst [vmem:[#allocation1 + $0xb0] sm:$0xff] %v10526_v56  ;;  %15183 = sst [smem:[#allocation13_spill]] %s11806_s23  ;;  %s11813_s23 = smov 192  ;;  %v10663_v56 = vld [vmem:[%s15157_s0 + $0x260] sm:$0xff]   ;;  %v10712_v40 = vld [vmem:[%s15157_s0 + $0xd8] sm:$0xff]  }
  0x43   :  { %10772 = vrot.lane.b32.xlu1 %v10771_v59, %s15159_s21  ;;  %s11778_s21 = smov 192  ;;  %3543 = vst [vmem:[#allocation1 + $0xa0] sm:$0xff] %v10530_v58  ;;  %15185 = sst [smem:[#allocation15_spill]] %s11813_s23  ;;  %v10267_v4 = vunpack.c.h.bf16 %v10663_v56 }
  0x44   :  { %15175 = sst [smem:[#allocation5_spill]] %s11778_s21  ;;  %s11787_s21 = smov 48  ;;  %3573 = vst [vmem:[#allocation1 + $0x90] sm:$0xff] %v10534_v61  ;;  %v10259_v61 = vunpack.c.h.bf16 %v10661_v50 }
  0x45   :  { %15178 = sst [smem:[#allocation8_spill]] %s11787_s21  ;;  %3603 = vst [vmem:[#allocation1 + $0x80] sm:$0xff] %v10538_v63  ;;  %s11820_s23 = smov 192 }
  0x46   :  { %738 = vst [vmem:[#allocation1 + $0x678] sm:$0xff] %v10159_v1  ;;  %15187 = sst [smem:[#allocation17_spill]] %s11820_s23  ;;  %s11829_s23 = smov 48  ;;  %v10263_v1 = vunpack.c.h.bf16 %v10662_v54  ;;  %v10463_v54 = vunpack.c.h.bf16 %v10712_v40 }
  0x47   :  { %768 = vst [vmem:[#allocation1 + $0x668] sm:$0xff] %v10163_v3  ;;  %s11836_s21 = smov 3  ;;  %s11841_s27 = smov 12 }
  0x48   :  { %798 = vst [vmem:[#allocation1 + $0x658] sm:$0xff] %v10167_v5  ;;  %15189 = sst [smem:[#allocation19_spill]] %s11841_s27  ;;  %s11846_s27 = smov 48  ;;  %v10666_v5 = vld [vmem:[%s15157_s0 + $0x248] sm:$0xff]  }
  0x49   :  { %828 = vst [vmem:[#allocation1 + $0x648] sm:$0xff] %v10171_v7  ;;  %15190 = sst [smem:[#allocation20_spill]] %s11846_s27  ;;  %s11853_s27 = smov 3  ;;  %v10271_v7 = vunpack.c.h.bf16 %v10664_v57  ;;  %v10279_v12 = vunpack.c.h.bf16 %v10666_v5 }
  0x4a   :  { %858 = vst [vmem:[#allocation1 + $0x638] sm:$0xff] %v10175_v9  ;;  %15192 = sst [smem:[#allocation22_spill]] %s11853_s27  ;;  %s11860_s27 = smov 48 }
  0x4b   :  { %888 = vst [vmem:[#allocation1 + $0x628] sm:$0xff] %v10179_v11  ;;  %15194 = sst [smem:[#allocation24_spill]] %s11860_s27  ;;  %s11867_s27 = smov 3  ;;  %v10676_v11 = vld [vmem:[%s15157_s0 + $0x1f8] sm:$0xff]  }
  0x4c   :  { %918 = vst [vmem:[#allocation1 + $0x618] sm:$0xff] %v10183_v13  ;;  %15196 = sst [smem:[#allocation26_spill]] %s11867_s27  ;;  %s11874_s27 = smov 48  ;;  %v10677_v13 = vld [vmem:[%s15157_s0 + $0x1f0] sm:$0xff]   ;;  %v10319_v16 = vunpack.c.h.bf16 %v10676_v11 }
  0x4d   :  { %948 = vst [vmem:[#allocation1 + $0x608] sm:$0xff] %v10187_v15  ;;  %15198 = sst [smem:[#allocation28_spill]] %s11874_s27  ;;  %s11881_s27 = smov 3  ;;  %v10678_v15 = vld [vmem:[%s15157_s0 + $0x1e8] sm:$0xff]   ;;  %v10323_v18 = vunpack.c.h.bf16 %v10677_v13  ;;  %v10619_v13 = vld [vmem:[%s15157_s0 + $0x3c0] sm:$0xff]  }
  0x4e   :  { %1698 = vst [vmem:[#allocation1 + $0x478] sm:$0xff] %v10287_v17  ;;  %15200 = sst [smem:[#allocation30_spill]] %s11881_s27  ;;  %s11888_s27 = smov 48  ;;  %v10679_v17 = vld [vmem:[%s15157_s0 + $0x1e0] sm:$0xff]  }
  0x4f   :  { %1728 = vst [vmem:[#allocation1 + $0x468] sm:$0xff] %v10291_v19  ;;  %15202 = sst [smem:[#allocation32_spill]] %s11888_s27  ;;  %s11895_s27 = smov 3  ;;  %v10680_v19 = vld [vmem:[%s15157_s0 + $0x1d8] sm:$0xff]   ;;  %v10331_v24 = vunpack.c.h.bf16 %v10679_v17 }
  0x50   :  { %1758 = vst [vmem:[#allocation1 + $0x458] sm:$0xff] %v10295_v21 }
  0x51   :  { %1788 = vst [vmem:[#allocation1 + $0x448] sm:$0xff] %v10299_v23  ;;  %v10327_v23 = vunpack.c.h.bf16 %v10678_v15 }
  0x52   :  { %1818 = vst [vmem:[#allocation1 + $0x438] sm:$0xff] %v10303_v25  ;;  %v10335_v25 = vunpack.c.h.bf16 %v10680_v19  ;;  %v10091_v19 = vunpack.c.h.bf16 %v10619_v13  ;;  %v12323_v13 = vld [vmem:[%s15157_s0 + $0xb0] sm:$0xff]  }
  0x53   :  { %1848 = vst [vmem:[#allocation1 + $0x428] sm:$0xff] %v10307_v27 }
  0x54   :  { %1878 = vst [vmem:[#allocation1 + $0x418] sm:$0xff] %v10311_v29  ;;  %v4243_v37 = vld [vmem:[#allocation1 + $0x60f] ss:$16 sm:%s11698_s5]   ;;  %s11904_s5 = smov 48  ;;  %v10339_v29 = vunpack.c.h.bf16 %v10681_v20 }
  0x55   :  { %v4246_v38 = vld [vmem:[#allocation1 + $0x60f] ss:$16 sm:%s11702_s6]   ;;  %1908 = vst [vmem:[#allocation1 + $0x408] sm:$0xff] %v10315_v31  ;;  %15204 = sst [smem:[#allocation34_spill]] %s11904_s5  ;;  %s11906_s6 = smov 192 }
  0x56   :  { %15205 = sst [smem:[#allocation35_spill]] %s11906_s6  ;;  %498 = vst [vmem:[#allocation1 + $0x6f8] sm:$0xff] %v10127_v33  ;;  %s11911_s5 = smov 3  ;;  %v4248_v44 = vsel %vm3846_vm0, %v4246_v38, %v4243_v37  ;;  %v4251_v45 = vld [vmem:[#allocation1 + $0x60f] ss:$16 sm:%s11704_s7]   ;;  %v10709_v33 = vld [vmem:[%s15157_s0 + $0xf0] sm:$0xff]  }
  0x57   :  { %15206 = sst [smem:[#allocation36_spill]] %s11911_s5  ;;  %s11913_s6 = smov 12  ;;  %528 = vst [vmem:[#allocation1 + $0x6e8] sm:$0xff] %v10131_v35  ;;  %v4253_v51 = vsel %vm3850_vm1, %v4251_v45, %v4248_v44  ;;  %v4256_v52 = vld [vmem:[#allocation1 + $0x60f] ss:$16 sm:%s11706_s8]   ;;  %v10451_v44 = vunpack.c.h.bf16 %v10709_v33 }
  0x58   :  { %15207 = sst [smem:[#allocation37_spill]] %s11913_s6  ;;  %s11920_s6 = smov 48  ;;  %558 = vst [vmem:[#allocation1 + $0x6d8] sm:$0xff] %v10135_v39  ;;  %v4258_v0 = vsel %vm3854_vm2, %v4256_v52, %v4253_v51  ;;  %v10708_v31 = vld [vmem:[%s15157_s0 + $0xf8] sm:$0xff]   ;;  %v10710_v37 = vld [vmem:[%s15157_s0 + $0xe8] sm:$0xff]   ;;  %v10711_v39 = vld [vmem:[%s15157_s0 + $0xe0] sm:$0xff]  }
  0x59   :  { %15208 = sst [smem:[#allocation38_spill]] %s11920_s6  ;;  %s11922_s7 = smov 3  ;;  %588 = vst [vmem:[#allocation1 + $0x6c8] sm:$0xff] %v10139_v41  ;;  %v10447_v38 = vunpack.c.h.bf16 %v10708_v31  ;;  %v10455_v48 = vunpack.c.h.bf16 %v10710_v37  ;;  %v10459_v51 = vunpack.c.h.bf16 %v10711_v39  ;;  %v10714_v52 = vld [vmem:[%s15157_s0 + $0xc8] sm:$0xff]  }
  0x5a   :  { %15209 = sst [smem:[#allocation39_spill]] %s11922_s7  ;;  %s11927_s5 = smov 192  ;;  %618 = vst [vmem:[#allocation1 + $0x6b8] sm:$0xff] %v10143_v42  ;;  %v10646_v20 = vld [vmem:[%s15157_s0 + $0x2e8] sm:$0xff]  }
  0x5b   :  { %15210 = sst [smem:[#allocation40_spill]] %s11927_s5  ;;  %s11929_s6 = smov 12  ;;  %648 = vst [vmem:[#allocation1 + $0x6a8] sm:$0xff] %v10147_v46  ;;  %v10199_v33 = vunpack.c.h.bf16 %v10646_v20 }
  0x5c   :  { %15211 = sst [smem:[#allocation41_spill]] %s11929_s6  ;;  %s11934_s5 = smov 48  ;;  %v4220_v58 = vld [vmem:[#allocation1 + $0x40f] ss:$16 sm:%s11688_s30]   ;;  %678 = vst [vmem:[#allocation1 + $0x698] sm:$0xff] %v10151_v49  ;;  %v10713_v49 = vld [vmem:[%s15157_s0 + $0xd0] sm:$0xff]  }
  0x5d   :  { %15212 = sst [smem:[#allocation42_spill]] %s11934_s5  ;;  %s11936_s6 = smov 192  ;;  %v4223_v59 = vld [vmem:[#allocation1 + $0x40f] ss:$16 sm:%s11691_s2]   ;;  %708 = vst [vmem:[#allocation1 + $0x688] sm:$0xff] %v10155_v53  ;;  %v10467_v57 = vunpack.c.h.bf16 %v10713_v49 }
  0x5e   :  { %15213 = sst [smem:[#allocation43_spill]] %s11936_s6  ;;  %s11943_s6 = smov 3  ;;  %v4228_v60 = vld [vmem:[#allocation1 + $0x40f] ss:$16 sm:%s11693_s3]   ;;  %v4225_v62 = vsel %vm3846_vm0, %v4223_v59, %v4220_v58  ;;  %1458 = vst [vmem:[#allocation1 + $0x4f8] sm:$0xff] %v10255_v55  ;;  %v10715_v55 = vld [vmem:[%s15157_s0 + $0xc0] sm:$0xff]   ;;  %v10471_v59 = vunpack.c.h.bf16 %v10714_v52 }
  0x5f   :  { %15214 = sst [smem:[#allocation44_spill]] %s11943_s6  ;;  %s11945_s8 = smov 12  ;;  %v4233_v63 = vld [vmem:[#allocation1 + $0x40f] ss:$16 sm:%s11696_s4]   ;;  %v4230_v3 = vsel %vm3850_vm1, %v4228_v60, %v4225_v62  ;;  %1488 = vst [vmem:[#allocation1 + $0x4e8] sm:$0xff] %v10259_v61  ;;  %v10613_v60 = vld [vmem:[%s15157_s0 + $0x3f0] sm:$0xff]   ;;  %v10475_v61 = vunpack.c.h.bf16 %v10715_v55 }
  0x60   :  { %15215 = sst [smem:[#allocation45_spill]] %s11945_s8  ;;  %s11953_s6 = smov 48  ;;  %v4235_v6 = vsel %vm3854_vm2, %v4233_v63, %v4230_v3  ;;  %1518 = vst [vmem:[#allocation1 + $0x4d8] sm:$0xff] %v10263_v1  ;;  %v10612_v58 = vld [vmem:[%s15157_s0 + $0x3f8] sm:$0xff]   ;;  %v10614_v62 = vld [vmem:[%s15157_s0 + $0x3e8] sm:$0xff]   ;;  %v10067_v1 = vunpack.c.h.bf16 %v10613_v60  ;;  %v10617_v3 = vld [vmem:[%s15157_s0 + $0x3d0] sm:$0xff]  }
  0x61   :  { %15216 = sst [smem:[#allocation46_spill]] %s11953_s6  ;;  %s11955_s8 = smov 192  ;;  %v10766_v9 = vpack.i.bf16 %v4258_v0, %v4235_v6  ;;  %1548 = vst [vmem:[#allocation1 + $0x4c8] sm:$0xff] %v10267_v4  ;;  %v10063_v63 = vunpack.c.h.bf16 %v10612_v58  ;;  %v10615_v0 = vld [vmem:[%s15157_s0 + $0x3e0] sm:$0xff]   ;;  %v10071_v6 = vunpack.c.h.bf16 %v10614_v62  ;;  %v4587_v37 = vld [vmem:[#allocation1 + $0x40e] ss:$16 sm:%s11822_s24]  }
  0x62   :  { %15217 = sst [smem:[#allocation47_spill]] %s11955_s8  ;;  %s11966_s3 = smov 3  ;;  %1578 = vst [vmem:[#allocation1 + $0x4b8] sm:$0xff] %v10271_v7  ;;  %v10075_v7 = vunpack.c.h.bf16 %v10615_v0 }
  0x63   :  { %15218 = sst [smem:[#allocation48_spill]] %s11966_s3  ;;  %s11968_s4 = smov 12  ;;  %1608 = vst [vmem:[#allocation1 + $0x4a8] sm:$0xff] %v10275_v10 }
  0x64   :  { %15219 = sst [smem:[#allocation49_spill]] %s11968_s4  ;;  %s11974_s30 = smov 48  ;;  %1638 = vst [vmem:[#allocation1 + $0x498] sm:$0xff] %v10279_v12  ;;  %v4335_v21 = vld [vmem:[#allocation1 + $0x68f] ss:$16 sm:%s11719_s13]   ;;  %v10083_v12 = vunpack.c.h.bf16 %v10617_v3  ;;  %v12290_v3 = vld [vmem:[%s15157_s0 + $0x190] sm:$0xff]  }
  0x65   :  { %15220 = sst [smem:[#allocation50_spill]] %s11974_s30  ;;  %s11976_s2 = smov 192  ;;  %v4338_v22 = vld [vmem:[#allocation1 + $0x68f] ss:$16 sm:%s11722_s14]   ;;  %1668 = vst [vmem:[#allocation1 + $0x488] sm:$0xff] %v10283_v14 }
  0x66   :  { %15221 = sst [smem:[#allocation51_spill]] %s11976_s2  ;;  %s11982_s6 = smov 3  ;;  %1938 = vst [vmem:[#allocation1 + $0x3f8] sm:$0xff] %v10319_v16  ;;  %v4340_v27 = vsel %vm3846_vm0, %v4338_v22, %v4335_v21  ;;  %v4343_v28 = vld [vmem:[#allocation1 + $0x68f] ss:$16 sm:%s11724_s15]   ;;  %v10645_v16 = vld [vmem:[%s15157_s0 + $0x2f0] sm:$0xff]  }
  0x67   :  { %15222 = sst [smem:[#allocation52_spill]] %s11982_s6  ;;  %s11984_s8 = smov 12  ;;  %1968 = vst [vmem:[#allocation1 + $0x3e8] sm:$0xff] %v10323_v18  ;;  %v4345_v34 = vsel %vm3850_vm1, %v4343_v28, %v4340_v27  ;;  %v4348_v35 = vld [vmem:[#allocation1 + $0x68f] ss:$16 sm:%s11734_s16]   ;;  %v10647_v22 = vld [vmem:[%s15157_s0 + $0x2e0] sm:$0xff]   ;;  %v10195_v28 = vunpack.c.h.bf16 %v10645_v16 }
  0x68   :  { %15223 = sst [smem:[#allocation53_spill]] %s11984_s8  ;;  %s11989_s2 = smov 48  ;;  %1998 = vst [vmem:[#allocation1 + $0x3d8] sm:$0xff] %v10327_v23  ;;  %v4350_v47 = vsel %vm3854_vm2, %v4348_v35, %v4345_v34  ;;  %v10644_v14 = vld [vmem:[%s15157_s0 + $0x2f8] sm:$0xff]   ;;  %v10651_v34 = vld [vmem:[%s15157_s0 + $0x2c0] sm:$0xff]  }
  0x69   :  { %15224 = sst [smem:[#allocation54_spill]] %s11989_s2  ;;  %s11991_s8 = smov 192  ;;  %2028 = vst [vmem:[#allocation1 + $0x3c8] sm:$0xff] %v10331_v24  ;;  %v10191_v21 = vunpack.c.h.bf16 %v10644_v14  ;;  %v10648_v23 = vld [vmem:[%s15157_s0 + $0x2d8] sm:$0xff]   ;;  %v10649_v24 = vld [vmem:[%s15157_s0 + $0x2d0] sm:$0xff]   ;;  %v10219_v55 = vunpack.c.h.bf16 %v10651_v34  ;;  %v12332_v14 = vld [vmem:[%s15157_s0 + $0xa8] sm:$0xff]  }
  0x6a   :  { %15225 = sst [smem:[#allocation55_spill]] %s11991_s8  ;;  %s11996_s2 = smov 3  ;;  %2058 = vst [vmem:[#allocation1 + $0x3b8] sm:$0xff] %v10335_v25  ;;  %v10207_v40 = vunpack.c.h.bf16 %v10648_v23  ;;  %v12356_v23 = vld [vmem:[%s15157_s0 + $0x98] sm:$0xff]  }
  0x6b   :  { %15226 = sst [smem:[#allocation56_spill]] %s11996_s2  ;;  %s11998_s8 = smov 12  ;;  %2088 = vst [vmem:[#allocation1 + $0x3a8] sm:$0xff] %v10339_v29  ;;  %v10650_v29 = vld [vmem:[%s15157_s0 + $0x2c8] sm:$0xff]  }
  0x6c   :  { %15227 = sst [smem:[#allocation57_spill]] %s11998_s8  ;;  %s15228_s8 = smov 120   ;;  %v4312_v41 = vld [vmem:[#allocation1 + $0x48f] ss:$16 sm:%s11708_s9]   ;;  %2118 = vst [vmem:[#allocation1 + $0x398] sm:$0xff] %v10343_v32 }
  0x6d   :  { %10767 = vrot.lane.b32.xlu0 %v10766_v9, %s15228_s8  ;;  %s12004_s6 = smov 48  ;;  %s12006_s2 = smov 192  ;;  %v4315_v42 = vld [vmem:[#allocation1 + $0x48f] ss:$16 sm:%s11711_s10]   ;;  %2148 = vst [vmem:[#allocation1 + $0x388] sm:$0xff] %v10347_v36  ;;  %v10203_v36 = vunpack.c.h.bf16 %v10647_v22 }
  0x6e   :  { %15229 = sst [smem:[#allocation58_spill]] %s12004_s6  ;;  %s12011_s6 = smov 3  ;;  %v4320_v43 = vld [vmem:[#allocation1 + $0x48f] ss:$16 sm:%s11713_s11]   ;;  %v4317_v45 = vsel %vm3846_vm0, %v4315_v42, %v4312_v41  ;;  %2898 = vst [vmem:[#allocation1 + $0x1f8] sm:$0xff] %v10447_v38 }
  0x6f   :  { %15230 = sst [smem:[#allocation59_spill]] %s12006_s2  ;;  %s12013_s2 = smov 12  ;;  %v4325_v46 = vld [vmem:[#allocation1 + $0x48f] ss:$16 sm:%s11717_s12]   ;;  %v4322_v50 = vsel %vm3850_vm1, %v4320_v43, %v4317_v45  ;;  %2928 = vst [vmem:[#allocation1 + $0x1e8] sm:$0xff] %v10451_v44  ;;  %v10211_v45 = vunpack.c.h.bf16 %v10649_v24 }
  0x70   :  { %s12021_s4 = smov 48  ;;  %s12023_s30 = smov 192  ;;  %v4327_v53 = vsel %vm3854_vm2, %v4325_v46, %v4322_v50  ;;  %2958 = vst [vmem:[#allocation1 + $0x1d8] sm:$0xff] %v10455_v48  ;;  %v10618_v9 = vld [vmem:[%s15157_s0 + $0x3c8] sm:$0xff]   ;;  %v12238_v46 = vld [vmem:[%s15157_s0 + $0x1b8] sm:$0xff]   ;;  %v10215_v50 = vunpack.c.h.bf16 %v10650_v29 }
  0x71   :  { %s12027_s13 = smov 3  ;;  %s12029_s14 = smov 12  ;;  %v10776_v56 = vpack.i.bf16 %v4350_v47, %v4327_v53  ;;  %2988 = vst [vmem:[#allocation1 + $0x1c8] sm:$0xff] %v10459_v51  ;;  %v10087_v15 = vunpack.c.h.bf16 %v10618_v9  ;;  %v4590_v38 = vld [vmem:[#allocation1 + $0x40e] ss:$16 sm:%s11827_s28]   ;;  %v12246_v51 = vld [vmem:[%s15157_s0 + $0x1b0] sm:$0xff]   ;;  %v10351_v58 = vunpack.c.h.bf16 %v12238_v46  ;;  %v10350_v46 = vunpack.c.l.bf16 %v12238_v46 }
  0x72   :  { %s12031_s3 = smov 48  ;;  %s12036_s7 = smov 192  ;;  %3018 = vst [vmem:[#allocation1 + $0x1b8] sm:$0xff] %v10463_v54  ;;  %v4592_v41 = vsel %vm3846_vm0, %v4590_v38, %v4587_v37  ;;  %v4595_v42 = vld [vmem:[#allocation1 + $0x40e] ss:$16 sm:%s11829_s23]   ;;  %v10355_v62 = vunpack.c.h.bf16 %v12246_v51  ;;  %v10354_v51 = vunpack.c.l.bf16 %v12246_v51 }
  0x73   :  { %s12038_s5 = smov 3  ;;  %s12047_s15 = smov 48  ;;  %10777 = vrot.lane.b32.xlu1 %v10776_v56, %s15228_s8  ;;  %3048 = vst [vmem:[#allocation1 + $0x1a8] sm:$0xff] %v10467_v57  ;;  %v4610_v43 = vld [vmem:[#allocation1 + $0x60e] ss:$16 sm:%s11836_s21]   ;;  %v4597_v47 = vsel %vm3850_vm1, %v4595_v42, %v4592_v41 }
  0x74   :  { %15231 = sst [smem:[#allocation60_spill]] %s12038_s5  ;;  %s12045_s5 = smov 12  ;;  %3078 = vst [vmem:[#allocation1 + $0x198] sm:$0xff] %v10471_v59  ;;  %v4473_v4 = vld [vmem:[#allocation1 + $0x38f] ss:$16 sm:%s11748_s22]   ;;  %v12266_v59 = vld [vmem:[%s15157_s0 + $0x1a0] sm:$0xff]  }
  0x75   :  { %15232 = sst [smem:[#allocation61_spill]] %s12045_s5  ;;  %s12052_s5 = smov 192  ;;  %v4476_v5 = vld [vmem:[#allocation1 + $0x38f] ss:$16 sm:%s11754_s25]   ;;  %3108 = vst [vmem:[#allocation1 + $0x188] sm:$0xff] %v10475_v61 }
  0x76   :  { %15233 = sst [smem:[#allocation62_spill]] %s12047_s15  ;;  %s12059_s15 = smov 12  ;;  %18 = vst [vmem:[#allocation1 + $0x7f8] sm:$0xff] %v10063_v63  ;;  %v4478_v10 = vsel %vm3846_vm0, %v4476_v5, %v4473_v4  ;;  %v4481_v11 = vld [vmem:[#allocation1 + $0x38f] ss:$16 sm:%s11756_s26]   ;;  %v10363_v4 = vunpack.c.h.bf16 %v12266_v59  ;;  %v10362_v59 = vunpack.c.l.bf16 %v12266_v59 }
  0x77   :  { %15234 = sst [smem:[#allocation63_spill]] %s12052_s5  ;;  %s12057_s5 = smov 3  ;;  %48 = vst [vmem:[#allocation1 + $0x7e8] sm:$0xff] %v10067_v1  ;;  %v4483_v17 = vsel %vm3850_vm1, %v4481_v11, %v4478_v10  ;;  %v4486_v18 = vld [vmem:[#allocation1 + $0x38f] ss:$16 sm:%s11762_s29]  }
  0x78   :  { %15235 = sst [smem:[#allocation64_spill]] %s12057_s5  ;;  %s12068_s16 = smov 192  ;;  %78 = vst [vmem:[#allocation1 + $0x7d8] sm:$0xff] %v10071_v6  ;;  %v4488_v32 = vsel %vm3854_vm2, %v4486_v18, %v4483_v17  ;;  %v12255_v56 = vld [vmem:[%s15157_s0 + $0x1a8] sm:$0xff]   ;;  %v12278_v63 = vld [vmem:[%s15157_s0 + $0x198] sm:$0xff]   ;;  %v12343_v17 = vld [vmem:[%s15157_s0 + $0xa0] sm:$0xff]  }
  0x79   :  { %15236 = sst [smem:[#allocation65_spill]] %s12059_s15  ;;  %s12066_s15 = smov 48  ;;  %108 = vst [vmem:[#allocation1 + $0x7c8] sm:$0xff] %v10075_v7  ;;  %v10359_v2 = vunpack.c.h.bf16 %v12255_v56  ;;  %v10367_v6 = vunpack.c.h.bf16 %v12278_v63  ;;  %v12301_v7 = vld [vmem:[%s15157_s0 + $0x188] sm:$0xff]   ;;  %v12311_v9 = vld [vmem:[%s15157_s0 + $0xb8] sm:$0xff]   ;;  %v10358_v56 = vunpack.c.l.bf16 %v12255_v56 }
  0x7a   :  { %15237 = sst [smem:[#allocation66_spill]] %s12066_s15  ;;  %s12076_s15 = smov 3  ;;  %138 = vst [vmem:[#allocation1 + $0x7b8] sm:$0xff] %v10079_v8  ;;  %v12306_v8 = vld [vmem:[%s15157_s0 + $0x180] sm:$0xff]   ;;  %v10375_v16 = vunpack.c.h.bf16 %v12301_v7  ;;  %v12390_v41 = vld [vmem:[%s15157_s0 + $0x88] sm:$0xff]  }
  0x7b   :  { %15238 = sst [smem:[#allocation67_spill]] %s12068_s16  ;;  %s12078_s16 = smov 12  ;;  %168 = vst [vmem:[#allocation1 + $0x7a8] sm:$0xff] %v10083_v12  ;;  %v10371_v12 = vunpack.c.h.bf16 %v12290_v3  ;;  %v10379_v22 = vunpack.c.h.bf16 %v12306_v8 }
  0x7c   :  { %15239 = sst [smem:[#allocation68_spill]] %s12076_s15  ;;  %s12089_s11 = smov 48  ;;  %v4450_v25 = vld [vmem:[#allocation1 + $0x18f] ss:$16 sm:%s11736_s17]   ;;  %198 = vst [vmem:[#allocation1 + $0x798] sm:$0xff] %v10087_v15 }
  0x7d   :  { %15240 = sst [smem:[#allocation69_spill]] %s12078_s16  ;;  %s12091_s12 = smov 192  ;;  %v4453_v26 = vld [vmem:[#allocation1 + $0x18f] ss:$16 sm:%s11740_s18]   ;;  %228 = vst [vmem:[#allocation1 + $0x788] sm:$0xff] %v10091_v19 }
  0x7e   :  { %15241 = sst [smem:[#allocation70_spill]] %s12089_s11  ;;  %s12097_s9 = smov 3  ;;  %v4458_v27 = vld [vmem:[#allocation1 + $0x18f] ss:$16 sm:%s11742_s19]   ;;  %v4455_v30 = vsel %vm3846_vm0, %v4453_v26, %v4450_v25  ;;  %978 = vst [vmem:[#allocation1 + $0x5f8] sm:$0xff] %v10191_v21  ;;  %v10479_v25 = vunpack.c.h.bf16 %v12311_v9  ;;  %v12365_v26 = vld [vmem:[%s15157_s0 + $0x90] sm:$0xff]   ;;  %v10478_v9 = vunpack.c.l.bf16 %v12311_v9 }
  0x7f   :  { %15242 = sst [smem:[#allocation71_spill]] %s12091_s12  ;;  %s12099_s10 = smov 12  ;;  %v4463_v31 = vld [vmem:[#allocation1 + $0x18f] ss:$16 sm:%s11746_s20]   ;;  %v4460_v35 = vsel %vm3850_vm1, %v4458_v27, %v4455_v30  ;;  %1008 = vst [vmem:[#allocation1 + $0x5e8] sm:$0xff] %v10195_v28 }
  0x80   :  { %15243 = sst [smem:[#allocation72_spill]] %s12097_s9  ;;  %s12105_s11 = smov 48  ;;  %v4465_v39 = vsel %vm3854_vm2, %v4463_v31, %v4460_v35  ;;  %1038 = vst [vmem:[#allocation1 + $0x5d8] sm:$0xff] %v10199_v33  ;;  %v10483_v31 = vunpack.c.h.bf16 %v12323_v13 }
  0x81   :  { %15244 = sst [smem:[#allocation73_spill]] %s12099_s10  ;;  %s12107_s12 = smov 192  ;;  %v10791_v44 = vpack.i.bf16 %v4488_v32, %v4465_v39  ;;  %1068 = vst [vmem:[#allocation1 + $0x5c8] sm:$0xff] %v10203_v36  ;;  %v10487_v32 = vunpack.c.h.bf16 %v12332_v14  ;;  %v10486_v14 = vunpack.c.l.bf16 %v12332_v14 }
  0x82   :  { %15245 = sst [smem:[#allocation74_spill]] %s12105_s11  ;;  %s12112_s11 = smov 3  ;;  %1098 = vst [vmem:[#allocation1 + $0x5b8] sm:$0xff] %v10207_v40  ;;  %v10491_v40 = vunpack.c.h.bf16 %v12343_v17  ;;  %v10490_v17 = vunpack.c.l.bf16 %v12343_v17 }
  0x83   :  { %15246 = sst [smem:[#allocation75_spill]] %s12107_s12  ;;  %s12114_s12 = smov 12  ;;  %10792 = vrot.lane.b32.xlu0 %v10791_v44, %s15228_s8  ;;  %1128 = vst [vmem:[#allocation1 + $0x5a8] sm:$0xff] %v10211_v45  ;;  %v12401_v44 = vld [vmem:[%s15157_s0 + $0x80] sm:$0xff]  }
  0x84   :  { %s12119_s9 = smov 48  ;;  %s12121_s10 = smov 192  ;;  %1158 = vst [vmem:[#allocation1 + $0x598] sm:$0xff] %v10215_v50 }
  0x85   :  { %s12127_s15 = smov 3  ;;  %s12129_s16 = smov 12  ;;  %1188 = vst [vmem:[#allocation1 + $0x588] sm:$0xff] %v10219_v55 }
  0x86   :  { %15247 = sst [smem:[#allocation76_spill]] %s12129_s16  ;;  %s12134_s5 = smov 48  ;;  %2178 = vst [vmem:[#allocation1 + $0x378] sm:$0xff] %v10351_v58 }
  0x87   :  { %15248 = sst [smem:[#allocation77_spill]] %s12134_s5  ;;  %s12136_s16 = smov 192  ;;  %2208 = vst [vmem:[#allocation1 + $0x368] sm:$0xff] %v10355_v62  ;;  %v10366_v62 = vunpack.c.l.bf16 %v12278_v63 }
  0x88   :  { %15249 = sst [smem:[#allocation78_spill]] %s12136_s16  ;;  %s12144_s5 = smov 3  ;;  %2238 = vst [vmem:[#allocation1 + $0x358] sm:$0xff] %v10359_v2 }
  0x89   :  { %s12146_s16 = smov 12  ;;  %s12150_s22 = smov 48  ;;  %2268 = vst [vmem:[#allocation1 + $0x348] sm:$0xff] %v10363_v4  ;;  %v10374_v4 = vunpack.c.l.bf16 %v12301_v7  ;;  %v10378_v7 = vunpack.c.l.bf16 %v12306_v8 }
  0x8a   :  { %15250 = sst [smem:[#allocation79_spill]] %s12150_s22  ;;  %s12152_s25 = smov 192  ;;  %2298 = vst [vmem:[#allocation1 + $0x338] sm:$0xff] %v10367_v6 }
  0x8b   :  { %15251 = sst [smem:[#allocation80_spill]] %s12152_s25  ;;  %s12154_s25 = smov 3  ;;  %2328 = vst [vmem:[#allocation1 + $0x328] sm:$0xff] %v10371_v12  ;;  %v10482_v12 = vunpack.c.l.bf16 %v12323_v13 }
  0x8c   :  { %15252 = sst [smem:[#allocation81_spill]] %s12154_s25  ;;  %s12159_s22 = smov 12  ;;  %2358 = vst [vmem:[#allocation1 + $0x318] sm:$0xff] %v10375_v16 }
  0x8d   :  { %s12161_s25 = smov 48  ;;  %s12170_s26 = smov 3  ;;  %2388 = vst [vmem:[#allocation1 + $0x308] sm:$0xff] %v10379_v22 }
  0x8e   :  { %15253 = sst [smem:[#allocation82_spill]] %s12161_s25  ;;  %s12168_s25 = smov 192  ;;  %3138 = vst [vmem:[#allocation1 + $0x178] sm:$0xff] %v10479_v25 }
  0x8f   :  { %15254 = sst [smem:[#allocation83_spill]] %s12168_s25  ;;  %s12175_s25 = smov 12  ;;  %3168 = vst [vmem:[#allocation1 + $0x168] sm:$0xff] %v10483_v31 }
  0x90   :  { %15255 = sst [smem:[#allocation84_spill]] %s12170_s26  ;;  %s12177_s26 = smov 48  ;;  %3198 = vst [vmem:[#allocation1 + $0x158] sm:$0xff] %v10487_v32 }
  0x91   :  { %15256 = sst [smem:[#allocation85_spill]] %s12175_s25  ;;  %s12182_s25 = smov 192  ;;  %3228 = vst [vmem:[#allocation1 + $0x148] sm:$0xff] %v10491_v40  ;;  %v10622_v40 = vld [vmem:[%s15157_s0 + $0x3a8] sm:$0xff]  }
  0x92   :  { %15257 = sst [smem:[#allocation86_spill]] %s12177_s26  ;;  %s12184_s26 = smov 3  ;;  %2193 = vst [vmem:[#allocation1 + $0x370] sm:$0xff] %v10350_v46 }
  0x93   :  { %15258 = sst [smem:[#allocation87_spill]] %s12182_s25  ;;  %s12191_s25 = smov 12  ;;  %2223 = vst [vmem:[#allocation1 + $0x360] sm:$0xff] %v10354_v51  ;;  %v4866_v51 = vld [vmem:[#allocation1 + $0x58e] ss:$16 sm:%s12013_s2]  }
  0x94   :  { %15259 = sst [smem:[#allocation88_spill]] %s12184_s26  ;;  %s12193_s29 = smov 48  ;;  %v4748_v63 = vld [vmem:[#allocation1 + $0x30e] ss:$16 sm:%s11895_s27]   ;;  %2253 = vst [vmem:[#allocation1 + $0x350] sm:$0xff] %v10358_v56 }
  0x95   :  { %15260 = sst [smem:[#allocation89_spill]] %s12191_s25  ;;  %s12204_s25 = smov 192  ;;  %2283 = vst [vmem:[#allocation1 + $0x340] sm:$0xff] %v10362_v59  ;;  %v4871_v59 = vld [vmem:[#allocation1 + $0x58e] ss:$16 sm:%s12021_s4]  }
  0x96   :  { %15261 = sst [smem:[#allocation90_spill]] %s12193_s29  ;;  %s12206_s29 = smov 3  ;;  %2313 = vst [vmem:[#allocation1 + $0x330] sm:$0xff] %v10366_v62 }
  0x97   :  { %15262 = sst [smem:[#allocation91_spill]] %s12204_s25  ;;  %s12220_s17 = smov 12  ;;  %2373 = vst [vmem:[#allocation1 + $0x310] sm:$0xff] %v10374_v4 }
  0x98   :  { %s12222_s18 = smov 48  ;;  %s15263_s19 = sld [smem:[#allocation18_spill]]  ;;  %2403 = vst [vmem:[#allocation1 + $0x300] sm:$0xff] %v10378_v7 }
  0x99   :  { %s15264_s24 = sld [smem:[#allocation19_spill]]  ;;  %s12227_s28 = smov 192  ;;  %3153 = vst [vmem:[#allocation1 + $0x170] sm:$0xff] %v10478_v9 }
  0x9a   :  { %s15265_s20 = sld [smem:[#allocation20_spill]]  ;;  %s12233_s23 = smov 3  ;;  %3183 = vst [vmem:[#allocation1 + $0x160] sm:$0xff] %v10482_v12 }
  0x9b   :  { %s15266_s25 = sld [smem:[#allocation21_spill]]  ;;  %s12258_s21 = smov 12  ;;  %3213 = vst [vmem:[#allocation1 + $0x150] sm:$0xff] %v10486_v14  ;;  %v10659_v14 = vld [vmem:[%s15157_s0 + $0x280] sm:$0xff]  }
  0x9c   :  { %15267 = sst [smem:[#allocation18_spill]] %s12233_s23  ;;  %3243 = vst [vmem:[#allocation1 + $0x140] sm:$0xff] %v10490_v17  ;;  %s12591_s4 = smov 192  ;;  %v5003_v17 = vld [vmem:[#allocation1 + $0x8d] ss:$16 sm:%s12114_s12]  }
  0x9d   :  { %15269 = sst [smem:[#allocation19_spill]] %s12258_s21  ;;  %s12623_s2 = smov 48 }
  0x9e   :  { %v4600_v48 = vld [vmem:[#allocation1 + $0x40e] ss:$16 sm:%s15263_s19]   ;;  %s15270_s26 = sld [smem:[#allocation7_spill]]  ;;  %s12260_s19 = smov 48 }
  0x9f   :  { %v4613_v49 = vld [vmem:[#allocation1 + $0x60e] ss:$16 sm:%s15264_s24]   ;;  %15271 = sst [smem:[#allocation20_spill]] %s12260_s19  ;;  %v4602_v60 = vsel %vm3854_vm2, %v4600_v48, %v4597_v47  ;;  %s12272_s24 = smov 3  ;;  %v10499_v47 = vunpack.c.h.bf16 %v12365_v26  ;;  %v10498_v26 = vunpack.c.l.bf16 %v12365_v26 }
  0xa0   :  { %v4615_v52 = vsel %vm3846_vm0, %v4613_v49, %v4610_v43  ;;  %v4618_v53 = vld [vmem:[#allocation1 + $0x60e] ss:$16 sm:%s15265_s20]   ;;  %s15268_s20 = sld [smem:[#allocation6_spill]]  ;;  %s12325_s19 = smov 192  ;;  %v10495_v43 = vunpack.c.h.bf16 %v12356_v23  ;;  %v10494_v23 = vunpack.c.l.bf16 %v12356_v23 }
  0xa1   :  { %v4623_v54 = vld [vmem:[#allocation1 + $0x60e] ss:$16 sm:%s15266_s25]   ;;  %v4620_v57 = vsel %vm3850_vm1, %v4618_v53, %v4615_v52  ;;  %s12270_s25 = smov 192  ;;  %15273 = sst [smem:[#allocation6_spill]] %s12272_s24  ;;  %v10503_v53 = vunpack.c.h.bf16 %v12390_v41  ;;  %3288 = vst [vmem:[#allocation1 + $0x128] sm:$0xff] %v10499_v47  ;;  %v10625_v47 = vld [vmem:[%s15157_s0 + $0x390] sm:$0xff]  }
  0xa2   :  { %v4625_v61 = vsel %vm3854_vm2, %v4623_v54, %v4620_v57  ;;  %15272 = sst [smem:[#allocation21_spill]] %s12270_s25  ;;  %s12280_s25 = smov 12  ;;  %v10507_v54 = vunpack.c.h.bf16 %v12401_v44  ;;  %3258 = vst [vmem:[#allocation1 + $0x138] sm:$0xff] %v10495_v43  ;;  %v10115_v46 = vunpack.c.h.bf16 %v10625_v47 }
  0xa3   :  { %15274 = sst [smem:[#allocation7_spill]] %s12280_s25  ;;  %s12282_s24 = smov 48  ;;  %v10806_v5 = vpack.i.bf16 %v4625_v61, %v4602_v60  ;;  %3318 = vst [vmem:[#allocation1 + $0x118] sm:$0xff] %v10503_v53  ;;  %v10652_v53 = vld [vmem:[%s15157_s0 + $0x2b8] sm:$0xff]  }
  0xa4   :  { %15275 = sst [smem:[#allocation92_spill]] %s12282_s24  ;;  %v4522_v1 = vld [vmem:[#allocation1 + $0x78f] ss:$16 sm:%s15270_s26]   ;;  %s12293_s24 = smov 192  ;;  %3348 = vst [vmem:[#allocation1 + $0x108] sm:$0xff] %v10507_v54  ;;  %v10653_v54 = vld [vmem:[%s15157_s0 + $0x2b0] sm:$0xff]  }
  0xa5   :  { %s12295_s26 = smov 3  ;;  %s12313_s25 = smov 12  ;;  %3273 = vst [vmem:[#allocation1 + $0x130] sm:$0xff] %v10494_v23  ;;  %v10227_v7 = vunpack.c.h.bf16 %v10653_v54 }
  0xa6   :  { %v4519_v0 = vld [vmem:[#allocation1 + $0x78f] ss:$16 sm:%s15268_s20]   ;;  %s15276_s20 = sld [smem:[#allocation8_spill]]  ;;  %3303 = vst [vmem:[#allocation1 + $0x120] sm:$0xff] %v10498_v26 }
  0xa7   :  { %15277 = sst [smem:[#allocation8_spill]] %s12293_s24  ;;  %v4524_v10 = vsel %vm3846_vm0, %v4522_v1, %v4519_v0  ;;  %v4751_v0 = vld [vmem:[#allocation1 + $0x30e] ss:$16 sm:%s11897_s1]   ;;  %s12448_s1 = smov 192  ;;  %v10370_v1 = vunpack.c.l.bf16 %v12290_v3  ;;  %408 = vst [vmem:[#allocation1 + $0x728] sm:$0xff] %v10115_v46 }
  0xa8   :  { %15278 = sst [smem:[#allocation93_spill]] %s12295_s26  ;;  %s12315_s26 = smov 48  ;;  %1248 = vst [vmem:[#allocation1 + $0x568] sm:$0xff] %v10227_v7 }
  0xa9   :  { %s15279_s24 = sld [smem:[#allocation22_spill]]  ;;  %2343 = vst [vmem:[#allocation1 + $0x320] sm:$0xff] %v10370_v1  ;;  %v4889_v1 = vld [vmem:[#allocation1 + $0x78e] ss:$16 sm:%s12029_s14]   ;;  %s12618_s14 = smov 12 }
  0xaa   :  { %15280 = sst [smem:[#allocation22_spill]] %s12313_s25 }
  0xab   :  { %15281 = sst [smem:[#allocation94_spill]] %s12315_s26 }
  0xac   :  { %v4527_v11 = vld [vmem:[#allocation1 + $0x78f] ss:$16 sm:%s15276_s20]   ;;  %s15282_s20 = sld [smem:[#allocation23_spill]] }
  0xad   :  { %s15283_s26 = sld [smem:[#allocation26_spill]]  ;;  %v4529_v20 = vsel %vm3850_vm1, %v4527_v11, %v4524_v10 }
  0xae   :  { %15284 = sst [smem:[#allocation23_spill]] %s12325_s19  ;;  %s12327_s19 = smov 3 }
  0xaf   :  { %s15285_s25 = sld [smem:[#allocation9_spill]]  ;;  %v4633_v15 = vld [vmem:[#allocation1 + $0x8e] ss:$16 sm:%s15279_s24]   ;;  %s12335_s24 = smov 12 }
  0xb0   :  { %15286 = sst [smem:[#allocation26_spill]] %s12327_s19  ;;  %s12337_s19 = smov 48 }
  0xb1   :  { %s15287_s21 = sld [smem:[#allocation27_spill]] }
  0xb2   :  { %15288 = sst [smem:[#allocation9_spill]] %s12335_s24  ;;  %v4636_v18 = vld [vmem:[#allocation1 + $0x8e] ss:$16 sm:%s15282_s20]  }
  0xb3   :  { %15289 = sst [smem:[#allocation27_spill]] %s12337_s19  ;;  %s15162_s19 = smov 112   ;;  %v4656_v19 = vld [vmem:[#allocation1 + $0x28e] ss:$16 sm:%s15283_s26]   ;;  %v4638_v36 = vsel %vm3846_vm0, %v4636_v18, %v4633_v15 }
  0xb4   :  { %s15290_s24 = sld [smem:[#allocation24_spill]]  ;;  %10807 = vrot.lane.b32.xlu0 %v10806_v5, %s15162_s19  ;;  %s12348_s19 = smov 192  ;;  %v4753_v5 = vsel %vm3846_vm0, %v4751_v0, %v4748_v63  ;;  %v4886_v0 = vld [vmem:[#allocation1 + $0x78e] ss:$16 sm:%s12027_s13]  }
  0xb5   :  { %s15291_s20 = sld [smem:[#allocation2_spill]]  ;;  %v4532_v21 = vld [vmem:[#allocation1 + $0x78f] ss:$16 sm:%s15285_s25]   ;;  %s12370_s25 = smov 48  ;;  %v4891_v4 = vsel %vm3846_vm0, %v4889_v1, %v4886_v0 }
  0xb6   :  { %s15292_s26 = sld [smem:[#allocation3_spill]]  ;;  %v4534_v35 = vsel %vm3854_vm2, %v4532_v21, %v4529_v20  ;;  %s12616_s13 = smov 3 }
  0xb7   :  { %15293 = sst [smem:[#allocation24_spill]] %s12348_s19  ;;  %v4659_v24 = vld [vmem:[#allocation1 + $0x28e] ss:$16 sm:%s15287_s21]   ;;  %s12359_s21 = smov 3 }
  0xb8   :  { %s15294_s19 = sld [smem:[#allocation4_spill]]  ;;  %v4661_v37 = vsel %vm3846_vm0, %v4659_v24, %v4656_v19 }
  0xb9   :  { %s15295_s23 = sld [smem:[#allocation5_spill]] }
  0xba   :  { %15296 = sst [smem:[#allocation2_spill]] %s12359_s21  ;;  %v4641_v27 = vld [vmem:[#allocation1 + $0x8e] ss:$16 sm:%s15290_s24]   ;;  %s12368_s24 = smov 12 }
  0xbb   :  { %s15297_s21 = sld [smem:[#allocation28_spill]]  ;;  %v4496_v28 = vld [vmem:[#allocation1 + $0x58f] ss:$16 sm:%s15291_s20]   ;;  %v4643_v48 = vsel %vm3850_vm1, %v4641_v27, %v4638_v36 }
  0xbc   :  { %15298 = sst [smem:[#allocation3_spill]] %s12368_s24  ;;  %v4499_v29 = vld [vmem:[#allocation1 + $0x58f] ss:$16 sm:%s15292_s26]   ;;  %s12392_s26 = smov 3 }
  0xbd   :  { %15299 = sst [smem:[#allocation4_spill]] %s12370_s25  ;;  %v4501_v33 = vsel %vm3846_vm0, %v4499_v29, %v4496_v28  ;;  %s12403_s25 = smov 48 }
  0xbe   :  { %v4504_v30 = vld [vmem:[#allocation1 + $0x58f] ss:$16 sm:%s15294_s19]   ;;  %s12383_s19 = smov 192  ;;  %s15301_s20 = sld [smem:[#allocation25_spill]] }
  0xbf   :  { %v4509_v34 = vld [vmem:[#allocation1 + $0x58f] ss:$16 sm:%s15295_s23]   ;;  %15300 = sst [smem:[#allocation5_spill]] %s12383_s19  ;;  %v4506_v39 = vsel %vm3850_vm1, %v4504_v30, %v4501_v33  ;;  %s12394_s23 = smov 12 }
  0xc0   :  { %15303 = sst [smem:[#allocation28_spill]] %s12394_s23  ;;  %v4511_v42 = vsel %vm3854_vm2, %v4509_v34, %v4506_v39  ;;  %s12405_s19 = smov 192  ;;  %v10620_v34 = vld [vmem:[%s15157_s0 + $0x3b8] sm:$0xff]  }
  0xc1   :  { %v4664_v38 = vld [vmem:[#allocation1 + $0x28e] ss:$16 sm:%s15297_s21]   ;;  %s15302_s21 = sld [smem:[#allocation29_spill]]  ;;  %v10796_v45 = vpack.i.bf16 %v4534_v35, %v4511_v42  ;;  %v10502_v35 = vunpack.c.l.bf16 %v12390_v41  ;;  %v10095_v41 = vunpack.c.h.bf16 %v10620_v34  ;;  %v10623_v42 = vld [vmem:[%s15157_s0 + $0x3a0] sm:$0xff]   ;;  %v5013_v34 = vld [vmem:[#allocation1 + $0x8d] ss:$16 sm:%s12121_s10]  }
  0xc2   :  { %15304 = sst [smem:[#allocation25_spill]] %s12403_s25  ;;  %v4666_v50 = vsel %vm3850_vm1, %v4664_v38, %v4661_v37  ;;  %s12467_s25 = smov 12  ;;  %v10621_v37 = vld [vmem:[%s15157_s0 + $0x3b0] sm:$0xff]   ;;  %v10506_v38 = vunpack.c.l.bf16 %v12401_v44  ;;  %v10624_v44 = vld [vmem:[%s15157_s0 + $0x398] sm:$0xff]  }
  0xc3   :  { %15305 = sst [smem:[#allocation29_spill]] %s12405_s19  ;;  %10797 = vrot.lane.b32.xlu1 %v10796_v45, %s15228_s8  ;;  %s12465_s19 = smov 3  ;;  %v10099_v43 = vunpack.c.h.bf16 %v10621_v37  ;;  %3333 = vst [vmem:[#allocation1 + $0x110] sm:$0xff] %v10502_v35  ;;  %v10103_v45 = vunpack.c.h.bf16 %v10622_v40  ;;  %v5023_v37 = vld [vmem:[#allocation1 + $0x28d] ss:$16 sm:%s12127_s15]  }
  0xc4   :  { %v4646_v49 = vld [vmem:[#allocation1 + $0x8e] ss:$16 sm:%s15301_s20]   ;;  %s12413_s20 = smov 3  ;;  %s15308_s24 = sld [smem:[#allocation12_spill]]  ;;  %3363 = vst [vmem:[#allocation1 + $0x100] sm:$0xff] %v10506_v38 }
  0xc5   :  { %15306 = sst [smem:[#allocation95_spill]] %s12413_s20  ;;  %s12419_s20 = smov 48  ;;  %v4648_v55 = vsel %vm3854_vm2, %v4646_v49, %v4643_v48  ;;  %v10107_v48 = vunpack.c.h.bf16 %v10623_v42  ;;  %v10626_v49 = vld [vmem:[%s15157_s0 + $0x388] sm:$0xff]   ;;  %258 = vst [vmem:[#allocation1 + $0x778] sm:$0xff] %v10095_v41 }
  0xc6   :  { %15310 = sst [smem:[#allocation12_spill]] %s12419_s20  ;;  %s12421_s20 = smov 192  ;;  %288 = vst [vmem:[#allocation1 + $0x768] sm:$0xff] %v10099_v43  ;;  %v10119_v56 = vunpack.c.h.bf16 %v10626_v49 }
  0xc7   :  { %v4669_v52 = vld [vmem:[#allocation1 + $0x28e] ss:$16 sm:%s15302_s21]   ;;  %s12415_s21 = smov 12  ;;  %s15320_s27 = sld [smem:[#allocation34_spill]]  ;;  %318 = vst [vmem:[#allocation1 + $0x758] sm:$0xff] %v10103_v45 }
  0xc8   :  { %15307 = sst [smem:[#allocation96_spill]] %s12415_s21  ;;  %v4671_v57 = vsel %vm3854_vm2, %v4669_v52, %v4666_v50  ;;  %v10111_v50 = vunpack.c.h.bf16 %v10624_v44  ;;  %v10627_v52 = vld [vmem:[%s15157_s0 + $0x380] sm:$0xff]   ;;  %348 = vst [vmem:[#allocation1 + $0x748] sm:$0xff] %v10107_v48 }
  0xc9   :  { %s15309_s21 = sld [smem:[#allocation14_spill]]  ;;  %v10811_v61 = vpack.i.bf16 %v4671_v57, %v4648_v55  ;;  %v10654_v55 = vld [vmem:[%s15157_s0 + $0x2a8] sm:$0xff]   ;;  %v10123_v62 = vunpack.c.h.bf16 %v10627_v52  ;;  %438 = vst [vmem:[#allocation1 + $0x718] sm:$0xff] %v10119_v56 }
  0xca   :  { %15311 = sst [smem:[#allocation14_spill]] %s12421_s20  ;;  %s12426_s20 = smov 3  ;;  %v4381_v58 = vld [vmem:[#allocation1 + $0x30f] ss:$16 sm:%s15308_s24]   ;;  %v4863_v57 = vld [vmem:[#allocation1 + $0x58e] ss:$16 sm:%s12011_s6]   ;;  %v10231_v9 = vunpack.c.h.bf16 %v10654_v55 }
  0xcb   :  { %15312 = sst [smem:[#allocation97_spill]] %s12426_s20  ;;  %s12428_s20 = smov 12  ;;  %378 = vst [vmem:[#allocation1 + $0x738] sm:$0xff] %v10111_v50 }
  0xcc   :  { %15313 = sst [smem:[#allocation98_spill]] %s12428_s20  ;;  %s12431_s20 = smov 48  ;;  %468 = vst [vmem:[#allocation1 + $0x708] sm:$0xff] %v10123_v62 }
  0xcd   :  { %15314 = sst [smem:[#allocation99_spill]] %s12431_s20  ;;  %s12433_s20 = smov 192  ;;  %v4756_v6 = vld [vmem:[#allocation1 + $0x30e] ss:$16 sm:%s15320_s27]   ;;  %1278 = vst [vmem:[#allocation1 + $0x558] sm:$0xff] %v10231_v9 }
  0xce   :  { %15315 = sst [smem:[#allocation100_spill]] %s12433_s20  ;;  %s12438_s24 = smov 3  ;;  %v4758_v18 = vsel %vm3850_vm1, %v4756_v6, %v4753_v5  ;;  %v4894_v5 = vld [vmem:[#allocation1 + $0x78e] ss:$16 sm:%s12031_s3]  }
  0xcf   :  { %s15316_s20 = sld [smem:[#allocation16_spill]]  ;;  %v4384_v60 = vld [vmem:[#allocation1 + $0x30f] ss:$16 sm:%s15309_s21]   ;;  %s12441_s21 = smov 12  ;;  %v4899_v6 = vld [vmem:[#allocation1 + $0x78e] ss:$16 sm:%s12036_s7]  }
  0xd0   :  { %15317 = sst [smem:[#allocation16_spill]] %s12438_s24  ;;  %v4386_v2 = vsel %vm3846_vm0, %v4384_v60, %v4381_v58  ;;  %s12583_s6 = smov 48  ;;  %v10655_v58 = vld [vmem:[%s15157_s0 + $0x2a0] sm:$0xff]   ;;  %v4868_v60 = vsel %vm3846_vm0, %v4866_v51, %v4863_v57 }
  0xd1   :  { %15318 = sst [smem:[#allocation101_spill]] %s12441_s21  ;;  %s12443_s21 = smov 48  ;;  %v4873_v63 = vsel %vm3850_vm1, %v4871_v59, %v4868_v60 }
  0xd2   :  { %15319 = sst [smem:[#allocation102_spill]] %s12443_s21  ;;  %s15328_s21 = smov 112  }
  0xd3   :  { %15321 = sst [smem:[#allocation34_spill]] %s12448_s1  ;;  %s12453_s1 = smov 3  ;;  %10812 = vrot.lane.b32.xlu1 %v10811_v61, %s15328_s21  ;;  %v4876_v61 = vld [vmem:[#allocation1 + $0x58e] ss:$16 sm:%s12023_s30]  }
  0xd4   :  { %s15329_s24 = sld [smem:[#allocation10_spill]]  ;;  %s12596_s30 = smov 3 }
  0xd5   :  { %v4389_v3 = vld [vmem:[#allocation1 + $0x30f] ss:$16 sm:%s15316_s20]   ;;  %s15322_s20 = sld [smem:[#allocation17_spill]]  ;;  %s12602_s3 = smov 12 }
  0xd6   :  { %15323 = sst [smem:[#allocation17_spill]] %s12453_s1  ;;  %s12455_s1 = smov 12  ;;  %v4391_v8 = vsel %vm3850_vm1, %v4389_v3, %v4386_v2  ;;  %v10223_v2 = vunpack.c.h.bf16 %v10652_v53  ;;  %v4878_v3 = vsel %vm3854_vm2, %v4876_v61, %v4873_v63 }
  0xd7   :  { %15324 = sst [smem:[#allocation103_spill]] %s12455_s1  ;;  %s12457_s1 = smov 48 }
  0xd8   :  { %15325 = sst [smem:[#allocation104_spill]] %s12457_s1  ;;  %s12459_s1 = smov 192  ;;  %1218 = vst [vmem:[#allocation1 + $0x578] sm:$0xff] %v10223_v2 }
  0xd9   :  { %15326 = sst [smem:[#allocation105_spill]] %s12459_s1  ;;  %s12608_s7 = smov 48 }
  0xda   :  { %s15327_s1 = sld [smem:[#allocation35_spill]]  ;;  %v4358_v13 = vld [vmem:[#allocation1 + $0x10f] ss:$16 sm:%s15329_s24]   ;;  %s12505_s24 = smov 3 }
  0xdb   :  { %s15330_s27 = sld [smem:[#allocation11_spill]]  ;;  %v4394_v10 = vld [vmem:[#allocation1 + $0x30f] ss:$16 sm:%s15322_s20]  }
  0xdc   :  { %15331 = sst [smem:[#allocation35_spill]] %s12465_s19  ;;  %v4396_v21 = vsel %vm3854_vm2, %v4394_v10, %v4391_v8  ;;  %v10656_v8 = vld [vmem:[%s15157_s0 + $0x298] sm:$0xff]   ;;  %v4896_v10 = vsel %vm3850_vm1, %v4894_v5, %v4891_v4 }
  0xdd   :  { %s15332_s19 = sld [smem:[#allocation13_spill]]  ;;  %v4901_v12 = vsel %vm3854_vm2, %v4899_v6, %v4896_v10 }
  0xde   :  { %15333 = sst [smem:[#allocation10_spill]] %s12467_s25  ;;  %s12472_s25 = smov 48 }
  0xdf   :  { %s15334_s20 = sld [smem:[#allocation15_spill]] }
  0xe0   :  { %15335 = sst [smem:[#allocation11_spill]] %s12472_s25  ;;  %s12474_s25 = smov 192  ;;  %v4761_v11 = vld [vmem:[#allocation1 + $0x30e] ss:$16 sm:%s15327_s1]  }
  0xe1   :  { %15336 = sst [smem:[#allocation13_spill]] %s12474_s25  ;;  %s12478_s1 = smov 3  ;;  %v4361_v15 = vld [vmem:[#allocation1 + $0x10f] ss:$16 sm:%s15330_s27]   ;;  %v4763_v31 = vsel %vm3854_vm2, %v4761_v11, %v4758_v18  ;;  %v10657_v11 = vld [vmem:[%s15157_s0 + $0x290] sm:$0xff]   ;;  %v10239_v18 = vunpack.c.h.bf16 %v10656_v8 }
  0xe2   :  { %s15337_s25 = sld [smem:[#allocation30_spill]]  ;;  %v4363_v19 = vsel %vm3846_vm0, %v4361_v15, %v4358_v13  ;;  %s12507_s27 = smov 12  ;;  %v10235_v13 = vunpack.c.h.bf16 %v10655_v58  ;;  %v10658_v15 = vld [vmem:[%s15157_s0 + $0x288] sm:$0xff]  }
  0xe3   :  { %15338 = sst [smem:[#allocation15_spill]] %s12478_s1  ;;  %s12480_s1 = smov 12  ;;  %v4366_v16 = vld [vmem:[#allocation1 + $0x10f] ss:$16 sm:%s15332_s19]   ;;  %1338 = vst [vmem:[#allocation1 + $0x538] sm:$0xff] %v10239_v18 }
  0xe4   :  { %15339 = sst [smem:[#allocation30_spill]] %s12480_s1  ;;  %v4368_v24 = vsel %vm3850_vm1, %v4366_v16, %v4363_v19  ;;  %v10836_v16 = vpack.i.bf16 %v4901_v12, %v4878_v3  ;;  %v10243_v19 = vunpack.c.h.bf16 %v10657_v11  ;;  %s12635_s0 = smov 48  ;;  %1308 = vst [vmem:[#allocation1 + $0x548] sm:$0xff] %v10235_v13 }
  0xe5   :  { %s15340_s1 = sld [smem:[#allocation31_spill]]  ;;  %v4371_v20 = vld [vmem:[#allocation1 + $0x10f] ss:$16 sm:%s15334_s20]   ;;  %s12516_s20 = smov 192 }
  0xe6   :  { %s15341_s23 = sld [smem:[#allocation32_spill]]  ;;  %v4373_v28 = vsel %vm3854_vm2, %v4371_v20, %v4368_v24  ;;  %v10247_v20 = vunpack.c.h.bf16 %v10658_v15  ;;  %1368 = vst [vmem:[#allocation1 + $0x528] sm:$0xff] %v10243_v19 }
  0xe7   :  { %s15342_s19 = sld [smem:[#allocation33_spill]]  ;;  %v10781_v32 = vpack.i.bf16 %v4396_v21, %v4373_v28  ;;  %v10251_v21 = vunpack.c.h.bf16 %v10659_v14 }
  0xe8   :  { %v4725_v22 = vld [vmem:[#allocation1 + $0x10e] ss:$16 sm:%s15337_s25]   ;;  %s12492_s25 = smov 48  ;;  %15343 = sst [smem:[#allocation31_spill]] %s12516_s20  ;;  %1398 = vst [vmem:[#allocation1 + $0x518] sm:$0xff] %v10247_v20 }
  0xe9   :  { %s12523_s20 = smov 3  ;;  %10782 = vrot.lane.b32.xlu2 %v10781_v32, %s15228_s8  ;;  %15358 = sst [smem:[#allocation118_spill]] %s12583_s6  ;;  %1428 = vst [vmem:[#allocation1 + $0x508] sm:$0xff] %v10251_v21 }
  0xea   :  { %15344 = sst [smem:[#allocation32_spill]] %s12523_s20  ;;  %s12532_s20 = smov 48 }
  0xeb   :  { %v4728_v25 = vld [vmem:[#allocation1 + $0x10e] ss:$16 sm:%s15340_s1]   ;;  %s12525_s1 = smov 12  ;;  %15346 = sst [smem:[#allocation106_spill]] %s12532_s20 }
  0xec   :  { %v4733_v27 = vld [vmem:[#allocation1 + $0x10e] ss:$16 sm:%s15341_s23]   ;;  %s12498_s23 = smov 192  ;;  %v4730_v29 = vsel %vm3846_vm0, %v4728_v25, %v4725_v22  ;;  %15345 = sst [smem:[#allocation33_spill]] %s12525_s1  ;;  %v5000_v22 = vld [vmem:[#allocation1 + $0x8d] ss:$16 sm:%s12112_s11]  }
  0xed   :  { %v4738_v30 = vld [vmem:[#allocation1 + $0x10e] ss:$16 sm:%s15342_s19]   ;;  %v4735_v33 = vsel %vm3850_vm1, %v4733_v27, %v4730_v29  ;;  %s12514_s19 = smov 48  ;;  %s12534_s1 = smov 192  ;;  %v5005_v27 = vsel %vm3846_vm0, %v5003_v17, %v5000_v22 }
  0xee   :  { %v4740_v36 = vsel %vm3854_vm2, %v4738_v30, %v4735_v33  ;;  %15347 = sst [smem:[#allocation107_spill]] %s12534_s1  ;;  %s12539_s20 = smov 3  ;;  %v5008_v33 = vld [vmem:[#allocation1 + $0x8d] ss:$16 sm:%s12119_s9]  }
  0xef   :  { %v10821_v39 = vpack.i.bf16 %v4763_v31, %v4740_v36  ;;  %15348 = sst [smem:[#allocation108_spill]] %s12539_s20  ;;  %s12541_s1 = smov 12  ;;  %v5010_v36 = vsel %vm3850_vm1, %v5008_v33, %v5005_v27  ;;  %v5072_v33 = vld [vmem:[#allocation1 + $0x68d] ss:$16 sm:%s12159_s22]  }
  0xf0   :  { %15349 = sst [smem:[#allocation109_spill]] %s12541_s1  ;;  %s12547_s20 = smov 48  ;;  %v5015_v42 = vsel %vm3854_vm2, %v5013_v34, %v5010_v36  ;;  %v5138_v34 = vld [vmem:[#allocation1 + $0x50d] ss:$16 sm:%s12206_s29]  }
  0xf1   :  { %10822 = vrot.lane.b32.xlu0 %v10821_v39, %s15328_s21  ;;  %15350 = sst [smem:[#allocation110_spill]] %s12547_s20  ;;  %s12549_s1 = smov 192 }
  0xf2   :  { %15351 = sst [smem:[#allocation111_spill]] %s12549_s1  ;;  %s12554_s20 = smov 3 }
  0xf3   :  { %15352 = sst [smem:[#allocation112_spill]] %s12554_s20  ;;  %s12556_s1 = smov 12 }
  0xf4   :  { %15353 = sst [smem:[#allocation113_spill]] %s12556_s1  ;;  %s12561_s20 = smov 48 }
  0xf5   :  { %15354 = sst [smem:[#allocation114_spill]] %s12561_s20  ;;  %s12563_s1 = smov 192 }
  0xf6   :  { %15355 = sst [smem:[#allocation115_spill]] %s12563_s1  ;;  %s12574_s20 = smov 3 }
  0xf7   :  { %15356 = sst [smem:[#allocation116_spill]] %s12574_s20  ;;  %s12576_s1 = smov 12 }
  0xf8   :  { %15357 = sst [smem:[#allocation117_spill]] %s12576_s1  ;;  %s12610_s1 = smov 192 }
  0xf9   :  { %15359 = sst [smem:[#allocation119_spill]] %s12591_s4  ;;  %s12625_s20 = smov 192  ;;  %10837 = vrot.lane.b32.xlu0 %v10836_v16, %s15328_s21 }
  0xfa   :  { %15360 = sst [smem:[#allocation120_spill]] %s12610_s1  ;;  %s12630_s6 = smov 3 }
  0xfb   :  { %15361 = sst [smem:[#allocation121_spill]] %s12616_s13  ;;  %s12632_s4 = smov 12 }
  0xfc   :  { %15362 = sst [smem:[#allocation122_spill]] %s12618_s14  ;;  %s12649_s14 = smov 12 }
  0xfd   :  { %15363 = sst [smem:[#allocation123_spill]] %s12623_s2  ;;  %s12647_s2 = smov 3 }
  0xfe   :  { %15364 = sst [smem:[#allocation124_spill]] %s12625_s20  ;;  %s12653_s13 = smov 48 }
  0xff   :  { %15365 = sst [smem:[#allocation125_spill]] %s12630_s6  ;;  %s12639_s6 = smov 3 }
 0x100   :  { %15366 = sst [smem:[#allocation126_spill]] %s12632_s4  ;;  %s12662_s1 = smov 12 }
 0x101   :  { %15367 = sst [smem:[#allocation127_spill]] %s12635_s0  ;;  %s12637_s0 = smov 192 }
 0x102   :  { %15368 = sst [smem:[#allocation128_spill]] %s12637_s0 }
 0x103   :  { %s15369_s0 = sld [smem:[#allocation39_spill]] }
 0x104   :  { %s15370_s4 = sld [smem:[#allocation41_spill]] }
 0x105   :  { %15371 = sst [smem:[#allocation39_spill]] %s12639_s6  ;;  %s12641_s6 = smov 12 }
 0x106   :  { %15372 = sst [smem:[#allocation41_spill]] %s12641_s6  ;;  %s12643_s6 = smov 48 }
 0x107   :  { %15373 = sst [smem:[#allocation129_spill]] %s12643_s6  ;;  %s12645_s6 = smov 192 }
 0x108   :  { %15374 = sst [smem:[#allocation130_spill]] %s12645_s6 }
 0x109   :  { %s15375_s6 = sld [smem:[#allocation42_spill]]  ;;  %v4427_v24 = vld [vmem:[#allocation1 + $0x70f] ss:$16 sm:%s15369_s0]   ;;  %s12657_s0 = smov 192 }
 0x10a   :  { %s15376_s20 = sld [smem:[#allocation48_spill]]  ;;  %v4430_v25 = vld [vmem:[#allocation1 + $0x70f] ss:$16 sm:%s15370_s4]  }
 0x10b   :  { %15377 = sst [smem:[#allocation42_spill]] %s12647_s2  ;;  %v4432_v30 = vsel %vm3846_vm0, %v4430_v25, %v4427_v24 }
 0x10c   :  { %s15378_s2 = sld [smem:[#allocation49_spill]] }
 0x10d   :  { %15379 = sst [smem:[#allocation48_spill]] %s12649_s14 }
 0x10e   :  { %s15380_s14 = sld [smem:[#allocation50_spill]] }
 0x10f   :  { %s15381_s11 = sld [smem:[#allocation52_spill]]  ;;  %v4435_v23 = vld [vmem:[#allocation1 + $0x70f] ss:$16 sm:%s15375_s6]  }
 0x110   :  { %s15382_s12 = sld [smem:[#allocation53_spill]]  ;;  %v4794_v28 = vld [vmem:[#allocation1 + $0x70e] ss:$16 sm:%s15376_s20]   ;;  %v4437_v45 = vsel %vm3850_vm1, %v4435_v23, %v4432_v30 }
 0x111   :  { %15383 = sst [smem:[#allocation49_spill]] %s12653_s13  ;;  %s12660_s13 = smov 3 }
 0x112   :  { %15384 = sst [smem:[#allocation50_spill]] %s12657_s0  ;;  %v4797_v29 = vld [vmem:[#allocation1 + $0x70e] ss:$16 sm:%s15378_s2]  }
 0x113   :  { %s15385_s4 = sld [smem:[#allocation76_spill]]  ;;  %v4799_v35 = vsel %vm3846_vm0, %v4797_v29, %v4794_v28 }
 0x114   :  { %s15386_s0 = sld [smem:[#allocation77_spill]]  ;;  %v4802_v31 = vld [vmem:[#allocation1 + $0x70e] ss:$16 sm:%s15380_s14]  }
 0x115   :  { %15387 = sst [smem:[#allocation52_spill]] %s12660_s13  ;;  %v4542_v26 = vld [vmem:[#allocation1 + $0xe] ss:$16 sm:%s15381_s11]   ;;  %v4804_v52 = vsel %vm3850_vm1, %v4802_v31, %v4799_v35  ;;  %v5046_v31 = vld [vmem:[#allocation1 + $0x48d] ss:$16 sm:%s12144_s5]  }
 0x116   :  { %s15388_s13 = sld [smem:[#allocation56_spill]]  ;;  %v4545_v32 = vld [vmem:[#allocation1 + $0xe] ss:$16 sm:%s15382_s12]   ;;  %v5141_v35 = vld [vmem:[#allocation1 + $0x50d] ss:$16 sm:%s12220_s17]  }
 0x117   :  { %15389 = sst [smem:[#allocation53_spill]] %s12662_s1  ;;  %v4547_v59 = vsel %vm3846_vm0, %v4545_v32, %v4542_v26  ;;  %v5049_v26 = vld [vmem:[#allocation1 + $0x48d] ss:$16 sm:%s12146_s16]   ;;  %v5143_v36 = vsel %vm3846_vm0, %v5141_v35, %v5138_v34 }
 0x118   :  { %s15390_s1 = sld [smem:[#allocation57_spill]] }
 0x119   :  { %s15391_s2 = sld [smem:[#allocation78_spill]]  ;;  %v5026_v38 = vld [vmem:[#allocation1 + $0x28d] ss:$16 sm:%s15385_s4]  }
 0x11a   :  { %s15392_s14 = sld [smem:[#allocation43_spill]]  ;;  %v5031_v39 = vld [vmem:[#allocation1 + $0x28d] ss:$16 sm:%s15386_s0]   ;;  %v5028_v43 = vsel %vm3846_vm0, %v5026_v38, %v5023_v37 }
 0x11b   :  { %s15393_s20 = sld [smem:[#allocation60_spill]]  ;;  %v5033_v50 = vsel %vm3850_vm1, %v5031_v39, %v5028_v43  ;;  %v5146_v37 = vld [vmem:[#allocation1 + $0x50d] ss:$16 sm:%s12222_s18]  }
 0x11c   :  { %s15394_s6 = sld [smem:[#allocation61_spill]]  ;;  %v4564_v40 = vld [vmem:[#allocation1 + $0x20e] ss:$16 sm:%s15388_s13]   ;;  %v5151_v38 = vld [vmem:[#allocation1 + $0x50d] ss:$16 sm:%s12227_s28]   ;;  %s12752_s28 = smov 48 }
 0x11d   :  { %s15395_s9 = sld [smem:[#allocation51_spill]] }
 0x11e   :  { %s15396_s10 = sld [smem:[#allocation54_spill]]  ;;  %v4567_v41 = vld [vmem:[#allocation1 + $0x20e] ss:$16 sm:%s15390_s1]  }
 0x11f   :  { %s15397_s15 = sld [smem:[#allocation58_spill]]  ;;  %v5036_v44 = vld [vmem:[#allocation1 + $0x28d] ss:$16 sm:%s15391_s2]   ;;  %v4569_v4 = vsel %vm3846_vm0, %v4567_v41, %v4564_v40 }
 0x120   :  { %s15398_s11 = sld [smem:[#allocation64_spill]]  ;;  %v4440_v47 = vld [vmem:[#allocation1 + $0x70f] ss:$16 sm:%s15392_s14]   ;;  %v5038_v51 = vsel %vm3854_vm2, %v5036_v44, %v5033_v50 }
 0x121   :  { %s15399_s12 = sld [smem:[#allocation65_spill]]  ;;  %v4909_v48 = vld [vmem:[#allocation1 + $0xd] ss:$16 sm:%s15393_s20]   ;;  %v10851_v62 = vpack.i.bf16 %v5038_v51, %v5015_v42  ;;  %v4442_v1 = vsel %vm3854_vm2, %v4440_v47, %v4437_v45  ;;  %v5148_v42 = vsel %vm3850_vm1, %v5146_v37, %v5143_v36 }
 0x122   :  { %s15400_s1 = sld [smem:[#allocation36_spill]]  ;;  %v4912_v49 = vld [vmem:[#allocation1 + $0xd] ss:$16 sm:%s15394_s6]  }
 0x123   :  { %s15401_s13 = sld [smem:[#allocation37_spill]]  ;;  %v4807_v53 = vld [vmem:[#allocation1 + $0x70e] ss:$16 sm:%s15395_s9]   ;;  %v4914_v5 = vsel %vm3846_vm0, %v4912_v49, %v4909_v48  ;;  %v5153_v49 = vsel %vm3854_vm2, %v5151_v38, %v5148_v42 }
 0x124   :  { %s15402_s0 = sld [smem:[#allocation38_spill]]  ;;  %v4550_v54 = vld [vmem:[#allocation1 + $0xe] ss:$16 sm:%s15396_s10]   ;;  %v4809_v9 = vsel %vm3854_vm2, %v4807_v53, %v4804_v52 }
 0x125   :  { %s15403_s4 = sld [smem:[#allocation62_spill]]  ;;  %v4572_v46 = vld [vmem:[#allocation1 + $0x20e] ss:$16 sm:%s15397_s15]   ;;  %v4552_v22 = vsel %vm3850_vm1, %v4550_v54, %v4547_v59 }
 0x126   :  { %s15404_s2 = sld [smem:[#allocation40_spill]]  ;;  %v4931_v55 = vld [vmem:[#allocation1 + $0x20d] ss:$16 sm:%s15398_s11]   ;;  %v4574_v17 = vsel %vm3850_vm1, %v4572_v46, %v4569_v4 }
 0x127   :  { %s15405_s14 = sld [smem:[#allocation44_spill]]  ;;  %v4934_v57 = vld [vmem:[#allocation1 + $0x20d] ss:$16 sm:%s15399_s12]  }
 0x128   :  { %s15406_s20 = sld [smem:[#allocation45_spill]]  ;;  %v4404_v56 = vld [vmem:[#allocation1 + $0x50f] ss:$16 sm:%s15400_s1]   ;;  %v4936_v12 = vsel %vm3846_vm0, %v4934_v57, %v4931_v55 }
 0x129   :  { %s15407_s6 = sld [smem:[#allocation46_spill]]  ;;  %v4407_v58 = vld [vmem:[#allocation1 + $0x50f] ss:$16 sm:%s15401_s13]  }
 0x12a   :  { %s15408_s9 = sld [smem:[#allocation47_spill]]  ;;  %v4412_v60 = vld [vmem:[#allocation1 + $0x50f] ss:$16 sm:%s15402_s0]   ;;  %v4409_v63 = vsel %vm3846_vm0, %v4407_v58, %v4404_v56  ;;  %v5051_v56 = vsel %vm3846_vm0, %v5049_v26, %v5046_v31 }
 0x12b   :  { %s15409_s10 = sld [smem:[#allocation55_spill]]  ;;  %v4917_v61 = vld [vmem:[#allocation1 + $0xd] ss:$16 sm:%s15403_s4]   ;;  %v4414_v6 = vsel %vm3850_vm1, %v4412_v60, %v4409_v63 }
 0x12c   :  { %s15410_s15 = sld [smem:[#allocation66_spill]]  ;;  %v4417_v0 = vld [vmem:[#allocation1 + $0x50f] ss:$16 sm:%s15404_s2]   ;;  %v4919_v29 = vsel %vm3850_vm1, %v4917_v61, %v4914_v5 }
 0x12d   :  { %v4771_v2 = vld [vmem:[#allocation1 + $0x50e] ss:$16 sm:%s15405_s14]   ;;  %s15411_s11 = sld [smem:[#allocation59_spill]]  ;;  %s11443_s14 = smov 104   ;;  %v4419_v15 = vsel %vm3854_vm2, %v4417_v0, %v4414_v6 }
 0x12e   :  { %v4774_v3 = vld [vmem:[#allocation1 + $0x50e] ss:$16 sm:%s15406_s20]   ;;  %s15412_s12 = sld [smem:[#allocation63_spill]]  ;;  %10852 = vrot.lane.b32.xlu0 %v10851_v62, %s11443_s14  ;;  %v10786_v20 = vpack.i.bf16 %v4442_v1, %v4419_v15 }
 0x12f   :  { %s15413_s1 = sld [smem:[#allocation67_spill]]  ;;  %v4776_v7 = vsel %vm3846_vm0, %v4774_v3, %v4771_v2  ;;  %v4779_v8 = vld [vmem:[#allocation1 + $0x50e] ss:$16 sm:%s15407_s6]  }
 0x130   :  { %v4784_v10 = vld [vmem:[#allocation1 + $0x50e] ss:$16 sm:%s15408_s9]   ;;  %s15414_s13 = sld [smem:[#allocation68_spill]]  ;;  %v4781_v16 = vsel %vm3850_vm1, %v4779_v8, %v4776_v7  ;;  %10787 = vrot.lane.b32.xlu2 %v10786_v20, %s15228_s8 }
 0x131   :  { %s15415_s0 = sld [smem:[#allocation69_spill]]  ;;  %v4555_v11 = vld [vmem:[#allocation1 + $0xe] ss:$16 sm:%s15409_s10]   ;;  %v4786_v21 = vsel %vm3854_vm2, %v4784_v10, %v4781_v16  ;;  %v5276_v16 = vld [vmem:[#allocation1 + $0xc] ss:$16 sm:%s12392_s26]  }
 0x132   :  { %s15416_s4 = sld [smem:[#allocation72_spill]]  ;;  %v4939_v13 = vld [vmem:[#allocation1 + $0x20d] ss:$16 sm:%s15410_s15]   ;;  %v10826_v28 = vpack.i.bf16 %v4809_v9, %v4786_v21  ;;  %v4557_v40 = vsel %vm3854_vm2, %v4555_v11, %v4552_v22  ;;  %s12754_s15 = smov 192 }
 0x133   :  { %s15417_s2 = sld [smem:[#allocation73_spill]]  ;;  %v4577_v18 = vld [vmem:[#allocation1 + $0x20e] ss:$16 sm:%s15411_s11]   ;;  %v4941_v30 = vsel %vm3850_vm1, %v4939_v13, %v4936_v12 }
 0x134   :  { %s15418_s20 = sld [smem:[#allocation81_spill]]  ;;  %v4922_v14 = vld [vmem:[#allocation1 + $0xd] ss:$16 sm:%s15412_s12]   ;;  %10827 = vrot.lane.b32.xlu1 %v10826_v28, %s15328_s21  ;;  %v4579_v41 = vsel %vm3854_vm2, %v4577_v18, %v4574_v17 }
 0x135   :  { %v4944_v19 = vld [vmem:[#allocation1 + $0x20d] ss:$16 sm:%s15413_s1]   ;;  %s15419_s6 = sld [smem:[#allocation18_spill]]  ;;  %v4924_v47 = vsel %vm3854_vm2, %v4922_v14, %v4919_v29  ;;  %v10801_v57 = vpack.i.bf16 %v4579_v41, %v4557_v40 }
 0x136   :  { %v4679_v24 = vld [vmem:[#allocation1 + $0x48e] ss:$16 sm:%s15414_s13]   ;;  %s15420_s9 = sld [smem:[#allocation19_spill]]  ;;  %v4946_v48 = vsel %vm3854_vm2, %v4944_v19, %v4941_v30  ;;  %s12761_s13 = smov 3 }
 0x137   :  { %v4682_v25 = vld [vmem:[#allocation1 + $0x48e] ss:$16 sm:%s15415_s0]   ;;  %s15421_s5 = sld [smem:[#allocation20_spill]]  ;;  %v10841_v62 = vpack.i.bf16 %v4946_v48, %v4924_v47 }
 0x138   :  { %v4702_v27 = vld [vmem:[#allocation1 + $0x68e] ss:$16 sm:%s15416_s4]   ;;  %s15422_s16 = sld [smem:[#allocation21_spill]]  ;;  %v4684_v52 = vsel %vm3846_vm0, %v4682_v25, %v4679_v24  ;;  %10802 = vrot.lane.b32.xlu2 %v10801_v57, %s15328_s21 }
 0x139   :  { %v4705_v23 = vld [vmem:[#allocation1 + $0x68e] ss:$16 sm:%s15417_s2]   ;;  %s15423_s8 = sld [smem:[#allocation70_spill]] }
 0x13a   :  { %v5069_v32 = vld [vmem:[#allocation1 + $0x68d] ss:$16 sm:%s15418_s20]   ;;  %s15424_s22 = sld [smem:[#allocation74_spill]]  ;;  %v4707_v54 = vsel %vm3846_vm0, %v4705_v23, %v4702_v27 }
 0x13b   :  { %v5161_v39 = vld [vmem:[#allocation1 + $0x70d] ss:$16 sm:%s15419_s6]   ;;  %s15425_s29 = sld [smem:[#allocation71_spill]]  ;;  %v5074_v60 = vsel %vm3846_vm0, %v5072_v33, %v5069_v32 }
 0x13c   :  { %v5164_v43 = vld [vmem:[#allocation1 + $0x70d] ss:$16 sm:%s15420_s9]   ;;  %s15426_s17 = sld [smem:[#allocation79_spill]]  ;;  %10842 = vrot.lane.b32.xlu1 %v10841_v62, %s11443_s14 }
 0x13d   :  { %v5169_v44 = vld [vmem:[#allocation1 + $0x70d] ss:$16 sm:%s15421_s5]   ;;  %s15427_s18 = sld [smem:[#allocation82_spill]]  ;;  %v5166_v50 = vsel %vm3846_vm0, %v5164_v43, %v5161_v39 }
 0x13e   :  { %v5174_v45 = vld [vmem:[#allocation1 + $0x70d] ss:$16 sm:%s15422_s16]   ;;  %s15428_s10 = sld [smem:[#allocation75_spill]]  ;;  %v5171_v55 = vsel %vm3850_vm1, %v5169_v44, %v5166_v50 }
 0x13f   :  { %s15429_s11 = sld [smem:[#allocation80_spill]]  ;;  %v4687_v53 = vld [vmem:[#allocation1 + $0x48e] ss:$16 sm:%s15423_s8]   ;;  %v5176_v61 = vsel %vm3854_vm2, %v5174_v45, %v5171_v55 }
 0x140   :  { %s15430_s12 = sld [smem:[#allocation83_spill]]  ;;  %v4710_v46 = vld [vmem:[#allocation1 + $0x68e] ss:$16 sm:%s15424_s22]   ;;  %v10866_v2 = vpack.i.bf16 %v5176_v61, %v5153_v49  ;;  %v4689_v3 = vsel %vm3850_vm1, %v4687_v53, %v4684_v52 }
 0x141   :  { %s15431_s1 = sld [smem:[#allocation84_spill]]  ;;  %v4692_v51 = vld [vmem:[#allocation1 + $0x48e] ss:$16 sm:%s15425_s29]   ;;  %v4712_v4 = vsel %vm3850_vm1, %v4710_v46, %v4707_v54 }
 0x142   :  { %s15432_s0 = sld [smem:[#allocation85_spill]]  ;;  %v5054_v58 = vld [vmem:[#allocation1 + $0x48d] ss:$16 sm:%s15426_s17]   ;;  %10867 = vrot.lane.b32.xlu0 %v10866_v2, %s11443_s14  ;;  %v4694_v22 = vsel %vm3854_vm2, %v4692_v51, %v4689_v3 }
 0x143   :  { %s15433_s4 = sld [smem:[#allocation88_spill]]  ;;  %v5077_v59 = vld [vmem:[#allocation1 + $0x68d] ss:$16 sm:%s15427_s18]   ;;  %v5056_v10 = vsel %vm3850_vm1, %v5054_v58, %v5051_v56 }
 0x144   :  { %s15434_s2 = sld [smem:[#allocation89_spill]]  ;;  %v4715_v63 = vld [vmem:[#allocation1 + $0x68e] ss:$16 sm:%s15428_s10]   ;;  %v5079_v9 = vsel %vm3850_vm1, %v5077_v59, %v5074_v60 }
 0x145   :  { %s15435_s20 = sld [smem:[#allocation6_spill]]  ;;  %v5059_v0 = vld [vmem:[#allocation1 + $0x48d] ss:$16 sm:%s15429_s11]   ;;  %v4717_v17 = vsel %vm3854_vm2, %v4715_v63, %v4712_v4  ;;  %v5421_v63 = vld [vmem:[#allocation1 + $0x48c] ss:$16 sm:%s12492_s25]  }
 0x146   :  { %s15436_s6 = sld [smem:[#allocation7_spill]]  ;;  %v5082_v1 = vld [vmem:[#allocation1 + $0x68d] ss:$16 sm:%s15430_s12]   ;;  %v5061_v28 = vsel %vm3854_vm2, %v5059_v0, %v5056_v10  ;;  %v10816_v36 = vpack.i.bf16 %v4717_v17, %v4694_v22  ;;  %v5426_v0 = vld [vmem:[#allocation1 + $0x48c] ss:$16 sm:%s12498_s23]  }
 0x147   :  { %s15437_s9 = sld [smem:[#allocation93_spill]]  ;;  %v4817_v5 = vld [vmem:[#allocation1 + $0x18e] ss:$16 sm:%s15431_s1]   ;;  %v5084_v29 = vsel %vm3854_vm2, %v5082_v1, %v5079_v9  ;;  %v5436_v1 = vld [vmem:[#allocation1 + $0x68c] ss:$16 sm:%s12505_s24]  }
 0x148   :  { %s15438_s5 = sld [smem:[#allocation22_spill]]  ;;  %v4820_v6 = vld [vmem:[#allocation1 + $0x18e] ss:$16 sm:%s15432_s0]   ;;  %v10856_v43 = vpack.i.bf16 %v5084_v29, %v5061_v28  ;;  %10817 = vrot.lane.b32.xlu2 %v10816_v36, %s15328_s21 }
 0x149   :  { %s15439_s16 = sld [smem:[#allocation28_spill]]  ;;  %v4840_v7 = vld [vmem:[#allocation1 + $0x38e] ss:$16 sm:%s15433_s4]   ;;  %s12803_s4 = smov 12  ;;  %v4822_v26 = vsel %vm3846_vm0, %v4820_v6, %v4817_v5  ;;  %v5439_v5 = vld [vmem:[#allocation1 + $0x68c] ss:$16 sm:%s12507_s27]  }
 0x14a   :  { %s15440_s8 = sld [smem:[#allocation25_spill]]  ;;  %v4843_v8 = vld [vmem:[#allocation1 + $0x38e] ss:$16 sm:%s15434_s2]   ;;  %s12805_s2 = smov 48  ;;  %10857 = vrot.lane.b32.xlu1 %v10856_v43, %s11443_s14  ;;  %v5444_v6 = vld [vmem:[#allocation1 + $0x68c] ss:$16 sm:%s12514_s19]  }
 0x14b   :  { %s15441_s22 = sld [smem:[#allocation29_spill]]  ;;  %v5184_v11 = vld [vmem:[#allocation1 + $0x18d] ss:$16 sm:%s15435_s20]   ;;  %v4845_v33 = vsel %vm3846_vm0, %v4843_v8, %v4840_v7 }
 0x14c   :  { %s15442_s29 = sld [smem:[#allocation95_spill]]  ;;  %v5187_v12 = vld [vmem:[#allocation1 + $0x18d] ss:$16 sm:%s15436_s6]  }
 0x14d   :  { %s15443_s17 = sld [smem:[#allocation96_spill]]  ;;  %v5207_v13 = vld [vmem:[#allocation1 + $0x38d] ss:$16 sm:%s15437_s9]   ;;  %v5189_v38 = vsel %vm3846_vm0, %v5187_v12, %v5184_v11  ;;  %v5441_v11 = vsel %vm3846_vm0, %v5439_v5, %v5436_v1 }
 0x14e   :  { %s15444_s18 = sld [smem:[#allocation12_spill]]  ;;  %v5210_v15 = vld [vmem:[#allocation1 + $0x38d] ss:$16 sm:%s15438_s5]   ;;  %s12812_s5 = smov 192 }
 0x14f   :  { %s15445_s10 = sld [smem:[#allocation14_spill]]  ;;  %v5279_v18 = vld [vmem:[#allocation1 + $0xc] ss:$16 sm:%s15439_s16]   ;;  %v5212_v40 = vsel %vm3846_vm0, %v5210_v15, %v5207_v13 }
 0x150   :  { %v5281_v14 = vsel %vm3846_vm0, %v5279_v18, %v5276_v16  ;;  %v5284_v19 = vld [vmem:[#allocation1 + $0xc] ss:$16 sm:%s15440_s8]   ;;  %s15446_s26 = sld [smem:[#allocation86_spill]]  ;;  %s12814_s8 = smov 3  ;;  %v5446_v18 = vsel %vm3850_vm1, %v5444_v6, %v5441_v11 }
 0x151   :  { %v5289_v20 = vld [vmem:[#allocation1 + $0xc] ss:$16 sm:%s15441_s22]   ;;  %s15447_s11 = sld [smem:[#allocation90_spill]]  ;;  %v5286_v24 = vsel %vm3850_vm1, %v5284_v19, %v5281_v14 }
 0x152   :  { %v5298_v21 = vld [vmem:[#allocation1 + $0x20c] ss:$16 sm:%s15442_s29]   ;;  %s15448_s12 = sld [smem:[#allocation87_spill]]  ;;  %v5291_v30 = vsel %vm3854_vm2, %v5289_v20, %v5286_v24 }
 0x153   :  { %v5301_v25 = vld [vmem:[#allocation1 + $0x20c] ss:$16 sm:%s15443_s17]   ;;  %s15449_s1 = sld [smem:[#allocation92_spill]] }
 0x154   :  { %v5306_v27 = vld [vmem:[#allocation1 + $0x20c] ss:$16 sm:%s15444_s18]   ;;  %s15450_s0 = sld [smem:[#allocation94_spill]]  ;;  %v5303_v31 = vsel %vm3846_vm0, %v5301_v25, %v5298_v21 }
 0x155   :  { %v5311_v23 = vld [vmem:[#allocation1 + $0x20c] ss:$16 sm:%s15445_s10]   ;;  %s15451_s20 = sld [smem:[#allocation91_spill]]  ;;  %v5308_v35 = vsel %vm3850_vm1, %v5306_v27, %v5303_v31 }
 0x156   :  { %s15452_s6 = sld [smem:[#allocation8_spill]]  ;;  %v4825_v32 = vld [vmem:[#allocation1 + $0x18e] ss:$16 sm:%s15446_s26]   ;;  %v5313_v42 = vsel %vm3854_vm2, %v5311_v23, %v5308_v35 }
 0x157   :  { %s15453_s9 = sld [smem:[#allocation23_spill]]  ;;  %v4848_v34 = vld [vmem:[#allocation1 + $0x38e] ss:$16 sm:%s15447_s11]   ;;  %v10881_v48 = vpack.i.bf16 %v5313_v42, %v5291_v30  ;;  %v4827_v49 = vsel %vm3850_vm1, %v4825_v32, %v4822_v26  ;;  %v5554_v42 = vld [vmem:[#allocation1 + $0x18c] ss:$16 sm:%s12602_s3]  }
 0x158   :  { %s15454_s16 = sld [smem:[#allocation26_spill]]  ;;  %v4830_v37 = vld [vmem:[#allocation1 + $0x18e] ss:$16 sm:%s15448_s12]   ;;  %v4850_v50 = vsel %vm3850_vm1, %v4848_v34, %v4845_v33 }
 0x159   :  { %s15455_s22 = sld [smem:[#allocation9_spill]]  ;;  %v5192_v39 = vld [vmem:[#allocation1 + $0x18d] ss:$16 sm:%s15449_s1]   ;;  %v4832_v2 = vsel %vm3854_vm2, %v4830_v37, %v4827_v49 }
 0x15a   :  { %s15456_s29 = sld [smem:[#allocation2_spill]]  ;;  %v5215_v41 = vld [vmem:[#allocation1 + $0x38d] ss:$16 sm:%s15450_s0]   ;;  %v5194_v55 = vsel %vm3850_vm1, %v5192_v39, %v5189_v38  ;;  %s11444_s0 = smov 96  }
 0x15b   :  { %s15457_s17 = sld [smem:[#allocation3_spill]]  ;;  %v4853_v44 = vld [vmem:[#allocation1 + $0x38e] ss:$16 sm:%s15451_s20]   ;;  %v5217_v57 = vsel %vm3850_vm1, %v5215_v41, %v5212_v40  ;;  %10882 = vrot.lane.b32.xlu0 %v10881_v48, %s11444_s0  ;;  %v5551_v41 = vld [vmem:[#allocation1 + $0x18c] ss:$16 sm:%s12596_s30]  }
 0x15c   :  { %s15458_s18 = sld [smem:[#allocation97_spill]]  ;;  %v5197_v45 = vld [vmem:[#allocation1 + $0x18d] ss:$16 sm:%s15452_s6]   ;;  %v4855_v3 = vsel %vm3854_vm2, %v4853_v44, %v4850_v50  ;;  %s12856_s6 = smov 12  ;;  %v5556_v43 = vsel %vm3846_vm0, %v5554_v42, %v5551_v41  ;;  %v5559_v44 = vld [vmem:[#allocation1 + $0x18c] ss:$16 sm:%s12608_s7]  }
 0x15d   :  { %s15459_s10 = sld [smem:[#allocation98_spill]]  ;;  %v5220_v47 = vld [vmem:[#allocation1 + $0x38d] ss:$16 sm:%s15453_s9]   ;;  %v5199_v8 = vsel %vm3854_vm2, %v5197_v45, %v5194_v55  ;;  %s12858_s9 = smov 48  ;;  %v10831_v14 = vpack.i.bf16 %v4855_v3, %v4832_v2  ;;  %v5561_v50 = vsel %vm3850_vm1, %v5559_v44, %v5556_v43 }
 0x15e   :  { %s15460_s26 = sld [smem:[#allocation16_spill]]  ;;  %v4954_v52 = vld [vmem:[#allocation1 + $0x40d] ss:$16 sm:%s15454_s16]   ;;  %v5222_v10 = vsel %vm3854_vm2, %v5220_v47, %v5217_v57 }
 0x15f   :  { %s15461_s11 = sld [smem:[#allocation101_spill]]  ;;  %v4957_v53 = vld [vmem:[#allocation1 + $0x40d] ss:$16 sm:%s15455_s22]   ;;  %v10871_v25 = vpack.i.bf16 %v5222_v10, %v5199_v8  ;;  %10832 = vrot.lane.b32.xlu2 %v10831_v14, %s15328_s21 }
 0x160   :  { %s15462_s12 = sld [smem:[#allocation15_spill]]  ;;  %v4977_v54 = vld [vmem:[#allocation1 + $0x60d] ss:$16 sm:%s15456_s29]   ;;  %v4959_v12 = vsel %vm3846_vm0, %v4957_v53, %v4954_v52 }
 0x161   :  { %s15463_s1 = sld [smem:[#allocation30_spill]]  ;;  %v4980_v46 = vld [vmem:[#allocation1 + $0x60d] ss:$16 sm:%s15457_s17]   ;;  %s12865_s17 = smov 192  ;;  %10872 = vrot.lane.b32.xlu1 %v10871_v25, %s11443_s14 }
 0x162   :  { %v5321_v51 = vld [vmem:[#allocation1 + $0x40c] ss:$16 sm:%s15458_s18]   ;;  %s15464_s20 = sld [smem:[#allocation31_spill]]  ;;  %v4982_v15 = vsel %vm3846_vm0, %v4980_v46, %v4977_v54 }
 0x163   :  { %v5324_v56 = vld [vmem:[#allocation1 + $0x40c] ss:$16 sm:%s15459_s10]   ;;  %s15465_s25 = sld [smem:[#allocation27_spill]]  ;;  %s12867_s10 = smov 3 }
 0x164   :  { %v5344_v58 = vld [vmem:[#allocation1 + $0x60c] ss:$16 sm:%s15460_s26]   ;;  %s15466_s23 = sld [smem:[#allocation4_spill]]  ;;  %v5326_v20 = vsel %vm3846_vm0, %v5324_v56, %v5321_v51 }
 0x165   :  { %v5347_v60 = vld [vmem:[#allocation1 + $0x60c] ss:$16 sm:%s15461_s11]   ;;  %s15467_s24 = sld [smem:[#allocation24_spill]] }
 0x166   :  { %v5413_v59 = vld [vmem:[#allocation1 + $0x48c] ss:$16 sm:%s15462_s12]   ;;  %s15468_s27 = sld [smem:[#allocation99_spill]]  ;;  %v5349_v22 = vsel %vm3846_vm0, %v5347_v60, %v5344_v58 }
 0x167   :  { %v5416_v61 = vld [vmem:[#allocation1 + $0x48c] ss:$16 sm:%s15463_s1]   ;;  %s15469_s19 = sld [smem:[#allocation102_spill]] }
 0x168   :  { %v5418_v62 = vsel %vm3846_vm0, %v5416_v61, %v5413_v59  ;;  %v5449_v7 = vld [vmem:[#allocation1 + $0x68c] ss:$16 sm:%s15464_s20]   ;;  %s15470_s16 = sld [smem:[#allocation5_spill]] }
 0x169   :  { %v5423_v4 = vsel %vm3850_vm1, %v5421_v63, %v5418_v62  ;;  %s15471_s22 = sld [smem:[#allocation100_spill]]  ;;  %v4962_v13 = vld [vmem:[#allocation1 + $0x40d] ss:$16 sm:%s15465_s25]   ;;  %v5451_v24 = vsel %vm3854_vm2, %v5449_v7, %v5446_v18 }
 0x16a   :  { %v5428_v9 = vsel %vm3854_vm2, %v5426_v0, %v5423_v4  ;;  %s15472_s29 = sld [smem:[#allocation34_spill]]  ;;  %v4985_v16 = vld [vmem:[#allocation1 + $0x60d] ss:$16 sm:%s15466_s23]   ;;  %v4964_v30 = vsel %vm3850_vm1, %v4962_v13, %v4959_v12 }
 0x16b   :  { %s15473_s18 = sld [smem:[#allocation17_spill]]  ;;  %v4967_v19 = vld [vmem:[#allocation1 + $0x40d] ss:$16 sm:%s15467_s24]   ;;  %v10896_v29 = vpack.i.bf16 %v5451_v24, %v5428_v9  ;;  %v4987_v31 = vsel %vm3850_vm1, %v4985_v16, %v4982_v15  ;;  %v5691_v24 = vld [vmem:[#allocation1 + $0x40b] ss:$16 sm:%s12803_s4]  }
 0x16c   :  { %s15474_s26 = sld [smem:[#allocation103_spill]]  ;;  %v5329_v21 = vld [vmem:[#allocation1 + $0x40c] ss:$16 sm:%s15468_s27]   ;;  %v4969_v48 = vsel %vm3854_vm2, %v4967_v19, %v4964_v30 }
 0x16d   :  { %s15475_s11 = sld [smem:[#allocation35_spill]]  ;;  %v5352_v17 = vld [vmem:[#allocation1 + $0x60c] ss:$16 sm:%s15469_s19]   ;;  %v5331_v35 = vsel %vm3850_vm1, %v5329_v21, %v5326_v20  ;;  %10897 = vrot.lane.b32.xlu0 %v10896_v29, %s11444_s0 }
 0x16e   :  { %s15476_s12 = sld [smem:[#allocation10_spill]]  ;;  %v4990_v27 = vld [vmem:[#allocation1 + $0x60d] ss:$16 sm:%s15470_s16]   ;;  %v5354_v36 = vsel %vm3850_vm1, %v5352_v17, %v5349_v22  ;;  %v5688_v17 = vld [vmem:[#allocation1 + $0x40b] ss:$16 sm:%s12761_s13]  }
 0x16f   :  { %s15477_s1 = sld [smem:[#allocation32_spill]]  ;;  %v5334_v23 = vld [vmem:[#allocation1 + $0x40c] ss:$16 sm:%s15471_s22]   ;;  %v4992_v49 = vsel %vm3854_vm2, %v4990_v27, %v4987_v31  ;;  %v5693_v25 = vsel %vm3846_vm0, %v5691_v24, %v5688_v17  ;;  %v5696_v27 = vld [vmem:[#allocation1 + $0x40b] ss:$16 sm:%s12805_s2]  }
 0x170   :  { %s15478_s20 = sld [smem:[#allocation33_spill]]  ;;  %v5357_v28 = vld [vmem:[#allocation1 + $0x60c] ss:$16 sm:%s15472_s29]   ;;  %v5336_v46 = vsel %vm3854_vm2, %v5334_v23, %v5331_v35  ;;  %v10846_v62 = vpack.i.bf16 %v4992_v49, %v4969_v48  ;;  %v5701_v23 = vld [vmem:[#allocation1 + $0x40b] ss:$16 sm:%s12812_s5]   ;;  %v5698_v31 = vsel %vm3850_vm1, %v5696_v27, %v5693_v25 }
 0x171   :  { %s15479_s25 = sld [smem:[#allocation108_spill]]  ;;  %v5092_v26 = vld [vmem:[#allocation1 + $0x10d] ss:$16 sm:%s15473_s18]   ;;  %v5359_v55 = vsel %vm3854_vm2, %v5357_v28, %v5354_v36  ;;  %s12909_s18 = smov 12  ;;  %v5711_v28 = vld [vmem:[#allocation1 + $0x60b] ss:$16 sm:%s12814_s8]   ;;  %v5703_v36 = vsel %vm3854_vm2, %v5701_v23, %v5698_v31 }
 0x172   :  { %s15480_s23 = sld [smem:[#allocation109_spill]]  ;;  %v5095_v32 = vld [vmem:[#allocation1 + $0x10d] ss:$16 sm:%s15474_s26]   ;;  %s12911_s26 = smov 48  ;;  %v10886_v5 = vpack.i.bf16 %v5359_v55, %v5336_v46  ;;  %10847 = vrot.lane.b32.xlu2 %v10846_v62, %s11443_s14 }
 0x173   :  { %s15481_s24 = sld [smem:[#allocation120_spill]]  ;;  %v5115_v33 = vld [vmem:[#allocation1 + $0x30d] ss:$16 sm:%s15475_s11]   ;;  %v5097_v56 = vsel %vm3846_vm0, %v5095_v32, %v5092_v26  ;;  %v5714_v26 = vld [vmem:[#allocation1 + $0x60b] ss:$16 sm:%s12856_s6]  }
 0x174   :  { %s15482_s27 = sld [smem:[#allocation121_spill]]  ;;  %v5118_v34 = vld [vmem:[#allocation1 + $0x30d] ss:$16 sm:%s15476_s12]   ;;  %10887 = vrot.lane.b32.xlu1 %v10886_v5, %s11444_s0  ;;  %v5719_v32 = vld [vmem:[#allocation1 + $0x60b] ss:$16 sm:%s12858_s9]   ;;  %s12962_s9 = smov 12 }
 0x175   :  { %s15483_s19 = sld [smem:[#allocation122_spill]]  ;;  %v5459_v37 = vld [vmem:[#allocation1 + $0x10c] ss:$16 sm:%s15477_s1]   ;;  %v5120_v60 = vsel %vm3846_vm0, %v5118_v34, %v5115_v33  ;;  %v5724_v33 = vld [vmem:[#allocation1 + $0x60b] ss:$16 sm:%s12865_s17]   ;;  %s12964_s17 = smov 48 }
 0x176   :  { %s15484_s16 = sld [smem:[#allocation123_spill]]  ;;  %v5462_v38 = vld [vmem:[#allocation1 + $0x10c] ss:$16 sm:%s15478_s20]   ;;  %s12918_s20 = smov 192 }
 0x177   :  { %s15485_s22 = sld [smem:[#allocation124_spill]]  ;;  %v5482_v39 = vld [vmem:[#allocation1 + $0x30c] ss:$16 sm:%s15479_s25]   ;;  %v5464_v0 = vsel %vm3846_vm0, %v5462_v38, %v5459_v37  ;;  %v5716_v37 = vsel %vm3846_vm0, %v5714_v26, %v5711_v28 }
 0x178   :  { %v5485_v40 = vld [vmem:[#allocation1 + $0x30c] ss:$16 sm:%s15480_s23]   ;;  %s15486_s21 = sld [smem:[#allocation104_spill]]  ;;  %s12920_s23 = smov 3  ;;  %v5721_v42 = vsel %vm3850_vm1, %v5719_v32, %v5716_v37 }
 0x179   :  { %v5564_v45 = vld [vmem:[#allocation1 + $0x18c] ss:$16 sm:%s15481_s24]   ;;  %s15487_s30 = sld [smem:[#allocation11_spill]]  ;;  %v5487_v2 = vsel %vm3846_vm0, %v5485_v40, %v5482_v39 }
 0x17a   :  { %v5574_v47 = vld [vmem:[#allocation1 + $0x38c] ss:$16 sm:%s15482_s27]   ;;  %s15488_s3 = sld [smem:[#allocation105_spill]]  ;;  %v5566_v57 = vsel %vm3854_vm2, %v5564_v45, %v5561_v50 }
 0x17b   :  { %v5577_v52 = vld [vmem:[#allocation1 + $0x38c] ss:$16 sm:%s15483_s19]   ;;  %s15489_s7 = sld [smem:[#allocation106_spill]] }
 0x17c   :  { %v5582_v53 = vld [vmem:[#allocation1 + $0x38c] ss:$16 sm:%s15484_s16]   ;;  %s15490_s29 = sld [smem:[#allocation110_spill]]  ;;  %v5579_v51 = vsel %vm3846_vm0, %v5577_v52, %v5574_v47  ;;  %v5726_v52 = vsel %vm3854_vm2, %v5724_v33, %v5721_v42 }
 0x17d   :  { %v5587_v54 = vld [vmem:[#allocation1 + $0x38c] ss:$16 sm:%s15485_s22]   ;;  %s15491_s11 = sld [smem:[#allocation13_spill]]  ;;  %v5584_v61 = vsel %vm3850_vm1, %v5582_v53, %v5579_v51  ;;  %v10926_v55 = vpack.i.bf16 %v5726_v52, %v5703_v36  ;;  %v13061_v52 = vpop.permute.xlu0 %10762 }
 0x17e   :  { %s15492_s12 = sld [smem:[#allocation107_spill]]  ;;  %v5100_v58 = vld [vmem:[#allocation1 + $0x10d] ss:$16 sm:%s15486_s21]   ;;  %v5589_v4 = vsel %vm3854_vm2, %v5587_v54, %v5584_v61  ;;  %v5398_v5 = vld [vmem:[#allocation1 + $0x28c] ss:$16 sm:%s12752_s28]   ;;  %s5828_s28 = smov 12 }
 0x17f   :  { %s15493_s1 = sld [smem:[#allocation111_spill]]  ;;  %v5123_v59 = vld [vmem:[#allocation1 + $0x30d] ss:$16 sm:%s15487_s30]   ;;  %v10911_v10 = vpack.i.bf16 %v5589_v4, %v5566_v57  ;;  %v5102_v9 = vsel %vm3850_vm1, %v5100_v58, %v5097_v56 }
 0x180   :  { %s15494_s25 = sld [smem:[#allocation112_spill]]  ;;  %v5105_v63 = vld [vmem:[#allocation1 + $0x10d] ss:$16 sm:%s15488_s3]   ;;  %v5125_v11 = vsel %vm3850_vm1, %v5123_v59, %v5120_v60 }
 0x181   :  { %s15495_s24 = sld [smem:[#allocation113_spill]]  ;;  %v5467_v1 = vld [vmem:[#allocation1 + $0x10c] ss:$16 sm:%s15489_s7]   ;;  %10912 = vrot.lane.b32.xlu0 %v10911_v10, %s11444_s0  ;;  %v5107_v29 = vsel %vm3854_vm2, %v5105_v63, %v5102_v9  ;;  %v5734_v63 = vld [vmem:[#allocation1 + $0x8b] ss:$16 sm:%s12867_s10]   ;;  %s13002_s10 = smov 12 }
 0x182   :  { %s15496_s27 = sld [smem:[#allocation116_spill]]  ;;  %v5490_v3 = vld [vmem:[#allocation1 + $0x30c] ss:$16 sm:%s15490_s29]   ;;  %v5469_v18 = vsel %vm3850_vm1, %v5467_v1, %v5464_v0  ;;  %s12971_s29 = smov 192  ;;  %v5737_v0 = vld [vmem:[#allocation1 + $0x8b] ss:$16 sm:%s12909_s18]  }
 0x183   :  { %s15497_s19 = sld [smem:[#allocation117_spill]]  ;;  %v5128_v6 = vld [vmem:[#allocation1 + $0x30d] ss:$16 sm:%s15491_s11]   ;;  %v5492_v14 = vsel %vm3850_vm1, %v5490_v3, %v5487_v2  ;;  %s12973_s11 = smov 3  ;;  %v5757_v1 = vld [vmem:[#allocation1 + $0x28b] ss:$16 sm:%s12920_s23]   ;;  %v5739_v17 = vsel %vm3846_vm0, %v5737_v0, %v5734_v63 }
 0x184   :  { %s15498_s16 = sld [smem:[#allocation125_spill]]  ;;  %v5472_v7 = vld [vmem:[#allocation1 + $0x10c] ss:$16 sm:%s15492_s12]   ;;  %v5130_v30 = vsel %vm3854_vm2, %v5128_v6, %v5125_v11  ;;  %s13009_s18 = smov 192  ;;  %v5760_v6 = vld [vmem:[#allocation1 + $0x28b] ss:$16 sm:%s12962_s9]  }
 0x185   :  { %s15499_s22 = sld [smem:[#allocation126_spill]]  ;;  %v5495_v8 = vld [vmem:[#allocation1 + $0x30c] ss:$16 sm:%s15493_s1]   ;;  %v5474_v34 = vsel %vm3854_vm2, %v5472_v7, %v5469_v18  ;;  %v10861_v43 = vpack.i.bf16 %v5130_v30, %v5107_v29  ;;  %s5825_s23 = smov 3  ;;  %v5742_v9 = vld [vmem:[#allocation1 + $0x8b] ss:$16 sm:%s12911_s26]   ;;  %v5762_v24 = vsel %vm3846_vm0, %v5760_v6, %v5757_v1 }
 0x186   :  { %s15500_s21 = sld [smem:[#allocation39_spill]]  ;;  %v5230_v12 = vld [vmem:[#allocation1 + $0x58d] ss:$16 sm:%s15494_s25]   ;;  %v5497_v35 = vsel %vm3854_vm2, %v5495_v8, %v5492_v14  ;;  %v5826_v7 = vld [vmem:[#allocation1 + $0x10b] ss:$16 sm:%s5825_s23]   ;;  %s5838_s26 = smov 192 }
 0x187   :  { %s15501_s30 = sld [smem:[#allocation41_spill]]  ;;  %v5233_v13 = vld [vmem:[#allocation1 + $0x58d] ss:$16 sm:%s15495_s24]   ;;  %v10901_v53 = vpack.i.bf16 %v5497_v35, %v5474_v34  ;;  %10862 = vrot.lane.b32.xlu2 %v10861_v43, %s11443_s14  ;;  %v5765_v11 = vld [vmem:[#allocation1 + $0x28b] ss:$16 sm:%s12964_s17]   ;;  %s5871_s9 = smov 3 }
 0x188   :  { %v5253_v15 = vld [vmem:[#allocation1 + $0x78d] ss:$16 sm:%s15496_s27]   ;;  %s15502_s13 = sld [smem:[#allocation114_spill]]  ;;  %v5235_v38 = vsel %vm3846_vm0, %v5233_v13, %v5230_v12  ;;  %s12984_s27 = smov 12  ;;  %v5829_v12 = vld [vmem:[#allocation1 + $0x10b] ss:$16 sm:%s5828_s28]  }
 0x189   :  { %v5256_v16 = vld [vmem:[#allocation1 + $0x78d] ss:$16 sm:%s15497_s19]   ;;  %s15503_s4 = sld [smem:[#allocation118_spill]]  ;;  %s12986_s19 = smov 48  ;;  %10902 = vrot.lane.b32.xlu1 %v10901_v53, %s11444_s0  ;;  %v5831_v18 = vsel %vm3846_vm0, %v5829_v12, %v5826_v7  ;;  %v5839_v14 = vld [vmem:[#allocation1 + $0x10b] ss:$16 sm:%s5838_s26]  }
 0x18a   :  { %v5597_v19 = vld [vmem:[#allocation1 + $0x58c] ss:$16 sm:%s15498_s16]   ;;  %s15504_s2 = sld [smem:[#allocation115_spill]]  ;;  %v5258_v40 = vsel %vm3846_vm0, %v5256_v16, %v5253_v15  ;;  %s12993_s16 = smov 192  ;;  %v5747_v29 = vld [vmem:[#allocation1 + $0x8b] ss:$16 sm:%s12918_s20]  }
 0x18b   :  { %v5600_v20 = vld [vmem:[#allocation1 + $0x58c] ss:$16 sm:%s15499_s22]   ;;  %s15505_s5 = sld [smem:[#allocation119_spill]]  ;;  %s12995_s22 = smov 3  ;;  %v5770_v30 = vld [vmem:[#allocation1 + $0x28b] ss:$16 sm:%s12971_s29]  }
 0x18c   :  { %v5620_v21 = vld [vmem:[#allocation1 + $0x78c] ss:$16 sm:%s15500_s21]   ;;  %s15506_s8 = sld [smem:[#allocation127_spill]]  ;;  %v5602_v47 = vsel %vm3846_vm0, %v5600_v20, %v5597_v19  ;;  %s5874_s20 = smov 12 }
 0x18d   :  { %v5623_v22 = vld [vmem:[#allocation1 + $0x78c] ss:$16 sm:%s15501_s30]   ;;  %s15507_s6 = sld [smem:[#allocation129_spill]]  ;;  %s11445_s30 = smov 88  }
 0x18e   :  { %s15508_s3 = sld [smem:[#allocation128_spill]]  ;;  %v5238_v39 = vld [vmem:[#allocation1 + $0x58d] ss:$16 sm:%s15502_s13]   ;;  %v5625_v49 = vsel %vm3846_vm0, %v5623_v22, %v5620_v21  ;;  %10927 = vrot.lane.b32.xlu0 %v10926_v55, %s11445_s30  ;;  %s13004_s13 = smov 48  ;;  %v5403_v22 = vld [vmem:[#allocation1 + $0x28c] ss:$16 sm:%s12754_s15]  }
 0x18f   :  { %s15509_s7 = sld [smem:[#allocation130_spill]]  ;;  %v5261_v41 = vld [vmem:[#allocation1 + $0x78d] ss:$16 sm:%s15503_s4]   ;;  %v5240_v57 = vsel %vm3850_vm1, %v5238_v39, %v5235_v38  ;;  %s5833_s4 = smov 48  ;;  %v5505_v35 = vld [vmem:[#allocation1 + $0x50c] ss:$16 sm:%s12973_s11]   ;;  %v5744_v38 = vsel %vm3850_vm1, %v5742_v9, %v5739_v17  ;;  %v5767_v39 = vsel %vm3850_vm1, %v5765_v11, %v5762_v24 }
 0x190   :  { %s15510_s12 = sld [smem:[#allocation42_spill]]  ;;  %v5243_v44 = vld [vmem:[#allocation1 + $0x58d] ss:$16 sm:%s15504_s2]   ;;  %v5263_v51 = vsel %vm3850_vm1, %v5261_v41, %v5258_v40  ;;  %v5834_v13 = vld [vmem:[#allocation1 + $0x10b] ss:$16 sm:%s5833_s4]   ;;  %s5861_s15 = smov 192  ;;  %v5749_v53 = vsel %vm3854_vm2, %v5747_v29, %v5744_v38 }
 0x191   :  { %s15511_s1 = sld [smem:[#allocation48_spill]]  ;;  %v5266_v45 = vld [vmem:[#allocation1 + $0x78d] ss:$16 sm:%s15505_s5]   ;;  %v5245_v2 = vsel %vm3854_vm2, %v5243_v44, %v5240_v57  ;;  %s5848_s5 = smov 3  ;;  %v5836_v25 = vsel %vm3850_vm1, %v5834_v13, %v5831_v18  ;;  %v5862_v32 = vld [vmem:[#allocation1 + $0x30b] ss:$16 sm:%s5861_s15]  }
 0x192   :  { %s15512_s25 = sld [smem:[#allocation52_spill]]  ;;  %v5605_v48 = vld [vmem:[#allocation1 + $0x58c] ss:$16 sm:%s15506_s8]   ;;  %v5268_v3 = vsel %vm3854_vm2, %v5266_v45, %v5263_v51  ;;  %v5849_v19 = vld [vmem:[#allocation1 + $0x30b] ss:$16 sm:%s5848_s5]   ;;  %s5851_s8 = smov 12  ;;  %v5841_v31 = vsel %vm3854_vm2, %v5839_v14, %v5836_v25 }
 0x193   :  { %v5628_v50 = vld [vmem:[#allocation1 + $0x78c] ss:$16 sm:%s15507_s6]   ;;  %s15513_s24 = sld [smem:[#allocation53_spill]]  ;;  %v5607_v59 = vsel %vm3850_vm1, %v5605_v48, %v5602_v47  ;;  %s5856_s6 = smov 48  ;;  %v10876_v20 = vpack.i.bf16 %v5268_v3, %v5245_v2  ;;  %v5852_v27 = vld [vmem:[#allocation1 + $0x30b] ss:$16 sm:%s5851_s8]  }
 0x194   :  { %v5610_v54 = vld [vmem:[#allocation1 + $0x58c] ss:$16 sm:%s15508_s3]   ;;  %s15514_s21 = sld [smem:[#allocation49_spill]]  ;;  %v5630_v61 = vsel %vm3850_vm1, %v5628_v50, %v5625_v49  ;;  %v5857_v23 = vld [vmem:[#allocation1 + $0x30b] ss:$16 sm:%s5856_s6]   ;;  %v5854_v26 = vsel %vm3846_vm0, %v5852_v27, %v5849_v19  ;;  %s13033_s17 = smov 48 }
 0x195   :  { %v5633_v46 = vld [vmem:[#allocation1 + $0x78c] ss:$16 sm:%s15509_s7]   ;;  %v5612_v8 = vsel %vm3854_vm2, %v5610_v54, %v5607_v59  ;;  %s15515_s2 = sld [smem:[#allocation50_spill]]  ;;  %v5859_v37 = vsel %vm3850_vm1, %v5857_v23, %v5854_v26  ;;  %s13040_s3 = smov 192  ;;  %10877 = vrot.lane.b32.xlu2 %v10876_v20, %s11443_s14  ;;  %v5872_v44 = vld [vmem:[#allocation1 + $0x50b] ss:$16 sm:%s5871_s9]   ;;  %v5772_v54 = vsel %vm3854_vm2, %v5770_v30, %v5767_v39 }
 0x196   :  { %v5367_v56 = vld [vmem:[#allocation1 + $0x8c] ss:$16 sm:%s15510_s12]   ;;  %v5635_v10 = vsel %vm3854_vm2, %v5633_v46, %v5630_v61  ;;  %s5894_s7 = smov 3  ;;  %v5864_v42 = vsel %vm3854_vm2, %v5862_v32, %v5859_v37  ;;  %s5897_s29 = smov 12  ;;  %v5875_v45 = vld [vmem:[#allocation1 + $0x50b] ss:$16 sm:%s5874_s20]   ;;  %v13068_v46 = vpop.permute.xlu1 %10772  ;;  %v10931_v1 = vpack.i.bf16 %v5772_v54, %v5749_v53 }
 0x197   :  { %v5370_v58 = vld [vmem:[#allocation1 + $0x8c] ss:$16 sm:%s15511_s1]   ;;  %v10916_v28 = vpack.i.bf16 %v5635_v10, %v5612_v8  ;;  %s13047_s11 = smov 48  ;;  %v10941_v43 = vpack.i.bf16 %v5864_v42, %v5841_v31  ;;  %s13050_s14 = smov 192  ;;  %v5895_v49 = vld [vmem:[#allocation1 + $0x70b] ss:$16 sm:%s5894_s7]   ;;  %v5877_v61 = vsel %vm3846_vm0, %v5875_v45, %v5872_v44 }
 0x198   :  { %v5390_v60 = vld [vmem:[#allocation1 + $0x28c] ss:$16 sm:%s15512_s25]   ;;  %v5372_v15 = vsel %vm3846_vm0, %v5370_v58, %v5367_v56  ;;  %s13052_s12 = smov 3  ;;  %v5898_v50 = vld [vmem:[#allocation1 + $0x70b] ss:$16 sm:%s5897_s29]   ;;  %s13057_s1 = smov 12 }
 0x199   :  { %v5393_v62 = vld [vmem:[#allocation1 + $0x28c] ss:$16 sm:%s15513_s24]   ;;  %10917 = vrot.lane.b32.xlu1 %v10916_v28, %s11444_s0  ;;  %s13059_s25 = smov 48  ;;  %10942 = vrot.lane.b32.xlu0 %v10941_v43, %s11445_s30  ;;  %s13066_s24 = smov 192  ;;  %v5900_v63 = vsel %vm3846_vm0, %v5898_v50, %v5895_v49  ;;  %v5903_v0 = vld [vmem:[#allocation1 + $0x70b] ss:$16 sm:%s13047_s11]   ;;  %v13100_v28 = vpop.permute.xlu2 %10782 }
 0x19a   :  { %v5375_v4 = vld [vmem:[#allocation1 + $0x8c] ss:$16 sm:%s15514_s21]   ;;  %v5395_v16 = vsel %vm3846_vm0, %v5393_v62, %v5390_v60  ;;  %v5880_v62 = vld [vmem:[#allocation1 + $0x50b] ss:$16 sm:%s13033_s17]   ;;  %s5963_s21 = smov 3  ;;  %s5986_s23 = smov 3 }
 0x19b   :  { %v5380_v21 = vld [vmem:[#allocation1 + $0x8c] ss:$16 sm:%s15515_s2]   ;;  %v5377_v33 = vsel %vm3850_vm1, %v5375_v4, %v5372_v15  ;;  %v5400_v34 = vsel %vm3850_vm1, %v5398_v5, %v5395_v16  ;;  %v5885_v2 = vld [vmem:[#allocation1 + $0x50b] ss:$16 sm:%s13040_s3]   ;;  %v5882_v13 = vsel %vm3850_vm1, %v5880_v62, %v5877_v61  ;;  %v5905_v15 = vsel %vm3850_vm1, %v5903_v0, %v5900_v63  ;;  %s5989_s28 = smov 12  ;;  %s5994_s4 = smov 48 }
 0x19c   :  { %v5508_v36 = vld [vmem:[#allocation1 + $0x50c] ss:$16 sm:%s12984_s27]   ;;  %v5382_v47 = vsel %vm3854_vm2, %v5380_v21, %v5377_v33  ;;  %v5405_v48 = vsel %vm3854_vm2, %v5403_v22, %v5400_v34  ;;  %s5664_s27 = smov 3  ;;  %v5908_v3 = vld [vmem:[#allocation1 + $0x70b] ss:$16 sm:%s13050_s14]   ;;  %s5999_s2 = smov 192  ;;  %v5887_v29 = vsel %vm3854_vm2, %v5885_v2, %v5882_v13 }
 0x19d   :  { %v5528_v40 = vld [vmem:[#allocation1 + $0x70c] ss:$16 sm:%s12995_s22]   ;;  %v5510_v55 = vsel %vm3846_vm0, %v5508_v36, %v5505_v35  ;;  %s13074_s22 = smov 48  ;;  %v10891_v58 = vpack.i.bf16 %v5405_v48, %v5382_v47  ;;  %v5964_v4 = vld [vmem:[#allocation1 + $0x58b] ss:$16 sm:%s5963_s21]   ;;  %s6009_s26 = smov 3  ;;  %v5910_v30 = vsel %vm3854_vm2, %v5908_v3, %v5905_v15 }
 0x19e   :  { %v5531_v41 = vld [vmem:[#allocation1 + $0x70c] ss:$16 sm:%s13002_s10]   ;;  %s5966_s10 = smov 12  ;;  %v5643_v7 = vld [vmem:[#allocation1 + $0xb] ss:$16 sm:%s13052_s12]   ;;  %s6012_s5 = smov 12  ;;  %v10946_v44 = vpack.i.bf16 %v5910_v30, %v5887_v29 }
 0x19f   :  { %v5513_v57 = vld [vmem:[#allocation1 + $0x50c] ss:$16 sm:%s12986_s19]   ;;  %v5533_v51 = vsel %vm3846_vm0, %v5531_v41, %v5528_v40  ;;  %s5667_s19 = smov 12  ;;  %v5646_v8 = vld [vmem:[#allocation1 + $0xb] ss:$16 sm:%s13057_s1]   ;;  %10892 = vrot.lane.b32.xlu2 %v10891_v58, %s11444_s0  ;;  %s6017_s8 = smov 48 }
 0x1a0   :  { %v5536_v56 = vld [vmem:[#allocation1 + $0x70c] ss:$16 sm:%s13004_s13]   ;;  %s5971_s13 = smov 48  ;;  %v5515_v5 = vsel %vm3850_vm1, %v5513_v57, %v5510_v55  ;;  %v5665_v10 = vld [vmem:[#allocation1 + $0x20b] ss:$16 sm:%s5664_s27]   ;;  %s6022_s6 = smov 192  ;;  %v5648_v33 = vsel %vm3846_vm0, %v5646_v8, %v5643_v7 }
 0x1a1   :  { %v5518_v60 = vld [vmem:[#allocation1 + $0x50c] ss:$16 sm:%s12993_s16]   ;;  %s13082_s16 = smov 192  ;;  %v5538_v6 = vsel %vm3850_vm1, %v5536_v56, %v5533_v51  ;;  %v5668_v9 = vld [vmem:[#allocation1 + $0x20b] ss:$16 sm:%s5667_s19]   ;;  %10932 = vrot.lane.b32.xlu1 %v10931_v1, %s11445_s30  ;;  %s6031_s15 = smov 3 }
 0x1a2   :  { %v5541_v59 = vld [vmem:[#allocation1 + $0x70c] ss:$16 sm:%s13009_s18]   ;;  %v5967_v11 = vld [vmem:[#allocation1 + $0x58b] ss:$16 sm:%s5966_s10]   ;;  %s5976_s18 = smov 192  ;;  %v5520_v22 = vsel %vm3854_vm2, %v5518_v60, %v5515_v5  ;;  %v5670_v34 = vsel %vm3846_vm0, %v5668_v9, %v5665_v10  ;;  %s6034_s9 = smov 12 }
 0x1a3   :  { %v5972_v12 = vld [vmem:[#allocation1 + $0x58b] ss:$16 sm:%s5971_s13]   ;;  %v5969_v16 = vsel %vm3846_vm0, %v5967_v11, %v5964_v4  ;;  %v5543_v17 = vsel %vm3854_vm2, %v5541_v59, %v5538_v6  ;;  %v6010_v23 = vld [vmem:[#allocation1 + $0xa] ss:$16 sm:%s6009_s26]   ;;  %s6039_s20 = smov 48  ;;  %s6044_s17 = smov 192 }
 0x1a4   :  { %v5977_v18 = vld [vmem:[#allocation1 + $0x58b] ss:$16 sm:%s5976_s18]   ;;  %v5974_v19 = vsel %vm3850_vm1, %v5972_v12, %v5969_v16  ;;  %v6013_v32 = vld [vmem:[#allocation1 + $0xa] ss:$16 sm:%s6012_s5]   ;;  %v10906_v38 = vpack.i.bf16 %v5543_v17, %v5520_v22  ;;  %s5779_s3 = smov 3  ;;  %s5782_s7 = smov 12 }
 0x1a5   :  { %v5987_v14 = vld [vmem:[#allocation1 + $0x78b] ss:$16 sm:%s5986_s23]   ;;  %v5979_v24 = vsel %vm3854_vm2, %v5977_v18, %v5974_v19  ;;  %v6018_v37 = vld [vmem:[#allocation1 + $0xa] ss:$16 sm:%s6017_s8]   ;;  %v6015_v41 = vsel %vm3846_vm0, %v6013_v32, %v6010_v23  ;;  %s5787_s29 = smov 48  ;;  %s13117_s11 = smov 192 }
 0x1a6   :  { %v5990_v20 = vld [vmem:[#allocation1 + $0x78b] ss:$16 sm:%s5989_s28]   ;;  %v6032_v42 = vld [vmem:[#allocation1 + $0x20a] ss:$16 sm:%s6031_s15]   ;;  %v6020_v55 = vsel %vm3850_vm1, %v6018_v37, %v6015_v41  ;;  %s5802_s14 = smov 3  ;;  %s5805_s12 = smov 12 }
 0x1a7   :  { %v5995_v21 = vld [vmem:[#allocation1 + $0x78b] ss:$16 sm:%s5994_s4]   ;;  %v5992_v25 = vsel %vm3846_vm0, %v5990_v20, %v5987_v14  ;;  %v6035_v43 = vld [vmem:[#allocation1 + $0x20a] ss:$16 sm:%s6034_s9]   ;;  %10907 = vrot.lane.b32.xlu2 %v10906_v38, %s11444_s0  ;;  %s5810_s0 = smov 48  ;;  %s5815_s1 = smov 192 }
 0x1a8   :  { %v6000_v27 = vld [vmem:[#allocation1 + $0x78b] ss:$16 sm:%s5999_s2]   ;;  %v5997_v26 = vsel %vm3850_vm1, %v5995_v21, %v5992_v25  ;;  %v6037_v47 = vsel %vm3846_vm0, %v6035_v43, %v6032_v42  ;;  %v6040_v48 = vld [vmem:[#allocation1 + $0x20a] ss:$16 sm:%s6039_s20]   ;;  %s6108_s27 = smov 48  ;;  %s6113_s19 = smov 192 }
 0x1a9   :  { %v5651_v31 = vld [vmem:[#allocation1 + $0xb] ss:$16 sm:%s13059_s25]   ;;  %v6002_v36 = vsel %vm3854_vm2, %v6000_v27, %v5997_v26  ;;  %v6023_v53 = vld [vmem:[#allocation1 + $0xa] ss:$16 sm:%s6022_s6]   ;;  %v6042_v57 = vsel %vm3850_vm1, %v6040_v48, %v6037_v47  ;;  %10947 = vrot.lane.b32.xlu1 %v10946_v44, %s11445_s30  ;;  %s6100_s25 = smov 3  ;;  %s6131_s21 = smov 48  ;;  %v10764_v48 = vunpack.i.l.bf16 %v13061_v52  ;;  %v10765_v52 = vunpack.i.h.bf16 %v13061_v52 }
 0x1aa   :  { %v5673_v35 = vld [vmem:[#allocation1 + $0x20b] ss:$16 sm:%s13074_s22]   ;;  %v10956_v40 = vpack.i.bf16 %v6002_v36, %v5979_v24  ;;  %v5653_v49 = vsel %vm3850_vm1, %v5651_v31, %v5648_v33  ;;  %v6045_v54 = vld [vmem:[#allocation1 + $0x20a] ss:$16 sm:%s6044_s17]   ;;  %v6025_v0 = vsel %vm3854_vm2, %v6023_v53, %v6020_v55  ;;  %s6123_s22 = smov 3  ;;  %s6136_s10 = smov 192 }
 0x1ab   :  { %v5656_v39 = vld [vmem:[#allocation1 + $0xb] ss:$16 sm:%s13066_s24]   ;;  %v5675_v50 = vsel %vm3850_vm1, %v5673_v35, %v5670_v34  ;;  %s6103_s24 = smov 12  ;;  %v6047_v1 = vsel %vm3854_vm2, %v6045_v54, %v6042_v57  ;;  %v6101_v2 = vld [vmem:[#allocation1 + $0x8a] ss:$16 sm:%s6100_s25]   ;;  %s6146_s13 = smov 3 }
 0x1ac   :  { %v5678_v45 = vld [vmem:[#allocation1 + $0x20b] ss:$16 sm:%s13082_s16]   ;;  %10957 = vrot.lane.b32.xlu0 %v10956_v40, %s11445_s30  ;;  %v5658_v59 = vsel %vm3854_vm2, %v5656_v39, %v5653_v49  ;;  %v6104_v3 = vld [vmem:[#allocation1 + $0x8a] ss:$16 sm:%s6103_s24]   ;;  %s6126_s16 = smov 12  ;;  %v10961_v16 = vpack.i.bf16 %v6047_v1, %v6025_v0  ;;  %s6149_s18 = smov 12  ;;  %v10774_v1 = vunpack.i.l.bf16 %v13068_v46  ;;  %v10775_v46 = vunpack.i.h.bf16 %v13068_v46 }
 0x1ad   :  { %v5780_v51 = vld [vmem:[#allocation1 + $0x48b] ss:$16 sm:%s5779_s3]   ;;  %v5680_v61 = vsel %vm3854_vm2, %v5678_v45, %v5675_v50  ;;  %v6106_v6 = vsel %vm3846_vm0, %v6104_v3, %v6101_v2  ;;  %v6109_v7 = vld [vmem:[#allocation1 + $0x8a] ss:$16 sm:%s6108_s27]   ;;  %s6154_s23 = smov 48  ;;  %s6159_s28 = smov 192 }
 0x1ae   :  { %v5783_v56 = vld [vmem:[#allocation1 + $0x48b] ss:$16 sm:%s5782_s7]   ;;  %v6114_v8 = vld [vmem:[#allocation1 + $0x8a] ss:$16 sm:%s6113_s19]   ;;  %v10921_v10 = vpack.i.bf16 %v5680_v61, %v5658_v59  ;;  %v6111_v12 = vsel %vm3850_vm1, %v6109_v7, %v6106_v6  ;;  %s6169_s4 = smov 3  ;;  %s6172_s2 = smov 12 }
 0x1af   :  { %v5803_v58 = vld [vmem:[#allocation1 + $0x68b] ss:$16 sm:%s5802_s14]   ;;  %v5785_v4 = vsel %vm3846_vm0, %v5783_v56, %v5780_v51  ;;  %v6124_v13 = vld [vmem:[#allocation1 + $0x28a] ss:$16 sm:%s6123_s22]   ;;  %v6116_v18 = vsel %vm3854_vm2, %v6114_v8, %v6111_v12  ;;  %s6177_s26 = smov 48  ;;  %s6182_s5 = smov 192 }
 0x1b0   :  { %v5806_v60 = vld [vmem:[#allocation1 + $0x68b] ss:$16 sm:%s5805_s12]   ;;  %v6127_v15 = vld [vmem:[#allocation1 + $0x28a] ss:$16 sm:%s6126_s16]   ;;  %10922 = vrot.lane.b32.xlu2 %v10921_v10, %s11445_s30  ;;  %s15166_s8 = smov 80   ;;  %s3842_s6 = smov 3 }
 0x1b1   :  { %v5788_v62 = vld [vmem:[#allocation1 + $0x48b] ss:$16 sm:%s5787_s29]   ;;  %v5808_v5 = vsel %vm3846_vm0, %v5806_v60, %v5803_v58  ;;  %v6129_v14 = vsel %vm3846_vm0, %v6127_v15, %v6124_v13  ;;  %v6132_v19 = vld [vmem:[#allocation1 + $0x28a] ss:$16 sm:%s6131_s21]   ;;  %10962 = vrot.lane.b32.xlu1 %v10961_v16, %s15166_s8  ;;  %s3844_s15 = smov 12  ;;  %s3848_s9 = smov 48 }
 0x1b2   :  { %v5811_v63 = vld [vmem:[#allocation1 + $0x68b] ss:$16 sm:%s5810_s0]   ;;  %v6137_v20 = vld [vmem:[#allocation1 + $0x28a] ss:$16 sm:%s6136_s10]   ;;  %v5790_v21 = vsel %vm3850_vm1, %v5788_v62, %v5785_v4  ;;  %v6134_v17 = vsel %vm3850_vm1, %v6132_v19, %v6129_v14  ;;  %v3843_v41 = vld [vmem:[#allocation1] ss:$16 sm:%s3842_s6]   ;;  %v10784_v14 = vunpack.i.l.bf16 %v13100_v28  ;;  %v10785_v28 = vunpack.i.h.bf16 %v13100_v28 }
 0x1b3   :  { %v5793_v9 = vld [vmem:[#allocation1 + $0x48b] ss:$16 sm:%s13117_s11]   ;;  %v5813_v22 = vsel %vm3850_vm1, %v5811_v63, %v5808_v5  ;;  %v6147_v24 = vld [vmem:[#allocation1 + $0x48a] ss:$16 sm:%s6146_s13]   ;;  %v6139_v27 = vsel %vm3854_vm2, %v6137_v20, %v6134_v17  ;;  %v3845_v42 = vld [vmem:[#allocation1] ss:$16 sm:%s3844_s15]  }
 0x1b4   :  { %v5816_v11 = vld [vmem:[#allocation1 + $0x68b] ss:$16 sm:%s5815_s1]   ;;  %v6150_v25 = vld [vmem:[#allocation1 + $0x48a] ss:$16 sm:%s6149_s18]   ;;  %v10971_v31 = vpack.i.bf16 %v6139_v27, %v6116_v18  ;;  %v5795_v34 = vsel %vm3854_vm2, %v5793_v9, %v5790_v21  ;;  %s3852_s20 = smov 192  ;;  %v3847_v44 = vsel %vm3846_vm0, %v3845_v42, %v3843_v41  ;;  %s3922_s17 = smov 3 }
 0x1b5   :  { %v6152_v23 = vsel %vm3846_vm0, %v6150_v25, %v6147_v24  ;;  %v6155_v29 = vld [vmem:[#allocation1 + $0x48a] ss:$16 sm:%s6154_s23]   ;;  %v5818_v35 = vsel %vm3854_vm2, %v5816_v11, %v5813_v22  ;;  %v3849_v45 = vld [vmem:[#allocation1] ss:$16 sm:%s3848_s9]   ;;  %s3925_s3 = smov 12  ;;  %s3930_s7 = smov 48 }
 0x1b6   :  { %v6160_v30 = vld [vmem:[#allocation1 + $0x48a] ss:$16 sm:%s6159_s28]   ;;  %v6157_v26 = vsel %vm3850_vm1, %v6155_v29, %v6152_v23  ;;  %10972 = vrot.lane.b32.xlu0 %v10971_v31, %s15166_s8  ;;  %v3853_v47 = vld [vmem:[#allocation1] ss:$16 sm:%s3852_s20]   ;;  %v10936_v49 = vpack.i.bf16 %v5818_v35, %v5795_v34  ;;  %v3851_v50 = vsel %vm3850_vm1, %v3849_v45, %v3847_v44  ;;  %s3935_s29 = smov 192  ;;  %s3859_s11 = smov 3 }
 0x1b7   :  { %v6170_v32 = vld [vmem:[#allocation1 + $0x68a] ss:$16 sm:%s6169_s4]   ;;  %v6162_v39 = vsel %vm3854_vm2, %v6160_v30, %v6157_v26  ;;  %v3923_v53 = vld [vmem:[#allocation1 + $0x200] ss:$16 sm:%s3922_s17]   ;;  %v3855_v57 = vsel %vm3854_vm2, %v3853_v47, %v3851_v50  ;;  %s3862_s14 = smov 12  ;;  %s3867_s12 = smov 48 }
 0x1b8   :  { %v6173_v33 = vld [vmem:[#allocation1 + $0x68a] ss:$16 sm:%s6172_s2]   ;;  %v3926_v54 = vld [vmem:[#allocation1 + $0x200] ss:$16 sm:%s3925_s3]   ;;  %3857 = vst.msk [vmem:[#allocation0] sm:$0xff] %vm3856_vm3, %v3855_v57   ;;  %s3872_s0 = smov 192  ;;  %10937 = vrot.lane.b32.xlu2 %v10936_v49, %s11445_s30 }
 0x1b9   :  { %v6175_v36 = vsel %vm3846_vm0, %v6173_v33, %v6170_v32  ;;  %v6178_v37 = vld [vmem:[#allocation1 + $0x68a] ss:$16 sm:%s6177_s26]   ;;  %v3928_v51 = vsel %vm3846_vm0, %v3926_v54, %v3923_v53  ;;  %v3931_v56 = vld [vmem:[#allocation1 + $0x200] ss:$16 sm:%s3930_s7]   ;;  %4194 = vst.msk [vmem:[#allocation0] sm:$0xff] %vm4193_vm4, %v10764_v48   ;;  %s3943_s1 = smov 3 }
 0x1ba   :  { %v6183_v38 = vld [vmem:[#allocation1 + $0x68a] ss:$16 sm:%s6182_s5]   ;;  %v6180_v40 = vsel %vm3850_vm1, %v6178_v37, %v6175_v36  ;;  %v3936_v58 = vld [vmem:[#allocation1 + $0x200] ss:$16 sm:%s3935_s29]   ;;  %v3933_v60 = vsel %vm3850_vm1, %v3931_v56, %v3928_v51  ;;  %s3946_s25 = smov 12  ;;  %s3951_s24 = smov 48  ;;  %v13189_v36 = vpop.permute.xlu0 %10767 }
 0x1bb   :  { %v6185_v43 = vsel %vm3854_vm2, %v6183_v38, %v6180_v40  ;;  %v3860_v59 = vld [vmem:[#allocation1 + $0x80] ss:$16 sm:%s3859_s11]   ;;  %v3938_v62 = vsel %vm3854_vm2, %v3936_v58, %v3933_v60  ;;  %s3956_s27 = smov 192  ;;  %s3880_s19 = smov 3 }
 0x1bc   :  { %v10976_v55 = vpack.i.bf16 %v6185_v43, %v6162_v39  ;;  %v3863_v61 = vld [vmem:[#allocation1 + $0x80] ss:$16 sm:%s3862_s14]   ;;  %3941 = vst.msk [vmem:[#allocation0 + $0x20] sm:$0xff] %vm3856_vm3, %v3938_v62   ;;  %s3883_s22 = smov 12  ;;  %s3888_s16 = smov 48 }
 0x1bd   :  { %v3865_v63 = vsel %vm3846_vm0, %v3863_v61, %v3860_v59  ;;  %v3868_v0 = vld [vmem:[#allocation1 + $0x80] ss:$16 sm:%s3867_s12]   ;;  %4217 = vst.msk [vmem:[#allocation0 + $0x20] sm:$0xff] %vm4193_vm4, %v10765_v52   ;;  %s3893_s21 = smov 192  ;;  %s3964_s10 = smov 3 }
 0x1be   :  { %v3870_v2 = vsel %vm3850_vm1, %v3868_v0, %v3865_v63  ;;  %v3873_v3 = vld [vmem:[#allocation1 + $0x80] ss:$16 sm:%s3872_s0]   ;;  %10977 = vrot.lane.b32.xlu1 %v10976_v55, %s15166_s8  ;;  %s3967_s13 = smov 12  ;;  %s3972_s18 = smov 48 }
 0x1bf   :  { %v3875_v4 = vsel %vm3854_vm2, %v3873_v3, %v3870_v2  ;;  %v3944_v5 = vld [vmem:[#allocation1 + $0x280] ss:$16 sm:%s3943_s1]   ;;  %s3977_s23 = smov 192  ;;  %s5917_s28 = smov 3 }
 0x1c0   :  { %v3947_v6 = vld [vmem:[#allocation1 + $0x280] ss:$16 sm:%s3946_s25]   ;;  %3878 = vst.msk [vmem:[#allocation0 + $0x8] sm:$0xff] %vm3856_vm3, %v3875_v4   ;;  %s5920_s4 = smov 12  ;;  %v5918_v23 = vld [vmem:[#allocation1 + $0x18b] ss:$16 sm:%s5917_s28]  }
 0x1c1   :  { %v3949_v7 = vsel %vm3846_vm0, %v3947_v6, %v3944_v5  ;;  %v3952_v8 = vld [vmem:[#allocation1 + $0x280] ss:$16 sm:%s3951_s24]   ;;  %4286 = vst.msk [vmem:[#allocation0 + $0x8] sm:$0xff] %vm4193_vm4, %v10774_v1   ;;  %v5921_v29 = vld [vmem:[#allocation1 + $0x18b] ss:$16 sm:%s5920_s4]   ;;  %s5925_s2 = smov 48 }
 0x1c2   :  { %v3957_v10 = vld [vmem:[#allocation1 + $0x280] ss:$16 sm:%s3956_s27]   ;;  %v3954_v9 = vsel %vm3850_vm1, %v3952_v8, %v3949_v7  ;;  %v5923_v31 = vsel %vm3846_vm0, %v5921_v29, %v5918_v23  ;;  %v5926_v26 = vld [vmem:[#allocation1 + $0x18b] ss:$16 sm:%s5925_s2]   ;;  %s5930_s26 = smov 192  ;;  %s5940_s5 = smov 3 }
 0x1c3   :  { %v3881_v11 = vld [vmem:[#allocation1 + $0x100] ss:$16 sm:%s3880_s19]   ;;  %v3959_v12 = vsel %vm3854_vm2, %v3957_v10, %v3954_v9  ;;  %v5928_v32 = vsel %vm3850_vm1, %v5926_v26, %v5923_v31  ;;  %v5931_v33 = vld [vmem:[#allocation1 + $0x18b] ss:$16 sm:%s5930_s26]   ;;  %s5943_s6 = smov 12  ;;  %s5948_s15 = smov 48 }
 0x1c4   :  { %v3884_v13 = vld [vmem:[#allocation1 + $0x100] ss:$16 sm:%s3883_s22]   ;;  %3962 = vst.msk [vmem:[#allocation0 + $0x28] sm:$0xff] %vm3856_vm3, %v3959_v12   ;;  %v5941_v34 = vld [vmem:[#allocation1 + $0x38b] ss:$16 sm:%s5940_s5]   ;;  %s5953_s9 = smov 192  ;;  %v5933_v37 = vsel %vm3854_vm2, %v5931_v33, %v5928_v32 }
 0x1c5   :  { %v3889_v15 = vld [vmem:[#allocation1 + $0x100] ss:$16 sm:%s3888_s16]   ;;  %v3886_v16 = vsel %vm3846_vm0, %v3884_v13, %v3881_v11  ;;  %4309 = vst.msk [vmem:[#allocation0 + $0x28] sm:$0xff] %vm4193_vm4, %v10775_v46   ;;  %v5944_v35 = vld [vmem:[#allocation1 + $0x38b] ss:$16 sm:%s5943_s6]   ;;  %s6238_s20 = smov 3 }
 0x1c6   :  { %v3894_v18 = vld [vmem:[#allocation1 + $0x100] ss:$16 sm:%s3893_s21]   ;;  %v3891_v19 = vsel %vm3850_vm1, %v3889_v15, %v3886_v16  ;;  %v5946_v38 = vsel %vm3846_vm0, %v5944_v35, %v5941_v34  ;;  %v5949_v39 = vld [vmem:[#allocation1 + $0x38b] ss:$16 sm:%s5948_s15]   ;;  %s6241_s17 = smov 12  ;;  %s6246_s3 = smov 48 }
 0x1c7   :  { %v3965_v20 = vld [vmem:[#allocation1 + $0x300] ss:$16 sm:%s3964_s10]   ;;  %v3896_v22 = vsel %vm3854_vm2, %v3894_v18, %v3891_v19  ;;  %v5954_v40 = vld [vmem:[#allocation1 + $0x38b] ss:$16 sm:%s5953_s9]   ;;  %v5951_v41 = vsel %vm3850_vm1, %v5949_v39, %v5946_v38  ;;  %v6239_v42 = vld [vmem:[#allocation1 + $0x50a] ss:$16 sm:%s6238_s20]  }
 0x1c8   :  { %v3968_v21 = vld [vmem:[#allocation1 + $0x300] ss:$16 sm:%s3967_s13]   ;;  %3899 = vst.msk [vmem:[#allocation0 + $0x10] sm:$0xff] %vm3856_vm3, %v3896_v22   ;;  %v6242_v43 = vld [vmem:[#allocation1 + $0x50a] ss:$16 sm:%s6241_s17]   ;;  %s6251_s7 = smov 192  ;;  %v5956_v44 = vsel %vm3854_vm2, %v5954_v40, %v5951_v41 }
 0x1c9   :  { %v3970_v17 = vsel %vm3846_vm0, %v3968_v21, %v3965_v20  ;;  %v3973_v24 = vld [vmem:[#allocation1 + $0x300] ss:$16 sm:%s3972_s18]   ;;  %4378 = vst.msk [vmem:[#allocation0 + $0x10] sm:$0xff] %vm4193_vm4, %v10784_v14   ;;  %v6244_v45 = vsel %vm3846_vm0, %v6242_v43, %v6239_v42  ;;  %v6247_v47 = vld [vmem:[#allocation1 + $0x50a] ss:$16 sm:%s6246_s3]   ;;  %s6261_s29 = smov 3  ;;  %v10951_v49 = vpack.i.bf16 %v5956_v44, %v5933_v37 }
 0x1ca   :  { %v3978_v25 = vld [vmem:[#allocation1 + $0x300] ss:$16 sm:%s3977_s23]   ;;  %v3975_v27 = vsel %vm3850_vm1, %v3973_v24, %v3970_v17  ;;  %v6252_v48 = vld [vmem:[#allocation1 + $0x50a] ss:$16 sm:%s6251_s7]   ;;  %s6264_s11 = smov 12  ;;  %v6249_v50 = vsel %vm3850_vm1, %v6247_v47, %v6244_v45  ;;  %s6269_s14 = smov 48 }
 0x1cb   :  { %v3980_v30 = vsel %vm3854_vm2, %v3978_v25, %v3975_v27  ;;  %v6262_v53 = vld [vmem:[#allocation1 + $0x70a] ss:$16 sm:%s6261_s29]   ;;  %s6274_s12 = smov 192  ;;  %v6254_v55 = vsel %vm3854_vm2, %v6252_v48, %v6249_v50  ;;  %s6284_s0 = smov 3  ;;  %10952 = vrot.lane.b32.xlu2 %v10951_v49, %s11445_s30  ;;  %v13312_v48 = vpop.permute.xlu1 %10777 }
 0x1cc   :  { %3983 = vst.msk [vmem:[#allocation0 + $0x30] sm:$0xff] %vm3856_vm3, %v3980_v30   ;;  %v6265_v54 = vld [vmem:[#allocation1 + $0x70a] ss:$16 sm:%s6264_s11]   ;;  %s6287_s1 = smov 12  ;;  %s15516_s27 = sld [smem:[#allocation131_spill]] }
 0x1cd   :  { %4401 = vst.msk [vmem:[#allocation0 + $0x30] sm:$0xff] %vm4193_vm4, %v10785_v28   ;;  %v6267_v57 = vsel %vm3846_vm0, %v6265_v54, %v6262_v53  ;;  %v6270_v52 = vld [vmem:[#allocation1 + $0x70a] ss:$16 sm:%s6269_s14]   ;;  %s6292_s30 = smov 48  ;;  %s6297_s19 = smov 192 }
 0x1ce   :  { %v6275_v51 = vld [vmem:[#allocation1 + $0x70a] ss:$16 sm:%s6274_s12]   ;;  %v6272_v60 = vsel %vm3850_vm1, %v6270_v52, %v6267_v57  ;;  %s6307_s21 = smov 3  ;;  %s6310_s10 = smov 12 }
 0x1cf   :  { %v6285_v59 = vld [vmem:[#allocation1 + $0x18a] ss:$16 sm:%s6284_s0]   ;;  %v6277_v0 = vsel %vm3854_vm2, %v6275_v51, %v6272_v60  ;;  %s6315_s23 = smov 48  ;;  %s6320_s28 = smov 192 }
 0x1d0   :  { %v6288_v61 = vld [vmem:[#allocation1 + $0x18a] ss:$16 sm:%s6287_s1]   ;;  %v10986_v6 = vpack.i.bf16 %v6277_v0, %v6254_v55  ;;  %s13226_s9 = smov 3  ;;  %s13228_s20 = smov 12 }
 0x1d1   :  { %v6290_v1 = vsel %vm3846_vm0, %v6288_v61, %v6285_v59  ;;  %v6293_v2 = vld [vmem:[#allocation1 + $0x18a] ss:$16 sm:%s6292_s30]   ;;  %s13234_s7 = smov 48  ;;  %s13236_s29 = smov 192 }
 0x1d2   :  { %v11361_v56 = vld [vmem:[%s15516_s27 + $0x330] sm:$0xff]   ;;  %v11362_v62 = vld [vmem:[%s15516_s27 + $0x328] sm:$0xff]   ;;  %v11363_v4 = vld [vmem:[%s15516_s27 + $0x320] sm:$0xff]   ;;  %v6295_v46 = vsel %vm3850_vm1, %v6293_v2, %v6290_v1  ;;  %10987 = vrot.lane.b32.xlu0 %v10986_v6, %s15166_s8  ;;  %s13241_s12 = smov 3  ;;  %s13243_s0 = smov 12 }
 0x1d3   :  { %v10162_v58 = vunpack.c.l.bf16 %v11361_v56  ;;  %v10166_v63 = vunpack.c.l.bf16 %v11362_v62  ;;  %v6298_v3 = vld [vmem:[#allocation1 + $0x18a] ss:$16 sm:%s6297_s19]   ;;  %v10170_v5 = vunpack.c.l.bf16 %v11363_v4  ;;  %v11365_v16 = vld [vmem:[%s15516_s27 + $0x310] sm:$0xff]   ;;  %v11367_v22 = vld [vmem:[%s15516_s27 + $0x300] sm:$0xff]   ;;  %s13248_s24 = smov 48  ;;  %s13250_s30 = smov 192 }
 0x1d4   :  { %v6308_v7 = vld [vmem:[#allocation1 + $0x38a] ss:$16 sm:%s6307_s21]   ;;  %v6300_v11 = vsel %vm3854_vm2, %v6298_v3, %v6295_v46  ;;  %v10178_v18 = vunpack.c.l.bf16 %v11365_v16  ;;  %v10186_v28 = vunpack.c.l.bf16 %v11367_v22  ;;  %v11369_v27 = vld [vmem:[%s15516_s27 + $0x230] sm:$0xff]   ;;  %s13256_s16 = smov 3  ;;  %s13258_s21 = smov 12  ;;  %v11371_v31 = vld [vmem:[%s15516_s27 + $0x220] sm:$0xff]   ;;  %v10769_v3 = vunpack.i.l.bf16 %v13189_v36 }
 0x1d5   :  { %v6311_v8 = vld [vmem:[#allocation1 + $0x38a] ss:$16 sm:%s6310_s10]   ;;  %783 = vst [vmem:[#allocation1 + $0x660] sm:$0xff] %v10162_v58  ;;  %v10290_v23 = vunpack.c.l.bf16 %v11369_v27  ;;  %v10298_v26 = vunpack.c.l.bf16 %v11371_v31  ;;  %s13263_s18 = smov 48  ;;  %s13270_s2 = smov 3  ;;  %v11373_v34 = vld [vmem:[%s15516_s27 + $0x210] sm:$0xff]   ;;  %v10770_v36 = vunpack.i.h.bf16 %v13189_v36 }
 0x1d6   :  { %v11364_v10 = vld [vmem:[%s15516_s27 + $0x318] sm:$0xff]   ;;  %v6313_v12 = vsel %vm3846_vm0, %v6311_v8, %v6308_v7  ;;  %813 = vst [vmem:[#allocation1 + $0x650] sm:$0xff] %v10166_v63  ;;  %v11366_v19 = vld [vmem:[%s15516_s27 + $0x308] sm:$0xff]   ;;  %s13272_s26 = smov 12  ;;  %v10306_v35 = vunpack.c.l.bf16 %v11373_v34  ;;  %s13277_s15 = smov 48  ;;  %v11375_v39 = vld [vmem:[%s15516_s27 + $0x200] sm:$0xff]  }
 0x1d7   :  { %v10174_v9 = vunpack.c.l.bf16 %v11364_v10  ;;  %v6316_v13 = vld [vmem:[#allocation1 + $0x38a] ss:$16 sm:%s6315_s23]   ;;  %v10182_v20 = vunpack.c.l.bf16 %v11366_v19  ;;  %843 = vst [vmem:[#allocation1 + $0x640] sm:$0xff] %v10170_v5  ;;  %s13265_s23 = smov 192  ;;  %s13279_s17 = smov 192  ;;  %v10314_v40 = vunpack.c.l.bf16 %v11375_v39  ;;  %v11377_v43 = vld [vmem:[%s15516_s27 + $0x370] sm:$0xff]  }
 0x1d8   :  { %v6321_v15 = vld [vmem:[#allocation1 + $0x38a] ss:$16 sm:%s6320_s28]   ;;  %v6318_v14 = vsel %vm3850_vm1, %v6316_v13, %v6313_v12  ;;  %903 = vst [vmem:[#allocation1 + $0x620] sm:$0xff] %v10178_v18  ;;  %s13284_s14 = smov 3  ;;  %s13286_s1 = smov 12  ;;  %v10130_v44 = vunpack.c.l.bf16 %v11377_v43  ;;  %v11379_v49 = vld [vmem:[%s15516_s27 + $0x360] sm:$0xff]  }
 0x1d9   :  { %v6323_v21 = vsel %vm3854_vm2, %v6321_v15, %v6318_v14  ;;  %873 = vst [vmem:[#allocation1 + $0x630] sm:$0xff] %v10174_v9  ;;  %v11368_v24 = vld [vmem:[%s15516_s27 + $0x238] sm:$0xff]   ;;  %v11370_v29 = vld [vmem:[%s15516_s27 + $0x228] sm:$0xff]   ;;  %15517 = sst [smem:[#allocation76_spill]] %s13284_s14  ;;  %s13291_s22 = smov 48  ;;  %v10138_v50 = vunpack.c.l.bf16 %v11379_v49  ;;  %v11381_v55 = vld [vmem:[%s15516_s27 + $0x350] sm:$0xff]  }
 0x1da   :  { %v10991_v17 = vpack.i.bf16 %v6323_v21, %v6300_v11  ;;  %v10286_v25 = vunpack.c.l.bf16 %v11368_v24  ;;  %933 = vst [vmem:[#allocation1 + $0x610] sm:$0xff] %v10182_v20  ;;  %v10294_v30 = vunpack.c.l.bf16 %v11370_v29  ;;  %v11372_v32 = vld [vmem:[%s15516_s27 + $0x218] sm:$0xff]   ;;  %v11374_v37 = vld [vmem:[%s15516_s27 + $0x208] sm:$0xff]   ;;  %15518 = sst [smem:[#allocation77_spill]] %s13286_s1  ;;  %s13293_s10 = smov 192  ;;  %v10146_v57 = vunpack.c.l.bf16 %v11381_v55  ;;  %v11383_v56 = vld [vmem:[%s15516_s27 + $0x340] sm:$0xff]  }
 0x1db   :  { %963 = vst [vmem:[#allocation1 + $0x600] sm:$0xff] %v10186_v28  ;;  %v10302_v33 = vunpack.c.l.bf16 %v11372_v32  ;;  %v10310_v38 = vunpack.c.l.bf16 %v11374_v37  ;;  %15519 = sst [smem:[#allocation56_spill]] %s13291_s22  ;;  %v11376_v41 = vld [vmem:[%s15516_s27 + $0x338] sm:$0xff]   ;;  %s13298_s4 = smov 3  ;;  %v11378_v45 = vld [vmem:[%s15516_s27 + $0x368] sm:$0xff]   ;;  %v10154_v58 = vunpack.c.l.bf16 %v11383_v56  ;;  %v11385_v11 = vld [vmem:[%s15516_s27 + $0x270] sm:$0xff]  }
 0x1dc   :  { %10992 = vrot.lane.b32.xlu1 %v10991_v17, %s15166_s8  ;;  %1713 = vst [vmem:[#allocation1 + $0x470] sm:$0xff] %v10286_v25  ;;  %15520 = sst [smem:[#allocation57_spill]] %s13293_s10  ;;  %v10158_v42 = vunpack.c.l.bf16 %v11376_v41  ;;  %s13300_s5 = smov 12  ;;  %v10134_v47 = vunpack.c.l.bf16 %v11378_v45  ;;  %v11380_v53 = vld [vmem:[%s15516_s27 + $0x358] sm:$0xff]   ;;  %v11382_v52 = vld [vmem:[%s15516_s27 + $0x348] sm:$0xff]   ;;  %v10258_v12 = vunpack.c.l.bf16 %v11385_v11  ;;  %v11387_v16 = vld [vmem:[%s15516_s27 + $0x260] sm:$0xff]  }
 0x1dd   :  { %1743 = vst [vmem:[#allocation1 + $0x460] sm:$0xff] %v10290_v23  ;;  %15521 = sst [smem:[#allocation78_spill]] %s13298_s4  ;;  %s13305_s11 = smov 48  ;;  %v10142_v54 = vunpack.c.l.bf16 %v11380_v53  ;;  %v10150_v51 = vunpack.c.l.bf16 %v11382_v52  ;;  %v11384_v10 = vld [vmem:[%s15516_s27 + $0x278] sm:$0xff]   ;;  %v11386_v13 = vld [vmem:[%s15516_s27 + $0x268] sm:$0xff]   ;;  %v10266_v18 = vunpack.c.l.bf16 %v11387_v16  ;;  %v11389_v20 = vld [vmem:[%s15516_s27 + $0x250] sm:$0xff]  }
 0x1de   :  { %1773 = vst [vmem:[#allocation1 + $0x450] sm:$0xff] %v10294_v30  ;;  %15522 = sst [smem:[#allocation43_spill]] %s13300_s5  ;;  %s13307_s25 = smov 192  ;;  %v10254_v9 = vunpack.c.l.bf16 %v11384_v10  ;;  %v10262_v15 = vunpack.c.l.bf16 %v11386_v13  ;;  %v11388_v14 = vld [vmem:[%s15516_s27 + $0x258] sm:$0xff]   ;;  %v10274_v21 = vunpack.c.l.bf16 %v11389_v20  ;;  %v11390_v22 = vld [vmem:[%s15516_s27 + $0x248] sm:$0xff]   ;;  %v11391_v17 = vld [vmem:[%s15516_s27 + $0x240] sm:$0xff]  }
 0x1df   :  { %1803 = vst [vmem:[#allocation1 + $0x440] sm:$0xff] %v10298_v26  ;;  %15523 = sst [smem:[#allocation60_spill]] %s13305_s11  ;;  %s13314_s28 = smov 3  ;;  %v10270_v19 = vunpack.c.l.bf16 %v11388_v14  ;;  %v10278_v28 = vunpack.c.l.bf16 %v11390_v22  ;;  %v10282_v24 = vunpack.c.l.bf16 %v11391_v17  ;;  %v11392_v25 = vld [vmem:[%s15516_s27 + $0x378] sm:$0xff]   ;;  %v11393_v23 = vld [vmem:[%s15516_s27 + $0x3b0] sm:$0xff]   ;;  %v11394_v30 = vld [vmem:[%s15516_s27 + $0x3a8] sm:$0xff]   ;;  %v13458_v26 = vpop.permute.xlu2 %10787 }
 0x1e0   :  { %1833 = vst [vmem:[#allocation1 + $0x430] sm:$0xff] %v10302_v33  ;;  %15524 = sst [smem:[#allocation61_spill]] %s13307_s25  ;;  %s13316_s6 = smov 12  ;;  %v10126_v27 = vunpack.c.l.bf16 %v11392_v25  ;;  %v10098_v29 = vunpack.c.l.bf16 %v11393_v23  ;;  %v10102_v31 = vunpack.c.l.bf16 %v11394_v30  ;;  %v11395_v32 = vld [vmem:[%s15516_s27 + $0x3a0] sm:$0xff]   ;;  %v11396_v34 = vld [vmem:[%s15516_s27 + $0x398] sm:$0xff]   ;;  %v11397_v39 = vld [vmem:[%s15516_s27 + $0x390] sm:$0xff]  }
 0x1e1   :  { %1863 = vst [vmem:[#allocation1 + $0x420] sm:$0xff] %v10306_v35  ;;  %s13321_s13 = smov 48  ;;  %s13323_s3 = smov 192  ;;  %v10106_v33 = vunpack.c.l.bf16 %v11395_v32  ;;  %v10110_v35 = vunpack.c.l.bf16 %v11396_v34  ;;  %v6055_v37 = vld [vmem:[#allocation1 + $0x40a] ss:$16 sm:%s13314_s28]   ;;  %v11401_v17 = vld [vmem:[%s15516_s27 + $0x2b0] sm:$0xff]  }
 0x1e2   :  { %1893 = vst [vmem:[#allocation1 + $0x410] sm:$0xff] %v10310_v38  ;;  %s13328_s8 = smov 3  ;;  %s13330_s19 = smov 12  ;;  %v6058_v38 = vld [vmem:[#allocation1 + $0x40a] ss:$16 sm:%s13316_s6]  }
 0x1e3   :  { %1923 = vst [vmem:[#allocation1 + $0x400] sm:$0xff] %v10314_v40  ;;  %s13335_s11 = smov 48  ;;  %s13337_s25 = smov 192  ;;  %v10114_v40 = vunpack.c.l.bf16 %v11397_v39  ;;  %v6060_v41 = vsel %vm3846_vm0, %v6058_v38, %v6055_v37  ;;  %v6078_v43 = vld [vmem:[#allocation1 + $0x60a] ss:$16 sm:%s13328_s8]  }
 0x1e4   :  { %753 = vst [vmem:[#allocation1 + $0x670] sm:$0xff] %v10158_v42  ;;  %s13339_s5 = smov 3  ;;  %s13341_s4 = smov 12  ;;  %v6063_v42 = vld [vmem:[#allocation1 + $0x40a] ss:$16 sm:%s13321_s13]  }
 0x1e5   :  { %543 = vst [vmem:[#allocation1 + $0x6e0] sm:$0xff] %v10130_v44  ;;  %s13343_s10 = smov 48  ;;  %s13345_s22 = smov 192  ;;  %v6065_v44 = vsel %vm3850_vm1, %v6063_v42, %v6060_v41  ;;  %v6068_v45 = vld [vmem:[#allocation1 + $0x40a] ss:$16 sm:%s13323_s3]  }
 0x1e6   :  { %573 = vst [vmem:[#allocation1 + $0x6d0] sm:$0xff] %v10134_v47  ;;  %s13350_s14 = smov 3  ;;  %s13357_s1 = smov 48  ;;  %v6081_v47 = vld [vmem:[#allocation1 + $0x60a] ss:$16 sm:%s13330_s19]   ;;  %v6070_v49 = vsel %vm3854_vm2, %v6068_v45, %v6065_v44 }
 0x1e7   :  { %603 = vst [vmem:[#allocation1 + $0x6c0] sm:$0xff] %v10138_v50  ;;  %15525 = sst [smem:[#allocation51_spill]] %s13350_s14  ;;  %s13355_s14 = smov 12  ;;  %v6083_v50 = vsel %vm3846_vm0, %v6081_v47, %v6078_v43  ;;  %v6086_v53 = vld [vmem:[#allocation1 + $0x60a] ss:$16 sm:%s13335_s11]  }
 0x1e8   :  { %633 = vst [vmem:[#allocation1 + $0x6b0] sm:$0xff] %v10142_v54  ;;  %s13476_s28 = smov 48  ;;  %s13484_s13 = smov 192  ;;  %v6091_v54 = vld [vmem:[#allocation1 + $0x60a] ss:$16 sm:%s13337_s25]   ;;  %v6088_v52 = vsel %vm3850_vm1, %v6086_v53, %v6083_v50  ;;  %v11405_v50 = vld [vmem:[%s15516_s27 + $0x290] sm:$0xff]  }
 0x1e9   :  { %663 = vst [vmem:[#allocation1 + $0x6a0] sm:$0xff] %v10146_v57  ;;  %s13489_s3 = smov 3  ;;  %s13495_s8 = smov 12  ;;  %v11398_v55 = vld [vmem:[%s15516_s27 + $0x388] sm:$0xff]   ;;  %v11400_v14 = vld [vmem:[%s15516_s27 + $0x2b8] sm:$0xff]   ;;  %v10242_v53 = vunpack.c.l.bf16 %v11405_v50 }
 0x1ea   :  { %v4007_v60 = vld [vmem:[#allocation1 + $0x400] ss:$16 sm:%s13226_s9]   ;;  %693 = vst [vmem:[#allocation1 + $0x690] sm:$0xff] %v10150_v51  ;;  %s13371_s9 = smov 192  ;;  %v10118_v57 = vunpack.c.l.bf16 %v11398_v55  ;;  %v6377_v51 = vld [vmem:[#allocation1 + $0x9] ss:$16 sm:%s13339_s5]  }
 0x1eb   :  { %v4010_v59 = vld [vmem:[#allocation1 + $0x400] ss:$16 sm:%s13228_s20]   ;;  %723 = vst [vmem:[#allocation1 + $0x680] sm:$0xff] %v10154_v58  ;;  %s13376_s20 = smov 3  ;;  %v6380_v56 = vld [vmem:[#allocation1 + $0x9] ss:$16 sm:%s13341_s4]  }
 0x1ec   :  { %v4015_v61 = vld [vmem:[#allocation1 + $0x400] ss:$16 sm:%s13234_s7]   ;;  %v4012_v62 = vsel %vm3846_vm0, %v4010_v59, %v4007_v60  ;;  %s13378_s7 = smov 12  ;;  %1473 = vst [vmem:[#allocation1 + $0x4f0] sm:$0xff] %v10254_v9  ;;  %s13503_s4 = smov 48  ;;  %v6093_v59 = vsel %vm3854_vm2, %v6091_v54, %v6088_v52  ;;  %v11404_v42 = vld [vmem:[%s15516_s27 + $0x298] sm:$0xff]  }
 0x1ed   :  { %v4020_v63 = vld [vmem:[#allocation1 + $0x400] ss:$16 sm:%s13236_s29]   ;;  %v4017_v2 = vsel %vm3850_vm1, %v4015_v61, %v4012_v62  ;;  %s13403_s29 = smov 192  ;;  %1503 = vst [vmem:[#allocation1 + $0x4e0] sm:$0xff] %v10258_v12  ;;  %v6382_v61 = vsel %vm3846_vm0, %v6380_v56, %v6377_v51  ;;  %v6385_v62 = vld [vmem:[#allocation1 + $0x9] ss:$16 sm:%s13343_s10]   ;;  %v10238_v43 = vunpack.c.l.bf16 %v11404_v42 }
 0x1ee   :  { %v4091_v0 = vld [vmem:[#allocation1 + $0x600] ss:$16 sm:%s13241_s12]   ;;  %v4022_v46 = vsel %vm3854_vm2, %v4020_v63, %v4017_v2  ;;  %s13393_s12 = smov 3  ;;  %15528 = sst [smem:[#allocation64_spill]] %s13403_s29  ;;  %1533 = vst [vmem:[#allocation1 + $0x4d0] sm:$0xff] %v10262_v15  ;;  %v11406_v55 = vld [vmem:[%s15516_s27 + $0x288] sm:$0xff]  }
 0x1ef   :  { %v4094_v1 = vld [vmem:[#allocation1 + $0x600] ss:$16 sm:%s13243_s0]   ;;  %4025 = vst.msk [vmem:[#allocation0 + $0x40] sm:$0xff] %vm3856_vm3, %v4022_v46   ;;  %s13385_s0 = smov 48  ;;  %s13411_s29 = smov 12 }
 0x1f0   :  { %v4096_v4 = vsel %vm3846_vm0, %v4094_v1, %v4091_v0  ;;  %v4099_v5 = vld [vmem:[#allocation1 + $0x600] ss:$16 sm:%s13248_s24]   ;;  %s13387_s24 = smov 192  ;;  %4240 = vst.msk [vmem:[#allocation0 + $0x40] sm:$0xff] %vm4193_vm4, %v10769_v3   ;;  %15530 = sst [smem:[#allocation36_spill]] %s13411_s29  ;;  %v10966_v3 = vpack.i.bf16 %v6093_v59, %v6070_v49 }
 0x1f1   :  { %v4104_v6 = vld [vmem:[#allocation1 + $0x600] ss:$16 sm:%s13250_s30]   ;;  %v4101_v7 = vsel %vm3850_vm1, %v4099_v5, %v4096_v4  ;;  %s13395_s30 = smov 12  ;;  %s13418_s29 = smov 192  ;;  %1563 = vst [vmem:[#allocation1 + $0x4c0] sm:$0xff] %v10266_v18 }
 0x1f2   :  { %v4106_v8 = vsel %vm3854_vm2, %v4104_v6, %v4101_v7  ;;  %15526 = sst [smem:[#allocation54_spill]] %s13395_s30  ;;  %s13401_s30 = smov 48  ;;  %1593 = vst [vmem:[#allocation1 + $0x4b0] sm:$0xff] %v10270_v19  ;;  %v11399_v58 = vld [vmem:[%s15516_s27 + $0x380] sm:$0xff]   ;;  %v6390_v63 = vld [vmem:[#allocation1 + $0x9] ss:$16 sm:%s13345_s22]   ;;  %v10222_v19 = vunpack.c.l.bf16 %v11400_v14 }
 0x1f3   :  { %4109 = vst.msk [vmem:[#allocation0 + $0x60] sm:$0xff] %vm3856_vm3, %v4106_v8   ;;  %15527 = sst [smem:[#allocation58_spill]] %s13401_s30  ;;  %s13409_s30 = smov 3  ;;  %v10122_v60 = vunpack.c.l.bf16 %v11399_v58  ;;  %v10779_v8 = vunpack.i.l.bf16 %v13312_v48  ;;  %v10780_v48 = vunpack.i.h.bf16 %v13312_v48  ;;  %v6402_v16 = vld [vmem:[#allocation1 + $0x209] ss:$16 sm:%s13355_s14]   ;;  %v11407_v51 = vld [vmem:[%s15516_s27 + $0x280] sm:$0xff]  }
 0x1f4   :  { %4263 = vst.msk [vmem:[#allocation0 + $0x60] sm:$0xff] %vm4193_vm4, %v10770_v36   ;;  %15529 = sst [smem:[#allocation65_spill]] %s13409_s30  ;;  %s13416_s30 = smov 48  ;;  %v6387_v36 = vsel %vm3850_vm1, %v6385_v62, %v6382_v61  ;;  %v6407_v22 = vld [vmem:[#allocation1 + $0x209] ss:$16 sm:%s13357_s1]   ;;  %v10250_v56 = vunpack.c.l.bf16 %v11407_v51 }
 0x1f5   :  { %15531 = sst [smem:[#allocation37_spill]] %s13416_s30  ;;  %s13423_s30 = smov 3  ;;  %1623 = vst [vmem:[#allocation1 + $0x4a0] sm:$0xff] %v10274_v21  ;;  %v6392_v20 = vsel %vm3854_vm2, %v6390_v63, %v6387_v36  ;;  %v6425_v23 = vld [vmem:[#allocation1 + $0x409] ss:$16 sm:%s13378_s7]   ;;  %v11410_v63 = vld [vmem:[%s15516_s27 + $0x1f0] sm:$0xff]  }
 0x1f6   :  { %15532 = sst [smem:[#allocation38_spill]] %s13418_s29  ;;  %s13425_s29 = smov 12  ;;  %1653 = vst [vmem:[#allocation1 + $0x490] sm:$0xff] %v10278_v28  ;;  %v6412_v28 = vld [vmem:[#allocation1 + $0x209] ss:$16 sm:%s13371_s9]  }
 0x1f7   :  { %15533 = sst [smem:[#allocation62_spill]] %s13423_s30  ;;  %s13430_s30 = smov 48  ;;  %1683 = vst [vmem:[#allocation1 + $0x480] sm:$0xff] %v10282_v24  ;;  %v10226_v24 = vunpack.c.l.bf16 %v11401_v17  ;;  %v6435_v34 = vld [vmem:[#allocation1 + $0x409] ss:$16 sm:%s13387_s24]  }
 0x1f8   :  { %15534 = sst [smem:[#allocation40_spill]] %s13425_s29  ;;  %s13432_s29 = smov 192  ;;  %513 = vst [vmem:[#allocation1 + $0x6f0] sm:$0xff] %v10126_v27  ;;  %v6422_v27 = vld [vmem:[#allocation1 + $0x409] ss:$16 sm:%s13376_s20]  }
 0x1f9   :  { %15535 = sst [smem:[#allocation44_spill]] %s13430_s30  ;;  %s13437_s30 = smov 3  ;;  %303 = vst [vmem:[#allocation1 + $0x760] sm:$0xff] %v10098_v29  ;;  %v11402_v29 = vld [vmem:[%s15516_s27 + $0x2a8] sm:$0xff]   ;;  %v6427_v32 = vsel %vm3846_vm0, %v6425_v23, %v6422_v27  ;;  %v11409_v61 = vld [vmem:[%s15516_s27 + $0x1f8] sm:$0xff]  }
 0x1fa   :  { %15536 = sst [smem:[#allocation45_spill]] %s13432_s29  ;;  %s13439_s29 = smov 12  ;;  %333 = vst [vmem:[#allocation1 + $0x750] sm:$0xff] %v10102_v31  ;;  %v10230_v30 = vunpack.c.l.bf16 %v11402_v29  ;;  %v10318_v62 = vunpack.c.l.bf16 %v11409_v61  ;;  %v11417_v23 = vld [vmem:[%s15516_s27 + $0xf8] sm:$0xff]  }
 0x1fb   :  { %15537 = sst [smem:[#allocation46_spill]] %s13437_s30  ;;  %s13444_s30 = smov 48  ;;  %363 = vst [vmem:[#allocation1 + $0x740] sm:$0xff] %v10106_v33  ;;  %v6430_v33 = vld [vmem:[#allocation1 + $0x409] ss:$16 sm:%s13385_s0]   ;;  %v10446_v29 = vunpack.c.l.bf16 %v11417_v23 }
 0x1fc   :  { %15538 = sst [smem:[#allocation47_spill]] %s13439_s29  ;;  %s13446_s29 = smov 192  ;;  %393 = vst [vmem:[#allocation1 + $0x730] sm:$0xff] %v10110_v35  ;;  %v11403_v35 = vld [vmem:[%s15516_s27 + $0x2a0] sm:$0xff]   ;;  %v6432_v39 = vsel %vm3850_vm1, %v6430_v33, %v6427_v32  ;;  %v11419_v32 = vld [vmem:[%s15516_s27 + $0xe8] sm:$0xff]  }
 0x1fd   :  { %15539 = sst [smem:[#allocation55_spill]] %s13444_s30  ;;  %s13451_s30 = smov 3  ;;  %423 = vst [vmem:[#allocation1 + $0x720] sm:$0xff] %v10114_v40  ;;  %v10234_v37 = vunpack.c.l.bf16 %v11403_v35  ;;  %v6445_v40 = vld [vmem:[#allocation1 + $0x609] ss:$16 sm:%s13393_s12]   ;;  %v6437_v44 = vsel %vm3854_vm2, %v6435_v34, %v6432_v39  ;;  %v10454_v33 = vunpack.c.l.bf16 %v11419_v32  ;;  %v11420_v34 = vld [vmem:[%s15516_s27 + $0xe0] sm:$0xff]  }
 0x1fe   :  { %15540 = sst [smem:[#allocation66_spill]] %s13446_s29  ;;  %s13453_s29 = smov 12  ;;  %v4028_v0 = vld [vmem:[#allocation1 + $0x480] ss:$16 sm:%s13256_s16]   ;;  %453 = vst [vmem:[#allocation1 + $0x710] sm:$0xff] %v10118_v57  ;;  %v10246_v57 = vunpack.c.l.bf16 %v11406_v55  ;;  %v10458_v35 = vunpack.c.l.bf16 %v11420_v34 }
 0x1ff   :  { %15541 = sst [smem:[#allocation59_spill]] %s13451_s30  ;;  %s13460_s30 = smov 48  ;;  %v4031_v1 = vld [vmem:[#allocation1 + $0x480] ss:$16 sm:%s13258_s21]   ;;  %483 = vst [vmem:[#allocation1 + $0x700] sm:$0xff] %v10122_v60  ;;  %v11408_v60 = vld [vmem:[%s15516_s27 + $0x3b8] sm:$0xff]  }
 0x200   :  { %15542 = sst [smem:[#allocation63_spill]] %s13453_s29  ;;  %s13462_s29 = smov 192  ;;  %v4036_v2 = vld [vmem:[#allocation1 + $0x480] ss:$16 sm:%s13263_s18]   ;;  %v4033_v4 = vsel %vm3846_vm0, %v4031_v1, %v4028_v0  ;;  %1233 = vst [vmem:[#allocation1 + $0x570] sm:$0xff] %v10222_v19  ;;  %v10094_v59 = vunpack.c.l.bf16 %v11408_v60  ;;  %v10322_v0 = vunpack.c.l.bf16 %v11410_v63  ;;  %v11411_v1 = vld [vmem:[%s15516_s27 + $0x1e8] sm:$0xff]   ;;  %v10789_v19 = vunpack.i.l.bf16 %v13458_v26 }
 0x201   :  { %15543 = sst [smem:[#allocation67_spill]] %s13460_s30  ;;  %s13467_s30 = smov 3  ;;  %v4041_v5 = vld [vmem:[#allocation1 + $0x480] ss:$16 sm:%s13265_s23]   ;;  %v4038_v7 = vsel %vm3850_vm1, %v4036_v2, %v4033_v4  ;;  %1263 = vst [vmem:[#allocation1 + $0x560] sm:$0xff] %v10226_v24  ;;  %v10326_v2 = vunpack.c.l.bf16 %v11411_v1  ;;  %v13636_v4 = vpop.permute.xlu2 %10802  ;;  %v10790_v26 = vunpack.i.h.bf16 %v13458_v26 }
 0x202   :  { %15544 = sst [smem:[#allocation68_spill]] %s13462_s29  ;;  %s13469_s29 = smov 12  ;;  %v4112_v6 = vld [vmem:[#allocation1 + $0x680] ss:$16 sm:%s13270_s2]   ;;  %v4043_v12 = vsel %vm3854_vm2, %v4041_v5, %v4038_v7  ;;  %1293 = vst [vmem:[#allocation1 + $0x550] sm:$0xff] %v10230_v30 }
 0x203   :  { %15545 = sst [smem:[#allocation69_spill]] %s13467_s30  ;;  %s13512_s22 = smov 192  ;;  %v4115_v46 = vld [vmem:[#allocation1 + $0x680] ss:$16 sm:%s13272_s26]   ;;  %4046 = vst.msk [vmem:[#allocation0 + $0x48] sm:$0xff] %vm3856_vm3, %v4043_v12  }
 0x204   :  { %15546 = sst [smem:[#allocation72_spill]] %s13469_s29  ;;  %v4117_v10 = vsel %vm3846_vm0, %v4115_v46, %v4112_v6  ;;  %v4120_v9 = vld [vmem:[#allocation1 + $0x680] ss:$16 sm:%s13277_s15]   ;;  %s15548_s21 = smov 80   ;;  %4332 = vst.msk [vmem:[#allocation0 + $0x48] sm:$0xff] %vm4193_vm4, %v10779_v8   ;;  %v11413_v46 = vld [vmem:[%s15516_s27 + $0x1d8] sm:$0xff]  }
 0x205   :  { %s15547_s16 = sld [smem:[#allocation51_spill]]  ;;  %v4125_v11 = vld [vmem:[#allocation1 + $0x680] ss:$16 sm:%s13279_s17]   ;;  %10967 = vrot.lane.b32.xlu2 %v10966_v3, %s15548_s21  ;;  %s13528_s18 = smov 3  ;;  %v4122_v13 = vsel %vm3850_vm1, %v4120_v9, %v4117_v10  ;;  %1323 = vst [vmem:[#allocation1 + $0x540] sm:$0xff] %v10234_v37  ;;  %v13634_v3 = vpop.permute.xlu0 %10792  ;;  %v10334_v36 = vunpack.c.l.bf16 %v11413_v46  ;;  %v11415_v10 = vld [vmem:[%s15516_s27 + $0x1c8] sm:$0xff]  }
 0x206   :  { %s13535_s23 = smov 12  ;;  %v4127_v18 = vsel %vm3854_vm2, %v4125_v11, %v4122_v13  ;;  %s13546_s15 = smov 48  ;;  %1353 = vst [vmem:[#allocation1 + $0x530] sm:$0xff] %v10238_v43  ;;  %v11412_v5 = vld [vmem:[%s15516_s27 + $0x1e0] sm:$0xff]   ;;  %v11414_v7 = vld [vmem:[%s15516_s27 + $0x1d0] sm:$0xff]   ;;  %v10342_v9 = vunpack.c.l.bf16 %v11415_v10  ;;  %v11421_v37 = vld [vmem:[%s15516_s27 + $0xd8] sm:$0xff]  }
 0x207   :  { %4130 = vst.msk [vmem:[#allocation0 + $0x68] sm:$0xff] %vm3856_vm3, %v4127_v18   ;;  %s15549_s14 = sld [smem:[#allocation54_spill]]  ;;  %s13555_s1 = smov 192  ;;  %v10330_v6 = vunpack.c.l.bf16 %v11412_v5  ;;  %v10338_v8 = vunpack.c.l.bf16 %v11414_v7  ;;  %v11418_v30 = vld [vmem:[%s15516_s27 + $0xf0] sm:$0xff]   ;;  %v11424_v43 = vld [vmem:[%s15516_s27 + $0xc0] sm:$0xff]  }
 0x208   :  { %s15550_s7 = sld [smem:[#allocation58_spill]]  ;;  %s13565_s24 = smov 3  ;;  %4355 = vst.msk [vmem:[#allocation0 + $0x68] sm:$0xff] %vm4193_vm4, %v10780_v48   ;;  %v11422_v39 = vld [vmem:[%s15516_s27 + $0xd0] sm:$0xff]   ;;  %v6201_v1 = vld [vmem:[#allocation1 + $0x10a] ss:$16 sm:%s13476_s28]  }
 0x209   :  { %s15551_s0 = sld [smem:[#allocation64_spill]]  ;;  %s13574_s12 = smov 12  ;;  %1383 = vst [vmem:[#allocation1 + $0x520] sm:$0xff] %v10242_v53  ;;  %v13777_v53 = vpop.permute.xlu1 %10797  ;;  %v6206_v5 = vld [vmem:[#allocation1 + $0x10a] ss:$16 sm:%s13484_s13]   ;;  %v11427_v46 = vld [vmem:[%s15516_s27 + $0x3e0] sm:$0xff]  }
 0x20a   :  { %s13583_s11 = smov 48  ;;  %s13590_s2 = smov 192  ;;  %1413 = vst [vmem:[#allocation1 + $0x510] sm:$0xff] %v10246_v57  ;;  %v6224_v10 = vld [vmem:[#allocation1 + $0x30a] ss:$16 sm:%s13503_s4]  }
 0x20b   :  { %v6399_v15 = vld [vmem:[#allocation1 + $0x209] ss:$16 sm:%s15547_s16]   ;;  %s15168_s16 = smov 72   ;;  %s13592_s26 = smov 3  ;;  %1443 = vst [vmem:[#allocation1 + $0x500] sm:$0xff] %v10250_v56  ;;  %v11425_v56 = vld [vmem:[%s15516_s27 + $0x3f0] sm:$0xff]  }
 0x20c   :  { %v6404_v21 = vsel %vm3846_vm0, %v6402_v16, %v6399_v15  ;;  %s13600_s9 = smov 48  ;;  %s13607_s29 = smov 3  ;;  %273 = vst [vmem:[#allocation1 + $0x770] sm:$0xff] %v10094_v59 }
 0x20d   :  { %v6409_v25 = vsel %vm3850_vm1, %v6407_v22, %v6404_v21  ;;  %v6448_v41 = vld [vmem:[#allocation1 + $0x609] ss:$16 sm:%s15549_s14]   ;;  %s13598_s14 = smov 12  ;;  %s13612_s19 = smov 12  ;;  %1953 = vst [vmem:[#allocation1 + $0x3f0] sm:$0xff] %v10318_v62 }
 0x20e   :  { %v6414_v31 = vsel %vm3854_vm2, %v6412_v28, %v6409_v25  ;;  %v6450_v45 = vsel %vm3846_vm0, %v6448_v41, %v6445_v40  ;;  %v6453_v47 = vld [vmem:[#allocation1 + $0x609] ss:$16 sm:%s15550_s7]   ;;  %s13614_s5 = smov 48  ;;  %s13620_s10 = smov 192  ;;  %1983 = vst [vmem:[#allocation1 + $0x3e0] sm:$0xff] %v10322_v0  ;;  %v11416_v25 = vld [vmem:[%s15516_s27 + $0x1c0] sm:$0xff]   ;;  %v10466_v40 = vunpack.c.l.bf16 %v11422_v39 }
 0x20f   :  { %v11001_v38 = vpack.i.bf16 %v6414_v31, %v6392_v20  ;;  %v6458_v49 = vld [vmem:[#allocation1 + $0x609] ss:$16 sm:%s15551_s0]   ;;  %v6455_v54 = vsel %vm3850_vm1, %v6453_v47, %v6450_v45  ;;  %s13605_s0 = smov 192  ;;  %15552 = sst [smem:[#allocation73_spill]] %s13614_s5  ;;  %2013 = vst [vmem:[#allocation1 + $0x3d0] sm:$0xff] %v10326_v2  ;;  %v10346_v27 = vunpack.c.l.bf16 %v11416_v25  ;;  %v10450_v31 = vunpack.c.l.bf16 %v11418_v30  ;;  %v11431_v39 = vld [vmem:[%s15516_s27 + $0x3c0] sm:$0xff]  }
 0x210   :  { %v6460_v52 = vsel %vm3854_vm2, %v6458_v49, %v6455_v54  ;;  %15553 = sst [smem:[#allocation81_spill]] %s13620_s10  ;;  %s13622_s20 = smov 3  ;;  %2043 = vst [vmem:[#allocation1 + $0x3c0] sm:$0xff] %v10330_v6  ;;  %v11423_v41 = vld [vmem:[%s15516_s27 + $0xc8] sm:$0xff]   ;;  %v10805_v45 = vunpack.i.h.bf16 %v13636_v4  ;;  %v10804_v47 = vunpack.i.l.bf16 %v13636_v4 }
 0x211   :  { %11002 = vrot.lane.b32.xlu0 %v11001_v38, %s15168_s16  ;;  %v11006_v58 = vpack.i.bf16 %v6460_v52, %v6437_v44  ;;  %15554 = sst [smem:[#allocation18_spill]] %s13622_s20  ;;  %s13627_s30 = smov 12  ;;  %2073 = vst [vmem:[#allocation1 + $0x3b0] sm:$0xff] %v10334_v36  ;;  %v10462_v38 = vunpack.c.l.bf16 %v11421_v37  ;;  %v10470_v42 = vunpack.c.l.bf16 %v11423_v41  ;;  %v10474_v44 = vunpack.c.l.bf16 %v11424_v43  ;;  %v11426_v62 = vld [vmem:[%s15516_s27 + $0x3e8] sm:$0xff]   ;;  %v13847_v23 = vpop.permute.xlu1 %10812 }
 0x212   :  { %15555 = sst [smem:[#allocation19_spill]] %s13627_s30  ;;  %s13629_s25 = smov 48  ;;  %2103 = vst [vmem:[#allocation1 + $0x3a0] sm:$0xff] %v10338_v8  ;;  %v10795_v52 = vunpack.i.h.bf16 %v13634_v3  ;;  %v10070_v63 = vunpack.c.l.bf16 %v11426_v62  ;;  %v6216_v2 = vld [vmem:[#allocation1 + $0x30a] ss:$16 sm:%s13489_s3]   ;;  %v10074_v36 = vunpack.c.l.bf16 %v11427_v46  ;;  %v10794_v3 = vunpack.i.l.bf16 %v13634_v3 }
 0x213   :  { %11007 = vrot.lane.b32.xlu1 %v11006_v58, %s15168_s16  ;;  %15556 = sst [smem:[#allocation20_spill]] %s13629_s25  ;;  %s13638_s6 = smov 192  ;;  %2133 = vst [vmem:[#allocation1 + $0x390] sm:$0xff] %v10342_v9  ;;  %v10066_v58 = vunpack.c.l.bf16 %v11425_v56  ;;  %v6219_v6 = vld [vmem:[#allocation1 + $0x30a] ss:$16 sm:%s13495_s8]  }
 0x214   :  { %15557 = sst [smem:[#allocation21_spill]] %s13638_s6  ;;  %s13640_s17 = smov 3  ;;  %2163 = vst [vmem:[#allocation1 + $0x380] sm:$0xff] %v10346_v27  ;;  %v6221_v8 = vsel %vm3846_vm0, %v6219_v6, %v6216_v2  ;;  %v6229_v9 = vld [vmem:[#allocation1 + $0x30a] ss:$16 sm:%s13512_s22]  }
 0x215   :  { %15558 = sst [smem:[#allocation70_spill]] %s13640_s17  ;;  %s13645_s16 = smov 12  ;;  %2913 = vst [vmem:[#allocation1 + $0x1f0] sm:$0xff] %v10446_v29  ;;  %v6545_v37 = vld [vmem:[#allocation1 + $0x689] ss:$16 sm:%s13583_s11]  }
 0x216   :  { %15559 = sst [smem:[#allocation74_spill]] %s13645_s16  ;;  %s13647_s7 = smov 48  ;;  %2943 = vst [vmem:[#allocation1 + $0x1e0] sm:$0xff] %v10450_v31  ;;  %v6537_v31 = vld [vmem:[#allocation1 + $0x689] ss:$16 sm:%s13565_s24]  }
 0x217   :  { %15560 = sst [smem:[#allocation71_spill]] %s13647_s7  ;;  %s13652_s16 = smov 192  ;;  %2973 = vst [vmem:[#allocation1 + $0x1d0] sm:$0xff] %v10454_v33  ;;  %v11430_v33 = vld [vmem:[%s15516_s27 + $0x3c8] sm:$0xff]  }
 0x218   :  { %15561 = sst [smem:[#allocation79_spill]] %s13652_s16  ;;  %s13654_s7 = smov 3  ;;  %3003 = vst [vmem:[#allocation1 + $0x1c0] sm:$0xff] %v10458_v35  ;;  %v10086_v34 = vunpack.c.l.bf16 %v11430_v33  ;;  %v6540_v35 = vld [vmem:[#allocation1 + $0x689] ss:$16 sm:%s13574_s12]  }
 0x219   :  { %15562 = sst [smem:[#allocation82_spill]] %s13654_s7  ;;  %s13656_s16 = smov 12  ;;  %3033 = vst [vmem:[#allocation1 + $0x1b0] sm:$0xff] %v10462_v38  ;;  %v6550_v43 = vld [vmem:[#allocation1 + $0x689] ss:$16 sm:%s13590_s2]  }
 0x21a   :  { %s15563_s7 = sld [smem:[#allocation76_spill]]  ;;  %s13658_s17 = smov 48  ;;  %3063 = vst [vmem:[#allocation1 + $0x1a0] sm:$0xff] %v10466_v40  ;;  %v10090_v40 = vunpack.c.l.bf16 %v11431_v39  ;;  %v6573_v56 = vld [vmem:[#allocation1 + $0x109] ss:$16 sm:%s13605_s0]  }
 0x21b   :  { %15564 = sst [smem:[#allocation75_spill]] %s13656_s16  ;;  %s13660_s6 = smov 192  ;;  %3093 = vst [vmem:[#allocation1 + $0x190] sm:$0xff] %v10470_v42  ;;  %v6542_v42 = vsel %vm3846_vm0, %v6540_v35, %v6537_v31  ;;  %v11440_v33 = vld [vmem:[%s15516_s27 + $0x3f8] sm:$0xff]  }
 0x21c   :  { %s15565_s16 = sld [smem:[#allocation77_spill]]  ;;  %s13662_s25 = smov 3  ;;  %3123 = vst [vmem:[#allocation1 + $0x180] sm:$0xff] %v10474_v44  ;;  %v6560_v44 = vld [vmem:[#allocation1 + $0x109] ss:$16 sm:%s13592_s26]  }
 0x21d   :  { %15566 = sst [smem:[#allocation80_spill]] %s13658_s17  ;;  %s13667_s30 = smov 12  ;;  %4584 = vst.msk [vmem:[#allocation0 + $0x20] sm:$0xff] %vm4560_vm5, %v10805_v45   ;;  %v11432_v45 = vld [vmem:[%s15516_s27 + $0x2f8] sm:$0xff]  }
 0x21e   :  { %s15567_s17 = sld [smem:[#allocation56_spill]]  ;;  %s13674_s10 = smov 192  ;;  %4561 = vst.msk [vmem:[#allocation0] sm:$0xff] %vm4560_vm5, %v10804_v47   ;;  %v10190_v47 = vunpack.c.l.bf16 %v11432_v45 }
 0x21f   :  { %15568 = sst [smem:[#allocation83_spill]] %s13660_s6  ;;  %s13804_s28 = smov 3  ;;  %63 = vst [vmem:[#allocation1 + $0x7e0] sm:$0xff] %v10066_v58  ;;  %v6583_v58 = vld [vmem:[#allocation1 + $0x309] ss:$16 sm:%s13607_s29]  }
 0x220   :  { %s15569_s6 = sld [smem:[#allocation57_spill]]  ;;  %v4049_v11 = vld [vmem:[#allocation1 + $0x500] ss:$16 sm:%s15563_s7]   ;;  %s13712_s7 = smov 48  ;;  %93 = vst [vmem:[#allocation1 + $0x7d0] sm:$0xff] %v10070_v63 }
 0x221   :  { %15570 = sst [smem:[#allocation84_spill]] %s13662_s25  ;;  %s13810_s13 = smov 12  ;;  %123 = vst [vmem:[#allocation1 + $0x7c0] sm:$0xff] %v10074_v36 }
 0x222   :  { %s15571_s25 = sld [smem:[#allocation78_spill]]  ;;  %v4052_v12 = vld [vmem:[#allocation1 + $0x500] ss:$16 sm:%s15565_s16]   ;;  %s13722_s16 = smov 12  ;;  %213 = vst [vmem:[#allocation1 + $0x790] sm:$0xff] %v10086_v34  ;;  %v10062_v34 = vunpack.c.l.bf16 %v11440_v33 }
 0x223   :  { %s15572_s20 = sld [smem:[#allocation43_spill]]  ;;  %v4054_v13 = vsel %vm3846_vm0, %v4052_v12, %v4049_v11  ;;  %v13820_v11 = vpop.permute.xlu0 %10807  ;;  %v13822_v12 = vpop.permute.xlu2 %10817  ;;  %s13824_s4 = smov 48  ;;  %243 = vst [vmem:[#allocation1 + $0x780] sm:$0xff] %v10090_v40 }
 0x224   :  { %15573 = sst [smem:[#allocation85_spill]] %s13667_s30  ;;  %s13669_s30 = smov 48  ;;  %v4057_v48 = vld [vmem:[#allocation1 + $0x500] ss:$16 sm:%s15567_s17]   ;;  %993 = vst [vmem:[#allocation1 + $0x5f0] sm:$0xff] %v10190_v47  ;;  %v10809_v39 = vunpack.i.l.bf16 %v13820_v11  ;;  %v10810_v11 = vunpack.i.h.bf16 %v13820_v11 }
 0x225   :  { %15574 = sst [smem:[#allocation88_spill]] %s13669_s30  ;;  %v4059_v14 = vsel %vm3850_vm1, %v4057_v48, %v4054_v13  ;;  %s13697_s17 = smov 192  ;;  %v11428_v48 = vld [vmem:[%s15516_s27 + $0x3d8] sm:$0xff]   ;;  %33 = vst [vmem:[#allocation1 + $0x7f0] sm:$0xff] %v10062_v34  ;;  %v10799_v34 = vunpack.i.l.bf16 %v13777_v53  ;;  %v10800_v53 = vunpack.i.h.bf16 %v13777_v53 }
 0x226   :  { %s15575_s30 = sld [smem:[#allocation60_spill]]  ;;  %v4062_v15 = vld [vmem:[#allocation1 + $0x500] ss:$16 sm:%s15569_s6]   ;;  %s13695_s6 = smov 48  ;;  %v10078_v13 = vunpack.c.l.bf16 %v11428_v48  ;;  %4607 = vst.msk [vmem:[#allocation0 + $0x40] sm:$0xff] %vm4560_vm5, %v10809_v39  }
 0x227   :  { %s15576_s5 = sld [smem:[#allocation61_spill]]  ;;  %v4064_v28 = vsel %vm3854_vm2, %v4062_v15, %v4059_v14  ;;  %v6226_v15 = vsel %vm3850_vm1, %v6224_v10, %v6221_v8  ;;  %v11429_v14 = vld [vmem:[%s15516_s27 + $0x3d0] sm:$0xff]   ;;  %s13862_s12 = smov 48  ;;  %v11436_v8 = vld [vmem:[%s15516_s27 + $0x2d8] sm:$0xff]   ;;  %4630 = vst.msk [vmem:[#allocation0 + $0x60] sm:$0xff] %vm4560_vm5, %v10810_v11  }
 0x228   :  { %15577 = sst [smem:[#allocation89_spill]] %s13674_s10  ;;  %s13676_s10 = smov 3  ;;  %v4133_v16 = vld [vmem:[#allocation1 + $0x700] ss:$16 sm:%s15571_s25]   ;;  %4067 = vst.msk [vmem:[#allocation0 + $0x50] sm:$0xff] %vm3856_vm3, %v4064_v28   ;;  %v10206_v10 = vunpack.c.l.bf16 %v11436_v8 }
 0x229   :  { %v4136_v18 = vld [vmem:[#allocation1 + $0x700] ss:$16 sm:%s15572_s20]   ;;  %s13690_s25 = smov 12  ;;  %15578 = sst [smem:[#allocation6_spill]] %s13697_s17  ;;  %4424 = vst.msk [vmem:[#allocation0 + $0x50] sm:$0xff] %vm4193_vm4, %v10789_v19   ;;  %v10082_v19 = vunpack.c.l.bf16 %v11429_v14 }
 0x22a   :  { %v4138_v20 = vsel %vm3846_vm0, %v4136_v18, %v4133_v16  ;;  %s13704_s20 = smov 3  ;;  %15581 = sst [smem:[#allocation22_spill]] %s13712_s7  ;;  %v6514_v16 = vld [vmem:[#allocation1 + $0x489] ss:$16 sm:%s13528_s18]   ;;  %153 = vst [vmem:[#allocation1 + $0x7b0] sm:$0xff] %v10078_v13 }
 0x22b   :  { %15579 = sst [smem:[#allocation7_spill]] %s13704_s20  ;;  %s13766_s20 = smov 12  ;;  %v6517_v18 = vld [vmem:[#allocation1 + $0x489] ss:$16 sm:%s13535_s23]   ;;  %183 = vst [vmem:[#allocation1 + $0x7a0] sm:$0xff] %v10082_v19 }
 0x22c   :  { %v4141_v21 = vld [vmem:[#allocation1 + $0x700] ss:$16 sm:%s15575_s30]   ;;  %s13706_s30 = smov 12  ;;  %15584 = sst [smem:[#allocation29_spill]] %s13722_s16  ;;  %v6527_v28 = vld [vmem:[#allocation1 + $0x489] ss:$16 sm:%s13555_s1]  }
 0x22d   :  { %v4146_v22 = vld [vmem:[#allocation1 + $0x700] ss:$16 sm:%s15576_s5]   ;;  %v4143_v17 = vsel %vm3850_vm1, %v4141_v21, %v4138_v20  ;;  %15580 = sst [smem:[#allocation93_spill]] %s13706_s30  ;;  %s13714_s5 = smov 192  ;;  %v6231_v20 = vsel %vm3854_vm2, %v6229_v9, %v6226_v15  ;;  %v6519_v21 = vsel %vm3846_vm0, %v6517_v18, %v6514_v16  ;;  %v13921_v15 = vpop.permute.xlu1 %10827  ;;  %1113 = vst [vmem:[#allocation1 + $0x5b0] sm:$0xff] %v10206_v10 }
 0x22e   :  { %v4148_v24 = vsel %vm3854_vm2, %v4146_v22, %v4143_v17  ;;  %15582 = sst [smem:[#allocation28_spill]] %s13714_s5  ;;  %s13720_s5 = smov 3  ;;  %v6522_v22 = vld [vmem:[#allocation1 + $0x489] ss:$16 sm:%s13546_s15]   ;;  %v11437_v16 = vld [vmem:[%s15516_s27 + $0x2d0] sm:$0xff]  }
 0x22f   :  { %4151 = vst.msk [vmem:[#allocation0 + $0x70] sm:$0xff] %vm3856_vm3, %v4148_v24   ;;  %15583 = sst [smem:[#allocation25_spill]] %s13720_s5  ;;  %s13728_s5 = smov 48  ;;  %v6524_v27 = vsel %vm3850_vm1, %v6522_v22, %v6519_v21  ;;  %v10210_v18 = vunpack.c.l.bf16 %v11437_v16  ;;  %v11438_v22 = vld [vmem:[%s15516_s27 + $0x2c8] sm:$0xff]  }
 0x230   :  { %4447 = vst.msk [vmem:[#allocation0 + $0x70] sm:$0xff] %vm4193_vm4, %v10790_v26   ;;  %15585 = sst [smem:[#allocation95_spill]] %s13728_s5  ;;  %s13730_s16 = smov 192  ;;  %v6529_v41 = vsel %vm3854_vm2, %v6527_v28, %v6524_v27  ;;  %v10214_v28 = vunpack.c.l.bf16 %v11438_v22  ;;  %v11439_v27 = vld [vmem:[%s15516_s27 + $0x2c0] sm:$0xff]  }
 0x231   :  { %15586 = sst [smem:[#allocation96_spill]] %s13730_s16  ;;  %s13735_s5 = smov 3  ;;  %1143 = vst [vmem:[#allocation1 + $0x5a0] sm:$0xff] %v10210_v18 }
 0x232   :  { %15587 = sst [smem:[#allocation12_spill]] %s13735_s5  ;;  %s13737_s16 = smov 12  ;;  %1173 = vst [vmem:[#allocation1 + $0x590] sm:$0xff] %v10214_v28 }
 0x233   :  { %15588 = sst [smem:[#allocation14_spill]] %s13737_s16  ;;  %s13742_s5 = smov 48 }
 0x234   :  { %15589 = sst [smem:[#allocation86_spill]] %s13742_s5  ;;  %s13744_s16 = smov 192 }
 0x235   :  { %15590 = sst [smem:[#allocation90_spill]] %s13744_s16  ;;  %s13749_s5 = smov 3 }
 0x236   :  { %15591 = sst [smem:[#allocation87_spill]] %s13749_s5  ;;  %s13754_s5 = smov 12 }
 0x237   :  { %15592 = sst [smem:[#allocation92_spill]] %s13754_s5  ;;  %s13756_s16 = smov 48 }
 0x238   :  { %15593 = sst [smem:[#allocation94_spill]] %s13756_s16  ;;  %s13761_s5 = smov 192 }
 0x239   :  { %s15594_s16 = sld [smem:[#allocation62_spill]]  ;;  %s13832_s18 = smov 192 }
 0x23a   :  { %s15595_s7 = sld [smem:[#allocation40_spill]]  ;;  %s13841_s15 = smov 3 }
 0x23b   :  { %15596 = sst [smem:[#allocation91_spill]] %s13761_s5  ;;  %s13763_s5 = smov 3 }
 0x23c   :  { %15597 = sst [smem:[#allocation8_spill]] %s13763_s5  ;;  %s13853_s1 = smov 12 }
 0x23d   :  { %s15598_s5 = sld [smem:[#allocation44_spill]]  ;;  %s13872_s2 = smov 192 }
 0x23e   :  { %s15599_s30 = sld [smem:[#allocation45_spill]]  ;;  %s13895_s8 = smov 12 }
 0x23f   :  { %15600 = sst [smem:[#allocation23_spill]] %s13766_s20  ;;  %s13768_s20 = smov 48  ;;  %v3986_v49 = vld [vmem:[#allocation1 + $0x380] ss:$16 sm:%s15594_s16]  }
 0x240   :  { %15601 = sst [smem:[#allocation26_spill]] %s13768_s20  ;;  %s13771_s20 = smov 192  ;;  %v3989_v50 = vld [vmem:[#allocation1 + $0x380] ss:$16 sm:%s15595_s7]  }
 0x241   :  { %15602 = sst [smem:[#allocation9_spill]] %s13771_s20  ;;  %s13773_s20 = smov 3  ;;  %v3991_v54 = vsel %vm3846_vm0, %v3989_v50, %v3986_v49  ;;  %v6547_v49 = vsel %vm3850_vm1, %v6545_v37, %v6542_v42  ;;  %v6563_v50 = vld [vmem:[#allocation1 + $0x109] ss:$16 sm:%s13598_s14]  }
 0x242   :  { %15603 = sst [smem:[#allocation2_spill]] %s13773_s20  ;;  %s13779_s16 = smov 12 }
 0x243   :  { %s15604_s20 = sld [smem:[#allocation69_spill]]  ;;  %v3994_v55 = vld [vmem:[#allocation1 + $0x380] ss:$16 sm:%s15598_s5]   ;;  %s13881_s14 = smov 3 }
 0x244   :  { %s15605_s17 = sld [smem:[#allocation72_spill]]  ;;  %v3999_v57 = vld [vmem:[#allocation1 + $0x380] ss:$16 sm:%s15599_s30]   ;;  %s13785_s30 = smov 48  ;;  %v3996_v51 = vsel %vm3850_vm1, %v3994_v55, %v3991_v54  ;;  %v6568_v54 = vld [vmem:[#allocation1 + $0x109] ss:$16 sm:%s13600_s9]  }
 0x245   :  { %v4001_v61 = vsel %vm3854_vm2, %v3999_v57, %v3996_v51  ;;  %s15606_s22 = sld [smem:[#allocation65_spill]]  ;;  %v11433_v55 = vld [vmem:[%s15516_s27 + $0x2f0] sm:$0xff]   ;;  %v6565_v51 = vsel %vm3846_vm0, %v6563_v50, %v6560_v44  ;;  %s13903_s11 = smov 48 }
 0x246   :  { %4004 = vst.msk [vmem:[#allocation0 + $0x38] sm:$0xff] %vm3856_vm3, %v4001_v61   ;;  %s15607_s7 = sld [smem:[#allocation36_spill]]  ;;  %v10194_v57 = vunpack.c.l.bf16 %v11433_v55  ;;  %v11434_v61 = vld [vmem:[%s15516_s27 + $0x2e8] sm:$0xff]   ;;  %s13912_s9 = smov 192  ;;  %v10820_v55 = vunpack.i.h.bf16 %v13822_v12  ;;  %v10819_v12 = vunpack.i.l.bf16 %v13822_v12 }
 0x247   :  { %4493 = vst.msk [vmem:[#allocation0 + $0x38] sm:$0xff] %vm4193_vm4, %v10795_v52   ;;  %s15608_s3 = sld [smem:[#allocation37_spill]]  ;;  %v6552_v52 = vsel %vm3854_vm2, %v6550_v43, %v6547_v49  ;;  %v10198_v62 = vunpack.c.l.bf16 %v11434_v61  ;;  %v6701_v61 = vld [vmem:[#allocation1 + $0x589] ss:$16 sm:%s13690_s25]   ;;  %s13991_s25 = smov 3 }
 0x248   :  { %s15609_s23 = sld [smem:[#allocation38_spill]]  ;;  %v11016_v63 = vpack.i.bf16 %v6552_v52, %v6529_v41  ;;  %1023 = vst [vmem:[#allocation1 + $0x5e0] sm:$0xff] %v10194_v57 }
 0x249   :  { %v6193_v60 = vld [vmem:[#allocation1 + $0x10a] ss:$16 sm:%s15604_s20]   ;;  %s15611_s0 = sld [smem:[#allocation81_spill]]  ;;  %1053 = vst [vmem:[#allocation1 + $0x5d0] sm:$0xff] %v10198_v62  ;;  %s13975_s20 = smov 48 }
 0x24a   :  { %v6196_v59 = vld [vmem:[#allocation1 + $0x10a] ss:$16 sm:%s15605_s17]   ;;  %s13794_s17 = smov 192  ;;  %s15612_s29 = sld [smem:[#allocation18_spill]]  ;;  %v6706_v62 = vld [vmem:[#allocation1 + $0x589] ss:$16 sm:%s13695_s6]  }
 0x24b   :  { %v6198_v0 = vsel %vm3846_vm0, %v6196_v59, %v6193_v60  ;;  %v3902_v26 = vld [vmem:[#allocation1 + $0x180] ss:$16 sm:%s15606_s22]   ;;  %v13891_v60 = vpop.permute.xlu0 %10822  ;;  %v13893_v59 = vpop.permute.xlu2 %10832  ;;  %s15614_s22 = sld [smem:[#allocation20_spill]]  ;;  %4722 = vst.msk [vmem:[#allocation0 + $0x68] sm:$0xff] %vm4560_vm5, %v10820_v55  }
 0x24c   :  { %v6203_v4 = vsel %vm3850_vm1, %v6201_v1, %v6198_v0  ;;  %v3905_v17 = vld [vmem:[#allocation1 + $0x180] ss:$16 sm:%s15607_s7]   ;;  %v6570_v0 = vsel %vm3850_vm1, %v6568_v54, %v6565_v51  ;;  %v6586_v1 = vld [vmem:[#allocation1 + $0x309] ss:$16 sm:%s13612_s19]   ;;  %s15613_s19 = sld [smem:[#allocation19_spill]]  ;;  %4699 = vst.msk [vmem:[#allocation0 + $0x48] sm:$0xff] %vm4560_vm5, %v10819_v12   ;;  %v10835_v55 = vunpack.i.h.bf16 %v13893_v59  ;;  %v10834_v59 = vunpack.i.l.bf16 %v13893_v59 }
 0x24d   :  { %v6208_v7 = vsel %vm3854_vm2, %v6206_v5, %v6203_v4  ;;  %v3910_v24 = vld [vmem:[#allocation1 + $0x180] ss:$16 sm:%s15608_s3]   ;;  %v3907_v29 = vsel %vm3846_vm0, %v3905_v17, %v3902_v26  ;;  %v6575_v6 = vsel %vm3854_vm2, %v6573_v56, %v6570_v0  ;;  %v6588_v46 = vsel %vm3846_vm0, %v6586_v1, %v6583_v58  ;;  %s15615_s7 = sld [smem:[#allocation21_spill]]  ;;  %v6698_v56 = vld [vmem:[#allocation1 + $0x589] ss:$16 sm:%s13676_s10]   ;;  %s13982_s10 = smov 192 }
 0x24e   :  { %v10981_v25 = vpack.i.bf16 %v6231_v20, %v6208_v7  ;;  %v3915_v30 = vld [vmem:[#allocation1 + $0x180] ss:$16 sm:%s15609_s23]   ;;  %v3912_v32 = vsel %vm3850_vm1, %v3910_v24, %v3907_v29  ;;  %s15610_s23 = sld [smem:[#allocation73_spill]]  ;;  %v10218_v29 = vunpack.c.l.bf16 %v11439_v27  ;;  %v10815_v0 = vunpack.i.h.bf16 %v13847_v23  ;;  %4860 = vst.msk [vmem:[#allocation0 + $0x38] sm:$0xff] %vm4560_vm5, %v10835_v55  }
 0x24f   :  { %v3917_v38 = vsel %vm3854_vm2, %v3915_v30, %v3912_v32  ;;  %v11435_v4 = vld [vmem:[%s15516_s27 + $0x2e0] sm:$0xff]   ;;  %v6596_v36 = vld [vmem:[#allocation1 + $0x309] ss:$16 sm:%s15611_s0]   ;;  %s15616_s3 = sld [smem:[#allocation70_spill]]  ;;  %v10814_v23 = vunpack.i.l.bf16 %v13847_v23 }
 0x250   :  { %10982 = vrot.lane.b32.xlu2 %v10981_v25, %s15548_s21  ;;  %3920 = vst.msk [vmem:[#allocation0 + $0x18] sm:$0xff] %vm3856_vm3, %v3917_v38   ;;  %v10202_v5 = vunpack.c.l.bf16 %v11435_v4  ;;  %v6331_v7 = vld [vmem:[#allocation1 + $0x58a] ss:$16 sm:%s15612_s29]   ;;  %s15617_s29 = smov 72   ;;  %s15618_s5 = sld [smem:[#allocation74_spill]] }
 0x251   :  { %4470 = vst.msk [vmem:[#allocation0 + $0x18] sm:$0xff] %vm4193_vm4, %v10794_v3   ;;  %11017 = vrot.lane.b32.xlu0 %v11016_v63, %s15617_s29  ;;  %v6339_v13 = vld [vmem:[#allocation1 + $0x58a] ss:$16 sm:%s15614_s22]   ;;  %s15619_s24 = sld [smem:[#allocation71_spill]]  ;;  %s13940_s22 = smov 48  ;;  %v13989_v63 = vpop.permute.xlu1 %10842 }
 0x252   :  { %v6334_v48 = vld [vmem:[#allocation1 + $0x58a] ss:$16 sm:%s15613_s19]   ;;  %s13923_s19 = smov 3  ;;  %s15620_s26 = sld [smem:[#allocation79_spill]]  ;;  %1083 = vst [vmem:[#allocation1 + $0x5c0] sm:$0xff] %v10202_v5 }
 0x253   :  { %v6336_v19 = vsel %vm3846_vm0, %v6334_v48, %v6331_v7  ;;  %v6344_v20 = vld [vmem:[#allocation1 + $0x58a] ss:$16 sm:%s15615_s7]   ;;  %s15621_s7 = sld [smem:[#allocation82_spill]]  ;;  %v13965_v44 = vpop.permute.xlu2 %10847  ;;  %v13967_v45 = vpop.permute.xlu0 %10837  ;;  %1203 = vst [vmem:[#allocation1 + $0x580] sm:$0xff] %v10218_v29 }
 0x254   :  { %v6591_v2 = vld [vmem:[#allocation1 + $0x309] ss:$16 sm:%s15610_s23]   ;;  %v6341_v17 = vsel %vm3850_vm1, %v6339_v13, %v6336_v19  ;;  %s15624_s0 = sld [smem:[#allocation83_spill]]  ;;  %4676 = vst.msk [vmem:[#allocation0 + $0x28] sm:$0xff] %vm4560_vm5, %v10815_v0   ;;  %v10825_v19 = vunpack.i.h.bf16 %v13891_v60  ;;  %v10824_v60 = vunpack.i.l.bf16 %v13891_v60 }
 0x255   :  { %v6593_v9 = vsel %vm3850_vm1, %v6591_v2, %v6588_v46  ;;  %v6354_v21 = vld [vmem:[#allocation1 + $0x78a] ss:$16 sm:%s15616_s3]   ;;  %s13932_s3 = smov 12  ;;  %v6346_v30 = vsel %vm3854_vm2, %v6344_v20, %v6341_v17  ;;  %s15626_s27 = sld [smem:[#allocation85_spill]]  ;;  %v6703_v2 = vsel %vm3846_vm0, %v6701_v61, %v6698_v56  ;;  %4653 = vst.msk [vmem:[#allocation0 + $0x8] sm:$0xff] %vm4560_vm5, %v10814_v23   ;;  %v10850_v23 = vunpack.i.h.bf16 %v13965_v44 }
 0x256   :  { %v6598_v14 = vsel %vm3854_vm2, %v6596_v36, %v6593_v9  ;;  %v6357_v24 = vld [vmem:[#allocation1 + $0x78a] ss:$16 sm:%s15618_s5]   ;;  %s15622_s5 = sld [smem:[#allocation75_spill]]  ;;  %v6708_v46 = vsel %vm3850_vm1, %v6706_v62, %v6703_v2  ;;  %4768 = vst.msk [vmem:[#allocation0 + $0x30] sm:$0xff] %vm4560_vm5, %v10825_v19   ;;  %v10830_v62 = vunpack.i.h.bf16 %v13921_v15  ;;  %v10829_v15 = vunpack.i.l.bf16 %v13921_v15 }
 0x257   :  { %v11021_v26 = vpack.i.bf16 %v6598_v14, %v6575_v6  ;;  %v6362_v25 = vld [vmem:[#allocation1 + $0x78a] ss:$16 sm:%s15619_s24]   ;;  %s15623_s24 = sld [smem:[#allocation80_spill]]  ;;  %v6359_v3 = vsel %vm3846_vm0, %v6357_v24, %v6354_v21  ;;  %4745 = vst.msk [vmem:[#allocation0 + $0x10] sm:$0xff] %vm4560_vm5, %v10824_v60   ;;  %v10849_v44 = vunpack.i.l.bf16 %v13965_v44  ;;  %v6642_v60 = vld [vmem:[#allocation1 + $0x709] ss:$16 sm:%s13912_s9]  }
 0x258   :  { %v6367_v31 = vld [vmem:[#allocation1 + $0x78a] ss:$16 sm:%s15620_s26]   ;;  %s15625_s26 = sld [smem:[#allocation84_spill]]  ;;  %v6364_v35 = vsel %vm3850_vm1, %v6362_v25, %v6359_v3  ;;  %4837 = vst.msk [vmem:[#allocation0 + $0x18] sm:$0xff] %vm4560_vm5, %v10834_v59   ;;  %s14179_s9 = smov 48 }
 0x259   :  { %v6652_v32 = vld [vmem:[#allocation1 + $0x189] ss:$16 sm:%s15621_s7]   ;;  %s13949_s7 = smov 192  ;;  %11022 = vrot.lane.b32.xlu1 %v11021_v26, %s15617_s29  ;;  %v6369_v40 = vsel %vm3854_vm2, %v6367_v31, %v6364_v35  ;;  %s15629_s23 = sld [smem:[#allocation6_spill]]  ;;  %v14051_v39 = vpop.permute.xlu1 %10857  ;;  %4814 = vst.msk [vmem:[#allocation0 + $0x70] sm:$0xff] %vm4560_vm5, %v10830_v62  }
 0x25a   :  { %v6665_v42 = vld [vmem:[#allocation1 + $0x189] ss:$16 sm:%s15624_s0]   ;;  %s15628_s0 = sld [smem:[#allocation89_spill]]  ;;  %v10996_v47 = vpack.i.bf16 %v6369_v40, %v6346_v30  ;;  %4791 = vst.msk [vmem:[#allocation0 + $0x50] sm:$0xff] %vm4560_vm5, %v10829_v15  }
 0x25b   :  { %v6678_v50 = vld [vmem:[#allocation1 + $0x389] ss:$16 sm:%s15626_s27]   ;;  %s15630_s27 = sld [smem:[#allocation7_spill]]  ;;  %v14030_v28 = vpop.permute.xlu2 %10862  ;;  %v14032_v26 = vpop.permute.xlu0 %10852  ;;  %4997 = vst.msk [vmem:[#allocation0 + $0x60] sm:$0xff] %vm4927_vm6, %v10850_v23  }
 0x25c   :  { %v6655_v37 = vld [vmem:[#allocation1 + $0x189] ss:$16 sm:%s15622_s5]   ;;  %s15627_s5 = sld [smem:[#allocation88_spill]]  ;;  %10997 = vrot.lane.b32.xlu2 %v10996_v47, %s15548_s21  ;;  %4974 = vst.msk [vmem:[#allocation0 + $0x40] sm:$0xff] %vm4927_vm6, %v10849_v44   ;;  %v10865_v59 = vunpack.i.h.bf16 %v14030_v28  ;;  %v10864_v28 = vunpack.i.l.bf16 %v14030_v28 }
 0x25d   :  { %v6660_v38 = vld [vmem:[#allocation1 + $0x189] ss:$16 sm:%s15623_s24]   ;;  %s13958_s24 = smov 3  ;;  %v6657_v41 = vsel %vm3846_vm0, %v6655_v37, %v6652_v32  ;;  %15631 = sst [smem:[#allocation3_spill]] %s13982_s10 }
 0x25e   :  { %v6675_v43 = vld [vmem:[#allocation1 + $0x389] ss:$16 sm:%s15625_s26]   ;;  %s13969_s26 = smov 12  ;;  %v6662_v49 = vsel %vm3850_vm1, %v6660_v38, %v6657_v41  ;;  %s15632_s21 = sld [smem:[#allocation93_spill]]  ;;  %5135 = vst.msk [vmem:[#allocation0 + $0x30] sm:$0xff] %vm4927_vm6, %v10865_v59  }
 0x25f   :  { %v6667_v57 = vsel %vm3854_vm2, %v6665_v42, %v6662_v49  ;;  %v6680_v52 = vsel %vm3846_vm0, %v6678_v50, %v6675_v43  ;;  %15634 = sst [smem:[#allocation97_spill]] %s13991_s25  ;;  %v6711_v4 = vld [vmem:[#allocation1 + $0x589] ss:$16 sm:%s15629_s23]   ;;  %s13999_s23 = smov 12  ;;  %5112 = vst.msk [vmem:[#allocation0 + $0x10] sm:$0xff] %vm4927_vm6, %v10864_v28  }
 0x260   :  { %v6688_v51 = vld [vmem:[#allocation1 + $0x389] ss:$16 sm:%s15628_s0]   ;;  %s15635_s6 = sld [smem:[#allocation28_spill]]  ;;  %v6713_v8 = vsel %vm3854_vm2, %v6711_v4, %v6708_v46 }
 0x261   :  { %s15636_s0 = sld [smem:[#allocation25_spill]]  ;;  %v6721_v5 = vld [vmem:[#allocation1 + $0x789] ss:$16 sm:%s15630_s27]   ;;  %v14120_v19 = vpop.permute.xlu1 %10872 }
 0x262   :  { %v6683_v54 = vld [vmem:[#allocation1 + $0x389] ss:$16 sm:%s15627_s5]   ;;  %s15633_s5 = sld [smem:[#allocation22_spill]] }
 0x263   :  { %v6685_v58 = vsel %vm3850_vm1, %v6683_v54, %v6680_v52  ;;  %15637 = sst [smem:[#allocation98_spill]] %s13999_s23 }
 0x264   :  { %v6690_v1 = vsel %vm3854_vm2, %v6688_v51, %v6685_v58  ;;  %s15638_s27 = sld [smem:[#allocation29_spill]]  ;;  %v6724_v36 = vld [vmem:[#allocation1 + $0x789] ss:$16 sm:%s15632_s21]   ;;  %s14005_s21 = smov 48 }
 0x265   :  { %v11031_v6 = vpack.i.bf16 %v6690_v1, %v6667_v57  ;;  %s15639_s23 = sld [smem:[#allocation95_spill]]  ;;  %v6726_v10 = vsel %vm3846_vm0, %v6724_v36, %v6721_v5  ;;  %v14092_v5 = vpop.permute.xlu2 %10877 }
 0x266   :  { %15640 = sst [smem:[#allocation16_spill]] %s14005_s21  ;;  %v6734_v9 = vld [vmem:[#allocation1 + $0x789] ss:$16 sm:%s15635_s6]   ;;  %s14012_s6 = smov 192 }
 0x267   :  { %s15642_s21 = sld [smem:[#allocation12_spill]]  ;;  %v6468_v48 = vld [vmem:[#allocation1 + $0x89] ss:$16 sm:%s15636_s0]   ;;  %11032 = vrot.lane.b32.xlu0 %v11031_v6, %s15617_s29  ;;  %v14094_v6 = vpop.permute.xlu0 %10867 }
 0x268   :  { %v6729_v7 = vld [vmem:[#allocation1 + $0x789] ss:$16 sm:%s15633_s5]   ;;  %s15641_s5 = sld [smem:[#allocation96_spill]] }
 0x269   :  { %15643 = sst [smem:[#allocation101_spill]] %s14012_s6  ;;  %v6731_v13 = vsel %vm3850_vm1, %v6729_v7, %v6726_v10 }
 0x26a   :  { %s15644_s0 = sld [smem:[#allocation46_spill]]  ;;  %v6471_v16 = vld [vmem:[#allocation1 + $0x89] ss:$16 sm:%s15638_s27]   ;;  %s14020_s27 = smov 3  ;;  %v6736_v14 = vsel %vm3854_vm2, %v6734_v9, %v6731_v13  ;;  %v6838_v9 = vld [vmem:[#allocation1 + $0x88] ss:$16 sm:%s13779_s16]  }
 0x26b   :  { %s15645_s6 = sld [smem:[#allocation47_spill]]  ;;  %v6476_v18 = vld [vmem:[#allocation1 + $0x89] ss:$16 sm:%s15639_s23]   ;;  %v6473_v20 = vsel %vm3846_vm0, %v6471_v16, %v6468_v48  ;;  %v11036_v27 = vpack.i.bf16 %v6736_v14, %v6713_v8  ;;  %v6843_v48 = vld [vmem:[#allocation1 + $0x88] ss:$16 sm:%s13785_s30]   ;;  %s14110_s16 = smov 12 }
 0x26c   :  { %s15646_s25 = sld [smem:[#allocation55_spill]]  ;;  %v6478_v32 = vsel %vm3850_vm1, %v6476_v18, %v6473_v20  ;;  %v6848_v18 = vld [vmem:[#allocation1 + $0x88] ss:$16 sm:%s13794_s17]   ;;  %s14118_s30 = smov 48 }
 0x26d   :  { %s15647_s23 = sld [smem:[#allocation66_spill]]  ;;  %v6491_v22 = vld [vmem:[#allocation1 + $0x289] ss:$16 sm:%s15642_s21]   ;;  %11037 = vrot.lane.b32.xlu1 %v11036_v27, %s15617_s29  ;;  %v6858_v14 = vld [vmem:[#allocation1 + $0x288] ss:$16 sm:%s13804_s28]   ;;  %s14127_s17 = smov 192 }
 0x26e   :  { %15648 = sst [smem:[#allocation15_spill]] %s14020_s27  ;;  %v6481_v21 = vld [vmem:[#allocation1 + $0x89] ss:$16 sm:%s15641_s5]   ;;  %s14028_s5 = smov 12 }
 0x26f   :  { %s15649_s27 = sld [smem:[#allocation59_spill]]  ;;  %v6483_v47 = vsel %vm3854_vm2, %v6481_v21, %v6478_v32  ;;  %s14135_s28 = smov 3  ;;  %v6609_v32 = vld [vmem:[#allocation1 + $0x509] ss:$16 sm:%s13853_s1]  }
 0x270   :  { %s15650_s10 = sld [smem:[#allocation63_spill]]  ;;  %v4070_v17 = vld [vmem:[#allocation1 + $0x580] ss:$16 sm:%s15644_s0]   ;;  %s14164_s1 = smov 3 }
 0x271   :  { %s15651_s21 = sld [smem:[#allocation67_spill]]  ;;  %v4073_v24 = vld [vmem:[#allocation1 + $0x580] ss:$16 sm:%s15645_s6]  }
 0x272   :  { %15652 = sst [smem:[#allocation30_spill]] %s14028_s5  ;;  %v4078_v25 = vld [vmem:[#allocation1 + $0x580] ss:$16 sm:%s15646_s25]   ;;  %v4075_v29 = vsel %vm3846_vm0, %v4073_v24, %v4070_v17  ;;  %v6866_v17 = vld [vmem:[#allocation1 + $0x288] ss:$16 sm:%s13824_s4]   ;;  %v10839_v24 = vunpack.i.l.bf16 %v13967_v45  ;;  %v10840_v45 = vunpack.i.h.bf16 %v13967_v45  ;;  %s14143_s4 = smov 12 }
 0x273   :  { %s15653_s5 = sld [smem:[#allocation68_spill]]  ;;  %v4083_v30 = vld [vmem:[#allocation1 + $0x580] ss:$16 sm:%s15647_s23]   ;;  %v4080_v33 = vsel %vm3850_vm1, %v4078_v25, %v4075_v29  ;;  %s14049_s23 = smov 48  ;;  %v6871_v29 = vld [vmem:[#allocation1 + $0x288] ss:$16 sm:%s13832_s18]  }
 0x274   :  { %s15655_s25 = sld [smem:[#allocation86_spill]]  ;;  %v4085_v40 = vsel %vm3854_vm2, %v4083_v30, %v4080_v33  ;;  %v6606_v30 = vld [vmem:[#allocation1 + $0x509] ss:$16 sm:%s13841_s15]   ;;  %s14151_s18 = smov 48  ;;  %v7004_v44 = vld [vmem:[#allocation1 + $0x708] ss:$16 sm:%s14049_s23]  }
 0x275   :  { %v4154_v3 = vld [vmem:[#allocation1 + $0x780] ss:$16 sm:%s15649_s27]   ;;  %s15656_s6 = sld [smem:[#allocation90_spill]]  ;;  %4088 = vst.msk [vmem:[#allocation0 + $0x58] sm:$0xff] %vm3856_vm3, %v4085_v40   ;;  %v6614_v33 = vld [vmem:[#allocation1 + $0x509] ss:$16 sm:%s13862_s12]  }
 0x276   :  { %v4157_v31 = vld [vmem:[#allocation1 + $0x780] ss:$16 sm:%s15650_s10]   ;;  %s15654_s10 = sld [smem:[#allocation14_spill]]  ;;  %4516 = vst.msk [vmem:[#allocation0 + $0x58] sm:$0xff] %vm4193_vm4, %v10799_v34   ;;  %s14157_s15 = smov 192 }
 0x277   :  { %v4159_v35 = vsel %vm3846_vm0, %v4157_v31, %v4154_v3  ;;  %v4162_v37 = vld [vmem:[#allocation1 + $0x780] ss:$16 sm:%s15651_s21]   ;;  %s15657_s0 = sld [smem:[#allocation87_spill]]  ;;  %v10845_v31 = vunpack.i.h.bf16 %v13989_v63  ;;  %v10844_v63 = vunpack.i.l.bf16 %v13989_v63  ;;  %4883 = vst.msk [vmem:[#allocation0 + $0x58] sm:$0xff] %vm4560_vm5, %v10839_v24   ;;  %s7123_s23 = smov 192 }
 0x278   :  { %v4164_v41 = vsel %vm3850_vm1, %v4162_v37, %v4159_v35  ;;  %s15658_s27 = sld [smem:[#allocation92_spill]]  ;;  %v6611_v35 = vsel %vm3846_vm0, %v6609_v32, %v6606_v30  ;;  %v6619_v37 = vld [vmem:[#allocation1 + $0x509] ss:$16 sm:%s13872_s2]   ;;  %s14171_s2 = smov 12 }
 0x279   :  { %v4167_v38 = vld [vmem:[#allocation1 + $0x780] ss:$16 sm:%s15653_s5]   ;;  %s15659_s21 = sld [smem:[#allocation94_spill]]  ;;  %s14059_s5 = smov 192  ;;  %4951 = vst.msk [vmem:[#allocation0 + $0x20] sm:$0xff] %vm4927_vm6, %v10845_v31  }
 0x27a   :  { %v6499_v43 = vld [vmem:[#allocation1 + $0x289] ss:$16 sm:%s15655_s25]   ;;  %v4169_v11 = vsel %vm3854_vm2, %v4167_v38, %v4164_v41  ;;  %s15661_s25 = sld [smem:[#allocation8_spill]]  ;;  %4928 = vst.msk [vmem:[#allocation0] sm:$0xff] %vm4927_vm6, %v10844_v63  }
 0x27b   :  { %v6504_v50 = vld [vmem:[#allocation1 + $0x289] ss:$16 sm:%s15656_s6]   ;;  %s14068_s6 = smov 3  ;;  %4172 = vst.msk [vmem:[#allocation0 + $0x78] sm:$0xff] %vm3856_vm3, %v4169_v11   ;;  %s15667_s12 = sld [smem:[#allocation3_spill]] }
 0x27c   :  { %v6494_v42 = vld [vmem:[#allocation1 + $0x289] ss:$16 sm:%s15654_s10]   ;;  %s15660_s10 = sld [smem:[#allocation91_spill]]  ;;  %4539 = vst.msk [vmem:[#allocation0 + $0x78] sm:$0xff] %vm4193_vm4, %v10800_v53   ;;  %v6616_v53 = vsel %vm3850_vm1, %v6614_v33, %v6611_v35 }
 0x27d   :  { %v6496_v49 = vsel %vm3846_vm0, %v6494_v42, %v6491_v22  ;;  %v6789_v54 = vld [vmem:[#allocation1 + $0x408] ss:$16 sm:%s15657_s0]   ;;  %15662 = sst [smem:[#allocation31_spill]] %s14068_s6  ;;  %v6629_v38 = vld [vmem:[#allocation1 + $0x709] ss:$16 sm:%s13881_s14]   ;;  %4906 = vst.msk [vmem:[#allocation0 + $0x78] sm:$0xff] %vm4560_vm5, %v10840_v45  }
 0x27e   :  { %s15663_s0 = sld [smem:[#allocation23_spill]]  ;;  %v6501_v57 = vsel %vm3850_vm1, %v6499_v43, %v6496_v49  ;;  %v6792_v52 = vld [vmem:[#allocation1 + $0x408] ss:$16 sm:%s15658_s27]   ;;  %s14075_s27 = smov 12  ;;  %v6632_v41 = vld [vmem:[#allocation1 + $0x709] ss:$16 sm:%s13895_s8]   ;;  %v6621_v43 = vsel %vm3854_vm2, %v6619_v37, %v6616_v53 }
 0x27f   :  { %s15664_s6 = sld [smem:[#allocation26_spill]]  ;;  %v6797_v51 = vld [vmem:[#allocation1 + $0x408] ss:$16 sm:%s15659_s21]   ;;  %v6506_v56 = vsel %vm3854_vm2, %v6504_v50, %v6501_v57  ;;  %v6794_v12 = vsel %vm3846_vm0, %v6792_v52, %v6789_v54  ;;  %v6637_v42 = vld [vmem:[#allocation1 + $0x709] ss:$16 sm:%s13903_s11]   ;;  %v6634_v11 = vsel %vm3846_vm0, %v6632_v41, %v6629_v38 }
 0x280   :  { %s15665_s21 = sld [smem:[#allocation9_spill]]  ;;  %v6812_v61 = vld [vmem:[#allocation1 + $0x608] ss:$16 sm:%s15661_s25]   ;;  %s14083_s25 = smov 48  ;;  %v11011_v0 = vpack.i.bf16 %v6506_v56, %v6483_v47  ;;  %v6799_v1 = vsel %vm3850_vm1, %v6797_v51, %v6794_v12  ;;  %v6639_v49 = vsel %vm3850_vm1, %v6637_v42, %v6634_v11  ;;  %v10879_v42 = vunpack.i.l.bf16 %v14092_v5 }
 0x281   :  { %v6861_v22 = vld [vmem:[#allocation1 + $0x288] ss:$16 sm:%s13810_s13]   ;;  %s11448_s13 = smov 64   ;;  %s15668_s14 = sld [smem:[#allocation97_spill]]  ;;  %v6644_v55 = vsel %vm3854_vm2, %v6642_v60, %v6639_v49  ;;  %v10880_v5 = vunpack.i.h.bf16 %v14092_v5 }
 0x282   :  { %v6802_v58 = vld [vmem:[#allocation1 + $0x408] ss:$16 sm:%s15660_s10]   ;;  %s15666_s10 = sld [smem:[#allocation2_spill]]  ;;  %11012 = vrot.lane.b32.xlu2 %v11011_v0, %s15617_s29  ;;  %v6863_v27 = vsel %vm3846_vm0, %v6861_v22, %v6858_v14  ;;  %v11026_v56 = vpack.i.bf16 %v6644_v55, %v6621_v43  ;;  %5250 = vst.msk [vmem:[#allocation0 + $0x58] sm:$0xff] %vm4927_vm6, %v10879_v42  }
 0x283   :  { %v6804_v46 = vsel %vm3854_vm2, %v6802_v58, %v6799_v1  ;;  %v6868_v3 = vsel %vm3850_vm1, %v6866_v17, %v6863_v27  ;;  %v6927_v47 = vld [vmem:[#allocation1 + $0x108] ss:$16 sm:%s13923_s19]   ;;  %s15669_s8 = sld [smem:[#allocation98_spill]]  ;;  %5273 = vst.msk [vmem:[#allocation0 + $0x78] sm:$0xff] %vm4927_vm6, %v10880_v5  }
 0x284   :  { %v6815_v2 = vld [vmem:[#allocation1 + $0x608] ss:$16 sm:%s15663_s0]   ;;  %s14102_s0 = smov 3  ;;  %v6873_v34 = vsel %vm3854_vm2, %v6871_v29, %v6868_v3  ;;  %s15670_s11 = sld [smem:[#allocation16_spill]] }
 0x285   :  { %v6820_v4 = vld [vmem:[#allocation1 + $0x608] ss:$16 sm:%s15664_s6]   ;;  %s14090_s6 = smov 192  ;;  %v6817_v36 = vsel %vm3846_vm0, %v6815_v2, %v6812_v61  ;;  %s15671_s19 = sld [smem:[#allocation101_spill]] }
 0x286   :  { %v6825_v7 = vld [vmem:[#allocation1 + $0x608] ss:$16 sm:%s15665_s21]   ;;  %v6822_v10 = vsel %vm3850_vm1, %v6820_v4, %v6817_v36  ;;  %v14192_v36 = vpop.permute.xlu2 %10892  ;;  %s7140_s21 = smov 48 }
 0x287   :  { %v6827_v13 = vsel %vm3854_vm2, %v6825_v7, %v6822_v10  ;;  %v6930_v50 = vld [vmem:[#allocation1 + $0x108] ss:$16 sm:%s13932_s3]   ;;  %s15672_s3 = sld [smem:[#allocation15_spill]]  ;;  %v14194_v7 = vpop.permute.xlu0 %10882 }
 0x288   :  { %v6835_v8 = vld [vmem:[#allocation1 + $0x88] ss:$16 sm:%s15666_s10]   ;;  %v11046_v20 = vpack.i.bf16 %v6827_v13, %v6804_v46  ;;  %v6932_v57 = vsel %vm3846_vm0, %v6930_v50, %v6927_v47  ;;  %v10854_v46 = vunpack.i.l.bf16 %v14032_v26  ;;  %v10855_v26 = vunpack.i.h.bf16 %v14032_v26  ;;  %v14203_v13 = vpop.permute.xlu1 %10887  ;;  %s7145_s10 = smov 192 }
 0x289   :  { %v6840_v16 = vsel %vm3846_vm0, %v6838_v9, %v6835_v8  ;;  %v6935_v54 = vld [vmem:[#allocation1 + $0x108] ss:$16 sm:%s13940_s22]   ;;  %s15673_s22 = sld [smem:[#allocation30_spill]] }
 0x28a   :  { %v6845_v21 = vsel %vm3850_vm1, %v6843_v48, %v6840_v16  ;;  %11047 = vrot.lane.b32.xlu0 %v11046_v20, %s11448_s13  ;;  %v6940_v52 = vld [vmem:[#allocation1 + $0x108] ss:$16 sm:%s13949_s7]   ;;  %v6937_v12 = vsel %vm3850_vm1, %v6935_v54, %v6932_v57  ;;  %11027 = vrot.lane.b32.xlu2 %v11026_v56, %s15617_s29  ;;  %s15674_s29 = sld [smem:[#allocation31_spill]]  ;;  %s14212_s7 = smov 192  ;;  %5020 = vst.msk [vmem:[#allocation0 + $0x8] sm:$0xff] %vm4927_vm6, %v10854_v46   ;;  %v10875_v46 = vunpack.i.h.bf16 %v14120_v19  ;;  %v10874_v19 = vunpack.i.l.bf16 %v14120_v19 }
 0x28b   :  { %v6850_v25 = vsel %vm3854_vm2, %v6848_v18, %v6845_v21  ;;  %v6950_v51 = vld [vmem:[#allocation1 + $0x308] ss:$16 sm:%s13958_s24]   ;;  %v6942_v0 = vsel %vm3854_vm2, %v6940_v52, %v6937_v12  ;;  %v10860_v21 = vunpack.i.h.bf16 %v14051_v39  ;;  %v10859_v39 = vunpack.i.l.bf16 %v14051_v39  ;;  %s14220_s24 = smov 3  ;;  %5043 = vst.msk [vmem:[#allocation0 + $0x28] sm:$0xff] %vm4927_vm6, %v10855_v26  }
 0x28c   :  { %v11051_v40 = vpack.i.bf16 %v6873_v34, %v6850_v25  ;;  %v6953_v58 = vld [vmem:[#allocation1 + $0x308] ss:$16 sm:%s13969_s26]   ;;  %s14227_s26 = smov 12  ;;  %v7111_v56 = vld [vmem:[#allocation1 + $0x7] ss:$16 sm:%s14220_s24]   ;;  %5227 = vst.msk [vmem:[#allocation0 + $0x38] sm:$0xff] %vm4927_vm6, %v10875_v46  }
 0x28d   :  { %v6958_v61 = vld [vmem:[#allocation1 + $0x308] ss:$16 sm:%s13975_s20]   ;;  %v6955_v1 = vsel %vm3846_vm0, %v6953_v58, %v6950_v51  ;;  %s7118_s20 = smov 48  ;;  %5089 = vst.msk [vmem:[#allocation0 + $0x68] sm:$0xff] %vm4927_vm6, %v10860_v21   ;;  %v7114_v12 = vld [vmem:[#allocation1 + $0x7] ss:$16 sm:%s14227_s26]  }
 0x28e   :  { %11052 = vrot.lane.b32.xlu1 %v11051_v40, %s11448_s13  ;;  %v6963_v62 = vld [vmem:[#allocation1 + $0x308] ss:$16 sm:%s15667_s12]   ;;  %v6960_v8 = vsel %vm3850_vm1, %v6958_v61, %v6955_v1  ;;  %5066 = vst.msk [vmem:[#allocation0 + $0x48] sm:$0xff] %vm4927_vm6, %v10859_v39   ;;  %v7119_v58 = vld [vmem:[#allocation1 + $0x7] ss:$16 sm:%s7118_s20]   ;;  %v10869_v61 = vunpack.i.l.bf16 %v14094_v6  ;;  %v7116_v28 = vsel %vm3846_vm0, %v7114_v12, %v7111_v56  ;;  %v10870_v6 = vunpack.i.h.bf16 %v14094_v6  ;;  %v14272_v26 = vpop.permute.xlu2 %10907  ;;  %s7209_s12 = smov 48 }
 0x28f   :  { %v6973_v2 = vld [vmem:[#allocation1 + $0x508] ss:$16 sm:%s15668_s14]   ;;  %v6965_v16 = vsel %vm3854_vm2, %v6963_v62, %v6960_v8  ;;  %5204 = vst.msk [vmem:[#allocation0 + $0x18] sm:$0xff] %vm4927_vm6, %v10874_v19   ;;  %s7224_s14 = smov 3  ;;  %s7273_s24 = smov 12  ;;  %v10890_v12 = vunpack.i.h.bf16 %v14203_v13  ;;  %v10889_v13 = vunpack.i.l.bf16 %v14203_v13 }
 0x290   :  { %v6976_v4 = vld [vmem:[#allocation1 + $0x508] ss:$16 sm:%s15669_s8]   ;;  %v11061_v22 = vpack.i.bf16 %v6965_v16, %v6942_v0  ;;  %v7124_v0 = vld [vmem:[#allocation1 + $0x7] ss:$16 sm:%s7123_s23]   ;;  %v14274_v16 = vpop.permute.xlu0 %10897  ;;  %5158 = vst.msk [vmem:[#allocation0 + $0x50] sm:$0xff] %vm4927_vm6, %v10869_v61   ;;  %s7227_s8 = smov 12 }
 0x291   :  { %v6981_v15 = vld [vmem:[#allocation1 + $0x508] ss:$16 sm:%s15670_s11]   ;;  %v6978_v10 = vsel %vm3846_vm0, %v6976_v4, %v6973_v2  ;;  %v7121_v2 = vsel %vm3850_vm1, %v7119_v58, %v7116_v28  ;;  %5181 = vst.msk [vmem:[#allocation0 + $0x70] sm:$0xff] %vm4927_vm6, %v10870_v6   ;;  %s7232_s11 = smov 48  ;;  %s7278_s26 = smov 48 }
 0x292   :  { %v6986_v9 = vld [vmem:[#allocation1 + $0x508] ss:$16 sm:%s15671_s19]   ;;  %v6983_v18 = vsel %vm3850_vm1, %v6981_v15, %v6978_v10  ;;  %11062 = vrot.lane.b32.xlu0 %v11061_v22, %s11448_s13  ;;  %v7126_v10 = vsel %vm3854_vm2, %v7124_v0, %v7121_v2  ;;  %s7247_s19 = smov 3  ;;  %v7279_v28 = vld [vmem:[#allocation1 + $0x687] ss:$16 sm:%s7278_s26]   ;;  %s7283_s20 = smov 192  ;;  %v10909_v2 = vunpack.i.l.bf16 %v14272_v26  ;;  %v10910_v26 = vunpack.i.h.bf16 %v14272_v26 }
 0x293   :  { %v6996_v48 = vld [vmem:[#allocation1 + $0x708] ss:$16 sm:%s15672_s3]   ;;  %v6988_v17 = vsel %vm3854_vm2, %v6986_v9, %v6983_v18  ;;  %s7250_s3 = smov 12  ;;  %s7018_s23 = smov 3  ;;  %5364 = vst.msk [vmem:[#allocation0 + $0x60] sm:$0xff] %vm5294_vm7, %v10890_v12  }
 0x294   :  { %v6999_v23 = vld [vmem:[#allocation1 + $0x708] ss:$16 sm:%s15673_s22]   ;;  %s7255_s22 = smov 48  ;;  %5341 = vst.msk [vmem:[#allocation0 + $0x40] sm:$0xff] %vm5294_vm7, %v10889_v13   ;;  %s7178_s26 = smov 3 }
 0x295   :  { %v7001_v14 = vsel %vm3846_vm0, %v6999_v23, %v6996_v48  ;;  %v7009_v20 = vld [vmem:[#allocation1 + $0x708] ss:$16 sm:%s14059_s5]   ;;  %s7132_s5 = smov 3  ;;  %v7141_v48 = vld [vmem:[#allocation1 + $0x207] ss:$16 sm:%s7140_s21]   ;;  %s7031_s21 = smov 192 }
 0x296   :  { %v7006_v24 = vsel %vm3850_vm1, %v7004_v44, %v7001_v14  ;;  %v6744_v25 = vld [vmem:[#allocation1 + $0x8] ss:$16 sm:%s15674_s29]   ;;  %v7133_v4 = vld [vmem:[#allocation1 + $0x207] ss:$16 sm:%s7132_s5]   ;;  %v10894_v44 = vunpack.i.l.bf16 %v14192_v36  ;;  %v10895_v36 = vunpack.i.h.bf16 %v14192_v36  ;;  %s7260_s29 = smov 192  ;;  %s7021_s5 = smov 12 }
 0x297   :  { %v6747_v27 = vld [vmem:[#allocation1 + $0x8] ss:$16 sm:%s14075_s27]   ;;  %v7011_v29 = vsel %vm3854_vm2, %v7009_v20, %v7006_v24  ;;  %s7135_s27 = smov 12  ;;  %v7146_v23 = vld [vmem:[#allocation1 + $0x207] ss:$16 sm:%s7145_s10]   ;;  %v14279_v20 = vpop.permute.xlu1 %10902  ;;  %s7041_s10 = smov 3 }
 0x298   :  { %v6749_v45 = vsel %vm3846_vm0, %v6747_v27, %v6744_v25  ;;  %v6752_v30 = vld [vmem:[#allocation1 + $0x8] ss:$16 sm:%s14083_s25]   ;;  %v11066_v31 = vpack.i.bf16 %v7011_v29, %v6988_v17  ;;  %v7136_v15 = vld [vmem:[#allocation1 + $0x207] ss:$16 sm:%s7135_s27]   ;;  %s6880_s25 = smov 3  ;;  %5387 = vst.msk [vmem:[#allocation0 + $0x8] sm:$0xff] %vm5294_vm7, %v10894_v44  }
 0x299   :  { %v6757_v3 = vld [vmem:[#allocation1 + $0x8] ss:$16 sm:%s14090_s6]   ;;  %v6754_v32 = vsel %vm3850_vm1, %v6752_v30, %v6749_v45  ;;  %v7138_v9 = vsel %vm3846_vm0, %v7136_v15, %v7133_v4  ;;  %s6883_s6 = smov 12  ;;  %5410 = vst.msk [vmem:[#allocation0 + $0x28] sm:$0xff] %vm5294_vm7, %v10895_v36   ;;  %v14313_v4 = vpop.permute.xlu2 %10922  ;;  %v14315_v15 = vpop.permute.xlu0 %10912  ;;  %s7026_s27 = smov 48 }
 0x29a   :  { %v6766_v33 = vld [vmem:[#allocation1 + $0x208] ss:$16 sm:%s14102_s0]   ;;  %v6759_v63 = vsel %vm3854_vm2, %v6757_v3, %v6754_v32  ;;  %11067 = vrot.lane.b32.xlu1 %v11066_v31, %s11448_s13  ;;  %v7143_v18 = vsel %vm3850_vm1, %v7141_v48, %v7138_v9  ;;  %s6888_s0 = smov 48  ;;  %5525 = vst.msk [vmem:[#allocation0 + $0x50] sm:$0xff] %vm5294_vm7, %v10909_v2  }
 0x29b   :  { %v6769_v34 = vld [vmem:[#allocation1 + $0x208] ss:$16 sm:%s14110_s16]   ;;  %v7148_v21 = vsel %vm3854_vm2, %v7146_v23, %v7143_v18  ;;  %s6893_s16 = smov 192  ;;  %5548 = vst.msk [vmem:[#allocation0 + $0x70] sm:$0xff] %vm5294_vm7, %v10910_v26  }
 0x29c   :  { %v6771_v35 = vsel %vm3846_vm0, %v6769_v34, %v6766_v33  ;;  %v6774_v37 = vld [vmem:[#allocation1 + $0x208] ss:$16 sm:%s14118_s30]   ;;  %v11081_v24 = vpack.i.bf16 %v7148_v21, %v7126_v10  ;;  %s6903_s30 = smov 3 }
 0x29d   :  { %v6779_v38 = vld [vmem:[#allocation1 + $0x208] ss:$16 sm:%s14127_s17]   ;;  %v6776_v40 = vsel %vm3850_vm1, %v6774_v37, %v6771_v35  ;;  %s6906_s17 = smov 12  ;;  %v7210_v37 = vld [vmem:[#allocation1 + $0x87] ss:$16 sm:%s7209_s12]   ;;  %s7375_s12 = smov 192 }
 0x29e   :  { %v7065_v53 = vld [vmem:[#allocation1 + $0x588] ss:$16 sm:%s14135_s28]   ;;  %v6781_v43 = vsel %vm3854_vm2, %v6779_v38, %v6776_v40  ;;  %s6911_s28 = smov 48 }
 0x29f   :  { %v7068_v41 = vld [vmem:[#allocation1 + $0x588] ss:$16 sm:%s14143_s4]   ;;  %v11041_v50 = vpack.i.bf16 %v6781_v43, %v6759_v63  ;;  %s11449_s4 = smov 56   ;;  %v7228_v43 = vld [vmem:[#allocation1 + $0x287] ss:$16 sm:%s7227_s8]   ;;  %v14320_v9 = vpop.permute.xlu1 %10917  ;;  %s7398_s8 = smov 192 }
 0x2a0   :  { %v7070_v11 = vsel %vm3846_vm0, %v7068_v41, %v7065_v53  ;;  %v7073_v60 = vld [vmem:[#allocation1 + $0x588] ss:$16 sm:%s14151_s18]   ;;  %s6916_s18 = smov 192  ;;  %v7225_v41 = vld [vmem:[#allocation1 + $0x287] ss:$16 sm:%s7224_s14]   ;;  %s7388_s14 = smov 12 }
 0x2a1   :  { %v7078_v47 = vld [vmem:[#allocation1 + $0x588] ss:$16 sm:%s14157_s15]   ;;  %v7075_v54 = vsel %vm3850_vm1, %v7073_v60, %v7070_v11  ;;  %11042 = vrot.lane.b32.xlu2 %v11041_v50, %s11448_s13  ;;  %s7201_s15 = smov 3  ;;  %v7233_v11 = vld [vmem:[#allocation1 + $0x287] ss:$16 sm:%s7232_s11]   ;;  %s7408_s11 = smov 3  ;;  %v14352_v12 = vpop.permute.xlu0 %10927 }
 0x2a2   :  { %v7088_v49 = vld [vmem:[#allocation1 + $0x788] ss:$16 sm:%s14164_s1]   ;;  %v7080_v51 = vsel %vm3854_vm2, %v7078_v47, %v7075_v54  ;;  %11082 = vrot.lane.b32.xlu1 %v11081_v24, %s11449_s4  ;;  %v7202_v34 = vld [vmem:[#allocation1 + $0x87] ss:$16 sm:%s7201_s15]   ;;  %s7204_s1 = smov 12  ;;  %v7230_v47 = vsel %vm3846_vm0, %v7228_v43, %v7225_v41  ;;  %v10884_v54 = vunpack.i.l.bf16 %v14194_v7  ;;  %v10885_v7 = vunpack.i.h.bf16 %v14194_v7  ;;  %s7365_s15 = smov 12 }
 0x2a3   :  { %v7091_v55 = vld [vmem:[#allocation1 + $0x788] ss:$16 sm:%s14171_s2]   ;;  %v7205_v35 = vld [vmem:[#allocation1 + $0x87] ss:$16 sm:%s7204_s1]   ;;  %s7214_s2 = smov 192  ;;  %s7370_s1 = smov 48 }
 0x2a4   :  { %v7096_v57 = vld [vmem:[#allocation1 + $0x788] ss:$16 sm:%s14179_s9]   ;;  %v7093_v59 = vsel %vm3846_vm0, %v7091_v55, %v7088_v49  ;;  %v7207_v40 = vsel %vm3846_vm0, %v7205_v35, %v7202_v34  ;;  %v7215_v53 = vld [vmem:[#allocation1 + $0x87] ss:$16 sm:%s7214_s2]   ;;  %s7237_s9 = smov 192  ;;  %v7235_v55 = vsel %vm3850_vm1, %v7233_v11, %v7230_v47  ;;  %5295 = vst.msk [vmem:[#allocation0] sm:$0xff] %vm5294_vm7, %v10884_v54   ;;  %v10899_v11 = vunpack.i.l.bf16 %v14274_v16 }
 0x2a5   :  { %v7101_v52 = vld [vmem:[#allocation1 + $0x788] ss:$16 sm:%s14212_s7]   ;;  %v7098_v62 = vsel %vm3850_vm1, %v7096_v57, %v7093_v59  ;;  %v7212_v42 = vsel %vm3850_vm1, %v7210_v37, %v7207_v40  ;;  %v7238_v49 = vld [vmem:[#allocation1 + $0x287] ss:$16 sm:%s7237_s9]   ;;  %s7270_s7 = smov 3  ;;  %5318 = vst.msk [vmem:[#allocation0 + $0x20] sm:$0xff] %vm5294_vm7, %v10885_v7   ;;  %v10900_v16 = vunpack.i.h.bf16 %v14274_v16 }
 0x2a6   :  { %v7103_v1 = vsel %vm3854_vm2, %v7101_v52, %v7098_v62  ;;  %v6881_v14 = vld [vmem:[#allocation1 + $0x488] ss:$16 sm:%s6880_s25]   ;;  %v7217_v60 = vsel %vm3854_vm2, %v7215_v53, %v7212_v42  ;;  %v7248_v50 = vld [vmem:[#allocation1 + $0x487] ss:$16 sm:%s7247_s19]   ;;  %v7240_v5 = vsel %vm3854_vm2, %v7238_v49, %v7235_v55  ;;  %s7044_s25 = smov 12  ;;  %s7385_s2 = smov 3 }
 0x2a7   :  { %v11076_v8 = vpack.i.bf16 %v7103_v1, %v7080_v51  ;;  %v6884_v22 = vld [vmem:[#allocation1 + $0x488] ss:$16 sm:%s6883_s6]   ;;  %v7251_v57 = vld [vmem:[#allocation1 + $0x487] ss:$16 sm:%s7250_s3]   ;;  %v11091_v58 = vpack.i.bf16 %v7240_v5, %v7217_v60  ;;  %s7049_s6 = smov 48  ;;  %s7411_s9 = smov 12 }
 0x2a8   :  { %v6889_v17 = vld [vmem:[#allocation1 + $0x488] ss:$16 sm:%s6888_s0]   ;;  %v6886_v39 = vsel %vm3846_vm0, %v6884_v22, %v6881_v14  ;;  %v7256_v52 = vld [vmem:[#allocation1 + $0x487] ss:$16 sm:%s7255_s22]   ;;  %v7253_v51 = vsel %vm3846_vm0, %v7251_v57, %v7248_v50  ;;  %s7054_s0 = smov 192  ;;  %s7416_s19 = smov 48 }
 0x2a9   :  { %11077 = vrot.lane.b32.xlu0 %v11076_v8, %s11448_s13  ;;  %v6894_v25 = vld [vmem:[#allocation1 + $0x488] ss:$16 sm:%s6893_s16]   ;;  %v6891_v27 = vsel %vm3850_vm1, %v6889_v17, %v6886_v39  ;;  %v7261_v59 = vld [vmem:[#allocation1 + $0x487] ss:$16 sm:%s7260_s29]   ;;  %v7258_v61 = vsel %vm3850_vm1, %v7256_v52, %v7253_v51  ;;  %s7339_s16 = smov 3  ;;  %s7421_s3 = smov 192  ;;  %v10905_v52 = vunpack.i.h.bf16 %v14279_v20  ;;  %v10904_v20 = vunpack.i.l.bf16 %v14279_v20 }
 0x2aa   :  { %v6904_v29 = vld [vmem:[#allocation1 + $0x688] ss:$16 sm:%s6903_s30]   ;;  %v6896_v30 = vsel %vm3854_vm2, %v6894_v25, %v6891_v27  ;;  %v7271_v56 = vld [vmem:[#allocation1 + $0x687] ss:$16 sm:%s7270_s7]   ;;  %v7263_v0 = vsel %vm3854_vm2, %v7261_v59, %v7258_v61  ;;  %s7342_s30 = smov 12  ;;  %s7155_s22 = smov 3 }
 0x2ab   :  { %v6907_v45 = vld [vmem:[#allocation1 + $0x688] ss:$16 sm:%s6906_s17]   ;;  %v7274_v62 = vld [vmem:[#allocation1 + $0x687] ss:$16 sm:%s7273_s24]   ;;  %s7347_s17 = smov 48  ;;  %5433 = vst.msk [vmem:[#allocation0 + $0x48] sm:$0xff] %vm5294_vm7, %v10899_v11  }
 0x2ac   :  { %v6909_v3 = vsel %vm3846_vm0, %v6907_v45, %v6904_v29  ;;  %v6912_v31 = vld [vmem:[#allocation1 + $0x688] ss:$16 sm:%s6911_s28]   ;;  %v7276_v6 = vsel %vm3846_vm0, %v7274_v62, %v7271_v56  ;;  %v7284_v1 = vld [vmem:[#allocation1 + $0x687] ss:$16 sm:%s7283_s20]   ;;  %s7352_s28 = smov 192  ;;  %v14350_v56 = vpop.permute.xlu2 %10937  ;;  %s7158_s29 = smov 12  ;;  %v10924_v62 = vunpack.i.l.bf16 %v14313_v4  ;;  %v10925_v4 = vunpack.i.h.bf16 %v14313_v4 }
 0x2ad   :  { %v6914_v32 = vsel %vm3850_vm1, %v6912_v31, %v6909_v3  ;;  %v6917_v33 = vld [vmem:[#allocation1 + $0x688] ss:$16 sm:%s6916_s18]   ;;  %v7281_v46 = vsel %vm3850_vm1, %v7279_v28, %v7276_v6  ;;  %v7340_v29 = vld [vmem:[#allocation1 + $0x507] ss:$16 sm:%s7339_s16]   ;;  %s7362_s18 = smov 3  ;;  %s7163_s7 = smov 48  ;;  %v14358_v28 = vpop.permute.xlu1 %10932 }
 0x2ae   :  { %v6919_v63 = vsel %vm3854_vm2, %v6917_v33, %v6914_v32  ;;  %v7019_v8 = vld [vmem:[#allocation1 + $0x188] ss:$16 sm:%s7018_s23]   ;;  %v7286_v48 = vsel %vm3854_vm2, %v7284_v1, %v7281_v46  ;;  %v7343_v45 = vld [vmem:[#allocation1 + $0x507] ss:$16 sm:%s7342_s30]   ;;  %5456 = vst.msk [vmem:[#allocation0 + $0x68] sm:$0xff] %vm5294_vm7, %v10900_v16   ;;  %s7168_s24 = smov 192 }
 0x2af   :  { %v11056_v38 = vpack.i.bf16 %v6919_v63, %v6896_v30  ;;  %v7022_v10 = vld [vmem:[#allocation1 + $0x188] ss:$16 sm:%s7021_s5]   ;;  %v11096_v18 = vpack.i.bf16 %v7286_v48, %v7263_v0  ;;  %v7345_v3 = vsel %vm3846_vm0, %v7343_v45, %v7340_v29  ;;  %v7348_v31 = vld [vmem:[#allocation1 + $0x507] ss:$16 sm:%s7347_s17]   ;;  %5502 = vst.msk [vmem:[#allocation0 + $0x30] sm:$0xff] %vm5294_vm7, %v10905_v52   ;;  %s7181_s20 = smov 12 }
 0x2b0   :  { %v7024_v23 = vsel %vm3846_vm0, %v7022_v10, %v7019_v8  ;;  %v7027_v19 = vld [vmem:[#allocation1 + $0x188] ss:$16 sm:%s7026_s27]   ;;  %v7353_v32 = vld [vmem:[#allocation1 + $0x507] ss:$16 sm:%s7352_s28]   ;;  %v7350_v34 = vsel %vm3850_vm1, %v7348_v31, %v7345_v3  ;;  %5479 = vst.msk [vmem:[#allocation0 + $0x10] sm:$0xff] %vm5294_vm7, %v10904_v20   ;;  %s7186_s23 = smov 48 }
 0x2b1   :  { %11057 = vrot.lane.b32.xlu2 %v11056_v38, %s11448_s13  ;;  %11092 = vrot.lane.b32.xlu0 %v11091_v58, %s11449_s4  ;;  %v7029_v14 = vsel %vm3850_vm1, %v7027_v19, %v7024_v23  ;;  %v7032_v44 = vld [vmem:[#allocation1 + $0x188] ss:$16 sm:%s7031_s21]   ;;  %v7363_v63 = vld [vmem:[#allocation1 + $0x707] ss:$16 sm:%s7362_s18]   ;;  %v7355_v37 = vsel %vm3854_vm2, %v7353_v32, %v7350_v34  ;;  %s7191_s5 = smov 192  ;;  %s7477_s27 = smov 3  ;;  %v10914_v34 = vunpack.i.l.bf16 %v14315_v15  ;;  %v10915_v15 = vunpack.i.h.bf16 %v14315_v15 }
 0x2b2   :  { %v7042_v21 = vld [vmem:[#allocation1 + $0x388] ss:$16 sm:%s7041_s10]   ;;  %11097 = vrot.lane.b32.xlu1 %v11096_v18, %s11449_s4  ;;  %v7034_v17 = vsel %vm3854_vm2, %v7032_v44, %v7029_v14  ;;  %v7366_v35 = vld [vmem:[#allocation1 + $0x707] ss:$16 sm:%s7365_s15]   ;;  %5662 = vst.msk [vmem:[#allocation0] sm:$0xff] %vm5661_vm8, %v10924_v62   ;;  %s7480_s21 = smov 12 }
 0x2b3   :  { %v7045_v22 = vld [vmem:[#allocation1 + $0x388] ss:$16 sm:%s7044_s25]   ;;  %v7368_v38 = vsel %vm3846_vm0, %v7366_v35, %v7363_v63  ;;  %v7371_v40 = vld [vmem:[#allocation1 + $0x707] ss:$16 sm:%s7370_s1]   ;;  %s7485_s10 = smov 48  ;;  %s7490_s25 = smov 192 }
 0x2b4   :  { %v7047_v24 = vsel %vm3846_vm0, %v7045_v22, %v7042_v21  ;;  %v7050_v39 = vld [vmem:[#allocation1 + $0x388] ss:$16 sm:%s7049_s6]   ;;  %v7376_v53 = vld [vmem:[#allocation1 + $0x707] ss:$16 sm:%s7375_s12]   ;;  %v7373_v41 = vsel %vm3850_vm1, %v7371_v40, %v7368_v38  ;;  %v7478_v21 = vld [vmem:[#allocation1 + $0x6] ss:$16 sm:%s7477_s27]  }
 0x2b5   :  { %v7055_v25 = vld [vmem:[#allocation1 + $0x388] ss:$16 sm:%s7054_s0]   ;;  %v7052_v27 = vsel %vm3850_vm1, %v7050_v39, %v7047_v24  ;;  %v7386_v42 = vld [vmem:[#allocation1 + $0x187] ss:$16 sm:%s7385_s2]   ;;  %v7378_v36 = vsel %vm3854_vm2, %v7376_v53, %v7373_v41  ;;  %v7486_v24 = vld [vmem:[#allocation1 + $0x6] ss:$16 sm:%s7485_s10]   ;;  %v10919_v41 = vunpack.i.l.bf16 %v14320_v9  ;;  %v10920_v9 = vunpack.i.h.bf16 %v14320_v9  ;;  %v14397_v52 = vpop.permute.xlu1 %10947 }
 0x2b6   :  { %v7057_v30 = vsel %vm3854_vm2, %v7055_v25, %v7052_v27  ;;  %v7389_v43 = vld [vmem:[#allocation1 + $0x187] ss:$16 sm:%s7388_s14]   ;;  %v11106_v50 = vpack.i.bf16 %v7378_v36, %v7355_v37  ;;  %v7491_v27 = vld [vmem:[#allocation1 + $0x6] ss:$16 sm:%s7490_s25]   ;;  %s7499_s6 = smov 3  ;;  %s7502_s0 = smov 12 }
 0x2b7   :  { %v11071_v33 = vpack.i.bf16 %v7057_v30, %v7034_v17  ;;  %v7391_v60 = vsel %vm3846_vm0, %v7389_v43, %v7386_v42  ;;  %v7399_v49 = vld [vmem:[#allocation1 + $0x187] ss:$16 sm:%s7398_s8]   ;;  %v7481_v17 = vld [vmem:[#allocation1 + $0x6] ss:$16 sm:%s7480_s21]   ;;  %5685 = vst.msk [vmem:[#allocation0 + $0x20] sm:$0xff] %vm5661_vm8, %v10925_v4   ;;  %s7507_s16 = smov 48 }
 0x2b8   :  { %v7409_v55 = vld [vmem:[#allocation1 + $0x387] ss:$16 sm:%s7408_s11]   ;;  %v7483_v25 = vsel %vm3846_vm0, %v7481_v17, %v7478_v21  ;;  %v7500_v45 = vld [vmem:[#allocation1 + $0x206] ss:$16 sm:%s7499_s6]   ;;  %s7512_s30 = smov 192  ;;  %s7522_s17 = smov 3 }
 0x2b9   :  { %11072 = vrot.lane.b32.xlu2 %v11071_v33, %s11448_s13  ;;  %s7393_s13 = smov 48  ;;  %v7412_v57 = vld [vmem:[#allocation1 + $0x387] ss:$16 sm:%s7411_s9]   ;;  %11107 = vrot.lane.b32.xlu0 %v11106_v50, %s11449_s4  ;;  %v7488_v29 = vsel %vm3850_vm1, %v7486_v24, %v7483_v25  ;;  %v7503_v30 = vld [vmem:[#allocation1 + $0x206] ss:$16 sm:%s7502_s0]   ;;  %s7525_s28 = smov 12  ;;  %v14390_v50 = vpop.permute.xlu2 %10952  ;;  %v10939_v25 = vunpack.i.l.bf16 %v14350_v56  ;;  %v10940_v56 = vunpack.i.h.bf16 %v14350_v56 }
 0x2ba   :  { %v7394_v47 = vld [vmem:[#allocation1 + $0x187] ss:$16 sm:%s7393_s13]   ;;  %v7414_v5 = vsel %vm3846_vm0, %v7412_v57, %v7409_v55  ;;  %v7493_v3 = vsel %vm3854_vm2, %v7491_v27, %v7488_v29  ;;  %v7505_v31 = vsel %vm3846_vm0, %v7503_v30, %v7500_v45  ;;  %v7508_v32 = vld [vmem:[#allocation1 + $0x206] ss:$16 sm:%s7507_s16]   ;;  %s7530_s18 = smov 48  ;;  %s7535_s15 = smov 192 }
 0x2bb   :  { %v7396_v54 = vsel %vm3850_vm1, %v7394_v47, %v7391_v60  ;;  %v7417_v51 = vld [vmem:[#allocation1 + $0x387] ss:$16 sm:%s7416_s19]   ;;  %v7513_v33 = vld [vmem:[#allocation1 + $0x206] ss:$16 sm:%s7512_s30]   ;;  %v7510_v63 = vsel %vm3850_vm1, %v7508_v32, %v7505_v31  ;;  %s7545_s1 = smov 3  ;;  %s7548_s12 = smov 12 }
 0x2bc   :  { %v7401_v7 = vsel %vm3854_vm2, %v7399_v49, %v7396_v54  ;;  %v7422_v59 = vld [vmem:[#allocation1 + $0x387] ss:$16 sm:%s7421_s3]   ;;  %v7419_v58 = vsel %vm3850_vm1, %v7417_v51, %v7414_v5  ;;  %v7523_v35 = vld [vmem:[#allocation1 + $0x406] ss:$16 sm:%s7522_s17]   ;;  %v7515_v38 = vsel %vm3854_vm2, %v7513_v33, %v7510_v63  ;;  %s7553_s2 = smov 48  ;;  %s7558_s14 = smov 192  ;;  %v14392_v54 = vpop.permute.xlu0 %10942  ;;  %v10929_v33 = vunpack.i.l.bf16 %v14352_v12 }
 0x2bd   :  { %v7156_v61 = vld [vmem:[#allocation1 + $0x407] ss:$16 sm:%s7155_s22]   ;;  %v7424_v13 = vsel %vm3854_vm2, %v7422_v59, %v7419_v58  ;;  %v7526_v37 = vld [vmem:[#allocation1 + $0x406] ss:$16 sm:%s7525_s28]   ;;  %v11121_v42 = vpack.i.bf16 %v7515_v38, %v7493_v3  ;;  %5571 = vst.msk [vmem:[#allocation0 + $0x18] sm:$0xff] %vm5294_vm7, %v10914_v34   ;;  %s7293_s13 = smov 3  ;;  %v10930_v12 = vunpack.i.h.bf16 %v14352_v12 }
 0x2be   :  { %v7159_v0 = vld [vmem:[#allocation1 + $0x407] ss:$16 sm:%s7158_s29]   ;;  %v11111_v1 = vpack.i.bf16 %v7424_v13, %v7401_v7  ;;  %v7528_v40 = vsel %vm3846_vm0, %v7526_v37, %v7523_v35  ;;  %v7531_v53 = vld [vmem:[#allocation1 + $0x406] ss:$16 sm:%s7530_s18]   ;;  %s11450_s8 = smov 48   ;;  %5594 = vst.msk [vmem:[#allocation0 + $0x38] sm:$0xff] %vm5294_vm7, %v10915_v15  }
 0x2bf   :  { %v7164_v6 = vld [vmem:[#allocation1 + $0x407] ss:$16 sm:%s7163_s7]   ;;  %v7161_v2 = vsel %vm3846_vm0, %v7159_v0, %v7156_v61  ;;  %v7536_v26 = vld [vmem:[#allocation1 + $0x406] ss:$16 sm:%s7535_s15]   ;;  %v7533_v43 = vsel %vm3850_vm1, %v7531_v53, %v7528_v40  ;;  %s7296_s11 = smov 12  ;;  %s7301_s9 = smov 48 }
 0x2c0   :  { %v7169_v46 = vld [vmem:[#allocation1 + $0x407] ss:$16 sm:%s7168_s24]   ;;  %v7166_v8 = vsel %vm3850_vm1, %v7164_v6, %v7161_v2  ;;  %11112 = vrot.lane.b32.xlu1 %v11111_v1, %s11449_s4  ;;  %v7546_v11 = vld [vmem:[#allocation1 + $0x606] ss:$16 sm:%s7545_s1]   ;;  %v7538_v60 = vsel %vm3854_vm2, %v7536_v26, %v7533_v43  ;;  %5617 = vst.msk [vmem:[#allocation0 + $0x58] sm:$0xff] %vm5294_vm7, %v10919_v41   ;;  %s7306_s19 = smov 192  ;;  %v10934_v26 = vunpack.i.l.bf16 %v14358_v28  ;;  %v10935_v28 = vunpack.i.h.bf16 %v14358_v28 }
 0x2c1   :  { %v7179_v10 = vld [vmem:[#allocation1 + $0x607] ss:$16 sm:%s7178_s26]   ;;  %v7171_v23 = vsel %vm3854_vm2, %v7169_v46, %v7166_v8  ;;  %v7549_v36 = vld [vmem:[#allocation1 + $0x606] ss:$16 sm:%s7548_s12]   ;;  %11122 = vrot.lane.b32.xlu0 %v11121_v42, %s11450_s8  ;;  %5640 = vst.msk [vmem:[#allocation0 + $0x78] sm:$0xff] %vm5294_vm7, %v10920_v9   ;;  %s7316_s3 = smov 3  ;;  %v14430_v43 = vpop.permute.xlu2 %10967 }
 0x2c2   :  { %v7182_v48 = vld [vmem:[#allocation1 + $0x607] ss:$16 sm:%s7181_s20]   ;;  %v7551_v47 = vsel %vm3846_vm0, %v7549_v36, %v7546_v11  ;;  %v7554_v49 = vld [vmem:[#allocation1 + $0x606] ss:$16 sm:%s7553_s2]   ;;  %s7319_s22 = smov 12  ;;  %s7324_s29 = smov 48 }
 0x2c3   :  { %v7184_v19 = vsel %vm3846_vm0, %v7182_v48, %v7179_v10  ;;  %v7187_v18 = vld [vmem:[#allocation1 + $0x607] ss:$16 sm:%s7186_s23]   ;;  %v7559_v16 = vld [vmem:[#allocation1 + $0x606] ss:$16 sm:%s7558_s14]   ;;  %v7556_v55 = vsel %vm3850_vm1, %v7554_v49, %v7551_v47  ;;  %s7329_s7 = smov 192  ;;  %s7614_s24 = smov 3  ;;  %v14436_v47 = vpop.permute.xlu1 %10962 }
 0x2c4   :  { %v7189_v14 = vsel %vm3850_vm1, %v7187_v18, %v7184_v19  ;;  %v7192_v44 = vld [vmem:[#allocation1 + $0x607] ss:$16 sm:%s7191_s5]   ;;  %v7561_v7 = vsel %vm3854_vm2, %v7559_v16, %v7556_v55  ;;  %s7617_s26 = smov 12  ;;  %v7615_v8 = vld [vmem:[#allocation1 + $0x486] ss:$16 sm:%s7614_s24]   ;;  %s7622_s20 = smov 48  ;;  %v14432_v11 = vpop.permute.xlu0 %10957 }
 0x2c5   :  { %v7194_v22 = vsel %vm3854_vm2, %v7192_v44, %v7189_v14  ;;  %v7294_v57 = vld [vmem:[#allocation1 + $0x107] ss:$16 sm:%s7293_s13]   ;;  %v11126_v59 = vpack.i.bf16 %v7561_v7, %v7538_v60  ;;  %v7618_v10 = vld [vmem:[#allocation1 + $0x486] ss:$16 sm:%s7617_s26]   ;;  %s7627_s23 = smov 192  ;;  %s7637_s5 = smov 3 }
 0x2c6   :  { %v11086_v39 = vpack.i.bf16 %v7194_v22, %v7171_v23  ;;  %v7297_v5 = vld [vmem:[#allocation1 + $0x107] ss:$16 sm:%s7296_s11]   ;;  %v7620_v4 = vsel %vm3846_vm0, %v7618_v10, %v7615_v8  ;;  %v7623_v23 = vld [vmem:[#allocation1 + $0x486] ss:$16 sm:%s7622_s20]   ;;  %s7640_s27 = smov 12  ;;  %s7645_s21 = smov 48 }
 0x2c7   :  { %v7302_v51 = vld [vmem:[#allocation1 + $0x107] ss:$16 sm:%s7301_s9]   ;;  %v7299_v20 = vsel %vm3846_vm0, %v7297_v5, %v7294_v57  ;;  %v7628_v19 = vld [vmem:[#allocation1 + $0x486] ss:$16 sm:%s7627_s23]   ;;  %v7625_v14 = vsel %vm3850_vm1, %v7623_v23, %v7620_v4  ;;  %s7650_s10 = smov 192  ;;  %s7660_s25 = smov 3  ;;  %v10954_v23 = vunpack.i.l.bf16 %v14390_v50  ;;  %v10955_v50 = vunpack.i.h.bf16 %v14390_v50 }
 0x2c8   :  { %11087 = vrot.lane.b32.xlu2 %v11086_v39, %s11449_s4  ;;  %v7307_v58 = vld [vmem:[#allocation1 + $0x107] ss:$16 sm:%s7306_s19]   ;;  %v7304_v61 = vsel %vm3850_vm1, %v7302_v51, %v7299_v20  ;;  %11127 = vrot.lane.b32.xlu1 %v11126_v59, %s11450_s8  ;;  %v7638_v44 = vld [vmem:[#allocation1 + $0x686] ss:$16 sm:%s7637_s5]   ;;  %v7630_v22 = vsel %vm3854_vm2, %v7628_v19, %v7625_v14  ;;  %s7663_s6 = smov 12  ;;  %s7668_s0 = smov 48 }
 0x2c9   :  { %v7317_v62 = vld [vmem:[#allocation1 + $0x307] ss:$16 sm:%s7316_s3]   ;;  %v7309_v0 = vsel %vm3854_vm2, %v7307_v58, %v7304_v61  ;;  %v7641_v21 = vld [vmem:[#allocation1 + $0x686] ss:$16 sm:%s7640_s27]   ;;  %s7673_s16 = smov 192  ;;  %s7683_s30 = smov 3 }
 0x2ca   :  { %v7320_v13 = vld [vmem:[#allocation1 + $0x307] ss:$16 sm:%s7319_s22]   ;;  %v7643_v17 = vsel %vm3846_vm0, %v7641_v21, %v7638_v44  ;;  %v7646_v24 = vld [vmem:[#allocation1 + $0x686] ss:$16 sm:%s7645_s21]   ;;  %s7686_s17 = smov 12  ;;  %s7691_s28 = smov 48 }
 0x2cb   :  { %v7322_v6 = vsel %vm3846_vm0, %v7320_v13, %v7317_v62  ;;  %v7325_v1 = vld [vmem:[#allocation1 + $0x307] ss:$16 sm:%s7324_s29]   ;;  %v7651_v39 = vld [vmem:[#allocation1 + $0x686] ss:$16 sm:%s7650_s10]   ;;  %v7648_v27 = vsel %vm3850_vm1, %v7646_v24, %v7643_v17  ;;  %s7696_s18 = smov 192  ;;  %5800 = vst.msk [vmem:[#allocation0 + $0x48] sm:$0xff] %vm5661_vm8, %v10939_v25   ;;  %v10944_v24 = vunpack.i.l.bf16 %v14392_v54  ;;  %v10945_v54 = vunpack.i.h.bf16 %v14392_v54 }
 0x2cc   :  { %v7330_v2 = vld [vmem:[#allocation1 + $0x307] ss:$16 sm:%s7329_s7]   ;;  %v7327_v46 = vsel %vm3850_vm1, %v7325_v1, %v7322_v6  ;;  %v7661_v29 = vld [vmem:[#allocation1 + $0x106] ss:$16 sm:%s7660_s25]   ;;  %v7653_v30 = vsel %vm3854_vm2, %v7651_v39, %v7648_v27  ;;  %s7752_s15 = smov 3  ;;  %5823 = vst.msk [vmem:[#allocation0 + $0x68] sm:$0xff] %vm5661_vm8, %v10940_v56  }
 0x2cd   :  { %v7332_v48 = vsel %vm3854_vm2, %v7330_v2, %v7327_v46  ;;  %v7664_v45 = vld [vmem:[#allocation1 + $0x106] ss:$16 sm:%s7663_s6]   ;;  %v11136_v34 = vpack.i.bf16 %v7653_v30, %v7630_v22  ;;  %s7755_s1 = smov 12  ;;  %s7760_s12 = smov 48  ;;  %5708 = vst.msk [vmem:[#allocation0 + $0x40] sm:$0xff] %vm5661_vm8, %v10929_v33  }
 0x2ce   :  { %v11101_v18 = vpack.i.bf16 %v7332_v48, %v7309_v0  ;;  %v7666_v3 = vsel %vm3846_vm0, %v7664_v45, %v7661_v29  ;;  %v7669_v31 = vld [vmem:[#allocation1 + $0x106] ss:$16 sm:%s7668_s0]   ;;  %s7765_s2 = smov 192  ;;  %5731 = vst.msk [vmem:[#allocation0 + $0x60] sm:$0xff] %vm5661_vm8, %v10930_v12   ;;  %s7775_s14 = smov 3 }
 0x2cf   :  { %v7674_v32 = vld [vmem:[#allocation1 + $0x106] ss:$16 sm:%s7673_s16]   ;;  %v7671_v63 = vsel %vm3850_vm1, %v7669_v31, %v7666_v3  ;;  %11137 = vrot.lane.b32.xlu0 %v11136_v34, %s11450_s8  ;;  %s7778_s13 = smov 12  ;;  %5754 = vst.msk [vmem:[#allocation0 + $0x8] sm:$0xff] %vm5661_vm8, %v10934_v26   ;;  %s7783_s11 = smov 48  ;;  %v10949_v31 = vunpack.i.l.bf16 %v14397_v52  ;;  %v10950_v52 = vunpack.i.h.bf16 %v14397_v52 }
 0x2d0   :  { %11102 = vrot.lane.b32.xlu2 %v11101_v18, %s11449_s4  ;;  %v7684_v35 = vld [vmem:[#allocation1 + $0x306] ss:$16 sm:%s7683_s30]   ;;  %v7676_v15 = vsel %vm3854_vm2, %v7674_v32, %v7671_v63  ;;  %5777 = vst.msk [vmem:[#allocation0 + $0x28] sm:$0xff] %vm5661_vm8, %v10935_v28   ;;  %s7788_s9 = smov 192  ;;  %s7798_s19 = smov 3  ;;  %v14467_v63 = vpop.permute.xlu2 %10982 }
 0x2d1   :  { %v7687_v37 = vld [vmem:[#allocation1 + $0x306] ss:$16 sm:%s7686_s17]   ;;  %s7801_s3 = smov 12  ;;  %s7806_s22 = smov 48  ;;  %5938 = vst.msk [vmem:[#allocation0 + $0x18] sm:$0xff] %vm5661_vm8, %v10954_v23  }
 0x2d2   :  { %v7689_v38 = vsel %vm3846_vm0, %v7687_v37, %v7684_v35  ;;  %v7692_v40 = vld [vmem:[#allocation1 + $0x306] ss:$16 sm:%s7691_s28]   ;;  %s7811_s29 = smov 192  ;;  %s7821_s7 = smov 3  ;;  %5961 = vst.msk [vmem:[#allocation0 + $0x38] sm:$0xff] %vm5661_vm8, %v10955_v50   ;;  %v14469_v35 = vpop.permute.xlu0 %10972 }
 0x2d3   :  { %v7697_v53 = vld [vmem:[#allocation1 + $0x306] ss:$16 sm:%s7696_s18]   ;;  %v7694_v41 = vsel %vm3850_vm1, %v7692_v40, %v7689_v38  ;;  %s7824_s24 = smov 12  ;;  %s7829_s26 = smov 48  ;;  %5846 = vst.msk [vmem:[#allocation0 + $0x10] sm:$0xff] %vm5661_vm8, %v10944_v24   ;;  %v14475_v38 = vpop.permute.xlu1 %10977 }
 0x2d4   :  { %v7753_v42 = vld [vmem:[#allocation1 + $0x186] ss:$16 sm:%s7752_s15]   ;;  %v7699_v36 = vsel %vm3854_vm2, %v7697_v53, %v7694_v41  ;;  %s7834_s20 = smov 192  ;;  %s7431_s23 = smov 3  ;;  %5869 = vst.msk [vmem:[#allocation0 + $0x30] sm:$0xff] %vm5661_vm8, %v10945_v54   ;;  %v10984_v54 = vunpack.i.l.bf16 %v14467_v63  ;;  %v10985_v63 = vunpack.i.h.bf16 %v14467_v63 }
 0x2d5   :  { %v7756_v9 = vld [vmem:[#allocation1 + $0x186] ss:$16 sm:%s7755_s1]   ;;  %v11141_v49 = vpack.i.bf16 %v7699_v36, %v7676_v15  ;;  %v7432_v44 = vld [vmem:[#allocation1 + $0x587] ss:$16 sm:%s7431_s23]   ;;  %s7434_s5 = smov 12  ;;  %s7439_s27 = smov 48  ;;  %v10969_v15 = vunpack.i.l.bf16 %v14430_v43  ;;  %v10970_v43 = vunpack.i.h.bf16 %v14430_v43 }
 0x2d6   :  { %v7761_v60 = vld [vmem:[#allocation1 + $0x186] ss:$16 sm:%s7760_s12]   ;;  %v7758_v16 = vsel %vm3846_vm0, %v7756_v9, %v7753_v42  ;;  %v7435_v22 = vld [vmem:[#allocation1 + $0x587] ss:$16 sm:%s7434_s5]   ;;  %s7444_s21 = smov 192  ;;  %s7454_s10 = smov 3 }
 0x2d7   :  { %v7766_v55 = vld [vmem:[#allocation1 + $0x186] ss:$16 sm:%s7765_s2]   ;;  %v7763_v57 = vsel %vm3850_vm1, %v7761_v60, %v7758_v16  ;;  %11142 = vrot.lane.b32.xlu1 %v11141_v49, %s11450_s8  ;;  %v7440_v17 = vld [vmem:[#allocation1 + $0x587] ss:$16 sm:%s7439_s27]   ;;  %v7437_v25 = vsel %vm3846_vm0, %v7435_v22, %v7432_v44  ;;  %s7457_s25 = smov 12  ;;  %s7462_s6 = smov 48 }
 0x2d8   :  { %v7776_v7 = vld [vmem:[#allocation1 + $0x386] ss:$16 sm:%s7775_s14]   ;;  %v7768_v51 = vsel %vm3854_vm2, %v7766_v55, %v7763_v57  ;;  %v7445_v27 = vld [vmem:[#allocation1 + $0x587] ss:$16 sm:%s7444_s21]   ;;  %v7442_v56 = vsel %vm3850_vm1, %v7440_v17, %v7437_v25  ;;  %s7467_s0 = smov 192  ;;  %s7889_s16 = smov 3 }
 0x2d9   :  { %v7779_v5 = vld [vmem:[#allocation1 + $0x386] ss:$16 sm:%s7778_s13]   ;;  %v7455_v29 = vld [vmem:[#allocation1 + $0x787] ss:$16 sm:%s7454_s10]   ;;  %v7447_v32 = vsel %vm3854_vm2, %v7445_v27, %v7442_v56  ;;  %v7890_v12 = vld [vmem:[#allocation1 + $0x405] ss:$16 sm:%s7889_s16]  }
 0x2da   :  { %v7781_v59 = vsel %vm3846_vm0, %v7779_v5, %v7776_v7  ;;  %v7784_v20 = vld [vmem:[#allocation1 + $0x386] ss:$16 sm:%s7783_s11]   ;;  %v7458_v30 = vld [vmem:[#allocation1 + $0x787] ss:$16 sm:%s7457_s25]   ;;  %s7892_s30 = smov 12  ;;  %s7897_s17 = smov 48  ;;  %v14510_v56 = vpop.permute.xlu0 %10987 }
 0x2db   :  { %v7786_v58 = vsel %vm3850_vm1, %v7784_v20, %v7781_v59  ;;  %v7789_v61 = vld [vmem:[#allocation1 + $0x386] ss:$16 sm:%s7788_s9]   ;;  %v7463_v3 = vld [vmem:[#allocation1 + $0x787] ss:$16 sm:%s7462_s6]   ;;  %v7460_v33 = vsel %vm3846_vm0, %v7458_v30, %v7455_v29  ;;  %v7893_v53 = vld [vmem:[#allocation1 + $0x405] ss:$16 sm:%s7892_s30]  }
 0x2dc   :  { %v7799_v62 = vld [vmem:[#allocation1 + $0x586] ss:$16 sm:%s7798_s19]   ;;  %v7791_v13 = vsel %vm3854_vm2, %v7789_v61, %v7786_v58  ;;  %v7468_v34 = vld [vmem:[#allocation1 + $0x787] ss:$16 sm:%s7467_s0]   ;;  %v7465_v37 = vsel %vm3850_vm1, %v7463_v3, %v7460_v33  ;;  %v7898_v26 = vld [vmem:[#allocation1 + $0x405] ss:$16 sm:%s7897_s17]   ;;  %v7895_v28 = vsel %vm3846_vm0, %v7893_v53, %v7890_v12 }
 0x2dd   :  { %v7802_v0 = vld [vmem:[#allocation1 + $0x586] ss:$16 sm:%s7801_s3]   ;;  %v11151_v1 = vpack.i.bf16 %v7791_v13, %v7768_v51  ;;  %v7470_v40 = vsel %vm3854_vm2, %v7468_v34, %v7465_v37  ;;  %s7902_s28 = smov 192  ;;  %5892 = vst.msk [vmem:[#allocation0 + $0x50] sm:$0xff] %vm5661_vm8, %v10949_v31   ;;  %s7912_s18 = smov 3  ;;  %v7900_v36 = vsel %vm3850_vm1, %v7898_v26, %v7895_v28 }
 0x2de   :  { %v7807_v6 = vld [vmem:[#allocation1 + $0x586] ss:$16 sm:%s7806_s22]   ;;  %v7804_v2 = vsel %vm3846_vm0, %v7802_v0, %v7799_v62  ;;  %v11116_v41 = vpack.i.bf16 %v7470_v40, %v7447_v32  ;;  %v7903_v42 = vld [vmem:[#allocation1 + $0x405] ss:$16 sm:%s7902_s28]   ;;  %s7915_s15 = smov 12  ;;  %5915 = vst.msk [vmem:[#allocation0 + $0x70] sm:$0xff] %vm5661_vm8, %v10950_v52   ;;  %v14515_v32 = vpop.permute.xlu1 %10992 }
 0x2df   :  { %v7812_v46 = vld [vmem:[#allocation1 + $0x586] ss:$16 sm:%s7811_s29]   ;;  %v7809_v10 = vsel %vm3850_vm1, %v7807_v6, %v7804_v2  ;;  %11152 = vrot.lane.b32.xlu0 %v11151_v1, %s11450_s8  ;;  %v7913_v9 = vld [vmem:[#allocation1 + $0x605] ss:$16 sm:%s7912_s18]   ;;  %s7920_s1 = smov 48  ;;  %v7905_v49 = vsel %vm3854_vm2, %v7903_v42, %v7900_v36  ;;  %s7935_s12 = smov 3 }
 0x2e0   :  { %v7822_v8 = vld [vmem:[#allocation1 + $0x786] ss:$16 sm:%s7821_s7]   ;;  %v7814_v19 = vsel %vm3854_vm2, %v7812_v46, %v7809_v10  ;;  %v7916_v60 = vld [vmem:[#allocation1 + $0x605] ss:$16 sm:%s7915_s15]   ;;  %11117 = vrot.lane.b32.xlu2 %v11116_v41, %s11449_s4  ;;  %s7925_s4 = smov 192  ;;  %6075 = vst.msk [vmem:[#allocation0 + $0x40] sm:$0xff] %vm6028_vm9, %v10969_v15  }
 0x2e1   :  { %v7825_v48 = vld [vmem:[#allocation1 + $0x786] ss:$16 sm:%s7824_s24]   ;;  %v7918_v16 = vsel %vm3846_vm0, %v7916_v60, %v7913_v9  ;;  %v7921_v55 = vld [vmem:[#allocation1 + $0x605] ss:$16 sm:%s7920_s1]   ;;  %s7938_s2 = smov 12  ;;  %s7943_s14 = smov 48 }
 0x2e2   :  { %v7830_v4 = vld [vmem:[#allocation1 + $0x786] ss:$16 sm:%s7829_s26]   ;;  %v7827_v18 = vsel %vm3846_vm0, %v7825_v48, %v7822_v8  ;;  %v7923_v57 = vsel %vm3850_vm1, %v7921_v55, %v7918_v16  ;;  %v7926_v7 = vld [vmem:[#allocation1 + $0x605] ss:$16 sm:%s7925_s4]   ;;  %s7948_s13 = smov 192  ;;  %s7958_s11 = smov 3  ;;  %v10959_v48 = vunpack.i.l.bf16 %v14432_v11  ;;  %v10960_v11 = vunpack.i.h.bf16 %v14432_v11 }
 0x2e3   :  { %v7835_v14 = vld [vmem:[#allocation1 + $0x786] ss:$16 sm:%s7834_s20]   ;;  %v7832_v21 = vsel %vm3850_vm1, %v7830_v4, %v7827_v18  ;;  %v7936_v5 = vld [vmem:[#allocation1 + $0x85] ss:$16 sm:%s7935_s12]   ;;  %v7928_v51 = vsel %vm3854_vm2, %v7926_v7, %v7923_v57  ;;  %s7961_s9 = smov 12  ;;  %s7966_s19 = smov 48 }
 0x2e4   :  { %v7837_v39 = vsel %vm3854_vm2, %v7835_v14, %v7832_v21  ;;  %v7939_v59 = vld [vmem:[#allocation1 + $0x85] ss:$16 sm:%s7938_s2]   ;;  %v11166_v58 = vpack.i.bf16 %v7928_v51, %v7905_v49  ;;  %s7971_s3 = smov 192  ;;  %s7568_s22 = smov 3  ;;  %v10964_v21 = vunpack.i.l.bf16 %v14436_v47  ;;  %6098 = vst.msk [vmem:[#allocation0 + $0x60] sm:$0xff] %vm6028_vm9, %v10970_v43   ;;  %v10965_v47 = vunpack.i.h.bf16 %v14436_v47 }
 0x2e5   :  { %v11156_v45 = vpack.i.bf16 %v7837_v39, %v7814_v19  ;;  %v7944_v20 = vld [vmem:[#allocation1 + $0x85] ss:$16 sm:%s7943_s14]   ;;  %v7941_v61 = vsel %vm3846_vm0, %v7939_v59, %v7936_v5  ;;  %s11451_s29 = smov 40   ;;  %v7569_v10 = vld [vmem:[#allocation1 + $0x86] ss:$16 sm:%s7568_s22]   ;;  %s7571_s7 = smov 12 }
 0x2e6   :  { %v7949_v62 = vld [vmem:[#allocation1 + $0x85] ss:$16 sm:%s7948_s13]   ;;  %v7946_v0 = vsel %vm3850_vm1, %v7944_v20, %v7941_v61  ;;  %s7576_s24 = smov 48  ;;  %v7572_v23 = vld [vmem:[#allocation1 + $0x86] ss:$16 sm:%s7571_s7]   ;;  %s7581_s26 = smov 192 }
 0x2e7   :  { %11157 = vrot.lane.b32.xlu1 %v11156_v45, %s11450_s8  ;;  %v7959_v13 = vld [vmem:[#allocation1 + $0x285] ss:$16 sm:%s7958_s11]   ;;  %11167 = vrot.lane.b32.xlu0 %v11166_v58, %s11451_s29  ;;  %v7951_v2 = vsel %vm3854_vm2, %v7949_v62, %v7946_v0  ;;  %v7577_v19 = vld [vmem:[#allocation1 + $0x86] ss:$16 sm:%s7576_s24]   ;;  %s7591_s20 = smov 3  ;;  %v7574_v14 = vsel %vm3846_vm0, %v7572_v23, %v7569_v10  ;;  %s7594_s23 = smov 12  ;;  %v14508_v45 = vpop.permute.xlu2 %10997 }
 0x2e8   :  { %v7962_v6 = vld [vmem:[#allocation1 + $0x285] ss:$16 sm:%s7961_s9]   ;;  %v7582_v44 = vld [vmem:[#allocation1 + $0x86] ss:$16 sm:%s7581_s26]   ;;  %s7599_s5 = smov 48  ;;  %v7579_v17 = vsel %vm3850_vm1, %v7577_v19, %v7574_v14  ;;  %s7604_s27 = smov 192  ;;  %v10979_v19 = vunpack.i.l.bf16 %v14475_v38  ;;  %v10980_v38 = vunpack.i.h.bf16 %v14475_v38 }
 0x2e9   :  { %v7967_v1 = vld [vmem:[#allocation1 + $0x285] ss:$16 sm:%s7966_s19]   ;;  %v7964_v46 = vsel %vm3846_vm0, %v7962_v6, %v7959_v13  ;;  %v7592_v50 = vld [vmem:[#allocation1 + $0x286] ss:$16 sm:%s7591_s20]   ;;  %v7584_v25 = vsel %vm3854_vm2, %v7582_v44, %v7579_v17  ;;  %5984 = vst.msk [vmem:[#allocation0 + $0x58] sm:$0xff] %vm5661_vm8, %v10959_v48   ;;  %s8027_s21 = smov 3 }
 0x2ea   :  { %v7972_v8 = vld [vmem:[#allocation1 + $0x285] ss:$16 sm:%s7971_s3]   ;;  %v7969_v4 = vsel %vm3850_vm1, %v7967_v1, %v7964_v46  ;;  %v7595_v24 = vld [vmem:[#allocation1 + $0x286] ss:$16 sm:%s7594_s23]   ;;  %s8030_s10 = smov 12  ;;  %6007 = vst.msk [vmem:[#allocation0 + $0x78] sm:$0xff] %vm5661_vm8, %v10960_v11   ;;  %v10974_v1 = vunpack.i.l.bf16 %v14469_v35  ;;  %v10975_v35 = vunpack.i.h.bf16 %v14469_v35 }
 0x2eb   :  { %v7974_v18 = vsel %vm3854_vm2, %v7972_v8, %v7969_v4  ;;  %v7600_v39 = vld [vmem:[#allocation1 + $0x286] ss:$16 sm:%s7599_s5]   ;;  %v7597_v27 = vsel %vm3846_vm0, %v7595_v24, %v7592_v50  ;;  %v8028_v3 = vld [vmem:[#allocation1 + $0x105] ss:$16 sm:%s8027_s21]   ;;  %s8035_s25 = smov 48  ;;  %6029 = vst.msk [vmem:[#allocation0] sm:$0xff] %vm6028_vm9, %v10964_v21   ;;  %v14547_v21 = vpop.permute.xlu0 %11002  ;;  %v10999_v24 = vunpack.i.l.bf16 %v14508_v45  ;;  %v11000_v45 = vunpack.i.h.bf16 %v14508_v45 }
 0x2ec   :  { %v11171_v22 = vpack.i.bf16 %v7974_v18, %v7951_v2  ;;  %v7605_v29 = vld [vmem:[#allocation1 + $0x286] ss:$16 sm:%s7604_s27]   ;;  %v7602_v30 = vsel %vm3850_vm1, %v7600_v39, %v7597_v27  ;;  %v8031_v31 = vld [vmem:[#allocation1 + $0x105] ss:$16 sm:%s8030_s10]   ;;  %s8040_s6 = smov 192  ;;  %s8050_s0 = smov 3  ;;  %v14553_v39 = vpop.permute.xlu1 %11007 }
 0x2ed   :  { %v7607_v33 = vsel %vm3854_vm2, %v7605_v29, %v7602_v30  ;;  %v8033_v34 = vsel %vm3846_vm0, %v8031_v31, %v8028_v3  ;;  %v8036_v52 = vld [vmem:[#allocation1 + $0x105] ss:$16 sm:%s8035_s25]   ;;  %6052 = vst.msk [vmem:[#allocation0 + $0x20] sm:$0xff] %vm6028_vm9, %v10965_v47   ;;  %s8053_s16 = smov 12  ;;  %s8058_s30 = smov 48 }
 0x2ee   :  { %v11131_v37 = vpack.i.bf16 %v7607_v33, %v7584_v25  ;;  %v8038_v12 = vsel %vm3850_vm1, %v8036_v52, %v8033_v34  ;;  %v8041_v15 = vld [vmem:[#allocation1 + $0x105] ss:$16 sm:%s8040_s6]   ;;  %s8063_s17 = smov 192  ;;  %6213 = vst.msk [vmem:[#allocation0 + $0x10] sm:$0xff] %vm6028_vm9, %v10984_v54   ;;  %s8073_s28 = smov 3 }
 0x2ef   :  { %11172 = vrot.lane.b32.xlu1 %v11171_v22, %s11451_s29  ;;  %v8051_v40 = vld [vmem:[#allocation1 + $0x305] ss:$16 sm:%s8050_s0]   ;;  %v8043_v26 = vsel %vm3854_vm2, %v8041_v15, %v8038_v12  ;;  %s8076_s18 = smov 12  ;;  %s8081_s15 = smov 48  ;;  %6236 = vst.msk [vmem:[#allocation0 + $0x30] sm:$0xff] %vm6028_vm9, %v10985_v63   ;;  %v14545_v50 = vpop.permute.xlu2 %11012 }
 0x2f0   :  { %v8054_v53 = vld [vmem:[#allocation1 + $0x305] ss:$16 sm:%s8053_s16]   ;;  %11132 = vrot.lane.b32.xlu2 %v11131_v37, %s11450_s8  ;;  %s8086_s1 = smov 192  ;;  %s8096_s4 = smov 3  ;;  %6121 = vst.msk [vmem:[#allocation0 + $0x8] sm:$0xff] %vm6028_vm9, %v10974_v1  }
 0x2f1   :  { %v8056_v41 = vsel %vm3846_vm0, %v8054_v53, %v8051_v40  ;;  %v8059_v28 = vld [vmem:[#allocation1 + $0x305] ss:$16 sm:%s8058_s30]   ;;  %s8099_s12 = smov 12  ;;  %s8104_s2 = smov 48  ;;  %6144 = vst.msk [vmem:[#allocation0 + $0x28] sm:$0xff] %vm6028_vm9, %v10975_v35  }
 0x2f2   :  { %v8064_v42 = vld [vmem:[#allocation1 + $0x305] ss:$16 sm:%s8063_s17]   ;;  %v8061_v36 = vsel %vm3850_vm1, %v8059_v28, %v8056_v41  ;;  %s8109_s14 = smov 192  ;;  %s7706_s13 = smov 3  ;;  %6167 = vst.msk [vmem:[#allocation0 + $0x48] sm:$0xff] %vm6028_vm9, %v10979_v19  }
 0x2f3   :  { %v8074_v9 = vld [vmem:[#allocation1 + $0x505] ss:$16 sm:%s8073_s28]   ;;  %v8066_v49 = vsel %vm3854_vm2, %v8064_v42, %v8061_v36  ;;  %s7709_s11 = smov 12  ;;  %v7707_v0 = vld [vmem:[#allocation1 + $0x506] ss:$16 sm:%s7706_s13]   ;;  %s7714_s9 = smov 48 }
 0x2f4   :  { %v8077_v60 = vld [vmem:[#allocation1 + $0x505] ss:$16 sm:%s8076_s18]   ;;  %v11181_v7 = vpack.i.bf16 %v8066_v49, %v8043_v26  ;;  %v7710_v6 = vld [vmem:[#allocation1 + $0x506] ss:$16 sm:%s7709_s11]   ;;  %s7719_s19 = smov 192  ;;  %s7729_s3 = smov 3  ;;  %v14592_v19 = vpop.permute.xlu1 %11022 }
 0x2f5   :  { %v8079_v16 = vsel %vm3846_vm0, %v8077_v60, %v8074_v9  ;;  %v8082_v55 = vld [vmem:[#allocation1 + $0x505] ss:$16 sm:%s8081_s15]   ;;  %v7712_v2 = vsel %vm3846_vm0, %v7710_v6, %v7707_v0  ;;  %v7715_v46 = vld [vmem:[#allocation1 + $0x506] ss:$16 sm:%s7714_s9]   ;;  %s7732_s22 = smov 12  ;;  %s7737_s7 = smov 48 }
 0x2f6   :  { %v8087_v57 = vld [vmem:[#allocation1 + $0x505] ss:$16 sm:%s8086_s1]   ;;  %v8084_v5 = vsel %vm3850_vm1, %v8082_v55, %v8079_v16  ;;  %11182 = vrot.lane.b32.xlu0 %v11181_v7, %s11451_s29  ;;  %v7720_v8 = vld [vmem:[#allocation1 + $0x506] ss:$16 sm:%s7719_s19]   ;;  %v7717_v48 = vsel %vm3850_vm1, %v7715_v46, %v7712_v2  ;;  %s7742_s24 = smov 192  ;;  %s8165_s26 = smov 3 }
 0x2f7   :  { %v8097_v51 = vld [vmem:[#allocation1 + $0x705] ss:$16 sm:%s8096_s4]   ;;  %v8089_v20 = vsel %vm3854_vm2, %v8087_v57, %v8084_v5  ;;  %v7730_v4 = vld [vmem:[#allocation1 + $0x706] ss:$16 sm:%s7729_s3]   ;;  %v7722_v11 = vsel %vm3854_vm2, %v7720_v8, %v7717_v48  ;;  %s8168_s20 = smov 12  ;;  %s8173_s23 = smov 48  ;;  %v10989_v5 = vunpack.i.l.bf16 %v14510_v56  ;;  %v10990_v56 = vunpack.i.h.bf16 %v14510_v56  ;;  %v14587_v48 = vpop.permute.xlu0 %11017 }
 0x2f8   :  { %v8100_v59 = vld [vmem:[#allocation1 + $0x705] ss:$16 sm:%s8099_s12]   ;;  %v7733_v23 = vld [vmem:[#allocation1 + $0x706] ss:$16 sm:%s7732_s22]   ;;  %s8178_s5 = smov 192  ;;  %s8188_s27 = smov 3 }
 0x2f9   :  { %v8102_v58 = vsel %vm3846_vm0, %v8100_v59, %v8097_v51  ;;  %v8105_v61 = vld [vmem:[#allocation1 + $0x705] ss:$16 sm:%s8104_s2]   ;;  %v7735_v18 = vsel %vm3846_vm0, %v7733_v23, %v7730_v4  ;;  %v7738_v14 = vld [vmem:[#allocation1 + $0x706] ss:$16 sm:%s7737_s7]   ;;  %s8191_s21 = smov 12  ;;  %6190 = vst.msk [vmem:[#allocation0 + $0x68] sm:$0xff] %vm6028_vm9, %v10980_v38  }
 0x2fa   :  { %v8110_v62 = vld [vmem:[#allocation1 + $0x705] ss:$16 sm:%s8109_s14]   ;;  %v8107_v13 = vsel %vm3850_vm1, %v8105_v61, %v8102_v58  ;;  %v7743_v44 = vld [vmem:[#allocation1 + $0x706] ss:$16 sm:%s7742_s24]   ;;  %v7740_v22 = vsel %vm3850_vm1, %v7738_v14, %v7735_v18  ;;  %s8196_s10 = smov 48  ;;  %s8211_s25 = smov 3 }
 0x2fb   :  { %v8112_v43 = vsel %vm3854_vm2, %v8110_v62, %v8107_v13  ;;  %v8166_v17 = vld [vmem:[#allocation1 + $0x585] ss:$16 sm:%s8165_s26]   ;;  %v7745_v47 = vsel %vm3854_vm2, %v7743_v44, %v7740_v22  ;;  %6351 = vst.msk [vmem:[#allocation0 + $0x58] sm:$0xff] %vm6028_vm9, %v10999_v24   ;;  %v8212_v40 = vld [vmem:[#allocation1 + $0x4] ss:$16 sm:%s8211_s25]   ;;  %s8214_s6 = smov 12  ;;  %v10994_v13 = vunpack.i.l.bf16 %v14515_v32  ;;  %v10995_v32 = vunpack.i.h.bf16 %v14515_v32 }
 0x2fc   :  { %v11186_v10 = vpack.i.bf16 %v8112_v43, %v8089_v20  ;;  %v8169_v25 = vld [vmem:[#allocation1 + $0x585] ss:$16 sm:%s8168_s20]   ;;  %v11146_v29 = vpack.i.bf16 %v7745_v47, %v7722_v11  ;;  %s8219_s0 = smov 48  ;;  %v8215_v26 = vld [vmem:[#allocation1 + $0x4] ss:$16 sm:%s8214_s6]   ;;  %s8224_s16 = smov 192 }
 0x2fd   :  { %v8174_v27 = vld [vmem:[#allocation1 + $0x585] ss:$16 sm:%s8173_s23]   ;;  %v8171_v54 = vsel %vm3846_vm0, %v8169_v25, %v8166_v17  ;;  %v8220_v41 = vld [vmem:[#allocation1 + $0x4] ss:$16 sm:%s8219_s0]   ;;  %v8217_v42 = vsel %vm3846_vm0, %v8215_v26, %v8212_v40  ;;  %s8233_s30 = smov 3  ;;  %s8236_s17 = smov 12 }
 0x2fe   :  { %11187 = vrot.lane.b32.xlu1 %v11186_v10, %s11451_s29  ;;  %v8179_v30 = vld [vmem:[#allocation1 + $0x585] ss:$16 sm:%s8178_s5]   ;;  %v8176_v3 = vsel %vm3850_vm1, %v8174_v27, %v8171_v54  ;;  %11147 = vrot.lane.b32.xlu2 %v11146_v29, %s11450_s8  ;;  %s8201_s8 = smov 192  ;;  %v8225_v36 = vld [vmem:[#allocation1 + $0x4] ss:$16 sm:%s8224_s16]   ;;  %6374 = vst.msk [vmem:[#allocation0 + $0x78] sm:$0xff] %vm6028_vm9, %v11000_v45   ;;  %v8222_v9 = vsel %vm3850_vm1, %v8220_v41, %v8217_v42  ;;  %v14585_v10 = vpop.permute.xlu2 %11027  ;;  %v11014_v42 = vunpack.i.l.bf16 %v14545_v50  ;;  %v11015_v50 = vunpack.i.h.bf16 %v14545_v50 }
 0x2ff   :  { %v8189_v31 = vld [vmem:[#allocation1 + $0x785] ss:$16 sm:%s8188_s27]   ;;  %v8181_v34 = vsel %vm3854_vm2, %v8179_v30, %v8176_v3  ;;  %v8234_v60 = vld [vmem:[#allocation1 + $0x204] ss:$16 sm:%s8233_s30]   ;;  %s8241_s28 = smov 48  ;;  %s8246_s18 = smov 192  ;;  %v8227_v16 = vsel %vm3854_vm2, %v8225_v36, %v8222_v9 }
 0x300   :  { %v8192_v33 = vld [vmem:[#allocation1 + $0x785] ss:$16 sm:%s8191_s21]   ;;  %v8237_v49 = vld [vmem:[#allocation1 + $0x204] ss:$16 sm:%s8236_s17]   ;;  %s7844_s15 = smov 3  ;;  %s7847_s1 = smov 12 }
 0x301   :  { %v8194_v52 = vsel %vm3846_vm0, %v8192_v33, %v8189_v31  ;;  %v8197_v37 = vld [vmem:[#allocation1 + $0x785] ss:$16 sm:%s8196_s10]   ;;  %v8239_v55 = vsel %vm3846_vm0, %v8237_v49, %v8234_v60  ;;  %v8242_v57 = vld [vmem:[#allocation1 + $0x204] ss:$16 sm:%s8241_s28]   ;;  %s7852_s4 = smov 48  ;;  %s7857_s12 = smov 192 }
 0x302   :  { %v8199_v12 = vsel %vm3850_vm1, %v8197_v37, %v8194_v52  ;;  %v8202_v15 = vld [vmem:[#allocation1 + $0x785] ss:$16 sm:%s8201_s8]   ;;  %v8247_v7 = vld [vmem:[#allocation1 + $0x204] ss:$16 sm:%s8246_s18]   ;;  %v8244_v51 = vsel %vm3850_vm1, %v8242_v57, %v8239_v55  ;;  %s7866_s2 = smov 3  ;;  %s7869_s14 = smov 12 }
 0x303   :  { %v8204_v53 = vsel %vm3854_vm2, %v8202_v15, %v8199_v12  ;;  %v7845_v59 = vld [vmem:[#allocation1 + $0x5] ss:$16 sm:%s7844_s15]   ;;  %v8249_v58 = vsel %vm3854_vm2, %v8247_v7, %v8244_v51  ;;  %s7874_s13 = smov 48  ;;  %s7879_s11 = smov 192  ;;  %6259 = vst.msk [vmem:[#allocation0 + $0x50] sm:$0xff] %vm6028_vm9, %v10989_v5   ;;  %v11004_v7 = vunpack.i.l.bf16 %v14547_v21  ;;  %v11005_v21 = vunpack.i.h.bf16 %v14547_v21 }
 0x304   :  { %v11196_v28 = vpack.i.bf16 %v8204_v53, %v8181_v34  ;;  %v7848_v20 = vld [vmem:[#allocation1 + $0x5] ss:$16 sm:%s7847_s1]   ;;  %v11201_v0 = vpack.i.bf16 %v8249_v58, %v8227_v16  ;;  %s8302_s9 = smov 3  ;;  %s11452_s19 = smov 32   ;;  %6282 = vst.msk [vmem:[#allocation0 + $0x70] sm:$0xff] %vm6028_vm9, %v10990_v56  }
 0x305   :  { %v7850_v61 = vsel %vm3846_vm0, %v7848_v20, %v7845_v59  ;;  %v7853_v62 = vld [vmem:[#allocation1 + $0x5] ss:$16 sm:%s7852_s4]   ;;  %v8303_v23 = vld [vmem:[#allocation1 + $0x84] ss:$16 sm:%s8302_s9]   ;;  %s8305_s3 = smov 12  ;;  %s8310_s22 = smov 48 }
 0x306   :  { %11197 = vrot.lane.b32.xlu0 %v11196_v28, %s11451_s29  ;;  %v7858_v63 = vld [vmem:[#allocation1 + $0x5] ss:$16 sm:%s7857_s12]   ;;  %v7855_v6 = vsel %vm3850_vm1, %v7853_v62, %v7850_v61  ;;  %11202 = vrot.lane.b32.xlu1 %v11201_v0, %s11452_s19  ;;  %6305 = vst.msk [vmem:[#allocation0 + $0x18] sm:$0xff] %vm6028_vm9, %v10994_v13   ;;  %v8306_v18 = vld [vmem:[#allocation1 + $0x84] ss:$16 sm:%s8305_s3]   ;;  %s8315_s7 = smov 192 }
 0x307   :  { %v7867_v1 = vld [vmem:[#allocation1 + $0x205] ss:$16 sm:%s7866_s2]   ;;  %v7860_v2 = vsel %vm3854_vm2, %v7858_v63, %v7855_v6  ;;  %v8311_v14 = vld [vmem:[#allocation1 + $0x84] ss:$16 sm:%s8310_s22]   ;;  %6328 = vst.msk [vmem:[#allocation0 + $0x38] sm:$0xff] %vm6028_vm9, %v10995_v32   ;;  %v8308_v38 = vsel %vm3846_vm0, %v8306_v18, %v8303_v23  ;;  %s8325_s24 = smov 3  ;;  %v11009_v63 = vunpack.i.l.bf16 %v14553_v39  ;;  %v11010_v39 = vunpack.i.h.bf16 %v14553_v39  ;;  %v14625_v6 = vpop.permute.xlu2 %11042 }
 0x308   :  { %v7870_v43 = vld [vmem:[#allocation1 + $0x205] ss:$16 sm:%s7869_s14]   ;;  %v8316_v22 = vld [vmem:[#allocation1 + $0x84] ss:$16 sm:%s8315_s7]   ;;  %s8328_s26 = smov 12  ;;  %v8313_v17 = vsel %vm3850_vm1, %v8311_v14, %v8308_v38  ;;  %s8333_s20 = smov 48 }
 0x309   :  { %v7872_v46 = vsel %vm3846_vm0, %v7870_v43, %v7867_v1  ;;  %v7875_v8 = vld [vmem:[#allocation1 + $0x205] ss:$16 sm:%s7874_s13]   ;;  %v8326_v24 = vld [vmem:[#allocation1 + $0x284] ss:$16 sm:%s8325_s24]   ;;  %s8338_s23 = smov 192  ;;  %v8318_v25 = vsel %vm3854_vm2, %v8316_v22, %v8313_v17  ;;  %s8348_s5 = smov 3  ;;  %v14627_v1 = vpop.permute.xlu0 %11032 }
 0x30a   :  { %v7880_v35 = vld [vmem:[#allocation1 + $0x205] ss:$16 sm:%s7879_s11]   ;;  %v7877_v4 = vsel %vm3850_vm1, %v7875_v8, %v7872_v46  ;;  %v8329_v47 = vld [vmem:[#allocation1 + $0x284] ss:$16 sm:%s8328_s26]   ;;  %s8351_s27 = smov 12  ;;  %s8356_s21 = smov 48  ;;  %v14631_v46 = vpop.permute.xlu1 %11037 }
 0x30b   :  { %v7882_v11 = vsel %vm3854_vm2, %v7880_v35, %v7877_v4  ;;  %v8331_v27 = vsel %vm3846_vm0, %v8329_v47, %v8326_v24  ;;  %v8334_v29 = vld [vmem:[#allocation1 + $0x284] ss:$16 sm:%s8333_s20]   ;;  %s8361_s10 = smov 192  ;;  %s8371_s8 = smov 3  ;;  %6488 = vst.msk [vmem:[#allocation0 + $0x8] sm:$0xff] %vm6395_vm10, %v11014_v42  }
 0x30c   :  { %v11161_v44 = vpack.i.bf16 %v7882_v11, %v7860_v2  ;;  %v8339_v54 = vld [vmem:[#allocation1 + $0x284] ss:$16 sm:%s8338_s23]   ;;  %v8336_v30 = vsel %vm3850_vm1, %v8334_v29, %v8331_v27  ;;  %s8374_s25 = smov 12  ;;  %s8379_s6 = smov 48  ;;  %6511 = vst.msk [vmem:[#allocation0 + $0x28] sm:$0xff] %vm6395_vm10, %v11015_v50  }
 0x30d   :  { %v8349_v3 = vld [vmem:[#allocation1 + $0x484] ss:$16 sm:%s8348_s5]   ;;  %v8341_v33 = vsel %vm3854_vm2, %v8339_v54, %v8336_v30  ;;  %s8384_s0 = smov 192  ;;  %s7981_s16 = smov 3  ;;  %6396 = vst.msk [vmem:[#allocation0] sm:$0xff] %vm6395_vm10, %v11004_v7  }
 0x30e   :  { %11162 = vrot.lane.b32.xlu2 %v11161_v44, %s11451_s29  ;;  %v8352_v31 = vld [vmem:[#allocation1 + $0x484] ss:$16 sm:%s8351_s27]   ;;  %v11211_v37 = vpack.i.bf16 %v8341_v33, %v8318_v25  ;;  %s7984_s30 = smov 12  ;;  %v7982_v9 = vld [vmem:[#allocation1 + $0x485] ss:$16 sm:%s7981_s16]   ;;  %s7989_s17 = smov 48 }
 0x30f   :  { %v8354_v45 = vsel %vm3846_vm0, %v8352_v31, %v8349_v3  ;;  %v8357_v34 = vld [vmem:[#allocation1 + $0x484] ss:$16 sm:%s8356_s21]   ;;  %v7985_v60 = vld [vmem:[#allocation1 + $0x485] ss:$16 sm:%s7984_s30]   ;;  %s7994_s28 = smov 192  ;;  %s8004_s18 = smov 3 }
 0x310   :  { %v8362_v52 = vld [vmem:[#allocation1 + $0x484] ss:$16 sm:%s8361_s10]   ;;  %v8359_v12 = vsel %vm3850_vm1, %v8357_v34, %v8354_v45  ;;  %11212 = vrot.lane.b32.xlu0 %v11211_v37, %s11452_s19  ;;  %v7987_v16 = vsel %vm3846_vm0, %v7985_v60, %v7982_v9  ;;  %v7990_v55 = vld [vmem:[#allocation1 + $0x485] ss:$16 sm:%s7989_s17]   ;;  %s8007_s15 = smov 12  ;;  %s8012_s1 = smov 48  ;;  %v11029_v34 = vunpack.i.l.bf16 %v14585_v10  ;;  %v11030_v10 = vunpack.i.h.bf16 %v14585_v10 }
 0x311   :  { %v8372_v15 = vld [vmem:[#allocation1 + $0x684] ss:$16 sm:%s8371_s8]   ;;  %v8364_v53 = vsel %vm3854_vm2, %v8362_v52, %v8359_v12  ;;  %v7995_v57 = vld [vmem:[#allocation1 + $0x485] ss:$16 sm:%s7994_s28]   ;;  %v7992_v51 = vsel %vm3850_vm1, %v7990_v55, %v7987_v16  ;;  %s8017_s4 = smov 192  ;;  %s8440_s12 = smov 3  ;;  %v11024_v55 = vunpack.i.l.bf16 %v14592_v19  ;;  %v11025_v19 = vunpack.i.h.bf16 %v14592_v19 }
 0x312   :  { %v8375_v40 = vld [vmem:[#allocation1 + $0x684] ss:$16 sm:%s8374_s25]   ;;  %v8005_v59 = vld [vmem:[#allocation1 + $0x685] ss:$16 sm:%s8004_s18]   ;;  %v7997_v56 = vsel %vm3854_vm2, %v7995_v57, %v7992_v51  ;;  %s8443_s2 = smov 12  ;;  %s8448_s14 = smov 48  ;;  %v14662_v51 = vpop.permute.xlu2 %11057 }
 0x313   :  { %v8377_v26 = vsel %vm3846_vm0, %v8375_v40, %v8372_v15  ;;  %v8380_v41 = vld [vmem:[#allocation1 + $0x684] ss:$16 sm:%s8379_s6]   ;;  %v8008_v20 = vld [vmem:[#allocation1 + $0x685] ss:$16 sm:%s8007_s15]   ;;  %s8453_s13 = smov 192  ;;  %6419 = vst.msk [vmem:[#allocation0 + $0x20] sm:$0xff] %vm6395_vm10, %v11005_v21  }
 0x314   :  { %v8385_v28 = vld [vmem:[#allocation1 + $0x684] ss:$16 sm:%s8384_s0]   ;;  %v8382_v36 = vsel %vm3850_vm1, %v8380_v41, %v8377_v26  ;;  %v8010_v58 = vsel %vm3846_vm0, %v8008_v20, %v8005_v59  ;;  %v8013_v61 = vld [vmem:[#allocation1 + $0x685] ss:$16 sm:%s8012_s1]   ;;  %s8463_s11 = smov 3  ;;  %s8466_s9 = smov 12  ;;  %v11019_v41 = vunpack.i.l.bf16 %v14587_v48  ;;  %v11020_v48 = vunpack.i.h.bf16 %v14587_v48  ;;  %v14664_v59 = vpop.permute.xlu0 %11047 }
 0x315   :  { %v8387_v49 = vsel %vm3854_vm2, %v8385_v28, %v8382_v36  ;;  %v8018_v62 = vld [vmem:[#allocation1 + $0x685] ss:$16 sm:%s8017_s4]   ;;  %v8015_v13 = vsel %vm3850_vm1, %v8013_v61, %v8010_v58  ;;  %v8441_v0 = vld [vmem:[#allocation1 + $0x504] ss:$16 sm:%s8440_s12]   ;;  %6442 = vst.msk [vmem:[#allocation0 + $0x40] sm:$0xff] %vm6395_vm10, %v11009_v63   ;;  %s8471_s3 = smov 48  ;;  %v11044_v58 = vunpack.i.l.bf16 %v14625_v6  ;;  %v14670_v61 = vpop.permute.xlu1 %11052  ;;  %v11045_v6 = vunpack.i.h.bf16 %v14625_v6 }
 0x316   :  { %v11216_v5 = vpack.i.bf16 %v8387_v49, %v8364_v53  ;;  %v8020_v43 = vsel %vm3854_vm2, %v8018_v62, %v8015_v13  ;;  %v8444_v32 = vld [vmem:[#allocation1 + $0x504] ss:$16 sm:%s8443_s2]   ;;  %6465 = vst.msk [vmem:[#allocation0 + $0x60] sm:$0xff] %vm6395_vm10, %v11010_v39   ;;  %s8476_s22 = smov 192  ;;  %s8486_s7 = smov 3 }
 0x317   :  { %v8449_v2 = vld [vmem:[#allocation1 + $0x504] ss:$16 sm:%s8448_s14]   ;;  %v11176_v8 = vpack.i.bf16 %v8020_v43, %v7997_v56  ;;  %v8446_v35 = vsel %vm3846_vm0, %v8444_v32, %v8441_v0  ;;  %s8489_s24 = smov 12  ;;  %s8494_s26 = smov 48  ;;  %6626 = vst.msk [vmem:[#allocation0 + $0x50] sm:$0xff] %vm6395_vm10, %v11029_v34  }
 0x318   :  { %11217 = vrot.lane.b32.xlu1 %v11216_v5, %s11452_s19  ;;  %v8454_v4 = vld [vmem:[#allocation1 + $0x504] ss:$16 sm:%s8453_s13]   ;;  %v8451_v23 = vsel %vm3850_vm1, %v8449_v2, %v8446_v35  ;;  %s8499_s20 = smov 192  ;;  %s8509_s23 = smov 3  ;;  %6649 = vst.msk [vmem:[#allocation0 + $0x70] sm:$0xff] %vm6395_vm10, %v11030_v10  }
 0x319   :  { %v8464_v11 = vld [vmem:[#allocation1 + $0x704] ss:$16 sm:%s8463_s11]   ;;  %11177 = vrot.lane.b32.xlu2 %v11176_v8, %s11451_s29  ;;  %v8456_v14 = vsel %vm3854_vm2, %v8454_v4, %v8451_v23  ;;  %s8512_s5 = smov 12  ;;  %s8517_s27 = smov 48  ;;  %6534 = vst.msk [vmem:[#allocation0 + $0x48] sm:$0xff] %vm6395_vm10, %v11019_v41  }
 0x31a   :  { %v8467_v18 = vld [vmem:[#allocation1 + $0x704] ss:$16 sm:%s8466_s9]   ;;  %s8522_s21 = smov 192  ;;  %s8119_s10 = smov 3  ;;  %6557 = vst.msk [vmem:[#allocation0 + $0x68] sm:$0xff] %vm6395_vm10, %v11020_v48   ;;  %v11059_v48 = vunpack.i.l.bf16 %v14662_v51  ;;  %v11060_v51 = vunpack.i.h.bf16 %v14662_v51 }
 0x31b   :  { %v8469_v44 = vsel %vm3846_vm0, %v8467_v18, %v8464_v11  ;;  %v8472_v38 = vld [vmem:[#allocation1 + $0x704] ss:$16 sm:%s8471_s3]   ;;  %v8120_v15 = vld [vmem:[#allocation1 + $0x185] ss:$16 sm:%s8119_s10]   ;;  %s8122_s8 = smov 12  ;;  %s8127_s25 = smov 48 }
 0x31c   :  { %v8474_v22 = vsel %vm3850_vm1, %v8472_v38, %v8469_v44  ;;  %v8477_v17 = vld [vmem:[#allocation1 + $0x704] ss:$16 sm:%s8476_s22]   ;;  %v8123_v53 = vld [vmem:[#allocation1 + $0x185] ss:$16 sm:%s8122_s8]   ;;  %s8132_s6 = smov 192  ;;  %s8142_s0 = smov 3 }
 0x31d   :  { %v8487_v24 = vld [vmem:[#allocation1 + $0x184] ss:$16 sm:%s8486_s7]   ;;  %v8479_v47 = vsel %vm3854_vm2, %v8477_v17, %v8474_v22  ;;  %v8128_v26 = vld [vmem:[#allocation1 + $0x185] ss:$16 sm:%s8127_s25]   ;;  %v8125_v42 = vsel %vm3846_vm0, %v8123_v53, %v8120_v15  ;;  %s8145_s16 = smov 12  ;;  %s8150_s30 = smov 48 }
 0x31e   :  { %v8490_v25 = vld [vmem:[#allocation1 + $0x184] ss:$16 sm:%s8489_s24]   ;;  %v11226_v29 = vpack.i.bf16 %v8479_v47, %v8456_v14  ;;  %v8133_v36 = vld [vmem:[#allocation1 + $0x185] ss:$16 sm:%s8132_s6]   ;;  %v8130_v50 = vsel %vm3850_vm1, %v8128_v26, %v8125_v42  ;;  %s8155_s17 = smov 192  ;;  %s8578_s28 = smov 3 }
 0x31f   :  { %v8495_v27 = vld [vmem:[#allocation1 + $0x184] ss:$16 sm:%s8494_s26]   ;;  %v8492_v54 = vsel %vm3846_vm0, %v8490_v25, %v8487_v24  ;;  %v8143_v9 = vld [vmem:[#allocation1 + $0x385] ss:$16 sm:%s8142_s0]   ;;  %v8135_v57 = vsel %vm3854_vm2, %v8133_v36, %v8130_v50  ;;  %s8581_s18 = smov 12  ;;  %s8586_s15 = smov 48  ;;  %v14705_v50 = vpop.permute.xlu0 %11062 }
 0x320   :  { %v8500_v30 = vld [vmem:[#allocation1 + $0x184] ss:$16 sm:%s8499_s20]   ;;  %v8497_v31 = vsel %vm3850_vm1, %v8495_v27, %v8492_v54  ;;  %11227 = vrot.lane.b32.xlu0 %v11226_v29, %s11452_s19  ;;  %v8146_v49 = vld [vmem:[#allocation1 + $0x385] ss:$16 sm:%s8145_s16]   ;;  %v8579_v21 = vld [vmem:[#allocation1 + $0x3] ss:$16 sm:%s8578_s28]  }
 0x321   :  { %v8510_v3 = vld [vmem:[#allocation1 + $0x384] ss:$16 sm:%s8509_s23]   ;;  %v8502_v52 = vsel %vm3854_vm2, %v8500_v30, %v8497_v31  ;;  %v8151_v16 = vld [vmem:[#allocation1 + $0x385] ss:$16 sm:%s8150_s30]   ;;  %v8148_v7 = vsel %vm3846_vm0, %v8146_v49, %v8143_v9  ;;  %v8582_v56 = vld [vmem:[#allocation1 + $0x3] ss:$16 sm:%s8581_s18]  }
 0x322   :  { %v8513_v33 = vld [vmem:[#allocation1 + $0x384] ss:$16 sm:%s8512_s5]   ;;  %v8156_v5 = vld [vmem:[#allocation1 + $0x385] ss:$16 sm:%s8155_s17]   ;;  %v8153_v20 = vsel %vm3850_vm1, %v8151_v16, %v8148_v7  ;;  %v8584_v63 = vsel %vm3846_vm0, %v8582_v56, %v8579_v21  ;;  %v8587_v13 = vld [vmem:[#allocation1 + $0x3] ss:$16 sm:%s8586_s15]  }
 0x323   :  { %v8518_v45 = vld [vmem:[#allocation1 + $0x384] ss:$16 sm:%s8517_s27]   ;;  %v8515_v37 = vsel %vm3846_vm0, %v8513_v33, %v8510_v3  ;;  %v8158_v62 = vsel %vm3854_vm2, %v8156_v5, %v8153_v20  ;;  %s8591_s1 = smov 192  ;;  %6580 = vst.msk [vmem:[#allocation0 + $0x10] sm:$0xff] %vm6395_vm10, %v11024_v55   ;;  %v8589_v0 = vsel %vm3850_vm1, %v8587_v13, %v8584_v63  ;;  %s8600_s4 = smov 3  ;;  %v11034_v33 = vunpack.i.l.bf16 %v14627_v1 }
 0x324   :  { %v8523_v12 = vld [vmem:[#allocation1 + $0x384] ss:$16 sm:%s8522_s21]   ;;  %v8520_v40 = vsel %vm3850_vm1, %v8518_v45, %v8515_v37  ;;  %v11191_v39 = vpack.i.bf16 %v8158_v62, %v8135_v57  ;;  %v8592_v43 = vld [vmem:[#allocation1 + $0x3] ss:$16 sm:%s8591_s1]   ;;  %s8603_s12 = smov 12  ;;  %6603 = vst.msk [vmem:[#allocation0 + $0x30] sm:$0xff] %vm6395_vm10, %v11025_v19   ;;  %v11035_v1 = vunpack.i.h.bf16 %v14627_v1  ;;  %v14710_v57 = vpop.permute.xlu1 %11067 }
 0x325   :  { %v8525_v28 = vsel %vm3854_vm2, %v8523_v12, %v8520_v40  ;;  %v8601_v32 = vld [vmem:[#allocation1 + $0x203] ss:$16 sm:%s8600_s4]   ;;  %s8608_s2 = smov 48  ;;  %v8594_v8 = vsel %vm3854_vm2, %v8592_v43, %v8589_v0  ;;  %s8623_s14 = smov 3  ;;  %6763 = vst.msk [vmem:[#allocation0] sm:$0xff] %vm6762_vm11, %v11044_v58   ;;  %v11039_v40 = vunpack.i.l.bf16 %v14631_v46  ;;  %v11040_v46 = vunpack.i.h.bf16 %v14631_v46 }
 0x326   :  { %v11231_v60 = vpack.i.bf16 %v8525_v28, %v8502_v52  ;;  %v8604_v2 = vld [vmem:[#allocation1 + $0x203] ss:$16 sm:%s8603_s12]   ;;  %11192 = vrot.lane.b32.xlu2 %v11191_v39, %s11451_s29  ;;  %s8613_s29 = smov 192  ;;  %s8626_s13 = smov 12  ;;  %6786 = vst.msk [vmem:[#allocation0 + $0x20] sm:$0xff] %vm6762_vm11, %v11045_v6  }
 0x327   :  { %v8606_v35 = vsel %vm3846_vm0, %v8604_v2, %v8601_v32  ;;  %v8609_v4 = vld [vmem:[#allocation1 + $0x203] ss:$16 sm:%s8608_s2]   ;;  %s8631_s11 = smov 48  ;;  %s8636_s9 = smov 192  ;;  %6672 = vst.msk [vmem:[#allocation0 + $0x18] sm:$0xff] %vm6395_vm10, %v11034_v33  }
 0x328   :  { %11232 = vrot.lane.b32.xlu1 %v11231_v60, %s11452_s19  ;;  %v8611_v23 = vsel %vm3850_vm1, %v8609_v4, %v8606_v35  ;;  %v8614_v11 = vld [vmem:[#allocation1 + $0x203] ss:$16 sm:%s8613_s29]   ;;  %s8646_s3 = smov 3  ;;  %s8649_s22 = smov 12  ;;  %v14703_v60 = vpop.permute.xlu2 %11072  ;;  %6695 = vst.msk [vmem:[#allocation0 + $0x38] sm:$0xff] %vm6395_vm10, %v11035_v1  }
 0x329   :  { %v8624_v18 = vld [vmem:[#allocation1 + $0x403] ss:$16 sm:%s8623_s14]   ;;  %v8616_v14 = vsel %vm3854_vm2, %v8614_v11, %v8611_v23  ;;  %s8654_s7 = smov 48  ;;  %s8659_s24 = smov 192  ;;  %6718 = vst.msk [vmem:[#allocation0 + $0x58] sm:$0xff] %vm6395_vm10, %v11039_v40   ;;  %v14742_v40 = vpop.permute.xlu0 %11077 }
 0x32a   :  { %v8627_v44 = vld [vmem:[#allocation1 + $0x403] ss:$16 sm:%s8626_s13]   ;;  %v11241_v22 = vpack.i.bf16 %v8616_v14, %v8594_v8  ;;  %s8256_s26 = smov 3  ;;  %s11453_s20 = smov 24   ;;  %6741 = vst.msk [vmem:[#allocation0 + $0x78] sm:$0xff] %vm6395_vm10, %v11040_v46  }
 0x32b   :  { %v8632_v38 = vld [vmem:[#allocation1 + $0x403] ss:$16 sm:%s8631_s11]   ;;  %v8629_v17 = vsel %vm3846_vm0, %v8627_v44, %v8624_v18  ;;  %v8257_v31 = vld [vmem:[#allocation1 + $0x404] ss:$16 sm:%s8256_s26]   ;;  %s8259_s23 = smov 12  ;;  %s8264_s5 = smov 48 }
 0x32c   :  { %v8637_v24 = vld [vmem:[#allocation1 + $0x403] ss:$16 sm:%s8636_s9]   ;;  %v8634_v25 = vsel %vm3850_vm1, %v8632_v38, %v8629_v17  ;;  %11242 = vrot.lane.b32.xlu0 %v11241_v22, %s11453_s20  ;;  %v8260_v34 = vld [vmem:[#allocation1 + $0x404] ss:$16 sm:%s8259_s23]   ;;  %s8269_s27 = smov 192  ;;  %s8279_s21 = smov 3 }
 0x32d   :  { %v8647_v47 = vld [vmem:[#allocation1 + $0x603] ss:$16 sm:%s8646_s3]   ;;  %v8639_v54 = vsel %vm3854_vm2, %v8637_v24, %v8634_v25  ;;  %v8265_v52 = vld [vmem:[#allocation1 + $0x404] ss:$16 sm:%s8264_s5]   ;;  %v8262_v12 = vsel %vm3846_vm0, %v8260_v34, %v8257_v31  ;;  %s8282_s10 = smov 12  ;;  %s8287_s8 = smov 48 }
 0x32e   :  { %v8650_v27 = vld [vmem:[#allocation1 + $0x603] ss:$16 sm:%s8649_s22]   ;;  %v8270_v15 = vld [vmem:[#allocation1 + $0x404] ss:$16 sm:%s8269_s27]   ;;  %v8267_v26 = vsel %vm3850_vm1, %v8265_v52, %v8262_v12  ;;  %s8292_s25 = smov 192  ;;  %s8715_s6 = smov 3  ;;  %v11054_v52 = vunpack.i.l.bf16 %v14670_v61  ;;  %v11055_v61 = vunpack.i.h.bf16 %v14670_v61 }
 0x32f   :  { %v8655_v29 = vld [vmem:[#allocation1 + $0x603] ss:$16 sm:%s8654_s7]   ;;  %v8652_v30 = vsel %vm3846_vm0, %v8650_v27, %v8647_v47  ;;  %v8280_v10 = vld [vmem:[#allocation1 + $0x604] ss:$16 sm:%s8279_s21]   ;;  %v8272_v42 = vsel %vm3854_vm2, %v8270_v15, %v8267_v26  ;;  %s8718_s0 = smov 12  ;;  %s8723_s16 = smov 48 }
 0x330   :  { %v8660_v3 = vld [vmem:[#allocation1 + $0x603] ss:$16 sm:%s8659_s24]   ;;  %v8657_v45 = vsel %vm3850_vm1, %v8655_v29, %v8652_v30  ;;  %v8283_v41 = vld [vmem:[#allocation1 + $0x604] ss:$16 sm:%s8282_s10]   ;;  %s8728_s30 = smov 192  ;;  %s8738_s17 = smov 3  ;;  %v11049_v29 = vunpack.i.l.bf16 %v14664_v59  ;;  %v11050_v59 = vunpack.i.h.bf16 %v14664_v59 }
 0x331   :  { %v8662_v37 = vsel %vm3854_vm2, %v8660_v3, %v8657_v45  ;;  %v8288_v28 = vld [vmem:[#allocation1 + $0x604] ss:$16 sm:%s8287_s8]   ;;  %v8285_v36 = vsel %vm3846_vm0, %v8283_v41, %v8280_v10  ;;  %v8716_v16 = vld [vmem:[#allocation1 + $0x483] ss:$16 sm:%s8715_s6]   ;;  %s8741_s28 = smov 12  ;;  %s8746_s18 = smov 48  ;;  %v14740_v10 = vpop.permute.xlu2 %11087  ;;  %v11074_v41 = vunpack.i.l.bf16 %v14703_v60  ;;  %v11075_v60 = vunpack.i.h.bf16 %v14703_v60 }
 0x332   :  { %v11246_v53 = vpack.i.bf16 %v8662_v37, %v8639_v54  ;;  %v8293_v9 = vld [vmem:[#allocation1 + $0x604] ss:$16 sm:%s8292_s25]   ;;  %v8290_v49 = vsel %vm3850_vm1, %v8288_v28, %v8285_v36  ;;  %v8719_v55 = vld [vmem:[#allocation1 + $0x483] ss:$16 sm:%s8718_s0]   ;;  %s8751_s15 = smov 192  ;;  %6901 = vst.msk [vmem:[#allocation0 + $0x48] sm:$0xff] %vm6762_vm11, %v11059_v48   ;;  %v14748_v28 = vpop.permute.xlu1 %11082 }
 0x333   :  { %v8295_v7 = vsel %vm3854_vm2, %v8293_v9, %v8290_v49  ;;  %v8721_v5 = vsel %vm3846_vm0, %v8719_v55, %v8716_v16  ;;  %v8724_v19 = vld [vmem:[#allocation1 + $0x483] ss:$16 sm:%s8723_s16]   ;;  %s8761_s1 = smov 3  ;;  %s8764_s4 = smov 12  ;;  %6924 = vst.msk [vmem:[#allocation0 + $0x68] sm:$0xff] %vm6762_vm11, %v11060_v51  }
 0x334   :  { %11247 = vrot.lane.b32.xlu1 %v11246_v53, %s11453_s20  ;;  %v11206_v20 = vpack.i.bf16 %v8295_v7, %v8272_v42  ;;  %v8726_v21 = vsel %vm3850_vm1, %v8724_v19, %v8721_v5  ;;  %v8729_v56 = vld [vmem:[#allocation1 + $0x483] ss:$16 sm:%s8728_s30]   ;;  %s8769_s12 = smov 48  ;;  %s8774_s2 = smov 192  ;;  %6809 = vst.msk [vmem:[#allocation0 + $0x40] sm:$0xff] %vm6762_vm11, %v11049_v29  }
 0x335   :  { %v8739_v58 = vld [vmem:[#allocation1 + $0x683] ss:$16 sm:%s8738_s17]   ;;  %v8731_v63 = vsel %vm3854_vm2, %v8729_v56, %v8726_v21  ;;  %s8784_s29 = smov 3  ;;  %s8787_s14 = smov 12  ;;  %6832 = vst.msk [vmem:[#allocation0 + $0x60] sm:$0xff] %vm6762_vm11, %v11050_v59  }
 0x336   :  { %v8742_v62 = vld [vmem:[#allocation1 + $0x683] ss:$16 sm:%s8741_s28]   ;;  %11207 = vrot.lane.b32.xlu2 %v11206_v20, %s11452_s19  ;;  %s8792_s13 = smov 48  ;;  %s8797_s11 = smov 192  ;;  %6855 = vst.msk [vmem:[#allocation0 + $0x8] sm:$0xff] %vm6762_vm11, %v11054_v52  }
 0x337   :  { %v8744_v13 = vsel %vm3846_vm0, %v8742_v62, %v8739_v58  ;;  %v8747_v39 = vld [vmem:[#allocation1 + $0x683] ss:$16 sm:%s8746_s18]   ;;  %s8394_s9 = smov 3  ;;  %s8397_s3 = smov 12  ;;  %6878 = vst.msk [vmem:[#allocation0 + $0x28] sm:$0xff] %vm6762_vm11, %v11055_v61  }
 0x338   :  { %v8752_v0 = vld [vmem:[#allocation1 + $0x683] ss:$16 sm:%s8751_s15]   ;;  %v8749_v43 = vsel %vm3850_vm1, %v8747_v39, %v8744_v13  ;;  %v8395_v25 = vld [vmem:[#allocation1 + $0x104] ss:$16 sm:%s8394_s9]   ;;  %s8402_s22 = smov 48  ;;  %s8407_s7 = smov 192 }
 0x339   :  { %v8762_v32 = vld [vmem:[#allocation1 + $0x103] ss:$16 sm:%s8761_s1]   ;;  %v8754_v8 = vsel %vm3854_vm2, %v8752_v0, %v8749_v43  ;;  %v8398_v27 = vld [vmem:[#allocation1 + $0x104] ss:$16 sm:%s8397_s3]   ;;  %s8417_s24 = smov 3  ;;  %s8420_s26 = smov 12 }
 0x33a   :  { %v8765_v2 = vld [vmem:[#allocation1 + $0x103] ss:$16 sm:%s8764_s4]   ;;  %v11256_v11 = vpack.i.bf16 %v8754_v8, %v8731_v63  ;;  %v8400_v54 = vsel %vm3846_vm0, %v8398_v27, %v8395_v25  ;;  %v8403_v30 = vld [vmem:[#allocation1 + $0x104] ss:$16 sm:%s8402_s22]   ;;  %s8425_s23 = smov 48  ;;  %s8430_s5 = smov 192  ;;  %v11069_v25 = vunpack.i.l.bf16 %v14710_v57  ;;  %v11070_v57 = vunpack.i.h.bf16 %v14710_v57  ;;  %v14787_v52 = vpop.permute.xlu1 %11097 }
 0x33b   :  { %v8767_v35 = vsel %vm3846_vm0, %v8765_v2, %v8762_v32  ;;  %v8770_v4 = vld [vmem:[#allocation1 + $0x103] ss:$16 sm:%s8769_s12]   ;;  %v8408_v3 = vld [vmem:[#allocation1 + $0x104] ss:$16 sm:%s8407_s7]   ;;  %v8405_v33 = vsel %vm3850_vm1, %v8403_v30, %v8400_v54  ;;  %s8853_s27 = smov 3  ;;  %s8856_s21 = smov 12 }
 0x33c   :  { %v8775_v23 = vld [vmem:[#allocation1 + $0x103] ss:$16 sm:%s8774_s2]   ;;  %v8772_v18 = vsel %vm3850_vm1, %v8770_v4, %v8767_v35  ;;  %11257 = vrot.lane.b32.xlu0 %v11256_v11, %s11453_s20  ;;  %v8418_v45 = vld [vmem:[#allocation1 + $0x304] ss:$16 sm:%s8417_s24]   ;;  %v8410_v1 = vsel %vm3854_vm2, %v8408_v3, %v8405_v33  ;;  %s8861_s10 = smov 48  ;;  %s8866_s8 = smov 192  ;;  %v14782_v33 = vpop.permute.xlu0 %11092 }
 0x33d   :  { %v8785_v14 = vld [vmem:[#allocation1 + $0x303] ss:$16 sm:%s8784_s29]   ;;  %v8777_v38 = vsel %vm3854_vm2, %v8775_v23, %v8772_v18  ;;  %v8421_v34 = vld [vmem:[#allocation1 + $0x304] ss:$16 sm:%s8420_s26]   ;;  %s8876_s25 = smov 3  ;;  %s8879_s6 = smov 12 }
 0x33e   :  { %v8788_v44 = vld [vmem:[#allocation1 + $0x303] ss:$16 sm:%s8787_s14]   ;;  %v8423_v37 = vsel %vm3846_vm0, %v8421_v34, %v8418_v45  ;;  %v8426_v12 = vld [vmem:[#allocation1 + $0x304] ss:$16 sm:%s8425_s23]   ;;  %s8884_s0 = smov 48  ;;  %s8889_s16 = smov 192 }
 0x33f   :  { %v8790_v22 = vsel %vm3846_vm0, %v8788_v44, %v8785_v14  ;;  %v8793_v17 = vld [vmem:[#allocation1 + $0x303] ss:$16 sm:%s8792_s13]   ;;  %v8431_v15 = vld [vmem:[#allocation1 + $0x304] ss:$16 sm:%s8430_s5]   ;;  %v8428_v53 = vsel %vm3850_vm1, %v8426_v12, %v8423_v37  ;;  %s8899_s30 = smov 3  ;;  %7039 = vst.msk [vmem:[#allocation0 + $0x18] sm:$0xff] %vm6762_vm11, %v11074_v41   ;;  %v11064_v14 = vunpack.i.l.bf16 %v14705_v50  ;;  %v11065_v50 = vunpack.i.h.bf16 %v14705_v50 }
 0x340   :  { %v8798_v24 = vld [vmem:[#allocation1 + $0x303] ss:$16 sm:%s8797_s11]   ;;  %v8795_v47 = vsel %vm3850_vm1, %v8793_v17, %v8790_v22  ;;  %v8433_v46 = vsel %vm3854_vm2, %v8431_v15, %v8428_v53  ;;  %s8902_s17 = smov 12  ;;  %s8907_s28 = smov 48  ;;  %7062 = vst.msk [vmem:[#allocation0 + $0x38] sm:$0xff] %vm6762_vm11, %v11075_v60  }
 0x341   :  { %v8800_v6 = vsel %vm3854_vm2, %v8798_v24, %v8795_v47  ;;  %v8854_v26 = vld [vmem:[#allocation1 + $0x183] ss:$16 sm:%s8853_s27]   ;;  %v11221_v9 = vpack.i.bf16 %v8433_v46, %v8410_v1  ;;  %s8912_s18 = smov 192  ;;  %s8922_s15 = smov 3  ;;  %6947 = vst.msk [vmem:[#allocation0 + $0x10] sm:$0xff] %vm6762_vm11, %v11064_v14  }
 0x342   :  { %v11261_v31 = vpack.i.bf16 %v8800_v6, %v8777_v38  ;;  %v8857_v42 = vld [vmem:[#allocation1 + $0x183] ss:$16 sm:%s8856_s21]   ;;  %s8925_s1 = smov 12  ;;  %s8930_s4 = smov 48  ;;  %6970 = vst.msk [vmem:[#allocation0 + $0x30] sm:$0xff] %vm6762_vm11, %v11065_v50  }
 0x343   :  { %v8862_v36 = vld [vmem:[#allocation1 + $0x183] ss:$16 sm:%s8861_s10]   ;;  %v8859_v48 = vsel %vm3846_vm0, %v8857_v42, %v8854_v26  ;;  %11222 = vrot.lane.b32.xlu2 %v11221_v9, %s11452_s19  ;;  %s8935_s12 = smov 192  ;;  %s8532_s2 = smov 3  ;;  %6993 = vst.msk [vmem:[#allocation0 + $0x50] sm:$0xff] %vm6762_vm11, %v11069_v25  }
 0x344   :  { %11262 = vrot.lane.b32.xlu1 %v11261_v31, %s11453_s20  ;;  %v8867_v49 = vld [vmem:[#allocation1 + $0x183] ss:$16 sm:%s8866_s8]   ;;  %v8864_v16 = vsel %vm3850_vm1, %v8862_v36, %v8859_v48  ;;  %v8533_v18 = vld [vmem:[#allocation1 + $0x584] ss:$16 sm:%s8532_s2]   ;;  %s8535_s29 = smov 12  ;;  %s8540_s14 = smov 48  ;;  %v14780_v31 = vpop.permute.xlu2 %11102 }
 0x345   :  { %v8877_v55 = vld [vmem:[#allocation1 + $0x383] ss:$16 sm:%s8876_s25]   ;;  %v8869_v5 = vsel %vm3854_vm2, %v8867_v49, %v8864_v16  ;;  %v8536_v38 = vld [vmem:[#allocation1 + $0x584] ss:$16 sm:%s8535_s29]   ;;  %s8545_s13 = smov 192  ;;  %s8555_s11 = smov 3 }
 0x346   :  { %v8880_v7 = vld [vmem:[#allocation1 + $0x383] ss:$16 sm:%s8879_s6]   ;;  %v8541_v22 = vld [vmem:[#allocation1 + $0x584] ss:$16 sm:%s8540_s14]   ;;  %v8538_v24 = vsel %vm3846_vm0, %v8536_v38, %v8533_v18  ;;  %s8558_s9 = smov 12  ;;  %s8563_s3 = smov 48 }
 0x347   :  { %v8882_v19 = vsel %vm3846_vm0, %v8880_v7, %v8877_v55  ;;  %v8885_v20 = vld [vmem:[#allocation1 + $0x383] ss:$16 sm:%s8884_s0]   ;;  %v8546_v51 = vld [vmem:[#allocation1 + $0x584] ss:$16 sm:%s8545_s13]   ;;  %v8543_v29 = vsel %vm3850_vm1, %v8541_v22, %v8538_v24  ;;  %s8568_s22 = smov 192  ;;  %s8990_s7 = smov 3 }
 0x348   :  { %v8887_v21 = vsel %vm3850_vm1, %v8885_v20, %v8882_v19  ;;  %v8890_v56 = vld [vmem:[#allocation1 + $0x383] ss:$16 sm:%s8889_s16]   ;;  %v8556_v47 = vld [vmem:[#allocation1 + $0x784] ss:$16 sm:%s8555_s11]   ;;  %v8548_v30 = vsel %vm3854_vm2, %v8546_v51, %v8543_v29  ;;  %v8991_v34 = vld [vmem:[#allocation1 + $0x402] ss:$16 sm:%s8990_s7]   ;;  %v11084_v51 = vunpack.i.l.bf16 %v14748_v28  ;;  %v11085_v28 = vunpack.i.h.bf16 %v14748_v28  ;;  %v14822_v29 = vpop.permute.xlu1 %11112 }
 0x349   :  { %v8900_v58 = vld [vmem:[#allocation1 + $0x583] ss:$16 sm:%s8899_s30]   ;;  %v8892_v62 = vsel %vm3854_vm2, %v8890_v56, %v8887_v21  ;;  %v8559_v6 = vld [vmem:[#allocation1 + $0x784] ss:$16 sm:%s8558_s9]   ;;  %s8993_s24 = smov 12  ;;  %s8998_s26 = smov 48 }
 0x34a   :  { %v8903_v63 = vld [vmem:[#allocation1 + $0x583] ss:$16 sm:%s8902_s17]   ;;  %v11271_v39 = vpack.i.bf16 %v8892_v62, %v8869_v5  ;;  %v8564_v54 = vld [vmem:[#allocation1 + $0x784] ss:$16 sm:%s8563_s3]   ;;  %v8561_v3 = vsel %vm3846_vm0, %v8559_v6, %v8556_v47  ;;  %v8994_v37 = vld [vmem:[#allocation1 + $0x402] ss:$16 sm:%s8993_s24]  }
 0x34b   :  { %v8908_v13 = vld [vmem:[#allocation1 + $0x583] ss:$16 sm:%s8907_s28]   ;;  %v8905_v0 = vsel %vm3846_vm0, %v8903_v63, %v8900_v58  ;;  %v8569_v59 = vld [vmem:[#allocation1 + $0x784] ss:$16 sm:%s8568_s22]   ;;  %v8566_v45 = vsel %vm3850_vm1, %v8564_v54, %v8561_v3  ;;  %v8999_v12 = vld [vmem:[#allocation1 + $0x402] ss:$16 sm:%s8998_s26]   ;;  %v8996_v61 = vsel %vm3846_vm0, %v8994_v37, %v8991_v34 }
 0x34c   :  { %v8913_v43 = vld [vmem:[#allocation1 + $0x583] ss:$16 sm:%s8912_s18]   ;;  %v8910_v2 = vsel %vm3850_vm1, %v8908_v13, %v8905_v0  ;;  %11272 = vrot.lane.b32.xlu0 %v11271_v39, %s11453_s20  ;;  %v8571_v1 = vsel %vm3854_vm2, %v8569_v59, %v8566_v45  ;;  %s9003_s23 = smov 192  ;;  %7016 = vst.msk [vmem:[#allocation0 + $0x70] sm:$0xff] %vm6762_vm11, %v11070_v57   ;;  %s9013_s5 = smov 3  ;;  %v9001_v26 = vsel %vm3850_vm1, %v8999_v12, %v8996_v61 }
 0x34d   :  { %v8923_v32 = vld [vmem:[#allocation1 + $0x783] ss:$16 sm:%s8922_s15]   ;;  %v8915_v4 = vsel %vm3854_vm2, %v8913_v43, %v8910_v2  ;;  %v11236_v15 = vpack.i.bf16 %v8571_v1, %v8548_v30  ;;  %v9004_v53 = vld [vmem:[#allocation1 + $0x402] ss:$16 sm:%s9003_s23]   ;;  %s9016_s27 = smov 12  ;;  %s9021_s21 = smov 48  ;;  %v11089_v43 = vunpack.i.l.bf16 %v14740_v10  ;;  %v11090_v10 = vunpack.i.h.bf16 %v14740_v10  ;;  %v14826_v30 = vpop.permute.xlu2 %11117 }
 0x34e   :  { %v8926_v8 = vld [vmem:[#allocation1 + $0x783] ss:$16 sm:%s8925_s1]   ;;  %v9014_v41 = vld [vmem:[#allocation1 + $0x602] ss:$16 sm:%s9013_s5]   ;;  %s9026_s10 = smov 192  ;;  %v9006_v42 = vsel %vm3854_vm2, %v9004_v53, %v9001_v26  ;;  %s9039_s8 = smov 12 }
 0x34f   :  { %v8931_v35 = vld [vmem:[#allocation1 + $0x783] ss:$16 sm:%s8930_s4]   ;;  %v8928_v23 = vsel %vm3846_vm0, %v8926_v8, %v8923_v32  ;;  %v9017_v46 = vld [vmem:[#allocation1 + $0x602] ss:$16 sm:%s9016_s27]   ;;  %11237 = vrot.lane.b32.xlu2 %v11236_v15, %s11452_s19  ;;  %s9036_s19 = smov 3  ;;  %s9044_s25 = smov 48 }
 0x350   :  { %v8936_v11 = vld [vmem:[#allocation1 + $0x783] ss:$16 sm:%s8935_s12]   ;;  %v8933_v44 = vsel %vm3850_vm1, %v8931_v35, %v8928_v23  ;;  %v9019_v36 = vsel %vm3846_vm0, %v9017_v46, %v9014_v41  ;;  %v9022_v9 = vld [vmem:[#allocation1 + $0x602] ss:$16 sm:%s9021_s21]   ;;  %s9049_s6 = smov 192  ;;  %s9059_s0 = smov 3 }
 0x351   :  { %v8938_v17 = vsel %vm3854_vm2, %v8936_v11, %v8933_v44  ;;  %v9027_v48 = vld [vmem:[#allocation1 + $0x602] ss:$16 sm:%s9026_s10]   ;;  %v9024_v49 = vsel %vm3850_vm1, %v9022_v9, %v9019_v36  ;;  %s9062_s16 = smov 12  ;;  %s9067_s30 = smov 48  ;;  %v11079_v11 = vunpack.i.l.bf16 %v14742_v40  ;;  %v11080_v40 = vunpack.i.h.bf16 %v14742_v40  ;;  %7176 = vst.msk [vmem:[#allocation0 + $0x40] sm:$0xff] %vm7129_vm12, %v11089_v43  }
 0x352   :  { %v11276_v27 = vpack.i.bf16 %v8938_v17, %v8915_v4  ;;  %v9037_v16 = vld [vmem:[#allocation1 + $0x82] ss:$16 sm:%s9036_s19]   ;;  %v9029_v7 = vsel %vm3854_vm2, %v9027_v48, %v9024_v49  ;;  %s9072_s17 = smov 192  ;;  %s8669_s28 = smov 3  ;;  %7199 = vst.msk [vmem:[#allocation0 + $0x60] sm:$0xff] %vm7129_vm12, %v11090_v10  }
 0x353   :  { %v9040_v55 = vld [vmem:[#allocation1 + $0x82] ss:$16 sm:%s9039_s8]   ;;  %v11286_v21 = vpack.i.bf16 %v9029_v7, %v9006_v42  ;;  %s8672_s18 = smov 12  ;;  %s11454_s15 = smov 16   ;;  %v8670_v2 = vld [vmem:[#allocation1 + $0x83] ss:$16 sm:%s8669_s28]  }
 0x354   :  { %11277 = vrot.lane.b32.xlu1 %v11276_v27, %s11453_s20  ;;  %v9042_v5 = vsel %vm3846_vm0, %v9040_v55, %v9037_v16  ;;  %v9045_v19 = vld [vmem:[#allocation1 + $0x82] ss:$16 sm:%s9044_s25]   ;;  %v8673_v8 = vld [vmem:[#allocation1 + $0x83] ss:$16 sm:%s8672_s18]   ;;  %s8677_s1 = smov 48  ;;  %s8682_s4 = smov 192  ;;  %v14820_v27 = vpop.permute.xlu0 %11107 }
 0x355   :  { %v9050_v20 = vld [vmem:[#allocation1 + $0x82] ss:$16 sm:%s9049_s6]   ;;  %v9047_v56 = vsel %vm3850_vm1, %v9045_v19, %v9042_v5  ;;  %11287 = vrot.lane.b32.xlu0 %v11286_v21, %s11454_s15  ;;  %v8675_v60 = vsel %vm3846_vm0, %v8673_v8, %v8670_v2  ;;  %v8678_v4 = vld [vmem:[#allocation1 + $0x83] ss:$16 sm:%s8677_s1]   ;;  %s8692_s12 = smov 3  ;;  %s8695_s2 = smov 12  ;;  %v11104_v19 = vunpack.i.l.bf16 %v14780_v31  ;;  %v11105_v31 = vunpack.i.h.bf16 %v14780_v31 }
 0x356   :  { %v9060_v58 = vld [vmem:[#allocation1 + $0x282] ss:$16 sm:%s9059_s0]   ;;  %v9052_v63 = vsel %vm3854_vm2, %v9050_v20, %v9047_v56  ;;  %v8683_v23 = vld [vmem:[#allocation1 + $0x83] ss:$16 sm:%s8682_s4]   ;;  %v8680_v14 = vsel %vm3850_vm1, %v8678_v4, %v8675_v60  ;;  %s8700_s29 = smov 48  ;;  %s8705_s14 = smov 192  ;;  %v11099_v4 = vunpack.i.l.bf16 %v14787_v52  ;;  %v11100_v52 = vunpack.i.h.bf16 %v14787_v52 }
 0x357   :  { %v9063_v62 = vld [vmem:[#allocation1 + $0x282] ss:$16 sm:%s9062_s16]   ;;  %v8693_v44 = vld [vmem:[#allocation1 + $0x283] ss:$16 sm:%s8692_s12]   ;;  %v8685_v22 = vsel %vm3854_vm2, %v8683_v23, %v8680_v14  ;;  %s9128_s13 = smov 3  ;;  %s9131_s11 = smov 12 }
 0x358   :  { %v9065_v13 = vsel %vm3846_vm0, %v9063_v62, %v9060_v58  ;;  %v9068_v39 = vld [vmem:[#allocation1 + $0x282] ss:$16 sm:%s9067_s30]   ;;  %v8696_v38 = vld [vmem:[#allocation1 + $0x283] ss:$16 sm:%s8695_s2]   ;;  %s9136_s9 = smov 48  ;;  %7085 = vst.msk [vmem:[#allocation0 + $0x58] sm:$0xff] %vm6762_vm11, %v11079_v11  }
 0x359   :  { %v9073_v0 = vld [vmem:[#allocation1 + $0x282] ss:$16 sm:%s9072_s17]   ;;  %v9070_v32 = vsel %vm3850_vm1, %v9068_v39, %v9065_v13  ;;  %v8698_v50 = vsel %vm3846_vm0, %v8696_v38, %v8693_v44  ;;  %v8701_v17 = vld [vmem:[#allocation1 + $0x283] ss:$16 sm:%s8700_s29]   ;;  %s9141_s3 = smov 192  ;;  %7108 = vst.msk [vmem:[#allocation0 + $0x78] sm:$0xff] %vm6762_vm11, %v11080_v40   ;;  %v11094_v39 = vunpack.i.l.bf16 %v14782_v33  ;;  %v11095_v33 = vunpack.i.h.bf16 %v14782_v33  ;;  %v14859_v44 = vpop.permute.xlu1 %11127 }
 0x35a   :  { %v9075_v35 = vsel %vm3854_vm2, %v9073_v0, %v9070_v32  ;;  %v8706_v24 = vld [vmem:[#allocation1 + $0x283] ss:$16 sm:%s8705_s14]   ;;  %v8703_v47 = vsel %vm3850_vm1, %v8701_v17, %v8698_v50  ;;  %v9129_v25 = vld [vmem:[#allocation1 + $0x102] ss:$16 sm:%s9128_s13]   ;;  %s9151_s22 = smov 3  ;;  %s9154_s7 = smov 12  ;;  %v14864_v50 = vpop.permute.xlu2 %11132 }
 0x35b   :  { %v11291_v18 = vpack.i.bf16 %v9075_v35, %v9052_v63  ;;  %v8708_v6 = vsel %vm3854_vm2, %v8706_v24, %v8703_v47  ;;  %v9132_v54 = vld [vmem:[#allocation1 + $0x102] ss:$16 sm:%s9131_s11]   ;;  %7130 = vst.msk [vmem:[#allocation0] sm:$0xff] %vm7129_vm12, %v11084_v51   ;;  %s9159_s24 = smov 48  ;;  %s9164_s26 = smov 192 }
 0x35c   :  { %v9137_v57 = vld [vmem:[#allocation1 + $0x102] ss:$16 sm:%s9136_s9]   ;;  %v11251_v3 = vpack.i.bf16 %v8708_v6, %v8685_v22  ;;  %v9134_v59 = vsel %vm3846_vm0, %v9132_v54, %v9129_v25  ;;  %7153 = vst.msk [vmem:[#allocation0 + $0x20] sm:$0xff] %vm7129_vm12, %v11085_v28   ;;  %s9174_s23 = smov 3  ;;  %s9177_s5 = smov 12  ;;  %v14857_v14 = vpop.permute.xlu0 %11122 }
 0x35d   :  { %11292 = vrot.lane.b32.xlu1 %v11291_v18, %s11454_s15  ;;  %v9142_v45 = vld [vmem:[#allocation1 + $0x102] ss:$16 sm:%s9141_s3]   ;;  %v9139_v34 = vsel %vm3850_vm1, %v9137_v57, %v9134_v59  ;;  %s9182_s27 = smov 48  ;;  %s9187_s21 = smov 192  ;;  %7314 = vst.msk [vmem:[#allocation0 + $0x10] sm:$0xff] %vm7129_vm12, %v11104_v19   ;;  %v11109_v57 = vunpack.i.l.bf16 %v14820_v27  ;;  %v11110_v27 = vunpack.i.h.bf16 %v14820_v27 }
 0x35e   :  { %v9152_v1 = vld [vmem:[#allocation1 + $0x302] ss:$16 sm:%s9151_s22]   ;;  %11252 = vrot.lane.b32.xlu2 %v11251_v3, %s11453_s20  ;;  %v9144_v12 = vsel %vm3854_vm2, %v9142_v45, %v9139_v34  ;;  %s9197_s10 = smov 3  ;;  %s9200_s19 = smov 12  ;;  %7337 = vst.msk [vmem:[#allocation0 + $0x30] sm:$0xff] %vm7129_vm12, %v11105_v31  }
 0x35f   :  { %v9155_v37 = vld [vmem:[#allocation1 + $0x302] ss:$16 sm:%s9154_s7]   ;;  %s9205_s8 = smov 48  ;;  %s9210_s25 = smov 192  ;;  %7222 = vst.msk [vmem:[#allocation0 + $0x8] sm:$0xff] %vm7129_vm12, %v11094_v39  }
 0x360   :  { %v9157_v15 = vsel %vm3846_vm0, %v9155_v37, %v9152_v1  ;;  %v9160_v61 = vld [vmem:[#allocation1 + $0x302] ss:$16 sm:%s9159_s24]   ;;  %s8807_s6 = smov 3  ;;  %s8810_s0 = smov 12  ;;  %7245 = vst.msk [vmem:[#allocation0 + $0x28] sm:$0xff] %vm7129_vm12, %v11095_v33   ;;  %v11124_v33 = vunpack.i.l.bf16 %v14857_v14  ;;  %v11125_v14 = vunpack.i.h.bf16 %v14857_v14 }
 0x361   :  { %v9162_v53 = vsel %vm3850_vm1, %v9160_v61, %v9157_v15  ;;  %v9165_v26 = vld [vmem:[#allocation1 + $0x302] ss:$16 sm:%s9164_s26]   ;;  %v8808_v58 = vld [vmem:[#allocation1 + $0x503] ss:$16 sm:%s8807_s6]   ;;  %s8815_s16 = smov 48  ;;  %s8820_s30 = smov 192 }
 0x362   :  { %v9175_v41 = vld [vmem:[#allocation1 + $0x502] ss:$16 sm:%s9174_s23]   ;;  %v9167_v46 = vsel %vm3854_vm2, %v9165_v26, %v9162_v53  ;;  %v8811_v63 = vld [vmem:[#allocation1 + $0x503] ss:$16 sm:%s8810_s0]   ;;  %s8830_s17 = smov 3  ;;  %s8833_s28 = smov 12 }
 0x363   :  { %v9178_v42 = vld [vmem:[#allocation1 + $0x502] ss:$16 sm:%s9177_s5]   ;;  %v11301_v9 = vpack.i.bf16 %v9167_v46, %v9144_v12  ;;  %v8816_v13 = vld [vmem:[#allocation1 + $0x503] ss:$16 sm:%s8815_s16]   ;;  %v8813_v43 = vsel %vm3846_vm0, %v8811_v63, %v8808_v58  ;;  %s8838_s18 = smov 48  ;;  %s8843_s1 = smov 192 }
 0x364   :  { %v9183_v36 = vld [vmem:[#allocation1 + $0x502] ss:$16 sm:%s9182_s27]   ;;  %v9180_v48 = vsel %vm3846_vm0, %v9178_v42, %v9175_v41  ;;  %v8821_v32 = vld [vmem:[#allocation1 + $0x503] ss:$16 sm:%s8820_s30]   ;;  %v8818_v10 = vsel %vm3850_vm1, %v8816_v13, %v8813_v43  ;;  %s9266_s4 = smov 3  ;;  %s9269_s12 = smov 12 }
 0x365   :  { %v9188_v49 = vld [vmem:[#allocation1 + $0x502] ss:$16 sm:%s9187_s21]   ;;  %v9185_v55 = vsel %vm3850_vm1, %v9183_v36, %v9180_v48  ;;  %11302 = vrot.lane.b32.xlu0 %v11301_v9, %s11454_s15  ;;  %v8831_v2 = vld [vmem:[#allocation1 + $0x703] ss:$16 sm:%s8830_s17]   ;;  %v8823_v23 = vsel %vm3854_vm2, %v8821_v32, %v8818_v10  ;;  %s9274_s2 = smov 48  ;;  %s9279_s29 = smov 192  ;;  %v14900_v10 = vpop.permute.xlu1 %11142 }
 0x366   :  { %v9198_v16 = vld [vmem:[#allocation1 + $0x702] ss:$16 sm:%s9197_s10]   ;;  %v9190_v20 = vsel %vm3854_vm2, %v9188_v49, %v9185_v55  ;;  %v8834_v35 = vld [vmem:[#allocation1 + $0x703] ss:$16 sm:%s8833_s28]   ;;  %s9289_s14 = smov 3  ;;  %7268 = vst.msk [vmem:[#allocation0 + $0x48] sm:$0xff] %vm7129_vm12, %v11099_v4  }
 0x367   :  { %v9201_v7 = vld [vmem:[#allocation1 + $0x702] ss:$16 sm:%s9200_s19]   ;;  %v8839_v60 = vld [vmem:[#allocation1 + $0x703] ss:$16 sm:%s8838_s18]   ;;  %v8836_v11 = vsel %vm3846_vm0, %v8834_v35, %v8831_v2  ;;  %s9292_s13 = smov 12  ;;  %7291 = vst.msk [vmem:[#allocation0 + $0x68] sm:$0xff] %vm7129_vm12, %v11100_v52  }
 0x368   :  { %v9206_v5 = vld [vmem:[#allocation1 + $0x702] ss:$16 sm:%s9205_s8]   ;;  %v9203_v21 = vsel %vm3846_vm0, %v9201_v7, %v9198_v16  ;;  %v8844_v18 = vld [vmem:[#allocation1 + $0x703] ss:$16 sm:%s8843_s1]   ;;  %v8841_v38 = vsel %vm3850_vm1, %v8839_v60, %v8836_v11  ;;  %s9297_s11 = smov 48  ;;  %s9302_s9 = smov 192  ;;  %v11114_v7 = vunpack.i.l.bf16 %v14822_v29  ;;  %v11115_v29 = vunpack.i.h.bf16 %v14822_v29 }
 0x369   :  { %v9211_v56 = vld [vmem:[#allocation1 + $0x702] ss:$16 sm:%s9210_s25]   ;;  %v9208_v62 = vsel %vm3850_vm1, %v9206_v5, %v9203_v21  ;;  %v8846_v17 = vsel %vm3854_vm2, %v8844_v18, %v8841_v38  ;;  %s9315_s3 = smov 12  ;;  %s9320_s22 = smov 48  ;;  %7360 = vst.msk [vmem:[#allocation0 + $0x50] sm:$0xff] %vm7129_vm12, %v11109_v57  }
 0x36a   :  { %v9213_v0 = vsel %vm3854_vm2, %v9211_v56, %v9208_v62  ;;  %v9267_v40 = vld [vmem:[#allocation1 + $0x582] ss:$16 sm:%s9266_s4]   ;;  %v11266_v47 = vpack.i.bf16 %v8846_v17, %v8823_v23  ;;  %v9316_v12 = vld [vmem:[#allocation1 + $0x1] ss:$16 sm:%s9315_s3]   ;;  %s9325_s7 = smov 192  ;;  %s9334_s24 = smov 3  ;;  %v11119_v62 = vunpack.i.l.bf16 %v14826_v30  ;;  %v11120_v30 = vunpack.i.h.bf16 %v14826_v30  ;;  %v14905_v23 = vpop.permute.xlu2 %11147 }
 0x36b   :  { %v11306_v8 = vpack.i.bf16 %v9213_v0, %v9190_v20  ;;  %v9270_v22 = vld [vmem:[#allocation1 + $0x582] ss:$16 sm:%s9269_s12]   ;;  %v9321_v53 = vld [vmem:[#allocation1 + $0x1] ss:$16 sm:%s9320_s22]   ;;  %s9337_s26 = smov 12  ;;  %s9342_s23 = smov 48 }
 0x36c   :  { %v9272_v24 = vsel %vm3846_vm0, %v9270_v22, %v9267_v40  ;;  %v9275_v51 = vld [vmem:[#allocation1 + $0x582] ss:$16 sm:%s9274_s2]   ;;  %11267 = vrot.lane.b32.xlu2 %v11266_v47, %s11453_s20  ;;  %s9312_s20 = smov 3  ;;  %v9326_v26 = vld [vmem:[#allocation1 + $0x1] ss:$16 sm:%s9325_s7]   ;;  %s9347_s5 = smov 192 }
 0x36d   :  { %11307 = vrot.lane.b32.xlu1 %v11306_v8, %s11454_s15  ;;  %v9277_v28 = vsel %vm3850_vm1, %v9275_v51, %v9272_v24  ;;  %v9280_v25 = vld [vmem:[#allocation1 + $0x582] ss:$16 sm:%s9279_s29]   ;;  %v9313_v37 = vld [vmem:[#allocation1 + $0x1] ss:$16 sm:%s9312_s20]   ;;  %s8945_s27 = smov 3  ;;  %s8948_s21 = smov 12  ;;  %v14898_v8 = vpop.permute.xlu0 %11137 }
 0x36e   :  { %v9290_v6 = vld [vmem:[#allocation1 + $0x782] ss:$16 sm:%s9289_s14]   ;;  %v9282_v3 = vsel %vm3854_vm2, %v9280_v25, %v9277_v28  ;;  %v9318_v61 = vsel %vm3846_vm0, %v9316_v12, %v9313_v37  ;;  %v9335_v42 = vld [vmem:[#allocation1 + $0x201] ss:$16 sm:%s9334_s24]   ;;  %s8953_s10 = smov 48  ;;  %s8958_s19 = smov 192 }
 0x36f   :  { %v9293_v54 = vld [vmem:[#allocation1 + $0x782] ss:$16 sm:%s9292_s13]   ;;  %v9323_v46 = vsel %vm3850_vm1, %v9321_v53, %v9318_v61  ;;  %v9338_v36 = vld [vmem:[#allocation1 + $0x201] ss:$16 sm:%s9337_s26]   ;;  %s8967_s8 = smov 3  ;;  %s8970_s25 = smov 12  ;;  %v14922_v53 = vpop.permute.xlu1 %11157 }
 0x370   :  { %v9295_v59 = vsel %vm3846_vm0, %v9293_v54, %v9290_v6  ;;  %v9298_v45 = vld [vmem:[#allocation1 + $0x782] ss:$16 sm:%s9297_s11]   ;;  %v9343_v9 = vld [vmem:[#allocation1 + $0x201] ss:$16 sm:%s9342_s23]   ;;  %v9328_v48 = vsel %vm3854_vm2, %v9326_v26, %v9323_v46  ;;  %v9340_v49 = vsel %vm3846_vm0, %v9338_v36, %v9335_v42  ;;  %s8975_s6 = smov 48  ;;  %s8980_s0 = smov 192 }
 0x371   :  { %v9303_v34 = vld [vmem:[#allocation1 + $0x782] ss:$16 sm:%s9302_s9]   ;;  %v9300_v1 = vsel %vm3850_vm1, %v9298_v45, %v9295_v59  ;;  %v9348_v16 = vld [vmem:[#allocation1 + $0x201] ss:$16 sm:%s9347_s5]   ;;  %v9345_v5 = vsel %vm3850_vm1, %v9343_v9, %v9340_v49  ;;  %7383 = vst.msk [vmem:[#allocation0 + $0x70] sm:$0xff] %vm7129_vm12, %v11110_v27   ;;  %s9403_s16 = smov 3  ;;  %v11129_v49 = vunpack.i.l.bf16 %v14859_v44  ;;  %v11130_v44 = vunpack.i.h.bf16 %v14859_v44 }
 0x372   :  { %v9305_v15 = vsel %vm3854_vm2, %v9303_v34, %v9300_v1  ;;  %v8946_v55 = vld [vmem:[#allocation1 + $0x2] ss:$16 sm:%s8945_s27]   ;;  %v9350_v21 = vsel %vm3854_vm2, %v9348_v16, %v9345_v5  ;;  %7406 = vst.msk [vmem:[#allocation0 + $0x18] sm:$0xff] %vm7129_vm12, %v11114_v7   ;;  %s9406_s30 = smov 12  ;;  %s11455_s17 = smov 8   ;;  %v14927_v36 = vpop.permute.xlu2 %11162 }
 0x373   :  { %v11316_v41 = vpack.i.bf16 %v9305_v15, %v9282_v3  ;;  %v8949_v19 = vld [vmem:[#allocation1 + $0x2] ss:$16 sm:%s8948_s21]   ;;  %v11321_v63 = vpack.i.bf16 %v9350_v21, %v9328_v48  ;;  %7429 = vst.msk [vmem:[#allocation0 + $0x38] sm:$0xff] %vm7129_vm12, %v11115_v29   ;;  %v9404_v60 = vld [vmem:[#allocation1 + $0x81] ss:$16 sm:%s9403_s16]   ;;  %s9411_s28 = smov 48 }
 0x374   :  { %v8954_v20 = vld [vmem:[#allocation1 + $0x2] ss:$16 sm:%s8953_s10]   ;;  %v8951_v56 = vsel %vm3846_vm0, %v8949_v19, %v8946_v55  ;;  %v9407_v4 = vld [vmem:[#allocation1 + $0x81] ss:$16 sm:%s9406_s30]   ;;  %7452 = vst.msk [vmem:[#allocation0 + $0x58] sm:$0xff] %vm7129_vm12, %v11119_v62   ;;  %s9416_s18 = smov 192 }
 0x375   :  { %11317 = vrot.lane.b32.xlu0 %v11316_v41, %s11454_s15  ;;  %v8959_v58 = vld [vmem:[#allocation1 + $0x2] ss:$16 sm:%s8958_s19]   ;;  %v8956_v13 = vsel %vm3850_vm1, %v8954_v20, %v8951_v56  ;;  %11322 = vrot.lane.b32.xlu1 %v11321_v63, %s11455_s17  ;;  %v9409_v18 = vsel %vm3846_vm0, %v9407_v4, %v9404_v60  ;;  %v9412_v52 = vld [vmem:[#allocation1 + $0x81] ss:$16 sm:%s9411_s28]   ;;  %s9426_s1 = smov 3  ;;  %7475 = vst.msk [vmem:[#allocation0 + $0x78] sm:$0xff] %vm7129_vm12, %v11120_v30   ;;  %v14920_v61 = vpop.permute.xlu0 %11152  ;;  %v11135_v56 = vunpack.i.h.bf16 %v14864_v50  ;;  %v11134_v50 = vunpack.i.l.bf16 %v14864_v50 }
 0x376   :  { %v8968_v31 = vld [vmem:[#allocation1 + $0x202] ss:$16 sm:%s8967_s8]   ;;  %v8961_v43 = vsel %vm3854_vm2, %v8959_v58, %v8956_v13  ;;  %v9414_v40 = vsel %vm3850_vm1, %v9412_v52, %v9409_v18  ;;  %v9417_v22 = vld [vmem:[#allocation1 + $0x81] ss:$16 sm:%s9416_s18]   ;;  %s9429_s4 = smov 12  ;;  %s9434_s12 = smov 48 }
 0x377   :  { %v8971_v39 = vld [vmem:[#allocation1 + $0x202] ss:$16 sm:%s8970_s25]   ;;  %v9427_v17 = vld [vmem:[#allocation1 + $0x281] ss:$16 sm:%s9426_s1]   ;;  %s9439_s2 = smov 192  ;;  %7497 = vst.msk [vmem:[#allocation0] sm:$0xff] %vm7496_vm13, %v11124_v33   ;;  %v9419_v51 = vsel %vm3854_vm2, %v9417_v22, %v9414_v40  ;;  %v14951_v4 = vpop.permute.xlu1 %11172 }
 0x378   :  { %v8976_v0 = vld [vmem:[#allocation1 + $0x202] ss:$16 sm:%s8975_s6]   ;;  %v8973_v32 = vsel %vm3846_vm0, %v8971_v39, %v8968_v31  ;;  %v9430_v24 = vld [vmem:[#allocation1 + $0x281] ss:$16 sm:%s9429_s4]   ;;  %s9449_s29 = smov 3  ;;  %s9452_s14 = smov 12 }
 0x379   :  { %v8981_v2 = vld [vmem:[#allocation1 + $0x202] ss:$16 sm:%s8980_s0]   ;;  %v8978_v35 = vsel %vm3850_vm1, %v8976_v0, %v8973_v32  ;;  %v9432_v47 = vsel %vm3846_vm0, %v9430_v24, %v9427_v17  ;;  %v9435_v28 = vld [vmem:[#allocation1 + $0x281] ss:$16 sm:%s9434_s12]   ;;  %s9457_s13 = smov 48  ;;  %s9462_s11 = smov 192  ;;  %v11139_v0 = vunpack.i.l.bf16 %v14898_v8  ;;  %v11140_v8 = vunpack.i.h.bf16 %v14898_v8 }
 0x37a   :  { %v8983_v11 = vsel %vm3854_vm2, %v8981_v2, %v8978_v35  ;;  %v9440_v25 = vld [vmem:[#allocation1 + $0x281] ss:$16 sm:%s9439_s2]   ;;  %v9437_v6 = vsel %vm3850_vm1, %v9435_v28, %v9432_v47  ;;  %s9472_s9 = smov 3  ;;  %s9475_s20 = smov 12  ;;  %7520 = vst.msk [vmem:[#allocation0 + $0x20] sm:$0xff] %vm7496_vm13, %v11125_v14  }
 0x37b   :  { %v11281_v38 = vpack.i.bf16 %v8983_v11, %v8961_v43  ;;  %v9450_v54 = vld [vmem:[#allocation1 + $0x481] ss:$16 sm:%s9449_s29]   ;;  %v9442_v3 = vsel %vm3854_vm2, %v9440_v25, %v9437_v6  ;;  %s9480_s3 = smov 48  ;;  %s9485_s22 = smov 192  ;;  %7543 = vst.msk [vmem:[#allocation0 + $0x40] sm:$0xff] %vm7496_vm13, %v11129_v49  }
 0x37c   :  { %v9453_v57 = vld [vmem:[#allocation1 + $0x481] ss:$16 sm:%s9452_s14]   ;;  %v11331_v1 = vpack.i.bf16 %v9442_v3, %v9419_v51  ;;  %s9082_s7 = smov 3  ;;  %s9085_s24 = smov 12  ;;  %7566 = vst.msk [vmem:[#allocation0 + $0x60] sm:$0xff] %vm7496_vm13, %v11130_v44  }
 0x37d   :  { %11282 = vrot.lane.b32.xlu2 %v11281_v38, %s11454_s15  ;;  %v9455_v59 = vsel %vm3846_vm0, %v9453_v57, %v9450_v54  ;;  %v9458_v45 = vld [vmem:[#allocation1 + $0x481] ss:$16 sm:%s9457_s13]   ;;  %v9083_v27 = vld [vmem:[#allocation1 + $0x482] ss:$16 sm:%s9082_s7]   ;;  %s9090_s26 = smov 48  ;;  %s9095_s23 = smov 192  ;;  %v14949_v60 = vpop.permute.xlu0 %11167  ;;  %v14955_v38 = vpop.permute.xlu2 %11177 }
 0x37e   :  { %v9463_v34 = vld [vmem:[#allocation1 + $0x481] ss:$16 sm:%s9462_s11]   ;;  %v9460_v37 = vsel %vm3850_vm1, %v9458_v45, %v9455_v59  ;;  %11332 = vrot.lane.b32.xlu0 %v11331_v1, %s11455_s17  ;;  %v9086_v48 = vld [vmem:[#allocation1 + $0x482] ss:$16 sm:%s9085_s24]   ;;  %s9105_s5 = smov 3  ;;  %s9108_s27 = smov 12 }
 0x37f   :  { %v9473_v12 = vld [vmem:[#allocation1 + $0x681] ss:$16 sm:%s9472_s9]   ;;  %v9465_v26 = vsel %vm3854_vm2, %v9463_v34, %v9460_v37  ;;  %v9088_v55 = vsel %vm3846_vm0, %v9086_v48, %v9083_v27  ;;  %v9091_v7 = vld [vmem:[#allocation1 + $0x482] ss:$16 sm:%s9090_s26]   ;;  %s9113_s21 = smov 48  ;;  %s9118_s10 = smov 192  ;;  %v14974_v27 = vpop.permute.xlu1 %11187 }
 0x380   :  { %v9476_v15 = vld [vmem:[#allocation1 + $0x681] ss:$16 sm:%s9475_s20]   ;;  %v9096_v5 = vld [vmem:[#allocation1 + $0x482] ss:$16 sm:%s9095_s23]   ;;  %v9093_v20 = vsel %vm3850_vm1, %v9091_v7, %v9088_v55  ;;  %s9541_s19 = smov 3  ;;  %s9544_s8 = smov 12  ;;  %v11150_v7 = vunpack.i.h.bf16 %v14905_v23  ;;  %v11149_v23 = vunpack.i.l.bf16 %v14905_v23 }
 0x381   :  { %v9478_v41 = vsel %vm3846_vm0, %v9476_v15, %v9473_v12  ;;  %v9481_v46 = vld [vmem:[#allocation1 + $0x681] ss:$16 sm:%s9480_s3]   ;;  %v9106_v29 = vld [vmem:[#allocation1 + $0x682] ss:$16 sm:%s9105_s5]   ;;  %v9098_v58 = vsel %vm3854_vm2, %v9096_v5, %v9093_v20  ;;  %s9549_s25 = smov 48  ;;  %s9554_s6 = smov 192 }
 0x382   :  { %v9486_v42 = vld [vmem:[#allocation1 + $0x681] ss:$16 sm:%s9485_s22]   ;;  %v9483_v9 = vsel %vm3850_vm1, %v9481_v46, %v9478_v41  ;;  %v9109_v21 = vld [vmem:[#allocation1 + $0x682] ss:$16 sm:%s9108_s27]   ;;  %7612 = vst.msk [vmem:[#allocation0 + $0x28] sm:$0xff] %vm7496_vm13, %v11135_v56   ;;  %s9564_s0 = smov 3  ;;  %v11144_v41 = vunpack.i.l.bf16 %v14900_v10  ;;  %v11145_v10 = vunpack.i.h.bf16 %v14900_v10 }
 0x383   :  { %v9488_v16 = vsel %vm3854_vm2, %v9486_v42, %v9483_v9  ;;  %v9111_v31 = vsel %vm3846_vm0, %v9109_v21, %v9106_v29  ;;  %v9114_v62 = vld [vmem:[#allocation1 + $0x682] ss:$16 sm:%s9113_s21]   ;;  %v9542_v39 = vld [vmem:[#allocation1 + $0x501] ss:$16 sm:%s9541_s19]   ;;  %s9567_s16 = smov 12  ;;  %7589 = vst.msk [vmem:[#allocation0 + $0x8] sm:$0xff] %vm7496_vm13, %v11134_v50  }
 0x384   :  { %v11336_v19 = vpack.i.bf16 %v9488_v16, %v9465_v26  ;;  %v9119_v63 = vld [vmem:[#allocation1 + $0x682] ss:$16 sm:%s9118_s10]   ;;  %v9116_v13 = vsel %vm3850_vm1, %v9114_v62, %v9111_v31  ;;  %v9545_v43 = vld [vmem:[#allocation1 + $0x501] ss:$16 sm:%s9544_s8]   ;;  %s9572_s30 = smov 48  ;;  %s9577_s28 = smov 192  ;;  %v11154_v31 = vunpack.i.l.bf16 %v14920_v61  ;;  %v11155_v61 = vunpack.i.h.bf16 %v14920_v61 }
 0x385   :  { %v9121_v30 = vsel %vm3854_vm2, %v9119_v63, %v9116_v13  ;;  %v9550_v32 = vld [vmem:[#allocation1 + $0x501] ss:$16 sm:%s9549_s25]   ;;  %v9547_v33 = vsel %vm3846_vm0, %v9545_v43, %v9542_v39  ;;  %s9587_s18 = smov 3  ;;  %7635 = vst.msk [vmem:[#allocation0 + $0x48] sm:$0xff] %vm7496_vm13, %v11139_v0   ;;  %s9590_s1 = smov 12  ;;  %v14972_v9 = vpop.permute.xlu0 %11182  ;;  %v14979_v5 = vpop.permute.xlu2 %11192 }
 0x386   :  { %11337 = vrot.lane.b32.xlu1 %v11336_v19, %s11455_s17  ;;  %v11296_v2 = vpack.i.bf16 %v9121_v30, %v9098_v58  ;;  %v9555_v35 = vld [vmem:[#allocation1 + $0x501] ss:$16 sm:%s9554_s6]   ;;  %v9552_v11 = vsel %vm3850_vm1, %v9550_v32, %v9547_v33  ;;  %s9595_s4 = smov 48  ;;  %s9600_s12 = smov 192  ;;  %7658 = vst.msk [vmem:[#allocation0 + $0x68] sm:$0xff] %vm7496_vm13, %v11140_v8   ;;  %v11159_v30 = vunpack.i.l.bf16 %v14922_v53  ;;  %v11160_v53 = vunpack.i.h.bf16 %v14922_v53 }
 0x387   :  { %v9565_v18 = vld [vmem:[#allocation1 + $0x701] ss:$16 sm:%s9564_s0]   ;;  %v9557_v40 = vsel %vm3854_vm2, %v9555_v35, %v9552_v11  ;;  %s9610_s2 = smov 3  ;;  %s9613_s29 = smov 12  ;;  %7681 = vst.msk [vmem:[#allocation0 + $0x10] sm:$0xff] %vm7496_vm13, %v11144_v41   ;;  %v11165_v11 = vunpack.i.h.bf16 %v14927_v36  ;;  %v11164_v36 = vunpack.i.l.bf16 %v14927_v36 }
 0x388   :  { %v9568_v52 = vld [vmem:[#allocation1 + $0x701] ss:$16 sm:%s9567_s16]   ;;  %11297 = vrot.lane.b32.xlu2 %v11296_v2, %s11454_s15  ;;  %s9618_s14 = smov 48  ;;  %s9623_s13 = smov 192  ;;  %7704 = vst.msk [vmem:[#allocation0 + $0x30] sm:$0xff] %vm7496_vm13, %v11145_v10  }
 0x389   :  { %v9570_v22 = vsel %vm3846_vm0, %v9568_v52, %v9565_v18  ;;  %v9573_v17 = vld [vmem:[#allocation1 + $0x701] ss:$16 sm:%s9572_s30]   ;;  %s9220_s11 = smov 3  ;;  %s9223_s9 = smov 12  ;;  %7750 = vst.msk [vmem:[#allocation0 + $0x70] sm:$0xff] %vm7496_vm13, %v11150_v7  }
 0x38a   :  { %v9575_v24 = vsel %vm3850_vm1, %v9573_v17, %v9570_v22  ;;  %v9578_v51 = vld [vmem:[#allocation1 + $0x701] ss:$16 sm:%s9577_s28]   ;;  %v9221_v26 = vld [vmem:[#allocation1 + $0x182] ss:$16 sm:%s9220_s11]   ;;  %s9228_s20 = smov 48  ;;  %s9233_s3 = smov 192  ;;  %v15007_v17 = vpop.permute.xlu1 %11202 }
 0x38b   :  { %v9588_v47 = vld [vmem:[#allocation1 + $0x181] ss:$16 sm:%s9587_s18]   ;;  %v9580_v28 = vsel %vm3854_vm2, %v9578_v51, %v9575_v24  ;;  %v9224_v42 = vld [vmem:[#allocation1 + $0x182] ss:$16 sm:%s9223_s9]   ;;  %s9243_s22 = smov 3  ;;  %s9246_s7 = smov 12 }
 0x38c   :  { %v9591_v25 = vld [vmem:[#allocation1 + $0x181] ss:$16 sm:%s9590_s1]   ;;  %v11346_v54 = vpack.i.bf16 %v9580_v28, %v9557_v40  ;;  %v9229_v14 = vld [vmem:[#allocation1 + $0x182] ss:$16 sm:%s9228_s20]   ;;  %v9226_v49 = vsel %vm3846_vm0, %v9224_v42, %v9221_v26  ;;  %s9251_s24 = smov 48  ;;  %s9256_s26 = smov 192  ;;  %v11169_v28 = vunpack.i.l.bf16 %v14949_v60  ;;  %v11170_v60 = vunpack.i.h.bf16 %v14949_v60 }
 0x38d   :  { %v9596_v6 = vld [vmem:[#allocation1 + $0x181] ss:$16 sm:%s9595_s4]   ;;  %v9593_v57 = vsel %vm3846_vm0, %v9591_v25, %v9588_v47  ;;  %v9234_v16 = vld [vmem:[#allocation1 + $0x182] ss:$16 sm:%s9233_s3]   ;;  %v9231_v19 = vsel %vm3850_vm1, %v9229_v14, %v9226_v49  ;;  %s9357_s23 = smov 3  ;;  %s9360_s5 = smov 12  ;;  %v15005_v22 = vpop.permute.xlu0 %11197  ;;  %v11184_v14 = vunpack.i.l.bf16 %v14972_v9  ;;  %v11185_v9 = vunpack.i.h.bf16 %v14972_v9 }
 0x38e   :  { %v9601_v3 = vld [vmem:[#allocation1 + $0x181] ss:$16 sm:%s9600_s12]   ;;  %v9598_v45 = vsel %vm3850_vm1, %v9596_v6, %v9593_v57  ;;  %11347 = vrot.lane.b32.xlu0 %v11346_v54, %s11455_s17  ;;  %v9244_v55 = vld [vmem:[#allocation1 + $0x382] ss:$16 sm:%s9243_s22]   ;;  %v9236_v21 = vsel %vm3854_vm2, %v9234_v16, %v9231_v19  ;;  %s9365_s27 = smov 48  ;;  %s9370_s21 = smov 192 }
 0x38f   :  { %v9611_v59 = vld [vmem:[#allocation1 + $0x381] ss:$16 sm:%s9610_s2]   ;;  %v9603_v37 = vsel %vm3854_vm2, %v9601_v3, %v9598_v45  ;;  %v9247_v20 = vld [vmem:[#allocation1 + $0x382] ss:$16 sm:%s9246_s7]   ;;  %s9380_s10 = smov 3  ;;  %7727 = vst.msk [vmem:[#allocation0 + $0x50] sm:$0xff] %vm7496_vm13, %v11149_v23  }
 0x390   :  { %v9614_v34 = vld [vmem:[#allocation1 + $0x381] ss:$16 sm:%s9613_s29]   ;;  %v9252_v29 = vld [vmem:[#allocation1 + $0x382] ss:$16 sm:%s9251_s24]   ;;  %v9249_v56 = vsel %vm3846_vm0, %v9247_v20, %v9244_v55  ;;  %s9383_s19 = smov 12  ;;  %s9388_s8 = smov 48  ;;  %v15013_v25 = vpop.permute.xlu2 %11207 }
 0x391   :  { %v9619_v1 = vld [vmem:[#allocation1 + $0x381] ss:$16 sm:%s9618_s14]   ;;  %v9616_v12 = vsel %vm3846_vm0, %v9614_v34, %v9611_v59  ;;  %v9257_v58 = vld [vmem:[#allocation1 + $0x382] ss:$16 sm:%s9256_s26]   ;;  %v9254_v62 = vsel %vm3850_vm1, %v9252_v29, %v9249_v56  ;;  %s9393_s25 = smov 192  ;;  %7773 = vst.msk [vmem:[#allocation0 + $0x18] sm:$0xff] %vm7496_vm13, %v11154_v31   ;;  %v11174_v59 = vunpack.i.l.bf16 %v14951_v4  ;;  %v11175_v4 = vunpack.i.h.bf16 %v14951_v4 }
 0x392   :  { %v9624_v15 = vld [vmem:[#allocation1 + $0x381] ss:$16 sm:%s9623_s13]   ;;  %v9621_v46 = vsel %vm3850_vm1, %v9619_v1, %v9616_v12  ;;  %v9259_v13 = vsel %vm3854_vm2, %v9257_v58, %v9254_v62  ;;  %7796 = vst.msk [vmem:[#allocation0 + $0x38] sm:$0xff] %vm7496_vm13, %v11155_v61   ;;  %s9498_s6 = smov 12  ;;  %s9503_s0 = smov 48  ;;  %v11180_v12 = vunpack.i.h.bf16 %v14955_v38  ;;  %v11179_v38 = vunpack.i.l.bf16 %v14955_v38  ;;  %v15035_v49 = vpop.permute.xlu1 %11217 }
 0x393   :  { %v9626_v48 = vsel %vm3854_vm2, %v9624_v15, %v9621_v46  ;;  %v9358_v63 = vld [vmem:[#allocation1 + $0x401] ss:$16 sm:%s9357_s23]   ;;  %v11311_v43 = vpack.i.bf16 %v9259_v13, %v9236_v21  ;;  %7819 = vst.msk [vmem:[#allocation0 + $0x58] sm:$0xff] %vm7496_vm13, %v11159_v30   ;;  %s9508_s16 = smov 192  ;;  %s9518_s30 = smov 3  ;;  %v11195_v58 = vunpack.i.h.bf16 %v14979_v5  ;;  %v11194_v5 = vunpack.i.l.bf16 %v14979_v5 }
 0x394   :  { %v11351_v44 = vpack.i.bf16 %v9626_v48, %v9603_v37  ;;  %v9361_v50 = vld [vmem:[#allocation1 + $0x401] ss:$16 sm:%s9360_s5]   ;;  %7842 = vst.msk [vmem:[#allocation0 + $0x78] sm:$0xff] %vm7496_vm13, %v11160_v53   ;;  %s9521_s28 = smov 12  ;;  %s9526_s18 = smov 48  ;;  %v11199_v62 = vunpack.i.l.bf16 %v15005_v22  ;;  %v11205_v30 = vunpack.i.h.bf16 %v15007_v17  ;;  %v11210_v53 = vunpack.i.h.bf16 %v15013_v25 }
 0x395   :  { %v9363_v39 = vsel %vm3846_vm0, %v9361_v50, %v9358_v63  ;;  %v9366_v0 = vld [vmem:[#allocation1 + $0x401] ss:$16 sm:%s9365_s27]   ;;  %11312 = vrot.lane.b32.xlu2 %v11311_v43, %s11454_s15  ;;  %s9495_s15 = smov 3  ;;  %7887 = vst.msk [vmem:[#allocation0 + $0x20] sm:$0xff] %vm7863_vm14, %v11165_v11   ;;  %s9531_s1 = smov 192  ;;  %v11213_v48 = vpop.permute.xlu0 %11212 }
 0x396   :  { %11352 = vrot.lane.b32.xlu1 %v11351_v44, %s11455_s17  ;;  %v9368_v32 = vsel %vm3850_vm1, %v9366_v0, %v9363_v39  ;;  %v9371_v2 = vld [vmem:[#allocation1 + $0x401] ss:$16 sm:%s9370_s21]   ;;  %7864 = vst.msk [vmem:[#allocation0] sm:$0xff] %vm7863_vm14, %v11164_v36   ;;  %s9633_s4 = smov 3  ;;  %s9636_s12 = smov 12  ;;  %v11189_v44 = vunpack.i.l.bf16 %v14974_v27  ;;  %v11190_v27 = vunpack.i.h.bf16 %v14974_v27  ;;  %v11200_v39 = vunpack.i.h.bf16 %v15005_v22 }
 0x397   :  { %v9381_v33 = vld [vmem:[#allocation1 + $0x601] ss:$16 sm:%s9380_s10]   ;;  %v9373_v24 = vsel %vm3854_vm2, %v9371_v2, %v9368_v32  ;;  %7910 = vst.msk [vmem:[#allocation0 + $0x40] sm:$0xff] %vm7863_vm14, %v11169_v28   ;;  %s9641_s2 = smov 48  ;;  %s9656_s29 = smov 3  ;;  %v11204_v0 = vunpack.i.l.bf16 %v15007_v17  ;;  %v11214_v11 = vunpack.i.l.bf16 %v11213_v48  ;;  %v11220_v36 = vunpack.i.h.bf16 %v15035_v49 }
 0x398   :  { %v9384_v35 = vld [vmem:[#allocation1 + $0x601] ss:$16 sm:%s9383_s19]   ;;  %7933 = vst.msk [vmem:[#allocation0 + $0x60] sm:$0xff] %vm7863_vm14, %v11170_v60   ;;  %s9659_s14 = smov 12  ;;  %s9664_s13 = smov 48 }
 0x399   :  { %v9386_v18 = vsel %vm3846_vm0, %v9384_v35, %v9381_v33  ;;  %v9389_v52 = vld [vmem:[#allocation1 + $0x601] ss:$16 sm:%s9388_s8]   ;;  %7956 = vst.msk [vmem:[#allocation0 + $0x8] sm:$0xff] %vm7863_vm14, %v11174_v59   ;;  %s9646_s11 = smov 192  ;;  %s9669_s9 = smov 192  ;;  %v11209_v35 = vunpack.i.l.bf16 %v15013_v25 }
 0x39a   :  { %v9394_v40 = vld [vmem:[#allocation1 + $0x601] ss:$16 sm:%s9393_s25]   ;;  %v9391_v51 = vsel %vm3850_vm1, %v9389_v52, %v9386_v18  ;;  %7979 = vst.msk [vmem:[#allocation0 + $0x28] sm:$0xff] %vm7863_vm14, %v11175_v4   ;;  %v11233_v32 = vpop.permute.xlu1 %11232  ;;  %v11215_v52 = vunpack.i.h.bf16 %v11213_v48  ;;  %s15675_s3 = sld [smem:[#allocation132_spill]] }
 0x39b   :  { %v9496_v47 = vld [vmem:[#allocation1 + $0x101] ss:$16 sm:%s9495_s15]   ;;  %v9396_v6 = vsel %vm3854_vm2, %v9394_v40, %v9391_v51  ;;  %8025 = vst.msk [vmem:[#allocation0 + $0x68] sm:$0xff] %vm7863_vm14, %v11180_v12   ;;  %v11219_v40 = vunpack.i.l.bf16 %v15035_v49 }
 0x39c   :  { %v9499_v54 = vld [vmem:[#allocation1 + $0x101] ss:$16 sm:%s9498_s6]   ;;  %v11326_v45 = vpack.i.bf16 %v9396_v6, %v9373_v24  ;;  %8002 = vst.msk [vmem:[#allocation0 + $0x48] sm:$0xff] %vm7863_vm14, %v11179_v38   ;;  %v11234_v6 = vunpack.i.l.bf16 %v11233_v32 }
 0x39d   :  { %v9501_v57 = vsel %vm3846_vm0, %v9499_v54, %v9496_v47  ;;  %v9504_v3 = vld [vmem:[#allocation1 + $0x101] ss:$16 sm:%s9503_s0]   ;;  %v11223_v19 = vpop.permute.xlu2 %11222  ;;  %8048 = vst.msk [vmem:[#allocation0 + $0x10] sm:$0xff] %vm7863_vm14, %v11184_v14   ;;  %v11228_v43 = vpop.permute.xlu0 %11227  ;;  %v11235_v54 = vunpack.i.h.bf16 %v11233_v32 }
 0x39e   :  { %v9519_v34 = vld [vmem:[#allocation1 + $0x301] ss:$16 sm:%s9518_s30]   ;;  %v9506_v15 = vsel %vm3850_vm1, %v9504_v3, %v9501_v57  ;;  %11327 = vrot.lane.b32.xlu2 %v11326_v45, %s11455_s17  ;;  %8071 = vst.msk [vmem:[#allocation0 + $0x30] sm:$0xff] %vm7863_vm14, %v11185_v9   ;;  %v11225_v17 = vunpack.i.h.bf16 %v11223_v19  ;;  %v11224_v24 = vunpack.i.l.bf16 %v11223_v19  ;;  %v11229_v28 = vunpack.i.l.bf16 %v11228_v43 }
 0x39f   :  { %v9522_v1 = vld [vmem:[#allocation1 + $0x301] ss:$16 sm:%s9521_s28]   ;;  %8094 = vst.msk [vmem:[#allocation0 + $0x50] sm:$0xff] %vm7863_vm14, %v11189_v44   ;;  %v11230_v25 = vunpack.i.h.bf16 %v11228_v43 }
 0x3a0   :  { %v9524_v8 = vsel %vm3846_vm0, %v9522_v1, %v9519_v34  ;;  %v9527_v37 = vld [vmem:[#allocation1 + $0x301] ss:$16 sm:%s9526_s18]   ;;  %8117 = vst.msk [vmem:[#allocation0 + $0x70] sm:$0xff] %vm7863_vm14, %v11190_v27  }
 0x3a1   :  { %v9509_v26 = vld [vmem:[#allocation1 + $0x101] ss:$16 sm:%s9508_s16]   ;;  %v9529_v41 = vsel %vm3850_vm1, %v9527_v37, %v9524_v8  ;;  %8163 = vst.msk [vmem:[#allocation0 + $0x38] sm:$0xff] %vm7863_vm14, %v11195_v58  }
 0x3a2   :  { %v9532_v46 = vld [vmem:[#allocation1 + $0x301] ss:$16 sm:%s9531_s1]   ;;  %v9511_v16 = vsel %vm3854_vm2, %v9509_v26, %v9506_v15  ;;  %8140 = vst.msk [vmem:[#allocation0 + $0x18] sm:$0xff] %vm7863_vm14, %v11194_v5  }
 0x3a3   :  { %v9634_v42 = vld [vmem:[#allocation1 + $0x581] ss:$16 sm:%s9633_s4]   ;;  %v9534_v55 = vsel %vm3854_vm2, %v9532_v46, %v9529_v41  ;;  %8186 = vst.msk [vmem:[#allocation0 + $0x58] sm:$0xff] %vm7863_vm14, %v11199_v62  }
 0x3a4   :  { %v9637_v10 = vld [vmem:[#allocation1 + $0x581] ss:$16 sm:%s9636_s12]   ;;  %v11341_v31 = vpack.i.bf16 %v9534_v55, %v9511_v16  ;;  %8209 = vst.msk [vmem:[#allocation0 + $0x78] sm:$0xff] %vm7863_vm14, %v11200_v39  }
 0x3a5   :  { %v9657_v7 = vld [vmem:[#allocation1 + $0x781] ss:$16 sm:%s9656_s29]   ;;  %v9639_v29 = vsel %vm3846_vm0, %v9637_v10, %v9634_v42  ;;  %8231 = vst.msk [vmem:[#allocation0] sm:$0xff] %vm8230_vm15, %v11204_v0   ;;  %v11243_v51 = vpop.permute.xlu0 %11242 }
 0x3a6   :  { %v9660_v20 = vld [vmem:[#allocation1 + $0x781] ss:$16 sm:%s9659_s14]   ;;  %11342 = vrot.lane.b32.xlu2 %v11341_v31, %s11455_s17  ;;  %8254 = vst.msk [vmem:[#allocation0 + $0x20] sm:$0xff] %vm8230_vm15, %v11205_v30   ;;  %v11248_v47 = vpop.permute.xlu1 %11247  ;;  %v11244_v3 = vunpack.i.l.bf16 %v11243_v51  ;;  %v11245_v59 = vunpack.i.h.bf16 %v11243_v51 }
 0x3a7   :  { %v9642_v23 = vld [vmem:[#allocation1 + $0x581] ss:$16 sm:%s9641_s2]   ;;  %v9662_v21 = vsel %vm3846_vm0, %v9660_v20, %v9657_v7  ;;  %8300 = vst.msk [vmem:[#allocation0 + $0x60] sm:$0xff] %vm8230_vm15, %v11210_v53   ;;  %vm8597_vm0 = vcmask 261312   ;;  %v11249_v1 = vunpack.i.l.bf16 %v11248_v47  ;;  %v11250_v4 = vunpack.i.h.bf16 %v11248_v47 }
 0x3a8   :  { %v9665_v56 = vld [vmem:[#allocation1 + $0x781] ss:$16 sm:%s9664_s13]   ;;  %v9644_v63 = vsel %vm3850_vm1, %v9642_v23, %v9639_v29  ;;  %8277 = vst.msk [vmem:[#allocation0 + $0x40] sm:$0xff] %vm8230_vm15, %v11209_v35  }
 0x3a9   :  { %v9647_v50 = vld [vmem:[#allocation1 + $0x581] ss:$16 sm:%s9646_s11]   ;;  %v9667_v61 = vsel %vm3850_vm1, %v9665_v56, %v9662_v21  ;;  %v11238_v22 = vpop.permute.xlu2 %11237  ;;  %8323 = vst.msk [vmem:[#allocation0 + $0x8] sm:$0xff] %vm8230_vm15, %v11214_v11   ;;  %vm8964_vm1 = vcmask 195712  }
 0x3aa   :  { %v9670_v13 = vld [vmem:[#allocation1 + $0x781] ss:$16 sm:%s9669_s9]   ;;  %v9649_v2 = vsel %vm3854_vm2, %v9647_v50, %v9644_v63  ;;  %8346 = vst.msk [vmem:[#allocation0 + $0x28] sm:$0xff] %vm8230_vm15, %v11215_v52   ;;  %v11239_v60 = vunpack.i.l.bf16 %v11238_v22  ;;  %v11240_v57 = vunpack.i.h.bf16 %v11238_v22 }
 0x3ab   :  { %v9672_v33 = vsel %vm3854_vm2, %v9670_v13, %v9667_v61  ;;  %8369 = vst.msk [vmem:[#allocation0 + $0x48] sm:$0xff] %vm8230_vm15, %v11219_v40   ;;  %vm9331_vm2 = vcmask 130112  }
 0x3ac   :  { %v11356_v18 = vpack.i.bf16 %v9672_v33, %v9649_v2  ;;  %8392 = vst.msk [vmem:[#allocation0 + $0x68] sm:$0xff] %vm8230_vm15, %v11220_v36  }
 0x3ad   :  { %8438 = vst.msk [vmem:[#allocation0 + $0x30] sm:$0xff] %vm8230_vm15, %v11225_v17  }
 0x3ae   :  { %11357 = vrot.lane.b32.xlu2 %v11356_v18, %s11455_s17  ;;  %8415 = vst.msk [vmem:[#allocation0 + $0x10] sm:$0xff] %vm8230_vm15, %v11224_v24   ;;  %v11258_v45 = vpop.permute.xlu0 %11257 }
 0x3af   :  { %8461 = vst.msk [vmem:[#allocation0 + $0x50] sm:$0xff] %vm8230_vm15, %v11229_v28   ;;  %v11259_v15 = vunpack.i.l.bf16 %v11258_v45  ;;  %v11260_v26 = vunpack.i.h.bf16 %v11258_v45 }
 0x3b0   :  { %8484 = vst.msk [vmem:[#allocation0 + $0x70] sm:$0xff] %vm8230_vm15, %v11230_v25  }
 0x3b1   :  { %8507 = vst.msk [vmem:[#allocation0 + $0x18] sm:$0xff] %vm8230_vm15, %v11234_v6  }
 0x3b2   :  { %8530 = vst.msk [vmem:[#allocation0 + $0x38] sm:$0xff] %vm8230_vm15, %v11235_v54  }
 0x3b3   :  { %8553 = vst.msk [vmem:[#allocation0 + $0x58] sm:$0xff] %vm8230_vm15, %v11239_v60  }
 0x3b4   :  { %8576 = vst.msk [vmem:[#allocation0 + $0x78] sm:$0xff] %vm8230_vm15, %v11240_v57  }
 0x3b5   :  { %8598 = vst.msk [vmem:[#allocation0] sm:$0xff] %vm8597_vm0, %v11244_v3  }
 0x3b6   :  { %v11263_v34 = vpop.permute.xlu1 %11262  ;;  %8621 = vst.msk [vmem:[#allocation0 + $0x20] sm:$0xff] %vm8597_vm0, %v11245_v59  }
 0x3b7   :  { %8644 = vst.msk [vmem:[#allocation0 + $0x40] sm:$0xff] %vm8597_vm0, %v11249_v1   ;;  %v11264_v41 = vunpack.i.l.bf16 %v11263_v34  ;;  %v11265_v46 = vunpack.i.h.bf16 %v11263_v34 }
 0x3b8   :  { %v11253_v8 = vpop.permute.xlu2 %11252  ;;  %8667 = vst.msk [vmem:[#allocation0 + $0x60] sm:$0xff] %vm8597_vm0, %v11250_v4  }
 0x3b9   :  { %v11255_v37 = vunpack.i.h.bf16 %v11253_v8  ;;  %v11254_v12 = vunpack.i.l.bf16 %v11253_v8  ;;  %8736 = vst.msk [vmem:[#allocation0 + $0x48] sm:$0xff] %vm8597_vm0, %v11259_v15  }
 0x3ba   :  { %8759 = vst.msk [vmem:[#allocation0 + $0x68] sm:$0xff] %vm8597_vm0, %v11260_v26  }
 0x3bb   :  { %8690 = vst.msk [vmem:[#allocation0 + $0x8] sm:$0xff] %vm8597_vm0, %v11254_v12  }
 0x3bc   :  { %8713 = vst.msk [vmem:[#allocation0 + $0x28] sm:$0xff] %vm8597_vm0, %v11255_v37  }
 0x3bd   :  { %8782 = vst.msk [vmem:[#allocation0 + $0x10] sm:$0xff] %vm8597_vm0, %v11264_v41  }
 0x3be   :  { %v11273_v38 = vpop.permute.xlu0 %11272  ;;  %8805 = vst.msk [vmem:[#allocation0 + $0x30] sm:$0xff] %vm8597_vm0, %v11265_v46  }
 0x3bf   :  { %v11274_v42 = vunpack.i.l.bf16 %v11273_v38  ;;  %v11275_v14 = vunpack.i.h.bf16 %v11273_v38 }
 0x3c1   :  { %8874 = vst.msk [vmem:[#allocation0 + $0x18] sm:$0xff] %vm8597_vm0, %v11274_v42  }
 0x3c2   :  { %8897 = vst.msk [vmem:[#allocation0 + $0x38] sm:$0xff] %vm8597_vm0, %v11275_v14  }
 0x3c6   :  { %v11278_v10 = vpop.permute.xlu1 %11277  ;;  %v11268_v49 = vpop.permute.xlu2 %11267 }
 0x3c7   :  { %v11279_v9 = vunpack.i.l.bf16 %v11278_v10  ;;  %v11280_v48 = vunpack.i.h.bf16 %v11278_v10  ;;  %v11270_v16 = vunpack.i.h.bf16 %v11268_v49  ;;  %v11269_v55 = vunpack.i.l.bf16 %v11268_v49  ;;  %v11288_v7 = vpop.permute.xlu0 %11287 }
 0x3c8   :  { %v11290_v44 = vunpack.i.h.bf16 %v11288_v7  ;;  %v11289_v19 = vunpack.i.l.bf16 %v11288_v7 }
 0x3c9   :  { %8920 = vst.msk [vmem:[#allocation0 + $0x58] sm:$0xff] %vm8597_vm0, %v11279_v9  }
 0x3ca   :  { %8943 = vst.msk [vmem:[#allocation0 + $0x78] sm:$0xff] %vm8597_vm0, %v11280_v48  }
 0x3cb   :  { %8828 = vst.msk [vmem:[#allocation0 + $0x50] sm:$0xff] %vm8597_vm0, %v11269_v55  }
 0x3cc   :  { %8851 = vst.msk [vmem:[#allocation0 + $0x70] sm:$0xff] %vm8597_vm0, %v11270_v16  }
 0x3cd   :  { %9011 = vst.msk [vmem:[#allocation0 + $0x40] sm:$0xff] %vm8964_vm1, %v11289_v19  }
 0x3ce   :  { %9034 = vst.msk [vmem:[#allocation0 + $0x60] sm:$0xff] %vm8964_vm1, %v11290_v44  }
 0x3cf   :  { %v11293_v20 = vpop.permute.xlu1 %11292 }
 0x3d0   :  { %v11295_v27 = vunpack.i.h.bf16 %v11293_v20  ;;  %v11294_v29 = vunpack.i.l.bf16 %v11293_v20 }
 0x3d2   :  { %9057 = vst.msk [vmem:[#allocation0 + $0x8] sm:$0xff] %vm8964_vm1, %v11294_v29  }
 0x3d3   :  { %9080 = vst.msk [vmem:[#allocation0 + $0x28] sm:$0xff] %vm8964_vm1, %v11295_v27  }
 0x3d7   :  { %v11283_v23 = vpop.permute.xlu2 %11282  ;;  %v11303_v58 = vpop.permute.xlu0 %11302 }
 0x3d8   :  { %v11285_v21 = vunpack.i.h.bf16 %v11283_v23  ;;  %v11284_v56 = vunpack.i.l.bf16 %v11283_v23  ;;  %v11305_v31 = vunpack.i.h.bf16 %v11303_v58  ;;  %v11304_v5 = vunpack.i.l.bf16 %v11303_v58 }
 0x3da   :  { %8965 = vst.msk [vmem:[#allocation0] sm:$0xff] %vm8964_vm1, %v11284_v56  }
 0x3db   :  { %8988 = vst.msk [vmem:[#allocation0 + $0x20] sm:$0xff] %vm8964_vm1, %v11285_v21  }
 0x3dc   :  { %9149 = vst.msk [vmem:[#allocation0 + $0x10] sm:$0xff] %vm8964_vm1, %v11304_v5  }
 0x3dd   :  { %9172 = vst.msk [vmem:[#allocation0 + $0x30] sm:$0xff] %vm8964_vm1, %v11305_v31  }
 0x3df   :  { %v11308_v62 = vpop.permute.xlu1 %11307 }
 0x3e0   :  { %v11310_v63 = vunpack.i.h.bf16 %v11308_v62  ;;  %v11309_v50 = vunpack.i.l.bf16 %v11308_v62 }
 0x3e2   :  { %9195 = vst.msk [vmem:[#allocation0 + $0x50] sm:$0xff] %vm8964_vm1, %v11309_v50   ;;  %v11298_v61 = vpop.permute.xlu2 %11297 }
 0x3e3   :  { %9218 = vst.msk [vmem:[#allocation0 + $0x70] sm:$0xff] %vm8964_vm1, %v11310_v63   ;;  %v11300_v13 = vunpack.i.h.bf16 %v11298_v61  ;;  %v11299_v39 = vunpack.i.l.bf16 %v11298_v61 }
 0x3e5   :  { %9103 = vst.msk [vmem:[#allocation0 + $0x48] sm:$0xff] %vm8964_vm1, %v11299_v39  }
 0x3e6   :  { %9126 = vst.msk [vmem:[#allocation0 + $0x68] sm:$0xff] %vm8964_vm1, %v11300_v13  }
 0x3e7   :  { %v11318_v0 = vpop.permute.xlu0 %11317  ;;  %v11323_v32 = vpop.permute.xlu1 %11322 }
 0x3e8   :  { %v11320_v30 = vunpack.i.h.bf16 %v11318_v0  ;;  %v11319_v43 = vunpack.i.l.bf16 %v11318_v0  ;;  %v11325_v2 = vunpack.i.h.bf16 %v11323_v32  ;;  %v11324_v33 = vunpack.i.l.bf16 %v11323_v32 }
 0x3ea   :  { %9287 = vst.msk [vmem:[#allocation0 + $0x58] sm:$0xff] %vm8964_vm1, %v11319_v43  }
 0x3eb   :  { %9310 = vst.msk [vmem:[#allocation0 + $0x78] sm:$0xff] %vm8964_vm1, %v11320_v30  }
 0x3ec   :  { %9332 = vst.msk [vmem:[#allocation0] sm:$0xff] %vm9331_vm2, %v11324_v33  }
 0x3ed   :  { %9355 = vst.msk [vmem:[#allocation0 + $0x20] sm:$0xff] %vm9331_vm2, %v11325_v2  }
 0x3ef   :  { %v11313_v53 = vpop.permute.xlu2 %11312 }
 0x3f0   :  { %v11315_v35 = vunpack.i.h.bf16 %v11313_v53  ;;  %v11314_v11 = vunpack.i.l.bf16 %v11313_v53  ;;  %v11333_v18 = vpop.permute.xlu0 %11332 }
 0x3f1   :  { %v11335_v52 = vunpack.i.h.bf16 %v11333_v18  ;;  %v11334_v40 = vunpack.i.l.bf16 %v11333_v18 }
 0x3f2   :  { %9241 = vst.msk [vmem:[#allocation0 + $0x18] sm:$0xff] %vm8964_vm1, %v11314_v11  }
 0x3f3   :  { %9264 = vst.msk [vmem:[#allocation0 + $0x38] sm:$0xff] %vm8964_vm1, %v11315_v35   ;;  %v9680_v28 = vld [vmem:[#allocation0] sm:$0xff] }
 0x3f4   :  { %9424 = vst.msk [vmem:[#allocation0 + $0x8] sm:$0xff] %vm9331_vm2, %v11334_v40   ;;  %v9707_v6 = vld [vmem:[#allocation0 + $0x20] sm:$0xff] }
 0x3f5   :  { %9447 = vst.msk [vmem:[#allocation0 + $0x28] sm:$0xff] %vm9331_vm2, %v11335_v52  }
 0x3f8   :  { %v11338_v36 = vpop.permute.xlu1 %11337  ;;  %v11328_v24 = vpop.permute.xlu2 %11327 }
 0x3f9   :  { %v11340_v22 = vunpack.i.h.bf16 %v11338_v36  ;;  %v11339_v17 = vunpack.i.l.bf16 %v11338_v36  ;;  %v11330_v51 = vunpack.i.h.bf16 %v11328_v24  ;;  %v11329_v47 = vunpack.i.l.bf16 %v11328_v24 }
 0x3fb   :  { %9470 = vst.msk [vmem:[#allocation0 + $0x48] sm:$0xff] %vm9331_vm2, %v11339_v17   ;;  %v9686_v25 = vld [vmem:[#allocation0 + $0x8] sm:$0xff] }
 0x3fc   :  { %9493 = vst.msk [vmem:[#allocation0 + $0x68] sm:$0xff] %vm9331_vm2, %v11340_v22   ;;  %v10575_v54 = vpack.c.bf16 %v9686_v25, %v9680_v28  ;;  %v9714_v60 = vld [vmem:[#allocation0 + $0x28] sm:$0xff] }
 0x3fd   :  { %9378 = vst.msk [vmem:[#allocation0 + $0x40] sm:$0xff] %vm9331_vm2, %v11329_v47   ;;  %v10585_v57 = vpack.c.bf16 %v9714_v60, %v9707_v6 }
 0x3fe   :  { %9401 = vst.msk [vmem:[#allocation0 + $0x60] sm:$0xff] %vm9331_vm2, %v11330_v51  }
 0x3ff   :  { %10576 = vst [vmem:[%s15675_s3] sm:$0xff] %v10575_v54  }
 0x400   :  { %v11348_v3 = vpop.permute.xlu0 %11347  ;;  %10740 = vst [vmem:[%s15675_s3 + $0x10] sm:$0xff] %v10585_v57   ;;  %v11343_v45 = vpop.permute.xlu2 %11342 }
 0x401   :  { %v11349_v34 = vunpack.i.l.bf16 %v11348_v3  ;;  %v11345_v4 = vunpack.i.h.bf16 %v11343_v45  ;;  %v11344_v8 = vunpack.i.l.bf16 %v11343_v45  ;;  %v11350_v26 = vunpack.i.h.bf16 %v11348_v3 }
 0x402   :  { %v9742_v59 = vld [vmem:[#allocation0 + $0x48] sm:$0xff] }
 0x403   :  { %v9770_v1 = vld [vmem:[#allocation0 + $0x68] sm:$0xff]  ;;  %9562 = vst.msk [vmem:[#allocation0 + $0x50] sm:$0xff] %vm9331_vm2, %v11349_v34  }
 0x404   :  { %v9735_v37 = vld [vmem:[#allocation0 + $0x40] sm:$0xff]  ;;  %9516 = vst.msk [vmem:[#allocation0 + $0x10] sm:$0xff] %vm9331_vm2, %v11344_v8  }
 0x405   :  { %v9763_v12 = vld [vmem:[#allocation0 + $0x60] sm:$0xff]  ;;  %v10595_v15 = vpack.c.bf16 %v9742_v59, %v9735_v37  ;;  %9539 = vst.msk [vmem:[#allocation0 + $0x30] sm:$0xff] %vm9331_vm2, %v11345_v4  }
 0x406   :  { %v10605_v41 = vpack.c.bf16 %v9770_v1, %v9763_v12  ;;  %9585 = vst.msk [vmem:[#allocation0 + $0x70] sm:$0xff] %vm9331_vm2, %v11350_v26  }
 0x407   :  { %10742 = vst [vmem:[%s15675_s3 + $0x20] sm:$0xff] %v10595_v15  }
 0x408   :  { %v11353_v46 = vpop.permute.xlu1 %11352  ;;  %10744 = vst [vmem:[%s15675_s3 + $0x30] sm:$0xff] %v10605_v41   ;;  %v11358_v14 = vpop.permute.xlu2 %11357 }
 0x409   :  { %v11355_v38 = vunpack.i.h.bf16 %v11353_v46  ;;  %v11354_v42 = vunpack.i.l.bf16 %v11353_v46  ;;  %v11360_v10 = vunpack.i.h.bf16 %v11358_v14  ;;  %v11359_v9 = vunpack.i.l.bf16 %v11358_v14 }
 0x40a   :  { %v9749_v55 = vld [vmem:[#allocation0 + $0x50] sm:$0xff] }
 0x40b   :  { %9608 = vst.msk [vmem:[#allocation0 + $0x18] sm:$0xff] %vm9331_vm2, %v11354_v42   ;;  %v9693_v48 = vld [vmem:[#allocation0 + $0x10] sm:$0xff] }
 0x40c   :  { %9631 = vst.msk [vmem:[#allocation0 + $0x38] sm:$0xff] %vm9331_vm2, %v11355_v38   ;;  %v9721_v16 = vld [vmem:[#allocation0 + $0x30] sm:$0xff] }
 0x40d   :  { %9654 = vst.msk [vmem:[#allocation0 + $0x58] sm:$0xff] %vm9331_vm2, %v11359_v9   ;;  %v9777_v19 = vld [vmem:[#allocation0 + $0x70] sm:$0xff] }
 0x40e   :  { %9677 = vst.msk [vmem:[#allocation0 + $0x78] sm:$0xff] %vm9331_vm2, %v11360_v10  }
 0x412   :  { %v9700_v49 = vld [vmem:[#allocation0 + $0x18] sm:$0xff] }
 0x413   :  { %v10580_v7 = vpack.c.bf16 %v9700_v49, %v9693_v48  ;;  %v9728_v44 = vld [vmem:[#allocation0 + $0x38] sm:$0xff] }
 0x414   :  { %v10590_v20 = vpack.c.bf16 %v9728_v44, %v9721_v16  ;;  %v9756_v27 = vld [vmem:[#allocation0 + $0x58] sm:$0xff] }
 0x415   :  { %10739 = vst [vmem:[%s15675_s3 + $0x8] sm:$0xff] %v10580_v7   ;;  %v10600_v29 = vpack.c.bf16 %v9756_v27, %v9749_v55  ;;  %v9784_v23 = vld [vmem:[#allocation0 + $0x78] sm:$0xff] }
 0x416   :  { %10741 = vst [vmem:[%s15675_s3 + $0x18] sm:$0xff] %v10590_v20   ;;  %v10610_v21 = vpack.c.bf16 %v9784_v23, %v9777_v19 }
 0x417   :  { %10743 = vst [vmem:[%s15675_s3 + $0x28] sm:$0xff] %v10600_v29  }
 0x418   :  { %10745 = vst [vmem:[%s15675_s3 + $0x38] sm:$0xff] %v10610_v21  }

// kernel: basic_block.1
= control target key start
LH: loop header
LB: loop body
LE: loop exit
PB: predicated region body
PF: predicated region fallthrough
CT: control target
= control target key end

     0   :  { %vm655_vm3 = vcmask 261120   ;;  %s1733_s2 = inlined_call_operand.vmem [shape: bf16[384,128], index: 2, kind: input, shape index: {}]   ;;  %s1734_s8 = inlined_call_operand.vmem [shape: f32[128,128], index: 8, kind: input, shape index: {}]   ;;  %s1735_s0 = inlined_call_operand.vmem [shape: bf16[32,384], index: 0, kind: input, shape index: {}]   ;;  %s1736_s3 = inlined_call_operand.vmem [shape: bf16[128,128], index: 3, kind: input, shape index: {}]   ;;  %s1737_s5 = inlined_call_operand.vmem [shape: bf16[128,128], index: 5, kind: input, shape index: {}]   ;;  %s1738_s4 = inlined_call_operand.vmem [shape: bf16[128,128], index: 4, kind: input, shape index: {}]   ;;  %s1739_s9 = inlined_call_operand.vmem [shape: f32[1,128], index: 9, kind: input, shape index: {}]   ;;  %s1740_s10 = inlined_call_operand.vmem [shape: f32[1,128], index: 10, kind: input, shape index: {}]   ;;  %s1741_s6 = inlined_call_operand.vmem [shape: f32[32,32], index: 6, kind: input, shape index: {}]   ;;  %s1742_s7 = inlined_call_operand.vmem [shape: f32[32,32], index: 7, kind: input, shape index: {}]   ;;  %s1743_s11 = inlined_call_operand.vmem [shape: f32[1,128], index: 11, kind: input, shape index: {}]   ;;  %s1744_s12 = inlined_call_operand.vmem [shape: f32[1,128], index: 12, kind: input, shape index: {}]   ;;  %s1745_s1 = inlined_call_operand.vmem [shape: f32[32,128], index: 1, kind: input, shape index: {}]   ;;  %s1746_s13 = inlined_call_operand.vmem [shape: f32[32,128], index: 13, kind: output, shape index: {}]  }
   0x1   :  { %v1184_v0 = vld [vmem:[%s1733_s2 + $0x38] sm:$0xff]  ;;  %v1183_v3 = vld [vmem:[%s1733_s2 + $0x30] sm:$0xff]  ;;  %v1182_v6 = vld [vmem:[%s1733_s2 + $0x28] sm:$0xff] }
   0x2   :  { %v1192_v1 = vld [vmem:[%s1733_s2 + $0x78] sm:$0xff]  ;;  %292 = vmatpush.bf16.msra.mxu0 %v1184_v0  ;;  %v1191_v4 = vld [vmem:[%s1733_s2 + $0x70] sm:$0xff]  ;;  %v1190_v7 = vld [vmem:[%s1733_s2 + $0x68] sm:$0xff] }
   0x3   :  { %v1200_v2 = vld [vmem:[%s1733_s2 + $0xb8] sm:$0xff]  ;;  %311 = vmatpush.bf16.msra.mxu1 %v1192_v1  ;;  %v1199_v5 = vld [vmem:[%s1733_s2 + $0xb0] sm:$0xff]  ;;  %v1198_v8 = vld [vmem:[%s1733_s2 + $0xa8] sm:$0xff] }
   0x4   :  { %330 = vmatpush.bf16.msra.mxu2 %v1200_v2  ;;  %v1181_v9 = vld [vmem:[%s1733_s2 + $0x20] sm:$0xff]  ;;  %v1180_v12 = vld [vmem:[%s1733_s2 + $0x18] sm:$0xff]  ;;  %v1179_v15 = vld [vmem:[%s1733_s2 + $0x10] sm:$0xff] }
   0x5   :  { %v1189_v10 = vld [vmem:[%s1733_s2 + $0x60] sm:$0xff]  ;;  %v1188_v13 = vld [vmem:[%s1733_s2 + $0x58] sm:$0xff]  ;;  %v1187_v16 = vld [vmem:[%s1733_s2 + $0x50] sm:$0xff] }
   0x6   :  { %293 = vmatpush.bf16.msra.mxu0 %v1183_v3  ;;  %v1197_v11 = vld [vmem:[%s1733_s2 + $0xa0] sm:$0xff]  ;;  %v1196_v14 = vld [vmem:[%s1733_s2 + $0x98] sm:$0xff]  ;;  %v1358_v18 = vld [vmem:[%s1734_s8 + $0x70] sm:$0xff] }
   0x7   :  { %312 = vmatpush.bf16.msra.mxu1 %v1191_v4  ;;  %v1353_v17 = vld [vmem:[%s1734_s8 + $0x78] sm:$0xff]  ;;  %v1195_v19 = vld [vmem:[%s1733_s2 + $0x90] sm:$0xff]  ;;  %v1367_v20 = vld [vmem:[%s1734_s8 + $0x68] sm:$0xff] }
   0x8   :  { %331 = vmatpush.bf16.msra.mxu2 %v1199_v5  ;;  %351 = vmatpush.msra.mxu3 %v1353_v17  ;;  %v1178_v21 = vld [vmem:[%s1733_s2 + $0x8] sm:$0xff]  ;;  %v1379_v23 = vld [vmem:[%s1734_s8 + $0x60] sm:$0xff]  ;;  %v1391_v26 = vld [vmem:[%s1734_s8 + $0x58] sm:$0xff] }
   0x9   :  { %v1186_v22 = vld [vmem:[%s1733_s2 + $0x48] sm:$0xff]  ;;  %v1177_v25 = vld [vmem:[%s1733_s2] sm:$0xff]  ;;  %v951_v31 = vld [vmem:[%s1735_s0 + $0xc] sm:$0xf0] }
   0xa   :  { %294 = vmatpush.bf16.msra.mxu0 %v1182_v6  ;;  %352 = vmatpush.msra.mxu3 %v1358_v18  ;;  %v1194_v24 = vld [vmem:[%s1733_s2 + $0x88] sm:$0xff]  ;;  %v1185_v27 = vld [vmem:[%s1733_s2 + $0x40] sm:$0xff]  ;;  %v1412_v32 = vld [vmem:[%s1734_s8 + $0x50] sm:$0xff] }
   0xb   :  { %313 = vmatpush.bf16.msra.mxu1 %v1190_v7  ;;  %v949_v28 = vld [vmem:[%s1735_s0] sm:$0xf]  ;;  %v1172_v29 = vld [vmem:[%s1735_s0 + $0x8] sm:$0xf0]  ;;  %v1171_v30 = vld [vmem:[%s1735_s0 + $0x4] sm:$0xf] }
   0xc   :  { %332 = vmatpush.bf16.msra.mxu2 %v1198_v8  ;;  %353 = vmatpush.msra.mxu3 %v1367_v20  ;;  %v1193_v33 = vld [vmem:[%s1733_s2 + $0x80] sm:$0xff]  ;;  %v957_v34 = vld [vmem:[%s1735_s0 + $0x8] sm:$0xf]  ;;  %v1173_v35 = vld [vmem:[%s1735_s0 + $0x10] sm:$0xf0]  ;;  %v950_v36 = vor.u32 %v1172_v29, %v949_v28  ;;  %v954_v37 = vor.u32 %v1171_v30, %v951_v31 }
   0xd   :  { %v1428_v38 = vld [vmem:[%s1734_s8 + $0x48] sm:$0xff]  ;;  %v958_v39 = vor.u32 %v1173_v35, %v957_v34  ;;  %v1435_v40 = vld [vmem:[%s1734_s8 + $0x40] sm:$0xff]  ;;  %v1441_v41 = vld [vmem:[%s1734_s8 + $0x38] sm:$0xff] }
   0xe   :  { %295 = vmatpush.bf16.msra.mxu0 %v1181_v9  ;;  %354 = vmatpush.msra.mxu3 %v1379_v23  ;;  %v1448_v42 = vld [vmem:[%s1734_s8 + $0x30] sm:$0xff]  ;;  %v1455_v43 = vld [vmem:[%s1734_s8 + $0x28] sm:$0xff]  ;;  %v961_v44 = vld [vmem:[%s1735_s0 + $0x18] sm:$0xf] }
   0xf   :  { %314 = vmatpush.bf16.msra.mxu1 %v1189_v10  ;;  %v1175_v45 = vld [vmem:[%s1735_s0 + $0x20] sm:$0xf0]  ;;  %v1174_v46 = vld [vmem:[%s1735_s0 + $0x1c] sm:$0xf]  ;;  %v963_v47 = vld [vmem:[%s1735_s0 + $0x24] sm:$0xf0] }
  0x10   :  { %333 = vmatpush.bf16.msra.mxu2 %v1197_v11  ;;  %355 = vmatpush.msra.mxu3 %v1391_v26  ;;  %v969_v48 = vld [vmem:[%s1735_s0 + $0x20] sm:$0xf]  ;;  %v1176_v49 = vld [vmem:[%s1735_s0 + $0x28] sm:$0xf0]  ;;  %v962_v50 = vor.u32 %v1175_v45, %v961_v44  ;;  %v966_v51 = vor.u32 %v1174_v46, %v963_v47  ;;  %v1493_v54 = vld [vmem:[%s1734_s8 + $0x18] sm:$0xff] }
  0x11   :  { %v970_v52 = vor.u32 %v1176_v49, %v969_v48  ;;  %v1487_v53 = vld [vmem:[%s1734_s8 + $0x20] sm:$0xff]  ;;  %v1499_v55 = vld [vmem:[%s1734_s8 + $0x10] sm:$0xff]  ;;  %v1508_v56 = vld [vmem:[%s1734_s8 + $0x8] sm:$0xff] }
  0x12   :  { %296 = vmatpush.bf16.msra.mxu0 %v1180_v12  ;;  %356 = vmatpush.msra.mxu3 %v1412_v32  ;;  %v1515_v57 = vld [vmem:[%s1734_s8] sm:$0xff]  ;;  %v1208_v28 = vld [vmem:[%s1736_s3 + $0x38] sm:$0xff]  ;;  %v1207_v34 = vld [vmem:[%s1736_s3 + $0x30] sm:$0xff] }
  0x13   :  { %315 = vmatpush.bf16.msra.mxu1 %v1188_v13  ;;  %v1224_v29 = vld [vmem:[%s1737_s5 + $0x38] sm:$0xff]  ;;  %v1223_v35 = vld [vmem:[%s1737_s5 + $0x30] sm:$0xff]  ;;  %v1206_v46 = vld [vmem:[%s1736_s3 + $0x28] sm:$0xff] }
  0x14   :  { %334 = vmatpush.bf16.msra.mxu2 %v1196_v14  ;;  %357 = vmatpush.msra.mxu3 %v1428_v38  ;;  %v1216_v30 = vld [vmem:[%s1738_s4 + $0x38] sm:$0xff]  ;;  %v1222_v47 = vld [vmem:[%s1737_s5 + $0x28] sm:$0xff] }
  0x15   :  { %v1214_v48 = vld [vmem:[%s1738_s4 + $0x28] sm:$0xff] }
  0x16   :  { %297 = vmatpush.bf16.msra.mxu0 %v1179_v15  ;;  %358 = vmatpush.msra.mxu3 %v1435_v40 }
  0x17   :  { %316 = vmatpush.bf16.msra.mxu1 %v1187_v16 }
  0x18   :  { %335 = vmatpush.bf16.msra.mxu2 %v1195_v19  ;;  %359 = vmatpush.msra.mxu3 %v1441_v41 }
  0x1a   :  { %298 = vmatpush.bf16.msra.mxu0 %v1178_v21  ;;  %360 = vmatpush.msra.mxu3 %v1448_v42 }
  0x1b   :  { %317 = vmatpush.bf16.msra.mxu1 %v1186_v22 }
  0x1c   :  { %336 = vmatpush.bf16.msra.mxu2 %v1194_v24  ;;  %361 = vmatpush.msra.mxu3 %v1455_v43 }
  0x1e   :  { %299 = vmatpush.bf16.msra.mxu0 %v1177_v25  ;;  %362 = vmatpush.msra.mxu3 %v1487_v53 }
  0x1f   :  { %318 = vmatpush.bf16.msra.mxu1 %v1185_v27 }
  0x20   :  { %337 = vmatpush.bf16.msra.mxu2 %v1193_v33  ;;  %363 = vmatpush.msra.mxu3 %v1493_v54 }
  0x21   :  { %300 = vmatmul.bf16.vlgmr.msra.gmra.mxu0 %v950_v36  ;;  %v1215_v36 = vld [vmem:[%s1738_s4 + $0x30] sm:$0xff] }
  0x22   :  { %384 = vmatpush.msrb.mxu0 %v1353_v17  ;;  %319 = vmatmul.bf16.vlgmr.msra.gmra.mxu1 %v954_v37 }
  0x23   :  { %338 = vmatmul.bf16.vlgmr.msra.gmra.mxu2 %v958_v39  ;;  %364 = vmatpush.msra.mxu3 %v1499_v55 }
  0x24   :  { %385 = vmatpush.msrb.mxu0 %v1358_v18  ;;  %533 = vmatpush.bf16.msrb.mxu1 %v1208_v28  ;;  %v1217_v28 = vld [vmem:[%s1737_s5] sm:$0xff] }
  0x25   :  { %365 = vmatpush.msra.mxu3 %v1508_v56  ;;  %632 = vmatpush.bf16.msrb.mxu2 %v1224_v29 }
  0x26   :  { %386 = vmatpush.msrb.mxu0 %v1367_v20 }
  0x27   :  { %366 = vmatpush.msra.mxu3 %v1515_v57 }
  0x28   :  { %387 = vmatpush.msrb.mxu0 %v1379_v23  ;;  %534 = vmatpush.bf16.msrb.mxu1 %v1207_v34 }
  0x29   :  { %633 = vmatpush.bf16.msrb.mxu2 %v1223_v35 }
  0x2a   :  { %388 = vmatpush.msrb.mxu0 %v1391_v26 }
  0x2c   :  { %389 = vmatpush.msrb.mxu0 %v1412_v32  ;;  %535 = vmatpush.bf16.msrb.mxu1 %v1206_v46 }
  0x2d   :  { %634 = vmatpush.bf16.msrb.mxu2 %v1222_v47 }
  0x2e   :  { %390 = vmatpush.msrb.mxu0 %v1428_v38 }
  0x30   :  { %391 = vmatpush.msrb.mxu0 %v1435_v40 }
  0x31   :  { %305 = vmatmul.bf16.gmra.mxu0 %v962_v50 }
  0x32   :  { %392 = vmatpush.msrb.mxu0 %v1441_v41  ;;  %324 = vmatmul.bf16.gmra.mxu1 %v966_v51 }
  0x33   :  { %343 = vmatmul.bf16.gmra.mxu2 %v970_v52 }
  0x34   :  { %393 = vmatpush.msrb.mxu0 %v1448_v42 }
  0x36   :  { %394 = vmatpush.msrb.mxu0 %v1455_v43 }
  0x38   :  { %395 = vmatpush.msrb.mxu0 %v1487_v53 }
  0x3a   :  { %396 = vmatpush.msrb.mxu0 %v1493_v54 }
  0x3c   :  { %397 = vmatpush.msrb.mxu0 %v1499_v55 }
  0x3e   :  { %398 = vmatpush.msrb.mxu0 %v1508_v56 }
  0x40   :  { %399 = vmatpush.msrb.mxu0 %v1515_v57 }
  0x42   :  { %745 = vmatpush.bf16.msra.mxu0 %v1216_v30 }
  0x46   :  { %746 = vmatpush.bf16.msra.mxu0 %v1215_v36 }
  0x4a   :  { %747 = vmatpush.bf16.msra.mxu0 %v1214_v48 }
  0x9e   :  { %v301_v58 = vpop.f32.mrf.mxu0 }
  0x9f   :  { %v320_v59 = vpop.f32.mrf.mxu1 }
  0xa0   :  { %v321_v60 = vadd.f32 %v320_v59, %v301_v58  ;;  %v1205_v59 = vld [vmem:[%s1736_s3 + $0x20] sm:$0xff] }
  0xa1   :  { %536 = vmatpush.bf16.msrb.mxu1 %v1205_v59 }
  0xa6   :  { %v339_v61 = vpop.f32.mrf.mxu2  ;;  %v303_v63 = vpop.f32.mrf.mxu0 }
  0xa7   :  { %v1519_v62 = vadd.f32 %v339_v61, %v321_v60  ;;  %v322_v0 = vpop.f32.mrf.mxu1  ;;  %v1221_v60 = vld [vmem:[%s1737_s5 + $0x20] sm:$0xff] }
  0xa8   :  { %v323_v2 = vadd.f32 %v322_v0, %v303_v63  ;;  %v1213_v61 = vld [vmem:[%s1738_s4 + $0x20] sm:$0xff]  ;;  %635 = vmatpush.bf16.msrb.mxu2 %v1221_v60 }
  0xa9   :  { %367 = vmatmul.f32.vlgmr.msra.gmra.mxu3 %v1519_v62  ;;  %v380_v1 = vmul.f32 %v1519_v62, %v1519_v62  ;;  %748 = vmatpush.bf16.msra.mxu0 %v1213_v61 }
  0xab   :  { %400 = vmatmul.f32.vlgmr.msrb.gmra.mxu0 %v380_v1 }
  0xae   :  { %v341_v3 = vpop.f32.mrf.mxu2  ;;  %v306_v5 = vpop.f32.mrf.mxu0 }
  0xaf   :  { %v1524_v4 = vadd.f32 %v341_v3, %v323_v2  ;;  %v325_v6 = vpop.f32.mrf.mxu1  ;;  %v1204_v3 = vld [vmem:[%s1736_s3 + $0x18] sm:$0xff] }
  0xb0   :  { %v326_v8 = vadd.f32 %v325_v6, %v306_v5  ;;  %v1220_v5 = vld [vmem:[%s1737_s5 + $0x18] sm:$0xff]  ;;  %537 = vmatpush.bf16.msrb.mxu1 %v1204_v3 }
  0xb1   :  { %370 = vmatmul.f32.gmra.mxu3 %v1524_v4  ;;  %v381_v7 = vmul.f32 %v1524_v4, %v1524_v4  ;;  %v1212_v6 = vld [vmem:[%s1738_s4 + $0x18] sm:$0xff]  ;;  %636 = vmatpush.bf16.msrb.mxu2 %v1220_v5 }
  0xb2   :  { %749 = vmatpush.bf16.msra.mxu0 %v1212_v6 }
  0xb3   :  { %403 = vmatmul.f32.gmra.mxu0 %v381_v7 }
  0xb6   :  { %v344_v9 = vpop.f32.mrf.mxu2  ;;  %v308_v12 = vpop.f32.mrf.mxu0 }
  0xb7   :  { %v1529_v10 = vadd.f32 %v344_v9, %v326_v8  ;;  %v327_v13 = vpop.f32.mrf.mxu1 }
  0xb8   :  { %v328_v14 = vadd.f32 %v327_v13, %v308_v12  ;;  %v1219_v12 = vld [vmem:[%s1737_s5 + $0x10] sm:$0xff] }
  0xb9   :  { %373 = vmatmul.f32.gmra.mxu3 %v1529_v10  ;;  %v382_v11 = vmul.f32 %v1529_v10, %v1529_v10  ;;  %v1211_v13 = vld [vmem:[%s1738_s4 + $0x10] sm:$0xff]  ;;  %637 = vmatpush.bf16.msrb.mxu2 %v1219_v12 }
  0xba   :  { %750 = vmatpush.bf16.msra.mxu0 %v1211_v13 }
  0xbb   :  { %406 = vmatmul.f32.gmra.mxu0 %v382_v11  ;;  %v1203_v11 = vld [vmem:[%s1736_s3 + $0x10] sm:$0xff] }
  0xbc   :  { %538 = vmatpush.bf16.msrb.mxu1 %v1203_v11 }
  0xbe   :  { %v346_v15 = vpop.f32.mrf.mxu2 }
  0xbf   :  { %v1534_v16 = vadd.f32 %v346_v15, %v328_v14 }
  0xc1   :  { %376 = vmatmul.f32.gmra.mxu3 %v1534_v16  ;;  %v383_v19 = vmul.f32 %v1534_v16, %v1534_v16 }
  0xc3   :  { %409 = vmatmul.f32.gmra.mxu0 %v383_v19 }
 0x128   :  { %v401_v21 = vpop.f32.mrf.mxu0 }
 0x12c   :  { %v368_v22 = vpop.f32.mrf.mxu3 }
 0x130   :  { %v404_v24 = vpop.f32.mrf.mxu0 }
 0x131   :  { %v422_v33 = vadd.f32 %v404_v24, %v401_v21  ;;  %v1202_v21 = vld [vmem:[%s1736_s3 + $0x8] sm:$0xff] }
 0x132   :  { %v1210_v24 = vld [vmem:[%s1738_s4 + $0x8] sm:$0xff]  ;;  %539 = vmatpush.bf16.msrb.mxu1 %v1202_v21  ;;  %v764_v21 = vld [vmem:[%s1742_s7] sm:$0xff] }
 0x133   :  { %751 = vmatpush.bf16.msra.mxu0 %v1210_v24 }
 0x134   :  { %v371_v25 = vpop.f32.mrf.mxu3 }
 0x135   :  { %v413_v44 = vadd.f32 %v371_v25, %v368_v22  ;;  %v1218_v22 = vld [vmem:[%s1737_s5 + $0x8] sm:$0xff] }
 0x136   :  { %638 = vmatpush.bf16.msrb.mxu2 %v1218_v22  ;;  %v652_v22 = vld [vmem:[%s1741_s6 + $0x8] sm:$0xff] }
 0x138   :  { %v407_v27 = vpop.f32.mrf.mxu0 }
 0x139   :  { %v423_v37 = vadd.f32 %v422_v33, %v407_v27  ;;  %v1201_v27 = vld [vmem:[%s1736_s3] sm:$0xff] }
 0x13a   :  { %540 = vmatpush.bf16.msrb.mxu1 %v1201_v27  ;;  %639 = vmatpush.bf16.msrb.mxu2 %v1217_v28 }
 0x13c   :  { %v374_v31 = vpop.f32.mrf.mxu3 }
 0x13d   :  { %v414_v49 = vadd.f32 %v413_v44, %v374_v31  ;;  %v1209_v31 = vld [vmem:[%s1738_s4] sm:$0xff] }
 0x13e   :  { %752 = vmatpush.bf16.msra.mxu0 %v1209_v31  ;;  %815 = vmatpush.msra.mxu2 %v1353_v17 }
 0x140   :  { %v410_v39 = vpop.f32.mrf.mxu0  ;;  %816 = vmatpush.msra.mxu2 %v1358_v18 }
 0x141   :  { %v424_v45 = vadd.f32 %v423_v37, %v410_v39 }
 0x142   :  { %817 = vmatpush.msra.mxu2 %v1367_v20 }
 0x143   :  { %v425_v50 = vrot.slane %v424_v45, 4 }
 0x144   :  { %v377_v51 = vpop.f32.mrf.mxu3  ;;  %818 = vmatpush.msra.mxu2 %v1379_v23 }
 0x145   :  { %v426_v52 = vadd.f32 %v425_v50, %v424_v45  ;;  %v415_v58 = vadd.f32 %v414_v49, %v377_v51  ;;  %v349_v45 = vld [vmem:[%s1739_s9] sm:$0x1] }
 0x146   :  { %819 = vmatpush.msra.mxu2 %v1391_v26  ;;  %v350_v49 = vld [vmem:[%s1740_s10] sm:$0x1] }
 0x147   :  { %v427_v63 = vrot.slane %v426_v52, 2  ;;  %v416_v0 = vrot.slane %v415_v58, 4 }
 0x148   :  { %820 = vmatpush.msra.mxu2 %v1412_v32 }
 0x149   :  { %v428_v1 = vadd.f32 %v427_v63, %v426_v52  ;;  %v417_v2 = vadd.f32 %v416_v0, %v415_v58 }
 0x14a   :  { %821 = vmatpush.msra.mxu2 %v1428_v38 }
 0x14b   :  { %v418_v7 = vrot.slane %v417_v2, 2  ;;  %v429_v8 = vrot.slane %v428_v1, 1 }
 0x14c   :  { %822 = vmatpush.msra.mxu2 %v1435_v40 }
 0x14d   :  { %v419_v9 = vadd.f32 %v418_v7, %v417_v2  ;;  %v430_v15 = vadd.f32 %v429_v8, %v428_v1 }
 0x14e   :  { %823 = vmatpush.msra.mxu2 %v1441_v41 }
 0x14f   :  { %v420_v14 = vrot.slane %v419_v9, 1  ;;  %v432_v29 = vmul.f32 0.001953125, %v430_v15 }
 0x150   :  { %824 = vmatpush.msra.mxu2 %v1448_v42 }
 0x151   :  { %v421_v19 = vadd.f32 %v420_v14, %v419_v9 }
 0x152   :  { %825 = vmatpush.msra.mxu2 %v1455_v43 }
 0x153   :  { %v431_v25 = vmul.f32 0.001953125, %v421_v19 }
 0x154   :  { %826 = vmatpush.msra.mxu2 %v1487_v53 }
 0x155   :  { %v433_v30 = vmul.f32 %v431_v25, %v431_v25 }
 0x156   :  { %827 = vmatpush.msra.mxu2 %v1493_v54 }
 0x157   :  { %v434_v33 = vsub.f32 %v432_v29, %v433_v30 }
 0x158   :  { %828 = vmatpush.msra.mxu2 %v1499_v55 }
 0x159   :  { %v435_v34 = vadd.f32 1e-05, %v434_v33 }
 0x15a   :  { %829 = vmatpush.msra.mxu2 %v1508_v56 }
 0x15b   :  { %1225 = vrsqrt.f32 %v435_v34  ;;  %vm442_vm1 = vweird.f32 %v435_v34 }
 0x15c   :  { %830 = vmatpush.msra.mxu2 %v1515_v57 }
 0x161   :  { %v1226_v35 = vpop.eup %1225 }
 0x162   :  { %v437_v36 = vmul.f32 %v1226_v35, %v435_v34  ;;  %vm443_vm0 = vweird.f32 %v1226_v35 }
 0x163   :  { %vm444_vm2 = vmor %vm442_vm1, %vm443_vm0 }
 0x164   :  { %v438_v37 = vmul.f32 %v1226_v35, %v437_v36 }
 0x166   :  { %v439_v39 = vmul.f32 0.5, %v438_v37 }
 0x168   :  { %v440_v44 = vsub.f32 1.5, %v439_v39 }
 0x16a   :  { %v441_v46 = vmul.f32 %v1226_v35, %v440_v44 }
 0x16c   :  { %v445_v47 = vsel %vm444_vm2, %v1226_v35, %v441_v46 }
 0x16d   :  { %v446_v48 = vmul.f32 %v445_v47, %v349_v45 }
 0x16f   :  { %v447_v50 = vmul.f32 %v446_v48, %v431_v25  ;;  %v450_v51 = vperm.slane %v446_v48, 0 }
 0x171   :  { %v448_v52 = vsub.f32 %v350_v49, %v447_v50  ;;  %v452_v59 = vmul.f32 %v450_v51, %v1519_v62  ;;  %v453_v60 = vmul.f32 %v450_v51, %v1524_v4  ;;  %v454_v3 = vmul.f32 %v450_v51, %v1529_v10  ;;  %v651_v10 = vld [vmem:[%s1741_s6] sm:$0xff] }
 0x172   :  { %v455_v62 = vmul.f32 %v450_v51, %v1534_v16 }
 0x173   :  { %v457_v58 = vperm.slane %v448_v52, 0 }
 0x175   :  { %v459_v61 = vadd.f32 %v457_v58, %v452_v59  ;;  %v460_v63 = vadd.f32 %v457_v58, %v453_v60  ;;  %v461_v5 = vadd.f32 %v457_v58, %v454_v3  ;;  %v462_v4 = vadd.f32 %v457_v58, %v455_v62 }
 0x177   :  { %v463_v0 = vmax.f32 %v459_v61, 0.0  ;;  %v464_v1 = vmax.f32 %v460_v63, 0.0  ;;  %v465_v6 = vmax.f32 %v461_v5, 0.0  ;;  %v466_v7 = vmax.f32 %v462_v4, 0.0 }
 0x179   :  { %v467_v2 = vpack.c.bf16 %v464_v1, %v463_v0  ;;  %v468_v8 = vpack.c.bf16 %v466_v7, %v465_v6 }
 0x17b   :  { %541 = vmatmul.bf16.vlgmr.msrb.gmra.mxu1 %v467_v2  ;;  %640 = vmatmul.bf16.vlgmr.msrb.gmra.mxu2 %v467_v2 }
 0x17c   :  { %753 = vmatmul.bf16.vlgmr.msra.gmra.mxu0 %v467_v2 }
 0x18b   :  { %546 = vmatmul.bf16.gmra.mxu1 %v468_v8  ;;  %645 = vmatmul.bf16.gmra.mxu2 %v468_v8 }
 0x18c   :  { %758 = vmatmul.bf16.gmra.mxu0 %v468_v8 }
 0x1f8   :  { %v542_v9 = vpop.f32.mrf.mxu1 }
 0x1fe   :  { %v641_v11 = vpop.f32.mrf.mxu2 }
 0x200   :  { %v544_v12 = vpop.f32.mrf.mxu1 }
 0x206   :  { %v643_v13 = vpop.f32.mrf.mxu2 }
 0x208   :  { %v547_v14 = vpop.f32.mrf.mxu1 }
 0x20e   :  { %v646_v15 = vpop.f32.mrf.mxu2 }
 0x210   :  { %v549_v19 = vpop.f32.mrf.mxu1 }
 0x211   :  { %680 = vmatpush.msrb.mxu3 %v549_v19 }
 0x213   :  { %681 = vmatpush.msrb.mxu3 %v547_v14 }
 0x215   :  { %682 = vmatpush.msrb.mxu3 %v544_v12 }
 0x216   :  { %v648_v16 = vpop.f32.mrf.mxu2 }
 0x217   :  { %683 = vmatpush.msrb.mxu3 %v542_v9  ;;  %792 = vmatpush.msra.mxu1 %v648_v16 }
 0x218   :  { %1131 = vmatmul.msk.f32.vlgmr.msrb.gmra.mxu3 %vm655_vm3, %v651_v10 }
 0x219   :  { %793 = vmatpush.msra.mxu1 %v646_v15  ;;  %848 = vmatpush.msra.mxu3 %v1353_v17  ;;  %v765_v17 = vld [vmem:[%s1742_s7 + $0x8] sm:$0xff] }
 0x21b   :  { %794 = vmatpush.msra.mxu1 %v643_v13  ;;  %849 = vmatpush.msra.mxu3 %v1358_v18  ;;  %v653_v18 = vld [vmem:[%s1741_s6 + $0x10] sm:$0xff] }
 0x21d   :  { %795 = vmatpush.msra.mxu1 %v641_v11  ;;  %850 = vmatpush.msra.mxu3 %v1367_v20  ;;  %v766_v20 = vld [vmem:[%s1742_s7 + $0x10] sm:$0xff] }
 0x21e   :  { %1167 = vmatmul.msk.f32.vlgmr.msra.gmra.mxu1 %vm655_vm3, %v764_v21 }
 0x21f   :  { %851 = vmatpush.msra.mxu3 %v1379_v23  ;;  %v654_v23 = vld [vmem:[%s1741_s6 + $0x18] sm:$0xff] }
 0x220   :  { %1132 = vmatmul.msk.f32.gmra.mxu3 %vm655_vm3, %v652_v22 }
 0x221   :  { %852 = vmatpush.msra.mxu3 %v1391_v26  ;;  %v767_v26 = vld [vmem:[%s1742_s7 + $0x18] sm:$0xff] }
 0x223   :  { %853 = vmatpush.msra.mxu3 %v1412_v32  ;;  %v754_v32 = vpop.f32.mrf.mxu0 }
 0x225   :  { %854 = vmatpush.msra.mxu3 %v1428_v38 }
 0x226   :  { %1168 = vmatmul.msk.f32.gmra.mxu1 %vm655_vm3, %v765_v17 }
 0x227   :  { %855 = vmatpush.msra.mxu3 %v1435_v40 }
 0x228   :  { %1133 = vmatmul.msk.f32.gmra.mxu3 %vm655_vm3, %v653_v18  ;;  %v813_v18 = vld [vmem:[%s1743_s11] sm:$0x1] }
 0x229   :  { %856 = vmatpush.msra.mxu3 %v1441_v41 }
 0x22b   :  { %857 = vmatpush.msra.mxu3 %v1448_v42  ;;  %v756_v42 = vpop.f32.mrf.mxu0 }
 0x22d   :  { %858 = vmatpush.msra.mxu3 %v1455_v43 }
 0x22e   :  { %1169 = vmatmul.msk.f32.gmra.mxu1 %vm655_vm3, %v766_v20 }
 0x22f   :  { %859 = vmatpush.msra.mxu3 %v1487_v53 }
 0x230   :  { %1134 = vmatmul.msk.f32.gmra.mxu3 %vm655_vm3, %v654_v23 }
 0x231   :  { %860 = vmatpush.msra.mxu3 %v1493_v54 }
 0x233   :  { %861 = vmatpush.msra.mxu3 %v1499_v55  ;;  %v759_v25 = vpop.f32.mrf.mxu0 }
 0x235   :  { %862 = vmatpush.msra.mxu3 %v1508_v56 }
 0x236   :  { %1170 = vmatmul.msk.f32.gmra.mxu1 %vm655_vm3, %v767_v26 }
 0x237   :  { %863 = vmatpush.msra.mxu3 %v1515_v57 }
 0x23b   :  { %v761_v33 = vpop.f32.mrf.mxu0 }
 0x29b   :  { %v685_v38 = vpop.f32.mrf.mxu3  ;;  %v797_v40 = vpop.f32.mrf.mxu1 }
 0x29c   :  { %v755_v41 = vadd.f32 %v754_v32, %v685_v38  ;;  %v814_v32 = vld [vmem:[%s1744_s12] sm:$0x1] }
 0x29e   :  { %v1685_v43 = vadd.f32 %v797_v40, %v755_v41 }
 0x2a0   :  { %v844_v53 = vmul.f32 %v1685_v43, %v1685_v43  ;;  %831 = vmatmul.f32.vlgmr.msra.gmra.mxu2 %v1685_v43 }
 0x2a2   :  { %864 = vmatmul.f32.vlgmr.msra.gmra.mxu3 %v844_v53 }
 0x2a3   :  { %v688_v54 = vpop.f32.mrf.mxu3  ;;  %v800_v55 = vpop.f32.mrf.mxu1 }
 0x2a4   :  { %v757_v56 = vadd.f32 %v756_v42, %v688_v54 }
 0x2a6   :  { %v1690_v24 = vadd.f32 %v800_v55, %v757_v56 }
 0x2a8   :  { %834 = vmatmul.f32.gmra.mxu2 %v1690_v24  ;;  %v845_v57 = vmul.f32 %v1690_v24, %v1690_v24 }
 0x2aa   :  { %867 = vmatmul.f32.gmra.mxu3 %v845_v57  ;;  %v928_v57 = vld [vmem:[%s1745_s1 + $0x8] sm:$0xff] }
 0x2ab   :  { %v691_v27 = vpop.f32.mrf.mxu3  ;;  %v803_v28 = vpop.f32.mrf.mxu1 }
 0x2ac   :  { %v760_v29 = vadd.f32 %v759_v25, %v691_v27  ;;  %v927_v25 = vld [vmem:[%s1745_s1] sm:$0xff]  ;;  %v929_v27 = vld [vmem:[%s1745_s1 + $0x10] sm:$0xff] }
 0x2ae   :  { %v1695_v30 = vadd.f32 %v803_v28, %v760_v29 }
 0x2b0   :  { %837 = vmatmul.f32.gmra.mxu2 %v1695_v30  ;;  %v846_v31 = vmul.f32 %v1695_v30, %v1695_v30 }
 0x2b2   :  { %870 = vmatmul.f32.gmra.mxu3 %v846_v31 }
 0x2b3   :  { %v694_v34 = vpop.f32.mrf.mxu3  ;;  %v806_v35 = vpop.f32.mrf.mxu1 }
 0x2b4   :  { %v762_v36 = vadd.f32 %v761_v33, %v694_v34 }
 0x2b6   :  { %v812_v37 = vadd.f32 %v806_v35, %v762_v36 }
 0x2b8   :  { %840 = vmatmul.f32.gmra.mxu2 %v812_v37  ;;  %v847_v39 = vmul.f32 %v812_v37, %v812_v37 }
 0x2ba   :  { %873 = vmatmul.f32.gmra.mxu3 %v847_v39 }
 0x323   :  { %v832_v44 = vpop.f32.mrf.mxu2 }
 0x325   :  { %v865_v45 = vpop.f32.mrf.mxu3 }
 0x32b   :  { %v835_v46 = vpop.f32.mrf.mxu2 }
 0x32c   :  { %v877_v50 = vadd.f32 %v835_v46, %v832_v44 }
 0x32d   :  { %v868_v47 = vpop.f32.mrf.mxu3 }
 0x32e   :  { %v886_v51 = vadd.f32 %v868_v47, %v865_v45 }
 0x333   :  { %v838_v48 = vpop.f32.mrf.mxu2 }
 0x334   :  { %v878_v52 = vadd.f32 %v877_v50, %v838_v48 }
 0x335   :  { %v871_v49 = vpop.f32.mrf.mxu3 }
 0x336   :  { %v887_v59 = vadd.f32 %v886_v51, %v871_v49 }
 0x33b   :  { %v841_v58 = vpop.f32.mrf.mxu2 }
 0x33c   :  { %v879_v60 = vadd.f32 %v878_v52, %v841_v58 }
 0x33d   :  { %v874_v61 = vpop.f32.mrf.mxu3 }
 0x33e   :  { %v880_v63 = vrot.slane %v879_v60, 4  ;;  %v888_v0 = vadd.f32 %v887_v59, %v874_v61 }
 0x340   :  { %v881_v1 = vadd.f32 %v880_v63, %v879_v60  ;;  %v889_v2 = vrot.slane %v888_v0, 4 }
 0x342   :  { %v882_v3 = vrot.slane %v881_v1, 2  ;;  %v890_v62 = vadd.f32 %v889_v2, %v888_v0 }
 0x344   :  { %v883_v5 = vadd.f32 %v882_v3, %v881_v1  ;;  %v891_v4 = vrot.slane %v890_v62, 2 }
 0x346   :  { %v884_v6 = vrot.slane %v883_v5, 1  ;;  %v892_v7 = vadd.f32 %v891_v4, %v890_v62 }
 0x348   :  { %v885_v8 = vadd.f32 %v884_v6, %v883_v5  ;;  %v893_v9 = vrot.slane %v892_v7, 1 }
 0x34a   :  { %v895_v11 = vmul.f32 0.001953125, %v885_v8  ;;  %v894_v12 = vadd.f32 %v893_v9, %v892_v7 }
 0x34c   :  { %v897_v13 = vmul.f32 %v895_v11, %v895_v11  ;;  %v896_v14 = vmul.f32 0.001953125, %v894_v12 }
 0x34e   :  { %v898_v15 = vsub.f32 %v896_v14, %v897_v13 }
 0x350   :  { %v899_v19 = vadd.f32 1e-05, %v898_v15 }
 0x352   :  { %1227 = vrsqrt.f32 %v899_v19  ;;  %vm906_vm5 = vweird.f32 %v899_v19 }
 0x358   :  { %v1228_v10 = vpop.eup %1227 }
 0x359   :  { %v901_v16 = vmul.f32 %v1228_v10, %v899_v19  ;;  %vm907_vm4 = vweird.f32 %v1228_v10 }
 0x35a   :  { %vm908_vm6 = vmor %vm906_vm5, %vm907_vm4 }
 0x35b   :  { %v902_v21 = vmul.f32 %v1228_v10, %v901_v16 }
 0x35d   :  { %v903_v22 = vmul.f32 0.5, %v902_v21 }
 0x35f   :  { %v904_v17 = vsub.f32 1.5, %v903_v22 }
 0x361   :  { %v905_v20 = vmul.f32 %v1228_v10, %v904_v17 }
 0x363   :  { %v909_v23 = vsel %vm908_vm6, %v1228_v10, %v905_v20 }
 0x364   :  { %v910_v26 = vmul.f32 %v909_v23, %v813_v18 }
 0x366   :  { %v911_v38 = vmul.f32 %v910_v26, %v895_v11  ;;  %v914_v40 = vperm.slane %v910_v26, 0 }
 0x368   :  { %v912_v41 = vsub.f32 %v814_v32, %v911_v38  ;;  %v916_v42 = vmul.f32 %v914_v40, %v1685_v43  ;;  %v917_v53 = vmul.f32 %v914_v40, %v1690_v24  ;;  %v918_v54 = vmul.f32 %v914_v40, %v1695_v30  ;;  %v930_v43 = vld [vmem:[%s1745_s1 + $0x18] sm:$0xff] }
 0x369   :  { %v919_v55 = vmul.f32 %v914_v40, %v812_v37 }
 0x36a   :  { %v921_v56 = vperm.slane %v912_v41, 0 }
 0x36c   :  { %v923_v24 = vadd.f32 %v921_v56, %v916_v42  ;;  %v924_v28 = vadd.f32 %v921_v56, %v917_v53  ;;  %v925_v29 = vadd.f32 %v921_v56, %v918_v54  ;;  %v926_v30 = vadd.f32 %v921_v56, %v919_v55 }
 0x36e   :  { %v931_v31 = vadd.f32 %v927_v25, %v923_v24  ;;  %v932_v33 = vadd.f32 %v928_v57, %v924_v28  ;;  %v933_v34 = vadd.f32 %v929_v27, %v925_v29  ;;  %v934_v35 = vadd.f32 %v930_v43, %v926_v30 }
 0x370   :  { %v935_v36 = vmax.f32 %v931_v31, 0.0  ;;  %v936_v37 = vmax.f32 %v932_v33, 0.0  ;;  %v937_v39 = vmax.f32 %v933_v34, 0.0  ;;  %v938_v44 = vmax.f32 %v934_v35, 0.0 }
 0x372   :  { %939 = vst [vmem:[%s1746_s13] sm:$0xff] %v935_v36 }
 0x373   :  { %940 = vst [vmem:[%s1746_s13 + $0x8] sm:$0xff] %v936_v37 }
 0x374   :  { %941 = vst [vmem:[%s1746_s13 + $0x10] sm:$0xff] %v937_v39 }
 0x375   :  { %942 = vst [vmem:[%s1746_s13 + $0x18] sm:$0xff] %v938_v44 }

</bundles_post_ra>
